<compile_context>
chip_gen: v6e
topology: v6e:2x2x1
jax: 0.10.0
libtpu: 0.0.40
codegen_flags: <defaults>
</compile_context>

<pallas_src>
import math
import functools

import jax
import jax.numpy as jnp
from jax import lax
from jax.experimental import pallas as pl
from jax.experimental.pallas import tpu as pltpu

# ----------------------- model hyper-parameters (fixed by the module __init__) -----------------
N_HEAD = 6
HEAD_DIM = 80
HALF_DIM = HEAD_DIM // 2
N_LAYERS = 2
D_MODEL = N_HEAD * HEAD_DIM          # 480
FF_DIM = 2 * D_MODEL                 # 960
N_TAGS = 9                           # len(tag_vocab), BMESO-style tag set
CHAR_VOCAB, CHAR_DIM = 20, 16
BICHAR_VOCAB, BICHAR_DIM = 30, 8
EMBED_SIZE = CHAR_DIM + BICHAR_DIM   # 24
LN_EPS = 1e-5


def _pick_tile(m):
    """Largest row-tile <= 256 that divides m and is a multiple of 8 (else full m)."""
    for c in (256, 128, 64, 32, 16, 8):
        if m % c == 0:
            return c
    return m


def _dot_nt(a, b):
    """a (m, d) @ b (n, d)^T -> (m, n), f32 accumulation (MXU, transposed-rhs contraction)."""
    return lax.dot_general(a, b, (((1,), (1,)), ((), ())),
                           preferred_element_type=jnp.float32)


# =============================== Pallas kernels ================================================

def _linear_kernel(x_ref, w_ref, b_ref, o_ref, *, activation=None):
    y = jnp.dot(x_ref[...].astype(jnp.bfloat16), w_ref[...],
                preferred_element_type=jnp.float32) + b_ref[...]
    if activation == "relu":
        y = jnp.maximum(y, 0.0)
    o_ref[...] = y


def linear(x2d, w, b, activation=None):
    """x2d: (M, K) f32, w: (K, N) f32, b: (N,) -> (M, N) f32.  Row-tiled, bf16 matmul."""
    M, K = x2d.shape
    N = w.shape[1]
    TM = _pick_tile(M)
    return pl.pallas_call(
        functools.partial(_linear_kernel, activation=activation),
        out_shape=jax.ShapeDtypeStruct((M, N), jnp.float32),
        grid=(M // TM,),
        in_specs=[
            pl.BlockSpec((TM, K), lambda i: (i, 0)),
            pl.BlockSpec((K, N), lambda i: (0, 0)),
            pl.BlockSpec((1, N), lambda i: (0, 0)),
        ],
        out_specs=pl.BlockSpec((TM, N), lambda i: (i, 0)),
        compiler_params=pltpu.CompilerParams(dimension_semantics=("parallel",)),
    )(x2d, w.astype(jnp.bfloat16), b.reshape(1, N))


def _attn_ln_kernel(x_ref, wqv_ref, rr_ref, rw_ref, psin_ref, pcos_ref, mask_ref,
                    g_ref, beta_ref, o_ref):
    """Fused: qv projection + 6-head relative attention + residual + LayerNorm for one batch."""
    x = x_ref[0]                                        # (L, D) f32
    qv = jnp.dot(x.astype(jnp.bfloat16), wqv_ref[...],
                 preferred_element_type=jnp.float32)    # (L, 2D) f32, no bias (qv_linear bias=False)
    psin = psin_ref[...]                                # (L, Dh/2) sin(p*w)
    pcos = pcos_ref[...]                                # (L, Dh/2) cos(p*w)
    psin_b = psin.astype(jnp.bfloat16)
    pcos_b = pcos.astype(jnp.bfloat16)
    mask_row = mask_ref[0]                              # (1, L) key mask {0,1}

    heads = []
    for hd in range(N_HEAD):
        lo = hd * HEAD_DIM
        q = qv[:, lo:lo + HEAD_DIM]                     # (L, Dh)
        v = qv[:, D_MODEL + lo:D_MODEL + lo + HEAD_DIM]
        k = x[:, lo:lo + HEAD_DIM]                      # adatrans: k is x itself
        rr = rr_ref[hd]                                 # (Dh,) r_r_bias
        rw = rw_ref[hd]                                 # (Dh,) r_w_bias

        # AC: content-content term.
        ac = _dot_nt((q + rr).astype(jnp.bfloat16), k.astype(jnp.bfloat16))

        # BD: (q + r_w) . pos_embed[k - q]  via exact sin/cos addition identities.
        qr = q + rw
        qr_s, qr_c = qr[:, :HALF_DIM], qr[:, HALF_DIM:]
        a_sin = (qr_s * pcos + qr_c * psin).astype(jnp.bfloat16)
        a_cos = (qr_c * pcos - qr_s * psin).astype(jnp.bfloat16)
        bd = _dot_nt(a_sin, psin_b) + _dot_nt(a_cos, pcos_b)

        # E: k . pos_embed[q - k]  via the same identities.
        k_s, k_c = k[:, :HALF_DIM], k[:, HALF_DIM:]
        kr_sin = (k_s * pcos + k_c * psin).astype(jnp.bfloat16)
        kr_cos = (k_c * pcos - k_s * psin).astype(jnp.bfloat16)
        e_ = _dot_nt(psin_b, kr_sin) + _dot_nt(pcos_b, kr_cos)

        attn = ac + bd + e_                             # scale == 1 for 'adatrans'
        attn = jnp.where(mask_row > 0.5, attn, -1e30)   # mask over key positions
        m = jnp.max(attn, axis=-1, keepdims=True)
        p = jnp.exp(attn - m)
        s = jnp.sum(p, axis=-1, keepdims=True)
        p = p * pl.reciprocal(s, approx=True)
        heads.append(jnp.dot(p.astype(jnp.bfloat16), v.astype(jnp.bfloat16),
                             preferred_element_type=jnp.float32))

    y = jnp.concatenate(heads, axis=-1) + x             # no output projection; residual add
    mean = jnp.mean(y, axis=-1, keepdims=True)
    var = jnp.mean((y - mean) ** 2, axis=-1, keepdims=True)
    o_ref[0] = (y - mean) * lax.rsqrt(var + LN_EPS) * g_ref[...] + beta_ref[...]


def attn_ln_block(x, p, psin, pcos, mask3):
    B, L, D = x.shape
    return pl.pallas_call(
        _attn_ln_kernel,
        out_shape=jax.ShapeDtypeStruct((B, L, D), jnp.float32),
        grid=(B,),
        in_specs=[
            pl.BlockSpec((1, L, D), lambda b: (b, 0, 0)),
            pl.BlockSpec((D, 2 * D), lambda b: (0, 0)),
            pl.BlockSpec((N_HEAD, HEAD_DIM), lambda b: (0, 0)),
            pl.BlockSpec((N_HEAD, HEAD_DIM), lambda b: (0, 0)),
            pl.BlockSpec((L, HALF_DIM), lambda b: (0, 0)),
            pl.BlockSpec((L, HALF_DIM), lambda b: (0, 0)),
            pl.BlockSpec((1, 1, L), lambda b: (b, 0, 0)),
            pl.BlockSpec((1, D), lambda b: (0, 0)),
            pl.BlockSpec((1, D), lambda b: (0, 0)),
        ],
        out_specs=pl.BlockSpec((1, L, D), lambda b: (b, 0, 0)),
        compiler_params=pltpu.CompilerParams(dimension_semantics=("parallel",)),
    )(x, p["qv_w"].astype(jnp.bfloat16), p["r_r_bias"], p["r_w_bias"],
      psin, pcos, mask3, p["ln1_g"].reshape(1, D), p["ln1_b"].reshape(1, D))


def _ffn_ln_kernel(x_ref, w1_ref, b1_ref, w2_ref, b2_ref, g_ref, beta_ref, o_ref):
    """Fused FFN(ReLU) + residual + LayerNorm on a row tile."""
    x = x_ref[...]
    h = jnp.dot(x.astype(jnp.bfloat16), w1_ref[...],
                preferred_element_type=jnp.float32) + b1_ref[...]
    h = jnp.maximum(h, 0.0)
    y = jnp.dot(h.astype(jnp.bfloat16), w2_ref[...],
                preferred_element_type=jnp.float32) + b2_ref[...]
    y = y + x
    mean = jnp.mean(y, axis=-1, keepdims=True)
    var = jnp.mean((y - mean) ** 2, axis=-1, keepdims=True)
    o_ref[...] = (y - mean) * lax.rsqrt(var + LN_EPS) * g_ref[...] + beta_ref[...]


def ffn_ln_block(x2d, p):
    M, D = x2d.shape
    FF = p["ffn1_w"].shape[1]
    TM = _pick_tile(M)
    return pl.pallas_call(
        _ffn_ln_kernel,
        out_shape=jax.ShapeDtypeStruct((M, D), jnp.float32),
        grid=(M // TM,),
        in_specs=[
            pl.BlockSpec((TM, D), lambda i: (i, 0)),
            pl.BlockSpec((D, FF), lambda i: (0, 0)),
            pl.BlockSpec((1, FF), lambda i: (0, 0)),
            pl.BlockSpec((FF, D), lambda i: (0, 0)),
            pl.BlockSpec((1, D), lambda i: (0, 0)),
            pl.BlockSpec((1, D), lambda i: (0, 0)),
            pl.BlockSpec((1, D), lambda i: (0, 0)),
        ],
        out_specs=pl.BlockSpec((TM, D), lambda i: (i, 0)),
        compiler_params=pltpu.CompilerParams(dimension_semantics=("parallel",)),
    )(x2d, p["ffn1_w"].astype(jnp.bfloat16), p["ffn1_b"].reshape(1, FF),
      p["ffn2_w"].astype(jnp.bfloat16), p["ffn2_b"].reshape(1, D),
      p["ln2_g"].reshape(1, D), p["ln2_b"].reshape(1, D))


def _outfc_logsoftmax_kernel(x_ref, w_ref, b_ref, o_ref):
    """Fused out_fc + log_softmax so the lane-sparse (M, 9) logits never round-trip HBM."""
    z = jnp.dot(x_ref[...].astype(jnp.bfloat16), w_ref[...],
                preferred_element_type=jnp.float32) + b_ref[...]
    m = jnp.max(z, axis=-1, keepdims=True)
    e = jnp.exp(z - m)
    o_ref[...] = z - m - jnp.log(jnp.sum(e, axis=-1, keepdims=True))


def out_fc_log_softmax(x2d, w, b):
    M, D = x2d.shape
    T = w.shape[1]
    TM = _pick_tile(M)
    return pl.pallas_call(
        _outfc_logsoftmax_kernel,
        out_shape=jax.ShapeDtypeStruct((M, T), jnp.float32),
        grid=(M // TM,),
        in_specs=[
            pl.BlockSpec((TM, D), lambda i: (i, 0)),
            pl.BlockSpec((D, T), lambda i: (0, 0)),
            pl.BlockSpec((1, T), lambda i: (0, 0)),
        ],
        out_specs=pl.BlockSpec((TM, T), lambda i: (i, 0)),
        compiler_params=pltpu.CompilerParams(dimension_semantics=("parallel",)),
    )(x2d, w.astype(jnp.bfloat16), b.reshape(1, T))


def _crf_forward_kernel(logp_ref, mask_ref, trans_ref, start_ref, end_ref, o_ref):
    """Batched CRF forward algorithm.  logp_ref: (L, B, T) time-major; mask_ref: (L, B, 1)."""
    L = logp_ref.shape[0]
    trans = trans_ref[...]                              # (T, T)
    tmax = jnp.max(trans, axis=0, keepdims=True)        # (1, T) column max -> overflow-safe exp
    exp_trans = jnp.exp(trans - tmax)
    alpha0 = logp_ref[0] + start_ref[...]               # (B, T)

    def body(i, alpha):
        emit = logp_ref[i]                              # (B, T)
        mi = mask_ref[i]                                # (B, 1)
        ma = jnp.max(alpha, axis=-1, keepdims=True)     # (B, 1)
        s = jnp.dot(jnp.exp(alpha - ma), exp_trans, preferred_element_type=jnp.float32)
        new_alpha = jnp.log(s) + ma + tmax + emit       # logsumexp over previous tag + emission
        return jnp.where(mi > 0.5, new_alpha, alpha)    # keep old alpha at padded positions

    alpha = lax.fori_loop(1, L, body, alpha0, unroll=True)
    o_ref[...] = alpha + end_ref[...]


def crf_forward_alpha(logpT, maskT, trans, start, end):
    L, B, T = logpT.shape
    return pl.pallas_call(
        _crf_forward_kernel,
        out_shape=jax.ShapeDtypeStruct((B, T), jnp.float32),
        grid=(1,),
        in_specs=[
            pl.BlockSpec((L, B, T), lambda i: (0, 0, 0)),
            pl.BlockSpec((L, B, 1), lambda i: (0, 0, 0)),
            pl.BlockSpec((T, T), lambda i: (0, 0)),
            pl.BlockSpec((1, T), lambda i: (0, 0)),
            pl.BlockSpec((1, T), lambda i: (0, 0)),
        ],
        out_specs=pl.BlockSpec((B, T), lambda i: (0, 0)),
    )(logpT, maskT, trans, start.reshape(1, T), end.reshape(1, T))


# =============================== JAX glue (gathers, reshapes, params) ==========================

def build_abs_pos(L, d):
    """Absolute sin/cos tables for the exact relative-position decomposition.

    TENER's relative sinusoid is pos[rel] = [sin(rel*w), cos(rel*w)].  Via the addition
    identities, (q + r_w).pos[k-q] and k.pos[q-k] become matmuls against sin(p*w)/cos(p*w)
    of absolute positions p, so no (L, 2L) shift or (L, L, Dh) gather is materialized."""
    half = d // 2
    inv = jnp.exp(jnp.arange(half, dtype=jnp.float32) * -(math.log(10000.0) / (half - 1)))
    ang = jnp.arange(L, dtype=jnp.float32)[:, None] * inv[None, :]
    return jnp.sin(ang), jnp.cos(ang)


def transformer_layer(x, mask3, p, psin, pcos):
    B, L, D = x.shape
    x = attn_ln_block(x, p, psin, pcos, mask3)                       # attn + residual + LN1
    x = ffn_ln_block(x.reshape(B * L, D), p).reshape(B, L, D)        # FFN + residual + LN2
    return x


def crf_loss(logp, tags, mask_bool, maskf, crf):
    B, L, T = logp.shape
    # normalizer via batched Pallas forward-algorithm kernel (time-major emissions)
    logpT = jnp.transpose(logp, (1, 0, 2))               # (L, B, T)
    maskT = jnp.transpose(maskf, (1, 0))[:, :, None]     # (L, B, 1)
    alpha_final = crf_forward_alpha(logpT, maskT, crf["trans"], crf["start"], crf["end"])
    normalizer = jax.nn.logsumexp(alpha_final, axis=-1)  # (B,)
    # gold path score (gather-heavy glue, plain JAX)
    emit = jnp.take_along_axis(logp, tags[..., None], axis=-1)[..., 0]      # (B, L)
    emit = jnp.where(mask_bool, emit, 0.0)
    trans_sc = crf["trans"][tags[:, :-1], tags[:, 1:]]                      # (B, L-1)
    trans_sc = jnp.where(mask_bool[:, 1:], trans_sc, 0.0)
    score = jnp.sum(trans_sc + emit[:, :-1], axis=-1) + emit[:, -1]
    st = crf["start"][tags[:, 0]]
    last_idx = jnp.sum(mask_bool.astype(jnp.int32), axis=-1) - 1
    ed = crf["end"][tags[jnp.arange(B), last_idx]]
    score = score + st + ed
    return jnp.mean(normalizer - score)


def tener_forward(params, char_id, bichar_id, label_ids):
    mask_bool = char_id != 0
    maskf = mask_bool.astype(jnp.float32)
    chars = params["char_emb"][char_id]                  # (B, L, CHAR_DIM)
    bigrams = params["bichar_emb"][bichar_id]            # (B, L, BICHAR_DIM)
    x = jnp.concatenate([chars, bigrams], axis=-1)       # (B, L, EMBED_SIZE)
    B, L, E = x.shape
    x = linear(x.reshape(B * L, E), params["in_fc_w"], params["in_fc_b"]).reshape(B, L, D_MODEL)
    psin, pcos = build_abs_pos(L, HEAD_DIM)
    mask3 = maskf[:, None, :]                            # (B, 1, L) for per-batch mask blocks
    for lp in params["layers"]:
        x = transformer_layer(x, mask3, lp, psin, pcos)
    # fc_dropout / attention dropouts: identity (eval behaviour)
    logp = out_fc_log_softmax(x.reshape(B * L, D_MODEL),
                              params["out_fc_w"], params["out_fc_b"]).reshape(B, L, N_TAGS)
    # TODO(synk): viterbi_decode (is_eval=True path) and the BMESO allowed_transitions
    # constraint (only used by viterbi, not by the loss) are not implemented.
    return crf_loss(logp, label_ids, mask_bool, maskf, params["crf"])


def init_params(key):
    keys = iter(jax.random.split(key, 32))

    def nrm(shape, scale=0.05):
        return jax.random.normal(next(keys), shape, dtype=jnp.float32) * scale

    params = {
        "char_emb": nrm((CHAR_VOCAB, CHAR_DIM), 0.1).at[0].set(0.0),
        "bichar_emb": nrm((BICHAR_VOCAB, BICHAR_DIM), 0.1).at[0].set(0.0),
        "in_fc_w": nrm((EMBED_SIZE, D_MODEL)),
        "in_fc_b": jnp.zeros((D_MODEL,), jnp.float32),
        "out_fc_w": nrm((D_MODEL, N_TAGS)),
        "out_fc_b": jnp.zeros((N_TAGS,), jnp.float32),
        "crf": {
            "trans": nrm((N_TAGS, N_TAGS), 0.1),
            "start": nrm((N_TAGS,), 0.1),
            "end": nrm((N_TAGS,), 0.1),
        },
        "layers": [],
    }
    for _ in range(N_LAYERS):
        params["layers"].append({
            "qv_w": nrm((D_MODEL, 2 * D_MODEL)),
            "r_r_bias": nrm((N_HEAD, HEAD_DIM), 0.1),
            "r_w_bias": nrm((N_HEAD, HEAD_DIM), 0.1),
            "ln1_g": jnp.ones((D_MODEL,), jnp.float32),
            "ln1_b": jnp.zeros((D_MODEL,), jnp.float32),
            "ln2_g": jnp.ones((D_MODEL,), jnp.float32),
            "ln2_b": jnp.zeros((D_MODEL,), jnp.float32),
            "ffn1_w": nrm((D_MODEL, FF_DIM)),
            "ffn1_b": jnp.zeros((FF_DIM,), jnp.float32),
            "ffn2_w": nrm((FF_DIM, D_MODEL)),
            "ffn2_b": jnp.zeros((D_MODEL,), jnp.float32),
        })
    return params


if __name__ == "__main__":
    B, L = 2, 8
    key = jax.random.PRNGKey(0)
    pkey, k1, k2, k3 = jax.random.split(key, 4)
    params = init_params(pkey)

    char_id = jax.random.randint(k1, (B, L), 1, CHAR_VOCAB, dtype=jnp.int32)
    char_id = char_id.at[1, 6:].set(0)                   # pad second sequence to length 6
    bichar_id = jax.random.randint(k2, (B, L), 1, BICHAR_VOCAB, dtype=jnp.int32)
    bichar_id = bichar_id.at[1, 6:].set(0)
    label_ids = jax.random.randint(k3, (B, L), 0, N_TAGS, dtype=jnp.int32)

    loss = jax.jit(tener_forward)(params, char_id, bichar_id, label_ids)
    jax.block_until_ready(loss)
    assert bool(jnp.isfinite(loss)), "loss is not finite"
    print("KERNEL_OK")
</pallas_src>

<mosaic_0001>
module attributes {stable_mosaic.version = 11 : i64} {
  func.func @_linear_kernel(%arg0: i32, %arg1: memref<16x24xf32, #tpu.memory_space<vmem>>, %arg2: memref<24x480xbf16, #tpu.memory_space<vmem>>, %arg3: memref<1x480xf32, #tpu.memory_space<vmem>>, %arg4: memref<16x480xf32, #tpu.memory_space<vmem>>) attributes {dimension_semantics = [#tpu.dimension_semantics<parallel>], iteration_bounds = array<i64: 1>, scalar_prefetch = 0 : i64, scratch_operands = 0 : i64, tpu.core_type = #tpu.core_type<tc>, window_params = [{transform_indices = @transform_0, window_bounds = array<i64: 16, 24>}, {pipeline_mode = #tpu.pipeline_mode<synchronous>, transform_indices = @transform_1, window_bounds = array<i64: 24, 480>}, {pipeline_mode = #tpu.pipeline_mode<synchronous>, transform_indices = @transform_2, window_bounds = array<i64: 1, 480>}, {transform_indices = @transform_3, window_bounds = array<i64: 16, 480>}]} {
    %c0 = arith.constant 0 : index
    %c0_0 = arith.constant 0 : index
    %0 = vector.load %arg1[%c0, %c0_0] : memref<16x24xf32, #tpu.memory_space<vmem>>, vector<16x24xf32>
    %1 = arith.truncf %0 : vector<16x24xf32> to vector<16x24xbf16>
    %c0_1 = arith.constant 0 : index
    %c0_2 = arith.constant 0 : index
    %2 = vector.load %arg2[%c0_1, %c0_2] : memref<24x480xbf16, #tpu.memory_space<vmem>>, vector<24x480xbf16>
    %cst = arith.constant dense<0.000000e+00> : vector<16x480xf32>
    %3 = tpu.matmul %1, %2, %cst {dimension_numbers = #tpu.dot_dimension_numbers<[1], [0], [0], [1], [0, 0, 1, 1], [], []>} : vector<16x24xbf16>, vector<24x480xbf16>, vector<16x480xf32> -> vector<16x480xf32>
    %c0_3 = arith.constant 0 : index
    %c0_4 = arith.constant 0 : index
    %4 = vector.load %arg3[%c0_3, %c0_4] : memref<1x480xf32, #tpu.memory_space<vmem>>, vector<1x480xf32>
    %5 = vector.broadcast %4 : vector<1x480xf32> to vector<16x480xf32>
    %6 = arith.addf %3, %5 : vector<16x480xf32>
    %c0_5 = arith.constant 0 : index
    %c0_6 = arith.constant 0 : index
    %7 = vector.load %arg4[%c0_5, %c0_6] : memref<16x480xf32, #tpu.memory_space<vmem>>, vector<16x480xf32>
    tpu.vector_store %arg4[%c0_5, %c0_6], %6 {strides = array<i32>} : memref<16x480xf32, #tpu.memory_space<vmem>>, vector<16x480xf32>,
    return
  }
  func.func @transform_0(%arg0: i32) -> (i32, i32) {
    %c0_i32 = arith.constant 0 : i32
    %c0_i32_0 = arith.constant 0 : i32
    return %arg0, %c0_i32 : i32, i32
  }
  func.func @transform_1(%arg0: i32) -> (i32, i32) {
    %c0_i32 = arith.constant 0 : i32
    %c0_i32_0 = arith.constant 0 : i32
    %c0_i32_1 = arith.constant 0 : i32
    return %c0_i32, %c0_i32_0 : i32, i32
  }
  func.func @transform_2(%arg0: i32) -> (i32, i32) {
    %c0_i32 = arith.constant 0 : i32
    %c0_i32_0 = arith.constant 0 : i32
    %c0_i32_1 = arith.constant 0 : i32
    return %c0_i32, %c0_i32_0 : i32, i32
  }
  func.func @transform_3(%arg0: i32) -> (i32, i32) {
    %c0_i32 = arith.constant 0 : i32
    %c0_i32_0 = arith.constant 0 : i32
    return %arg0, %c0_i32 : i32, i32
  }
}

module attributes {stable_mosaic.version = 11 : i64} {
  func.func @_attn_ln_kernel(%arg0: i32, %arg1: memref<1x8x480xf32, #tpu.memory_space<vmem>>, %arg2: memref<480x960xbf16, #tpu.memory_space<vmem>>, %arg3: memref<6x80xf32, #tpu.memory_space<vmem>>, %arg4: memref<6x80xf32, #tpu.memory_space<vmem>>, %arg5: memref<8x40xf32, #tpu.memory_space<vmem>>, %arg6: memref<8x40xf32, #tpu.memory_space<vmem>>, %arg7: memref<1x1x8xf32, #tpu.memory_space<vmem>>, %arg8: memref<1x480xf32, #tpu.memory_space<vmem>>, %arg9: memref<1x480xf32, #tpu.memory_space<vmem>>, %arg10: memref<1x8x480xf32, #tpu.memory_space<vmem>>) attributes {dimension_semantics = [#tpu.dimension_semantics<parallel>], iteration_bounds = array<i64: 2>, scalar_prefetch = 0 : i64, scratch_operands = 0 : i64, tpu.core_type = #tpu.core_type<tc>, window_params = [{transform_indices = @transform_0, window_bounds = array<i64: 1, 8, 480>}, {pipeline_mode = #tpu.pipeline_mode<synchronous>, transform_indices = @transform_1, window_bounds = array<i64: 480, 960>}, {pipeline_mode = #tpu.pipeline_mode<synchronous>, transform_indices = @transform_2, window_bounds = array<i64: 6, 80>}, {pipeline_mode = #tpu.pipeline_mode<synchronous>, transform_indices = @transform_3, window_bounds = array<i64: 6, 80>}, {pipeline_mode = #tpu.pipeline_mode<synchronous>, transform_indices = @transform_4, window_bounds = array<i64: 8, 40>}, {pipeline_mode = #tpu.pipeline_mode<synchronous>, transform_indices = @transform_5, window_bounds = array<i64: 8, 40>}, {transform_indices = @transform_6, window_bounds = array<i64: 1, 1, 8>}, {pipeline_mode = #tpu.pipeline_mode<synchronous>, transform_indices = @transform_7, window_bounds = array<i64: 1, 480>}, {pipeline_mode = #tpu.pipeline_mode<synchronous>, transform_indices = @transform_8, window_bounds = array<i64: 1, 480>}, {transform_indices = @transform_9, window_bounds = array<i64: 1, 8, 480>}]} {
    %c0 = arith.constant 0 : index
    %c0_0 = arith.constant 0 : index
    %c0_1 = arith.constant 0 : index
    %0 = vector.load %arg1[%c0, %c0_0, %c0_1] : memref<1x8x480xf32, #tpu.memory_space<vmem>>, vector<1x8x480xf32>
    %1 = vector.shape_cast %0 : vector<1x8x480xf32> to vector<8x480xf32>
    %2 = arith.truncf %1 : vector<8x480xf32> to vector<8x480xbf16>
    %c0_2 = arith.constant 0 : index
    %c0_3 = arith.constant 0 : index
    %3 = vector.load %arg2[%c0_2, %c0_3] : memref<480x960xbf16, #tpu.memory_space<vmem>>, vector<480x960xbf16>
    %cst = arith.constant dense<0.000000e+00> : vector<8x960xf32>
    %4 = tpu.matmul %2, %3, %cst {dimension_numbers = #tpu.dot_dimension_numbers<[1], [0], [0], [1], [0, 0, 1, 1], [], []>} : vector<8x480xbf16>, vector<480x960xbf16>, vector<8x960xf32> -> vector<8x960xf32>
    %c0_4 = arith.constant 0 : index
    %c0_5 = arith.constant 0 : index
    %5 = vector.load %arg5[%c0_4, %c0_5] : memref<8x40xf32, #tpu.memory_space<vmem>>, vector<8x40xf32>
    %c0_6 = arith.constant 0 : index
    %c0_7 = arith.constant 0 : index
    %6 = vector.load %arg6[%c0_6, %c0_7] : memref<8x40xf32, #tpu.memory_space<vmem>>, vector<8x40xf32>
    %7 = arith.truncf %5 : vector<8x40xf32> to vector<8x40xbf16>
    %8 = arith.truncf %6 : vector<8x40xf32> to vector<8x40xbf16>
    %c0_8 = arith.constant 0 : index
    %c0_9 = arith.constant 0 : index
    %c0_10 = arith.constant 0 : index
    %9 = vector.load %arg7[%c0_8, %c0_9, %c0_10] : memref<1x1x8xf32, #tpu.memory_space<vmem>>, vector<1x1x8xf32>
    %10 = vector.shape_cast %9 : vector<1x1x8xf32> to vector<1x8xf32>
    %11 = vector.extract_strided_slice %4 {offsets = [0, 0], sizes = [8, 80], strides = [1, 1]} : vector<8x960xf32> to vector<8x80xf32>
    %12 = vector.extract_strided_slice %4 {offsets = [0, 480], sizes = [8, 80], strides = [1, 1]} : vector<8x960xf32> to vector<8x80xf32>
    %13 = vector.extract_strided_slice %1 {offsets = [0, 0], sizes = [8, 80], strides = [1, 1]} : vector<8x480xf32> to vector<8x80xf32>
    %c0_11 = arith.constant 0 : index
    %c0_12 = arith.constant 0 : index
    %14 = vector.load %arg3[%c0_11, %c0_12] : memref<6x80xf32, #tpu.memory_space<vmem>>, vector<1x80xf32>
    %15 = vector.shape_cast %14 : vector<1x80xf32> to vector<80xf32>
    %c0_13 = arith.constant 0 : index
    %c0_14 = arith.constant 0 : index
    %16 = vector.load %arg4[%c0_13, %c0_14] : memref<6x80xf32, #tpu.memory_space<vmem>>, vector<1x80xf32>
    %17 = vector.shape_cast %16 : vector<1x80xf32> to vector<80xf32>
    %18 = vector.shape_cast %15 : vector<80xf32> to vector<1x80xf32>
    %19 = vector.broadcast %18 : vector<1x80xf32> to vector<8x80xf32>
    %20 = arith.addf %11, %19 : vector<8x80xf32>
    %21 = arith.truncf %20 : vector<8x80xf32> to vector<8x80xbf16>
    %22 = arith.truncf %13 : vector<8x80xf32> to vector<8x80xbf16>
    %cst_15 = arith.constant dense<0.000000e+00> : vector<8x8xf32>
    %23 = tpu.matmul %21, %22, %cst_15 {dimension_numbers = #tpu.dot_dimension_numbers<[1], [1], [0], [0], [0, 0, 1, 0], [], []>} : vector<8x80xbf16>, vector<8x80xbf16>, vector<8x8xf32> -> vector<8x8xf32>
    %24 = vector.shape_cast %17 : vector<80xf32> to vector<1x80xf32>
    %25 = vector.broadcast %24 : vector<1x80xf32> to vector<8x80xf32>
    %26 = arith.addf %11, %25 : vector<8x80xf32>
    %27 = vector.extract_strided_slice %26 {offsets = [0, 0], sizes = [8, 40], strides = [1, 1]} : vector<8x80xf32> to vector<8x40xf32>
    %28 = vector.extract_strided_slice %26 {offsets = [0, 40], sizes = [8, 40], strides = [1, 1]} : vector<8x80xf32> to vector<8x40xf32>
    %29 = arith.mulf %27, %6 : vector<8x40xf32>
    %30 = arith.mulf %28, %5 : vector<8x40xf32>
    %31 = arith.addf %29, %30 : vector<8x40xf32>
    %32 = arith.truncf %31 : vector<8x40xf32> to vector<8x40xbf16>
    %33 = arith.mulf %28, %6 : vector<8x40xf32>
    %34 = arith.mulf %27, %5 : vector<8x40xf32>
    %35 = arith.subf %33, %34 : vector<8x40xf32>
    %36 = arith.truncf %35 : vector<8x40xf32> to vector<8x40xbf16>
    %cst_16 = arith.constant dense<0.000000e+00> : vector<8x8xf32>
    %37 = tpu.matmul %32, %7, %cst_16 {dimension_numbers = #tpu.dot_dimension_numbers<[1], [1], [0], [0], [0, 0, 1, 0], [], []>} : vector<8x40xbf16>, vector<8x40xbf16>, vector<8x8xf32> -> vector<8x8xf32>
    %cst_17 = arith.constant dense<0.000000e+00> : vector<8x8xf32>
    %38 = tpu.matmul %36, %8, %cst_17 {dimension_numbers = #tpu.dot_dimension_numbers<[1], [1], [0], [0], [0, 0, 1, 0], [], []>} : vector<8x40xbf16>, vector<8x40xbf16>, vector<8x8xf32> -> vector<8x8xf32>
    %39 = arith.addf %37, %38 : vector<8x8xf32>
    %40 = vector.extract_strided_slice %13 {offsets = [0, 0], sizes = [8, 40], strides = [1, 1]} : vector<8x80xf32> to vector<8x40xf32>
    %41 = vector.extract_strided_slice %13 {offsets = [0, 40], sizes = [8, 40], strides = [1, 1]} : vector<8x80xf32> to vector<8x40xf32>
    %42 = arith.mulf %40, %6 : vector<8x40xf32>
    %43 = arith.mulf %41, %5 : vector<8x40xf32>
    %44 = arith.addf %42, %43 : vector<8x40xf32>
    %45 = arith.truncf %44 : vector<8x40xf32> to vector<8x40xbf16>
    %46 = arith.mulf %41, %6 : vector<8x40xf32>
    %47 = arith.mulf %40, %5 : vector<8x40xf32>
    %48 = arith.subf %46, %47 : vector<8x40xf32>
    %49 = arith.truncf %48 : vector<8x40xf32> to vector<8x40xbf16>
    %cst_18 = arith.constant dense<0.000000e+00> : vector<8x8xf32>
    %50 = tpu.matmul %7, %45, %cst_18 {dimension_numbers = #tpu.dot_dimension_numbers<[1], [1], [0], [0], [0, 0, 1, 0], [], []>} : vector<8x40xbf16>, vector<8x40xbf16>, vector<8x8xf32> -> vector<8x8xf32>
    %cst_19 = arith.constant dense<0.000000e+00> : vector<8x8xf32>
    %51 = tpu.matmul %8, %49, %cst_19 {dimension_numbers = #tpu.dot_dimension_numbers<[1], [1], [0], [0], [0, 0, 1, 0], [], []>} : vector<8x40xbf16>, vector<8x40xbf16>, vector<8x8xf32> -> vector<8x8xf32>
    %52 = arith.addf %50, %51 : vector<8x8xf32>
    %53 = arith.addf %23, %39 : vector<8x8xf32>
    %54 = arith.addf %53, %52 : vector<8x8xf32>
    %cst_20 = arith.constant 5.000000e-01 : f32
    %55 = vector.broadcast %cst_20 : f32 to vector<1x8xf32>
    %56 = arith.cmpf ogt, %10, %55 : vector<1x8xf32>
    %cst_21 = arith.constant -1.000000e+30 : f32
    %57 = vector.shape_cast %56 : vector<1x8xi1> to vector<1x8xi1>
    %58 = vector.broadcast %57 : vector<1x8xi1> to vector<8x8xi1>
    %59 = vector.broadcast %cst_21 : f32 to vector<8x8xf32>
    %60 = arith.select %58, %54, %59 : vector<8x8xi1>, vector<8x8xf32>
    %cst_22 = arith.constant dense<0xFF800000> : vector<8xf32>
    %61 = vector.multi_reduction <maximumf>, %60, %cst_22 [1] : vector<8x8xf32> to vector<8xf32>
    %62 = vector.shape_cast %61 : vector<8xf32> to vector<8x1xf32>
    %63 = vector.broadcast %62 : vector<8x1xf32> to vector<8x8xf32>
    %64 = arith.subf %60, %63 : vector<8x8xf32>
    %65 = math.exp %64 : vector<8x8xf32>
    %cst_23 = arith.constant dense<0.000000e+00> : vector<8xf32>
    %66 = vector.multi_reduction <add>, %65, %cst_23 [1] : vector<8x8xf32> to vector<8xf32>
    %67 = vector.shape_cast %66 : vector<8xf32> to vector<8x1xf32>
    %68 = tpu.reciprocal %67 {approx = true} : vector<8x1xf32> -> vector<8x1xf32>
    %69 = vector.broadcast %68 : vector<8x1xf32> to vector<8x8xf32>
    %70 = arith.mulf %65, %69 : vector<8x8xf32>
    %71 = arith.truncf %70 : vector<8x8xf32> to vector<8x8xbf16>
    %72 = arith.truncf %12 : vector<8x80xf32> to vector<8x80xbf16>
    %cst_24 = arith.constant dense<0.000000e+00> : vector<8x80xf32>
    %73 = tpu.matmul %71, %72, %cst_24 {dimension_numbers = #tpu.dot_dimension_numbers<[1], [0], [0], [1], [0, 0, 1, 1], [], []>} : vector<8x8xbf16>, vector<8x80xbf16>, vector<8x80xf32> -> vector<8x80xf32>
    %74 = vector.extract_strided_slice %4 {offsets = [0, 80], sizes = [8, 80], strides = [1, 1]} : vector<8x960xf32> to vector<8x80xf32>
    %75 = vector.extract_strided_slice %4 {offsets = [0, 560], sizes = [8, 80], strides = [1, 1]} : vector<8x960xf32> to vector<8x80xf32>
    %76 = vector.extract_strided_slice %1 {offsets = [0, 80], sizes = [8, 80], strides = [1, 1]} : vector<8x480xf32> to vector<8x80xf32>
    %c1 = arith.constant 1 : index
    %c0_25 = arith.constant 0 : index
    %77 = vector.load %arg3[%c1, %c0_25] : memref<6x80xf32, #tpu.memory_space<vmem>>, vector<1x80xf32>
    %78 = vector.shape_cast %77 : vector<1x80xf32> to vector<80xf32>
    %c1_26 = arith.constant 1 : index
    %c0_27 = arith.constant 0 : index
    %79 = vector.load %arg4[%c1_26, %c0_27] : memref<6x80xf32, #tpu.memory_space<vmem>>, vector<1x80xf32>
    %80 = vector.shape_cast %79 : vector<1x80xf32> to vector<80xf32>
    %81 = vector.shape_cast %78 : vector<80xf32> to vector<1x80xf32>
    %82 = vector.broadcast %81 : vector<1x80xf32> to vector<8x80xf32>
    %83 = arith.addf %74, %82 : vector<8x80xf32>
    %84 = arith.truncf %83 : vector<8x80xf32> to vector<8x80xbf16>
    %85 = arith.truncf %76 : vector<8x80xf32> to vector<8x80xbf16>
    %cst_28 = arith.constant dense<0.000000e+00> : vector<8x8xf32>
    %86 = tpu.matmul %84, %85, %cst_28 {dimension_numbers = #tpu.dot_dimension_numbers<[1], [1], [0], [0], [0, 0, 1, 0], [], []>} : vector<8x80xbf16>, vector<8x80xbf16>, vector<8x8xf32> -> vector<8x8xf32>
    %87 = vector.shape_cast %80 : vector<80xf32> to vector<1x80xf32>
    %88 = vector.broadcast %87 : vector<1x80xf32> to vector<8x80xf32>
    %89 = arith.addf %74, %88 : vector<8x80xf32>
    %90 = vector.extract_strided_slice %89 {offsets = [0, 0], sizes = [8, 40], strides = [1, 1]} : vector<8x80xf32> to vector<8x40xf32>
    %91 = vector.extract_strided_slice %89 {offsets = [0, 40], sizes = [8, 40], strides = [1, 1]} : vector<8x80xf32> to vector<8x40xf32>
    %92 = arith.mulf %90, %6 : vector<8x40xf32>
    %93 = arith.mulf %91, %5 : vector<8x40xf32>
    %94 = arith.addf %92, %93 : vector<8x40xf32>
    %95 = arith.truncf %94 : vector<8x40xf32> to vector<8x40xbf16>
    %96 = arith.mulf %91, %6 : vector<8x40xf32>
    %97 = arith.mulf %90, %5 : vector<8x40xf32>
    %98 = arith.subf %96, %97 : vector<8x40xf32>
    %99 = arith.truncf %98 : vector<8x40xf32> to vector<8x40xbf16>
    %cst_29 = arith.constant dense<0.000000e+00> : vector<8x8xf32>
    %100 = tpu.matmul %95, %7, %cst_29 {dimension_numbers = #tpu.dot_dimension_numbers<[1], [1], [0], [0], [0, 0, 1, 0], [], []>} : vector<8x40xbf16>, vector<8x40xbf16>, vector<8x8xf32> -> vector<8x8xf32>
    %cst_30 = arith.constant dense<0.000000e+00> : vector<8x8xf32>
    %101 = tpu.matmul %99, %8, %cst_30 {dimension_numbers = #tpu.dot_dimension_numbers<[1], [1], [0], [0], [0, 0, 1, 0], [], []>} : vector<8x40xbf16>, vector<8x40xbf16>, vector<8x8xf32> -> vector<8x8xf32>
    %102 = arith.addf %100, %101 : vector<8x8xf32>
    %103 = vector.extract_strided_slice %76 {offsets = [0, 0], sizes = [8, 40], strides = [1, 1]} : vector<8x80xf32> to vector<8x40xf32>
    %104 = vector.extract_strided_slice %76 {offsets = [0, 40], sizes = [8, 40], strides = [1, 1]} : vector<8x80xf32> to vector<8x40xf32>
    %105 = arith.mulf %103, %6 : vector<8x40xf32>
    %106 = arith.mulf %104, %5 : vector<8x40xf32>
    %107 = arith.addf %105, %106 : vector<8x40xf32>
    %108 = arith.truncf %107 : vector<8x40xf32> to vector<8x40xbf16>
    %109 = arith.mulf %104, %6 : vector<8x40xf32>
    %110 = arith.mulf %103, %5 : vector<8x40xf32>
    %111 = arith.subf %109, %110 : vector<8x40xf32>
    %112 = arith.truncf %111 : vector<8x40xf32> to vector<8x40xbf16>
    %cst_31 = arith.constant dense<0.000000e+00> : vector<8x8xf32>
    %113 = tpu.matmul %7, %108, %cst_31 {dimension_numbers = #tpu.dot_dimension_numbers<[1], [1], [0], [0], [0, 0, 1, 0], [], []>} : vector<8x40xbf16>, vector<8x40xbf16>, vector<8x8xf32> -> vector<8x8xf32>
    %cst_32 = arith.constant dense<0.000000e+00> : vector<8x8xf32>
    %114 = tpu.matmul %8, %112, %cst_32 {dimension_numbers = #tpu.dot_dimension_numbers<[1], [1], [0], [0], [0, 0, 1, 0], [], []>} : vector<8x40xbf16>, vector<8x40xbf16>, vector<8x8xf32> -> vector<8x8xf32>
    %115 = arith.addf %113, %114 : vector<8x8xf32>
    %116 = arith.addf %86, %102 : vector<8x8xf32>
    %117 = arith.addf %116, %115 : vector<8x8xf32>
    %cst_33 = arith.constant 5.000000e-01 : f32
    %118 = vector.broadcast %cst_33 : f32 to vector<1x8xf32>
    %119 = arith.cmpf ogt, %10, %118 : vector<1x8xf32>
    %cst_34 = arith.constant -1.000000e+30 : f32
    %120 = vector.shape_cast %119 : vector<1x8xi1> to vector<1x8xi1>
    %121 = vector.broadcast %120 : vector<1x8xi1> to vector<8x8xi1>
    %122 = vector.broadcast %cst_34 : f32 to vector<8x8xf32>
    %123 = arith.select %121, %117, %122 : vector<8x8xi1>, vector<8x8xf32>
    %cst_35 = arith.constant dense<0xFF800000> : vector<8xf32>
    %124 = vector.multi_reduction <maximumf>, %123, %cst_35 [1] : vector<8x8xf32> to vector<8xf32>
    %125 = vector.shape_cast %124 : vector<8xf32> to vector<8x1xf32>
    %126 = vector.broadcast %125 : vector<8x1xf32> to vector<8x8xf32>
    %127 = arith.subf %123, %126 : vector<8x8xf32>
    %128 = math.exp %127 : vector<8x8xf32>
    %cst_36 = arith.constant dense<0.000000e+00> : vector<8xf32>
    %129 = vector.multi_reduction <add>, %128, %cst_36 [1] : vector<8x8xf32> to vector<8xf32>
    %130 = vector.shape_cast %129 : vector<8xf32> to vector<8x1xf32>
    %131 = tpu.reciprocal %130 {approx = true} : vector<8x1xf32> -> vector<8x1xf32>
    %132 = vector.broadcast %131 : vector<8x1xf32> to vector<8x8xf32>
    %133 = arith.mulf %128, %132 : vector<8x8xf32>
    %134 = arith.truncf %133 : vector<8x8xf32> to vector<8x8xbf16>
    %135 = arith.truncf %75 : vector<8x80xf32> to vector<8x80xbf16>
    %cst_37 = arith.constant dense<0.000000e+00> : vector<8x80xf32>
    %136 = tpu.matmul %134, %135, %cst_37 {dimension_numbers = #tpu.dot_dimension_numbers<[1], [0], [0], [1], [0, 0, 1, 1], [], []>} : vector<8x8xbf16>, vector<8x80xbf16>, vector<8x80xf32> -> vector<8x80xf32>
    %137 = vector.extract_strided_slice %4 {offsets = [0, 160], sizes = [8, 80], strides = [1, 1]} : vector<8x960xf32> to vector<8x80xf32>
    %138 = vector.extract_strided_slice %4 {offsets = [0, 640], sizes = [8, 80], strides = [1, 1]} : vector<8x960xf32> to vector<8x80xf32>
    %139 = vector.extract_strided_slice %1 {offsets = [0, 160], sizes = [8, 80], strides = [1, 1]} : vector<8x480xf32> to vector<8x80xf32>
    %c2 = arith.constant 2 : index
    %c0_38 = arith.constant 0 : index
    %140 = vector.load %arg3[%c2, %c0_38] : memref<6x80xf32, #tpu.memory_space<vmem>>, vector<1x80xf32>
    %141 = vector.shape_cast %140 : vector<1x80xf32> to vector<80xf32>
    %c2_39 = arith.constant 2 : index
    %c0_40 = arith.constant 0 : index
    %142 = vector.load %arg4[%c2_39, %c0_40] : memref<6x80xf32, #tpu.memory_space<vmem>>, vector<1x80xf32>
    %143 = vector.shape_cast %142 : vector<1x80xf32> to vector<80xf32>
    %144 = vector.shape_cast %141 : vector<80xf32> to vector<1x80xf32>
    %145 = vector.broadcast %144 : vector<1x80xf32> to vector<8x80xf32>
    %146 = arith.addf %137, %145 : vector<8x80xf32>
    %147 = arith.truncf %146 : vector<8x80xf32> to vector<8x80xbf16>
    %148 = arith.truncf %139 : vector<8x80xf32> to vector<8x80xbf16>
    %cst_41 = arith.constant dense<0.000000e+00> : vector<8x8xf32>
    %149 = tpu.matmul %147, %148, %cst_41 {dimension_numbers = #tpu.dot_dimension_numbers<[1], [1], [0], [0], [0, 0, 1, 0], [], []>} : vector<8x80xbf16>, vector<8x80xbf16>, vector<8x8xf32> -> vector<8x8xf32>
    %150 = vector.shape_cast %143 : vector<80xf32> to vector<1x80xf32>
    %151 = vector.broadcast %150 : vector<1x80xf32> to vector<8x80xf32>
    %152 = arith.addf %137, %151 : vector<8x80xf32>
    %153 = vector.extract_strided_slice %152 {offsets = [0, 0], sizes = [8, 40], strides = [1, 1]} : vector<8x80xf32> to vector<8x40xf32>
    %154 = vector.extract_strided_slice %152 {offsets = [0, 40], sizes = [8, 40], strides = [1, 1]} : vector<8x80xf32> to vector<8x40xf32>
    %155 = arith.mulf %153, %6 : vector<8x40xf32>
    %156 = arith.mulf %154, %5 : vector<8x40xf32>
    %157 = arith.addf %155, %156 : vector<8x40xf32>
    %158 = arith.truncf %157 : vector<8x40xf32> to vector<8x40xbf16>
    %159 = arith.mulf %154, %6 : vector<8x40xf32>
    %160 = arith.mulf %153, %5 : vector<8x40xf32>
    %161 = arith.subf %159, %160 : vector<8x40xf32>
    %162 = arith.truncf %161 : vector<8x40xf32> to vector<8x40xbf16>
    %cst_42 = arith.constant dense<0.000000e+00> : vector<8x8xf32>
    %163 = tpu.matmul %158, %7, %cst_42 {dimension_numbers = #tpu.dot_dimension_numbers<[1], [1], [0], [0], [0, 0, 1, 0], [], []>} : vector<8x40xbf16>, vector<8x40xbf16>, vector<8x8xf32> -> vector<8x8xf32>
    %cst_43 = arith.constant dense<0.000000e+00> : vector<8x8xf32>
    %164 = tpu.matmul %162, %8, %cst_43 {dimension_numbers = #tpu.dot_dimension_numbers<[1], [1], [0], [0], [0, 0, 1, 0], [], []>} : vector<8x40xbf16>, vector<8x40xbf16>, vector<8x8xf32> -> vector<8x8xf32>
    %165 = arith.addf %163, %164 : vector<8x8xf32>
    %166 = vector.extract_strided_slice %139 {offsets = [0, 0], sizes = [8, 40], strides = [1, 1]} : vector<8x80xf32> to vector<8x40xf32>
    %167 = vector.extract_strided_slice %139 {offsets = [0, 40], sizes = [8, 40], strides = [1, 1]} : vector<8x80xf32> to vector<8x40xf32>
    %168 = arith.mulf %166, %6 : vector<8x40xf32>
    %169 = arith.mulf %167, %5 : vector<8x40xf32>
    %170 = arith.addf %168, %169 : vector<8x40xf32>
    %171 = arith.truncf %170 : vector<8x40xf32> to vector<8x40xbf16>
    %172 = arith.mulf %167, %6 : vector<8x40xf32>
    %173 = arith.mulf %166, %5 : vector<8x40xf32>
    %174 = arith.subf %172, %173 : vector<8x40xf32>
    %175 = arith.truncf %174 : vector<8x40xf32> to vector<8x40xbf16>
    %cst_44 = arith.constant dense<0.000000e+00> : vector<8x8xf32>
    %176 = tpu.matmul %7, %171, %cst_44 {dimension_numbers = #tpu.dot_dimension_numbers<[1], [1], [0], [0], [0, 0, 1, 0], [], []>} : vector<8x40xbf16>, vector<8x40xbf16>, vector<8x8xf32> -> vector<8x8xf32>
    %cst_45 = arith.constant dense<0.000000e+00> : vector<8x8xf32>
    %177 = tpu.matmul %8, %175, %cst_45 {dimension_numbers = #tpu.dot_dimension_numbers<[1], [1], [0], [0], [0, 0, 1, 0], [], []>} : vector<8x40xbf16>, vector<8x40xbf16>, vector<8x8xf32> -> vector<8x8xf32>
    %178 = arith.addf %176, %177 : vector<8x8xf32>
    %179 = arith.addf %149, %165 : vector<8x8xf32>
    %180 = arith.addf %179, %178 : vector<8x8xf32>
    %cst_46 = arith.constant 5.000000e-01 : f32
    %181 = vector.broadcast %cst_46 : f32 to vector<1x8xf32>
    %182 = arith.cmpf ogt, %10, %181 : vector<1x8xf32>
    %cst_47 = arith.constant -1.000000e+30 : f32
    %183 = vector.shape_cast %182 : vector<1x8xi1> to vector<1x8xi1>
    %184 = vector.broadcast %183 : vector<1x8xi1> to vector<8x8xi1>
    %185 = vector.broadcast %cst_47 : f32 to vector<8x8xf32>
    %186 = arith.select %184, %180, %185 : vector<8x8xi1>, vector<8x8xf32>
    %cst_48 = arith.constant dense<0xFF800000> : vector<8xf32>
    %187 = vector.multi_reduction <maximumf>, %186, %cst_48 [1] : vector<8x8xf32> to vector<8xf32>
    %188 = vector.shape_cast %187 : vector<8xf32> to vector<8x1xf32>
    %189 = vector.broadcast %188 : vector<8x1xf32> to vector<8x8xf32>
    %190 = arith.subf %186, %189 : vector<8x8xf32>
    %191 = math.exp %190 : vector<8x8xf32>
    %cst_49 = arith.constant dense<0.000000e+00> : vector<8xf32>
    %192 = vector.multi_reduction <add>, %191, %cst_49 [1] : vector<8x8xf32> to vector<8xf32>
    %193 = vector.shape_cast %192 : vector<8xf32> to vector<8x1xf32>
    %194 = tpu.reciprocal %193 {approx = true} : vector<8x1xf32> -> vector<8x1xf32>
    %195 = vector.broadcast %194 : vector<8x1xf32> to vector<8x8xf32>
    %196 = arith.mulf %191, %195 : vector<8x8xf32>
    %197 = arith.truncf %196 : vector<8x8xf32> to vector<8x8xbf16>
    %198 = arith.truncf %138 : vector<8x80xf32> to vector<8x80xbf16>
    %cst_50 = arith.constant dense<0.000000e+00> : vector<8x80xf32>
    %199 = tpu.matmul %197, %198, %cst_50 {dimension_numbers = #tpu.dot_dimension_numbers<[1], [0], [0], [1], [0, 0, 1, 1], [], []>} : vector<8x8xbf16>, vector<8x80xbf16>, vector<8x80xf32> -> vector<8x80xf32>
    %200 = vector.extract_strided_slice %4 {offsets = [0, 240], sizes = [8, 80], strides = [1, 1]} : vector<8x960xf32> to vector<8x80xf32>
    %201 = vector.extract_strided_slice %4 {offsets = [0, 720], sizes = [8, 80], strides = [1, 1]} : vector<8x960xf32> to vector<8x80xf32>
    %202 = vector.extract_strided_slice %1 {offsets = [0, 240], sizes = [8, 80], strides = [1, 1]} : vector<8x480xf32> to vector<8x80xf32>
    %c3 = arith.constant 3 : index
    %c0_51 = arith.constant 0 : index
    %203 = vector.load %arg3[%c3, %c0_51] : memref<6x80xf32, #tpu.memory_space<vmem>>, vector<1x80xf32>
    %204 = vector.shape_cast %203 : vector<1x80xf32> to vector<80xf32>
    %c3_52 = arith.constant 3 : index
    %c0_53 = arith.constant 0 : index
    %205 = vector.load %arg4[%c3_52, %c0_53] : memref<6x80xf32, #tpu.memory_space<vmem>>, vector<1x80xf32>
    %206 = vector.shape_cast %205 : vector<1x80xf32> to vector<80xf32>
    %207 = vector.shape_cast %204 : vector<80xf32> to vector<1x80xf32>
    %208 = vector.broadcast %207 : vector<1x80xf32> to vector<8x80xf32>
    %209 = arith.addf %200, %208 : vector<8x80xf32>
    %210 = arith.truncf %209 : vector<8x80xf32> to vector<8x80xbf16>
    %211 = arith.truncf %202 : vector<8x80xf32> to vector<8x80xbf16>
    %cst_54 = arith.constant dense<0.000000e+00> : vector<8x8xf32>
    %212 = tpu.matmul %210, %211, %cst_54 {dimension_numbers = #tpu.dot_dimension_numbers<[1], [1], [0], [0], [0, 0, 1, 0], [], []>} : vector<8x80xbf16>, vector<8x80xbf16>, vector<8x8xf32> -> vector<8x8xf32>
    %213 = vector.shape_cast %206 : vector<80xf32> to vector<1x80xf32>
    %214 = vector.broadcast %213 : vector<1x80xf32> to vector<8x80xf32>
    %215 = arith.addf %200, %214 : vector<8x80xf32>
    %216 = vector.extract_strided_slice %215 {offsets = [0, 0], sizes = [8, 40], strides = [1, 1]} : vector<8x80xf32> to vector<8x40xf32>
    %217 = vector.extract_strided_slice %215 {offsets = [0, 40], sizes = [8, 40], strides = [1, 1]} : vector<8x80xf32> to vector<8x40xf32>
    %218 = arith.mulf %216, %6 : vector<8x40xf32>
    %219 = arith.mulf %217, %5 : vector<8x40xf32>
    %220 = arith.addf %218, %219 : vector<8x40xf32>
    %221 = arith.truncf %220 : vector<8x40xf32> to vector<8x40xbf16>
    %222 = arith.mulf %217, %6 : vector<8x40xf32>
    %223 = arith.mulf %216, %5 : vector<8x40xf32>
    %224 = arith.subf %222, %223 : vector<8x40xf32>
    %225 = arith.truncf %224 : vector<8x40xf32> to vector<8x40xbf16>
    %cst_55 = arith.constant dense<0.000000e+00> : vector<8x8xf32>
    %226 = tpu.matmul %221, %7, %cst_55 {dimension_numbers = #tpu.dot_dimension_numbers<[1], [1], [0], [0], [0, 0, 1, 0], [], []>} : vector<8x40xbf16>, vector<8x40xbf16>, vector<8x8xf32> -> vector<8x8xf32>
    %cst_56 = arith.constant dense<0.000000e+00> : vector<8x8xf32>
    %227 = tpu.matmul %225, %8, %cst_56 {dimension_numbers = #tpu.dot_dimension_numbers<[1], [1], [0], [0], [0, 0, 1, 0], [], []>} : vector<8x40xbf16>, vector<8x40xbf16>, vector<8x8xf32> -> vector<8x8xf32>
    %228 = arith.addf %226, %227 : vector<8x8xf32>
    %229 = vector.extract_strided_slice %202 {offsets = [0, 0], sizes = [8, 40], strides = [1, 1]} : vector<8x80xf32> to vector<8x40xf32>
    %230 = vector.extract_strided_slice %202 {offsets = [0, 40], sizes = [8, 40], strides = [1, 1]} : vector<8x80xf32> to vector<8x40xf32>
    %231 = arith.mulf %229, %6 : vector<8x40xf32>
    %232 = arith.mulf %230, %5 : vector<8x40xf32>
    %233 = arith.addf %231, %232 : vector<8x40xf32>
    %234 = arith.truncf %233 : vector<8x40xf32> to vector<8x40xbf16>
    %235 = arith.mulf %230, %6 : vector<8x40xf32>
    %236 = arith.mulf %229, %5 : vector<8x40xf32>
    %237 = arith.subf %235, %236 : vector<8x40xf32>
    %238 = arith.truncf %237 : vector<8x40xf32> to vector<8x40xbf16>
    %cst_57 = arith.constant dense<0.000000e+00> : vector<8x8xf32>
    %239 = tpu.matmul %7, %234, %cst_57 {dimension_numbers = #tpu.dot_dimension_numbers<[1], [1], [0], [0], [0, 0, 1, 0], [], []>} : vector<8x40xbf16>, vector<8x40xbf16>, vector<8x8xf32> -> vector<8x8xf32>
    %cst_58 = arith.constant dense<0.000000e+00> : vector<8x8xf32>
    %240 = tpu.matmul %8, %238, %cst_58 {dimension_numbers = #tpu.dot_dimension_numbers<[1], [1], [0], [0], [0, 0, 1, 0], [], []>} : vector<8x40xbf16>, vector<8x40xbf16>, vector<8x8xf32> -> vector<8x8xf32>
    %241 = arith.addf %239, %240 : vector<8x8xf32>
    %242 = arith.addf %212, %228 : vector<8x8xf32>
    %243 = arith.addf %242, %241 : vector<8x8xf32>
    %cst_59 = arith.constant 5.000000e-01 : f32
    %244 = vector.broadcast %cst_59 : f32 to vector<1x8xf32>
    %245 = arith.cmpf ogt, %10, %244 : vector<1x8xf32>
    %cst_60 = arith.constant -1.000000e+30 : f32
    %246 = vector.shape_cast %245 : vector<1x8xi1> to vector<1x8xi1>
    %247 = vector.broadcast %246 : vector<1x8xi1> to vector<8x8xi1>
    %248 = vector.broadcast %cst_60 : f32 to vector<8x8xf32>
    %249 = arith.select %247, %243, %248 : vector<8x8xi1>, vector<8x8xf32>
    %cst_61 = arith.constant dense<0xFF800000> : vector<8xf32>
    %250 = vector.multi_reduction <maximumf>, %249, %cst_61 [1] : vector<8x8xf32> to vector<8xf32>
    %251 = vector.shape_cast %250 : vector<8xf32> to vector<8x1xf32>
    %252 = vector.broadcast %251 : vector<8x1xf32> to vector<8x8xf32>
    %253 = arith.subf %249, %252 : vector<8x8xf32>
    %254 = math.exp %253 : vector<8x8xf32>
    %cst_62 = arith.constant dense<0.000000e+00> : vector<8xf32>
    %255 = vector.multi_reduction <add>, %254, %cst_62 [1] : vector<8x8xf32> to vector<8xf32>
    %256 = vector.shape_cast %255 : vector<8xf32> to vector<8x1xf32>
    %257 = tpu.reciprocal %256 {approx = true} : vector<8x1xf32> -> vector<8x1xf32>
    %258 = vector.broadcast %257 : vector<8x1xf32> to vector<8x8xf32>
    %259 = arith.mulf %254, %258 : vector<8x8xf32>
    %260 = arith.truncf %259 : vector<8x8xf32> to vector<8x8xbf16>
    %261 = arith.truncf %201 : vector<8x80xf32> to vector<8x80xbf16>
    %cst_63 = arith.constant dense<0.000000e+00> : vector<8x80xf32>
    %262 = tpu.matmul %260, %261, %cst_63 {dimension_numbers = #tpu.dot_dimension_numbers<[1], [0], [0], [1], [0, 0, 1, 1], [], []>} : vector<8x8xbf16>, vector<8x80xbf16>, vector<8x80xf32> -> vector<8x80xf32>
    %263 = vector.extract_strided_slice %4 {offsets = [0, 320], sizes = [8, 80], strides = [1, 1]} : vector<8x960xf32> to vector<8x80xf32>
    %264 = vector.extract_strided_slice %4 {offsets = [0, 800], sizes = [8, 80], strides = [1, 1]} : vector<8x960xf32> to vector<8x80xf32>
    %265 = vector.extract_strided_slice %1 {offsets = [0, 320], sizes = [8, 80], strides = [1, 1]} : vector<8x480xf32> to vector<8x80xf32>
    %c4 = arith.constant 4 : index
    %c0_64 = arith.constant 0 : index
    %266 = vector.load %arg3[%c4, %c0_64] : memref<6x80xf32, #tpu.memory_space<vmem>>, vector<1x80xf32>
    %267 = vector.shape_cast %266 : vector<1x80xf32> to vector<80xf32>
    %c4_65 = arith.constant 4 : index
    %c0_66 = arith.constant 0 : index
    %268 = vector.load %arg4[%c4_65, %c0_66] : memref<6x80xf32, #tpu.memory_space<vmem>>, vector<1x80xf32>
    %269 = vector.shape_cast %268 : vector<1x80xf32> to vector<80xf32>
    %270 = vector.shape_cast %267 : vector<80xf32> to vector<1x80xf32>
    %271 = vector.broadcast %270 : vector<1x80xf32> to vector<8x80xf32>
    %272 = arith.addf %263, %271 : vector<8x80xf32>
    %273 = arith.truncf %272 : vector<8x80xf32> to vector<8x80xbf16>
    %274 = arith.truncf %265 : vector<8x80xf32> to vector<8x80xbf16>
    %cst_67 = arith.constant dense<0.000000e+00> : vector<8x8xf32>
    %275 = tpu.matmul %273, %274, %cst_67 {dimension_numbers = #tpu.dot_dimension_numbers<[1], [1], [0], [0], [0, 0, 1, 0], [], []>} : vector<8x80xbf16>, vector<8x80xbf16>, vector<8x8xf32> -> vector<8x8xf32>
    %276 = vector.shape_cast %269 : vector<80xf32> to vector<1x80xf32>
    %277 = vector.broadcast %276 : vector<1x80xf32> to vector<8x80xf32>
    %278 = arith.addf %263, %277 : vector<8x80xf32>
    %279 = vector.extract_strided_slice %278 {offsets = [0, 0], sizes = [8, 40], strides = [1, 1]} : vector<8x80xf32> to vector<8x40xf32>
    %280 = vector.extract_strided_slice %278 {offsets = [0, 40], sizes = [8, 40], strides = [1, 1]} : vector<8x80xf32> to vector<8x40xf32>
    %281 = arith.mulf %279, %6 : vector<8x40xf32>
    %282 = arith.mulf %280, %5 : vector<8x40xf32>
    %283 = arith.addf %281, %282 : vector<8x40xf32>
    %284 = arith.truncf %283 : vector<8x40xf32> to vector<8x40xbf16>
    %285 = arith.mulf %280, %6 : vector<8x40xf32>
    %286 = arith.mulf %279, %5 : vector<8x40xf32>
    %287 = arith.subf %285, %286 : vector<8x40xf32>
    %288 = arith.truncf %287 : vector<8x40xf32> to vector<8x40xbf16>
    %cst_68 = arith.constant dense<0.000000e+00> : vector<8x8xf32>
    %289 = tpu.matmul %284, %7, %cst_68 {dimension_numbers = #tpu.dot_dimension_numbers<[1], [1], [0], [0], [0, 0, 1, 0], [], []>} : vector<8x40xbf16>, vector<8x40xbf16>, vector<8x8xf32> -> vector<8x8xf32>
    %cst_69 = arith.constant dense<0.000000e+00> : vector<8x8xf32>
    %290 = tpu.matmul %288, %8, %cst_69 {dimension_numbers = #tpu.dot_dimension_numbers<[1], [1], [0], [0], [0, 0, 1, 0], [], []>} : vector<8x40xbf16>, vector<8x40xbf16>, vector<8x8xf32> -> vector<8x8xf32>
    %291 = arith.addf %289, %290 : vector<8x8xf32>
    %292 = vector.extract_strided_slice %265 {offsets = [0, 0], sizes = [8, 40], strides = [1, 1]} : vector<8x80xf32> to vector<8x40xf32>
    %293 = vector.extract_strided_slice %265 {offsets = [0, 40], sizes = [8, 40], strides = [1, 1]} : vector<8x80xf32> to vector<8x40xf32>
    %294 = arith.mulf %292, %6 : vector<8x40xf32>
    %295 = arith.mulf %293, %5 : vector<8x40xf32>
    %296 = arith.addf %294, %295 : vector<8x40xf32>
    %297 = arith.truncf %296 : vector<8x40xf32> to vector<8x40xbf16>
    %298 = arith.mulf %293, %6 : vector<8x40xf32>
    %299 = arith.mulf %292, %5 : vector<8x40xf32>
    %300 = arith.subf %298, %299 : vector<8x40xf32>
    %301 = arith.truncf %300 : vector<8x40xf32> to vector<8x40xbf16>
    %cst_70 = arith.constant dense<0.000000e+00> : vector<8x8xf32>
    %302 = tpu.matmul %7, %297, %cst_70 {dimension_numbers = #tpu.dot_dimension_numbers<[1], [1], [0], [0], [0, 0, 1, 0], [], []>} : vector<8x40xbf16>, vector<8x40xbf16>, vector<8x8xf32> -> vector<8x8xf32>
    %cst_71 = arith.constant dense<0.000000e+00> : vector<8x8xf32>
    %303 = tpu.matmul %8, %301, %cst_71 {dimension_numbers = #tpu.dot_dimension_numbers<[1], [1], [0], [0], [0, 0, 1, 0], [], []>} : vector<8x40xbf16>, vector<8x40xbf16>, vector<8x8xf32> -> vector<8x8xf32>
    %304 = arith.addf %302, %303 : vector<8x8xf32>
    %305 = arith.addf %275, %291 : vector<8x8xf32>
    %306 = arith.addf %305, %304 : vector<8x8xf32>
    %cst_72 = arith.constant 5.000000e-01 : f32
    %307 = vector.broadcast %cst_72 : f32 to vector<1x8xf32>
    %308 = arith.cmpf ogt, %10, %307 : vector<1x8xf32>
    %cst_73 = arith.constant -1.000000e+30 : f32
    %309 = vector.shape_cast %308 : vector<1x8xi1> to vector<1x8xi1>
    %310 = vector.broadcast %309 : vector<1x8xi1> to vector<8x8xi1>
    %311 = vector.broadcast %cst_73 : f32 to vector<8x8xf32>
    %312 = arith.select %310, %306, %311 : vector<8x8xi1>, vector<8x8xf32>
    %cst_74 = arith.constant dense<0xFF800000> : vector<8xf32>
    %313 = vector.multi_reduction <maximumf>, %312, %cst_74 [1] : vector<8x8xf32> to vector<8xf32>
    %314 = vector.shape_cast %313 : vector<8xf32> to vector<8x1xf32>
    %315 = vector.broadcast %314 : vector<8x1xf32> to vector<8x8xf32>
    %316 = arith.subf %312, %315 : vector<8x8xf32>
    %317 = math.exp %316 : vector<8x8xf32>
    %cst_75 = arith.constant dense<0.000000e+00> : vector<8xf32>
    %318 = vector.multi_reduction <add>, %317, %cst_75 [1] : vector<8x8xf32> to vector<8xf32>
    %319 = vector.shape_cast %318 : vector<8xf32> to vector<8x1xf32>
    %320 = tpu.reciprocal %319 {approx = true} : vector<8x1xf32> -> vector<8x1xf32>
    %321 = vector.broadcast %320 : vector<8x1xf32> to vector<8x8xf32>
    %322 = arith.mulf %317, %321 : vector<8x8xf32>
    %323 = arith.truncf %322 : vector<8x8xf32> to vector<8x8xbf16>
    %324 = arith.truncf %264 : vector<8x80xf32> to vector<8x80xbf16>
    %cst_76 = arith.constant dense<0.000000e+00> : vector<8x80xf32>
    %325 = tpu.matmul %323, %324, %cst_76 {dimension_numbers = #tpu.dot_dimension_numbers<[1], [0], [0], [1], [0, 0, 1, 1], [], []>} : vector<8x8xbf16>, vector<8x80xbf16>, vector<8x80xf32> -> vector<8x80xf32>
    %326 = vector.extract_strided_slice %4 {offsets = [0, 400], sizes = [8, 80], strides = [1, 1]} : vector<8x960xf32> to vector<8x80xf32>
    %327 = vector.extract_strided_slice %4 {offsets = [0, 880], sizes = [8, 80], strides = [1, 1]} : vector<8x960xf32> to vector<8x80xf32>
    %328 = vector.extract_strided_slice %1 {offsets = [0, 400], sizes = [8, 80], strides = [1, 1]} : vector<8x480xf32> to vector<8x80xf32>
    %c5 = arith.constant 5 : index
    %c0_77 = arith.constant 0 : index
    %329 = vector.load %arg3[%c5, %c0_77] : memref<6x80xf32, #tpu.memory_space<vmem>>, vector<1x80xf32>
    %330 = vector.shape_cast %329 : vector<1x80xf32> to vector<80xf32>
    %c5_78 = arith.constant 5 : index
    %c0_79 = arith.constant 0 : index
    %331 = vector.load %arg4[%c5_78, %c0_79] : memref<6x80xf32, #tpu.memory_space<vmem>>, vector<1x80xf32>
    %332 = vector.shape_cast %331 : vector<1x80xf32> to vector<80xf32>
    %333 = vector.shape_cast %330 : vector<80xf32> to vector<1x80xf32>
    %334 = vector.broadcast %333 : vector<1x80xf32> to vector<8x80xf32>
    %335 = arith.addf %326, %334 : vector<8x80xf32>
    %336 = arith.truncf %335 : vector<8x80xf32> to vector<8x80xbf16>
    %337 = arith.truncf %328 : vector<8x80xf32> to vector<8x80xbf16>
    %cst_80 = arith.constant dense<0.000000e+00> : vector<8x8xf32>
    %338 = tpu.matmul %336, %337, %cst_80 {dimension_numbers = #tpu.dot_dimension_numbers<[1], [1], [0], [0], [0, 0, 1, 0], [], []>} : vector<8x80xbf16>, vector<8x80xbf16>, vector<8x8xf32> -> vector<8x8xf32>
    %339 = vector.shape_cast %332 : vector<80xf32> to vector<1x80xf32>
    %340 = vector.broadcast %339 : vector<1x80xf32> to vector<8x80xf32>
    %341 = arith.addf %326, %340 : vector<8x80xf32>
    %342 = vector.extract_strided_slice %341 {offsets = [0, 0], sizes = [8, 40], strides = [1, 1]} : vector<8x80xf32> to vector<8x40xf32>
    %343 = vector.extract_strided_slice %341 {offsets = [0, 40], sizes = [8, 40], strides = [1, 1]} : vector<8x80xf32> to vector<8x40xf32>
    %344 = arith.mulf %342, %6 : vector<8x40xf32>
    %345 = arith.mulf %343, %5 : vector<8x40xf32>
    %346 = arith.addf %344, %345 : vector<8x40xf32>
    %347 = arith.truncf %346 : vector<8x40xf32> to vector<8x40xbf16>
    %348 = arith.mulf %343, %6 : vector<8x40xf32>
    %349 = arith.mulf %342, %5 : vector<8x40xf32>
    %350 = arith.subf %348, %349 : vector<8x40xf32>
    %351 = arith.truncf %350 : vector<8x40xf32> to vector<8x40xbf16>
    %cst_81 = arith.constant dense<0.000000e+00> : vector<8x8xf32>
    %352 = tpu.matmul %347, %7, %cst_81 {dimension_numbers = #tpu.dot_dimension_numbers<[1], [1], [0], [0], [0, 0, 1, 0], [], []>} : vector<8x40xbf16>, vector<8x40xbf16>, vector<8x8xf32> -> vector<8x8xf32>
    %cst_82 = arith.constant dense<0.000000e+00> : vector<8x8xf32>
    %353 = tpu.matmul %351, %8, %cst_82 {dimension_numbers = #tpu.dot_dimension_numbers<[1], [1], [0], [0], [0, 0, 1, 0], [], []>} : vector<8x40xbf16>, vector<8x40xbf16>, vector<8x8xf32> -> vector<8x8xf32>
    %354 = arith.addf %352, %353 : vector<8x8xf32>
    %355 = vector.extract_strided_slice %328 {offsets = [0, 0], sizes = [8, 40], strides = [1, 1]} : vector<8x80xf32> to vector<8x40xf32>
    %356 = vector.extract_strided_slice %328 {offsets = [0, 40], sizes = [8, 40], strides = [1, 1]} : vector<8x80xf32> to vector<8x40xf32>
    %357 = arith.mulf %355, %6 : vector<8x40xf32>
    %358 = arith.mulf %356, %5 : vector<8x40xf32>
    %359 = arith.addf %357, %358 : vector<8x40xf32>
    %360 = arith.truncf %359 : vector<8x40xf32> to vector<8x40xbf16>
    %361 = arith.mulf %356, %6 : vector<8x40xf32>
    %362 = arith.mulf %355, %5 : vector<8x40xf32>
    %363 = arith.subf %361, %362 : vector<8x40xf32>
    %364 = arith.truncf %363 : vector<8x40xf32> to vector<8x40xbf16>
    %cst_83 = arith.constant dense<0.000000e+00> : vector<8x8xf32>
    %365 = tpu.matmul %7, %360, %cst_83 {dimension_numbers = #tpu.dot_dimension_numbers<[1], [1], [0], [0], [0, 0, 1, 0], [], []>} : vector<8x40xbf16>, vector<8x40xbf16>, vector<8x8xf32> -> vector<8x8xf32>
    %cst_84 = arith.constant dense<0.000000e+00> : vector<8x8xf32>
    %366 = tpu.matmul %8, %364, %cst_84 {dimension_numbers = #tpu.dot_dimension_numbers<[1], [1], [0], [0], [0, 0, 1, 0], [], []>} : vector<8x40xbf16>, vector<8x40xbf16>, vector<8x8xf32> -> vector<8x8xf32>
    %367 = arith.addf %365, %366 : vector<8x8xf32>
    %368 = arith.addf %338, %354 : vector<8x8xf32>
    %369 = arith.addf %368, %367 : vector<8x8xf32>
    %cst_85 = arith.constant 5.000000e-01 : f32
    %370 = vector.broadcast %cst_85 : f32 to vector<1x8xf32>
    %371 = arith.cmpf ogt, %10, %370 : vector<1x8xf32>
    %cst_86 = arith.constant -1.000000e+30 : f32
    %372 = vector.shape_cast %371 : vector<1x8xi1> to vector<1x8xi1>
    %373 = vector.broadcast %372 : vector<1x8xi1> to vector<8x8xi1>
    %374 = vector.broadcast %cst_86 : f32 to vector<8x8xf32>
    %375 = arith.select %373, %369, %374 : vector<8x8xi1>, vector<8x8xf32>
    %cst_87 = arith.constant dense<0xFF800000> : vector<8xf32>
    %376 = vector.multi_reduction <maximumf>, %375, %cst_87 [1] : vector<8x8xf32> to vector<8xf32>
    %377 = vector.shape_cast %376 : vector<8xf32> to vector<8x1xf32>
    %378 = vector.broadcast %377 : vector<8x1xf32> to vector<8x8xf32>
    %379 = arith.subf %375, %378 : vector<8x8xf32>
    %380 = math.exp %379 : vector<8x8xf32>
    %cst_88 = arith.constant dense<0.000000e+00> : vector<8xf32>
    %381 = vector.multi_reduction <add>, %380, %cst_88 [1] : vector<8x8xf32> to vector<8xf32>
    %382 = vector.shape_cast %381 : vector<8xf32> to vector<8x1xf32>
    %383 = tpu.reciprocal %382 {approx = true} : vector<8x1xf32> -> vector<8x1xf32>
    %384 = vector.broadcast %383 : vector<8x1xf32> to vector<8x8xf32>
    %385 = arith.mulf %380, %384 : vector<8x8xf32>
    %386 = arith.truncf %385 : vector<8x8xf32> to vector<8x8xbf16>
    %387 = arith.truncf %327 : vector<8x80xf32> to vector<8x80xbf16>
    %cst_89 = arith.constant dense<0.000000e+00> : vector<8x80xf32>
    %388 = tpu.matmul %386, %387, %cst_89 {dimension_numbers = #tpu.dot_dimension_numbers<[1], [0], [0], [1], [0, 0, 1, 1], [], []>} : vector<8x8xbf16>, vector<8x80xbf16>, vector<8x80xf32> -> vector<8x80xf32>
    %389 = tpu.concatenate %73, %136, %199, %262, %325, %388 in 1 : vector<8x80xf32>, vector<8x80xf32>, vector<8x80xf32>, vector<8x80xf32>, vector<8x80xf32>, vector<8x80xf32> -> vector<8x480xf32>
    %390 = arith.addf %389, %1 : vector<8x480xf32>
    %cst_90 = arith.constant dense<0.000000e+00> : vector<8xf32>
    %391 = vector.multi_reduction <add>, %390, %cst_90 [1] : vector<8x480xf32> to vector<8xf32>
    %392 = vector.shape_cast %391 : vector<8xf32> to vector<8x1xf32>
    %cst_91 = arith.constant 4.800000e+02 : f32
    %393 = vector.broadcast %cst_91 : f32 to vector<8x1xf32>
    %394 = arith.divf %392, %393 : vector<8x1xf32>
    %395 = vector.broadcast %394 : vector<8x1xf32> to vector<8x480xf32>
    %396 = arith.subf %390, %395 : vector<8x480xf32>
    %397 = arith.mulf %396, %396 : vector<8x480xf32>
    %cst_92 = arith.constant dense<0.000000e+00> : vector<8xf32>
    %398 = vector.multi_reduction <add>, %397, %cst_92 [1] : vector<8x480xf32> to vector<8xf32>
    %399 = vector.shape_cast %398 : vector<8xf32> to vector<8x1xf32>
    %cst_93 = arith.constant 4.800000e+02 : f32
    %400 = vector.broadcast %cst_93 : f32 to vector<8x1xf32>
    %401 = arith.divf %399, %400 : vector<8x1xf32>
    %402 = vector.broadcast %394 : vector<8x1xf32> to vector<8x480xf32>
    %403 = arith.subf %390, %402 : vector<8x480xf32>
    %cst_94 = arith.constant 9.99999974E-6 : f32
    %404 = vector.broadcast %cst_94 : f32 to vector<8x1xf32>
    %405 = arith.addf %401, %404 : vector<8x1xf32>
    %406 = math.rsqrt %405 : vector<8x1xf32>
    %407 = vector.broadcast %406 : vector<8x1xf32> to vector<8x480xf32>
    %408 = arith.mulf %403, %407 : vector<8x480xf32>
    %c0_95 = arith.constant 0 : index
    %c0_96 = arith.constant 0 : index
    %409 = vector.load %arg8[%c0_95, %c0_96] : memref<1x480xf32, #tpu.memory_space<vmem>>, vector<1x480xf32>
    %410 = vector.broadcast %409 : vector<1x480xf32> to vector<8x480xf32>
    %411 = arith.mulf %408, %410 : vector<8x480xf32>
    %c0_97 = arith.constant 0 : index
    %c0_98 = arith.constant 0 : index
    %412 = vector.load %arg9[%c0_97, %c0_98] : memref<1x480xf32, #tpu.memory_space<vmem>>, vector<1x480xf32>
    %413 = vector.broadcast %412 : vector<1x480xf32> to vector<8x480xf32>
    %414 = arith.addf %411, %413 : vector<8x480xf32>
    %c0_99 = arith.constant 0 : index
    %c0_100 = arith.constant 0 : index
    %c0_101 = arith.constant 0 : index
    %415 = vector.load %arg10[%c0_99, %c0_100, %c0_101] : memref<1x8x480xf32, #tpu.memory_space<vmem>>, vector<1x8x480xf32>
    %416 = vector.shape_cast %415 : vector<1x8x480xf32> to vector<8x480xf32>
    %417 = vector.shape_cast %414 : vector<8x480xf32> to vector<1x8x480xf32>
    tpu.vector_store %arg10[%c0_99, %c0_100, %c0_101], %417 {strides = array<i32>} : memref<1x8x480xf32, #tpu.memory_space<vmem>>, vector<1x8x480xf32>,
    return
  }
  func.func @transform_0(%arg0: i32) -> (i32, i32, i32) {
    %c0_i32 = arith.constant 0 : i32
    %c0_i32_0 = arith.constant 0 : i32
    %c0_i32_1 = arith.constant 0 : i32
    return %arg0, %c0_i32, %c0_i32_0 : i32, i32, i32
  }
  func.func @transform_1(%arg0: i32) -> (i32, i32) {
    %c0_i32 = arith.constant 0 : i32
    %c0_i32_0 = arith.constant 0 : i32
    %c0_i32_1 = arith.constant 0 : i32
    return %c0_i32, %c0_i32_0 : i32, i32
  }
  func.func @transform_2(%arg0: i32) -> (i32, i32) {
    %c0_i32 = arith.constant 0 : i32
    %c0_i32_0 = arith.constant 0 : i32
    %c0_i32_1 = arith.constant 0 : i32
    return %c0_i32, %c0_i32_0 : i32, i32
  }
  func.func @transform_3(%arg0: i32) -> (i32, i32) {
    %c0_i32 = arith.constant 0 : i32
    %c0_i32_0 = arith.constant 0 : i32
    %c0_i32_1 = arith.constant 0 : i32
    return %c0_i32, %c0_i32_0 : i32, i32
  }
  func.func @transform_4(%arg0: i32) -> (i32, i32) {
    %c0_i32 = arith.constant 0 : i32
    %c0_i32_0 = arith.constant 0 : i32
    %c0_i32_1 = arith.constant 0 : i32
    return %c0_i32, %c0_i32_0 : i32, i32
  }
  func.func @transform_5(%arg0: i32) -> (i32, i32) {
    %c0_i32 = arith.constant 0 : i32
    %c0_i32_0 = arith.constant 0 : i32
    %c0_i32_1 = arith.constant 0 : i32
    return %c0_i32, %c0_i32_0 : i32, i32
  }
  func.func @transform_6(%arg0: i32) -> (i32, i32, i32) {
    %c0_i32 = arith.constant 0 : i32
    %c0_i32_0 = arith.constant 0 : i32
    %c0_i32_1 = arith.constant 0 : i32
    return %arg0, %c0_i32, %c0_i32_0 : i32, i32, i32
  }
  func.func @transform_7(%arg0: i32) -> (i32, i32) {
    %c0_i32 = arith.constant 0 : i32
    %c0_i32_0 = arith.constant 0 : i32
    %c0_i32_1 = arith.constant 0 : i32
    return %c0_i32, %c0_i32_0 : i32, i32
  }
  func.func @transform_8(%arg0: i32) -> (i32, i32) {
    %c0_i32 = arith.constant 0 : i32
    %c0_i32_0 = arith.constant 0 : i32
    %c0_i32_1 = arith.constant 0 : i32
    return %c0_i32, %c0_i32_0 : i32, i32
  }
  func.func @transform_9(%arg0: i32) -> (i32, i32, i32) {
    %c0_i32 = arith.constant 0 : i32
    %c0_i32_0 = arith.constant 0 : i32
    %c0_i32_1 = arith.constant 0 : i32
    return %arg0, %c0_i32, %c0_i32_0 : i32, i32, i32
  }
}

module attributes {stable_mosaic.version = 11 : i64} {
  func.func @_ffn_ln_kernel(%arg0: i32, %arg1: memref<16x480xf32, #tpu.memory_space<vmem>>, %arg2: memref<480x960xbf16, #tpu.memory_space<vmem>>, %arg3: memref<1x960xf32, #tpu.memory_space<vmem>>, %arg4: memref<960x480xbf16, #tpu.memory_space<vmem>>, %arg5: memref<1x480xf32, #tpu.memory_space<vmem>>, %arg6: memref<1x480xf32, #tpu.memory_space<vmem>>, %arg7: memref<1x480xf32, #tpu.memory_space<vmem>>, %arg8: memref<16x480xf32, #tpu.memory_space<vmem>>) attributes {dimension_semantics = [#tpu.dimension_semantics<parallel>], iteration_bounds = array<i64: 1>, scalar_prefetch = 0 : i64, scratch_operands = 0 : i64, tpu.core_type = #tpu.core_type<tc>, window_params = [{transform_indices = @transform_0, window_bounds = array<i64: 16, 480>}, {pipeline_mode = #tpu.pipeline_mode<synchronous>, transform_indices = @transform_1, window_bounds = array<i64: 480, 960>}, {pipeline_mode = #tpu.pipeline_mode<synchronous>, transform_indices = @transform_2, window_bounds = array<i64: 1, 960>}, {pipeline_mode = #tpu.pipeline_mode<synchronous>, transform_indices = @transform_3, window_bounds = array<i64: 960, 480>}, {pipeline_mode = #tpu.pipeline_mode<synchronous>, transform_indices = @transform_4, window_bounds = array<i64: 1, 480>}, {pipeline_mode = #tpu.pipeline_mode<synchronous>, transform_indices = @transform_5, window_bounds = array<i64: 1, 480>}, {pipeline_mode = #tpu.pipeline_mode<synchronous>, transform_indices = @transform_6, window_bounds = array<i64: 1, 480>}, {transform_indices = @transform_7, window_bounds = array<i64: 16, 480>}]} {
    %c0 = arith.constant 0 : index
    %c0_0 = arith.constant 0 : index
    %0 = vector.load %arg1[%c0, %c0_0] : memref<16x480xf32, #tpu.memory_space<vmem>>, vector<16x480xf32>
    %1 = arith.truncf %0 : vector<16x480xf32> to vector<16x480xbf16>
    %c0_1 = arith.constant 0 : index
    %c0_2 = arith.constant 0 : index
    %2 = vector.load %arg2[%c0_1, %c0_2] : memref<480x960xbf16, #tpu.memory_space<vmem>>, vector<480x960xbf16>
    %cst = arith.constant dense<0.000000e+00> : vector<16x960xf32>
    %3 = tpu.matmul %1, %2, %cst {dimension_numbers = #tpu.dot_dimension_numbers<[1], [0], [0], [1], [0, 0, 1, 1], [], []>} : vector<16x480xbf16>, vector<480x960xbf16>, vector<16x960xf32> -> vector<16x960xf32>
    %c0_3 = arith.constant 0 : index
    %c0_4 = arith.constant 0 : index
    %4 = vector.load %arg3[%c0_3, %c0_4] : memref<1x960xf32, #tpu.memory_space<vmem>>, vector<1x960xf32>
    %5 = vector.broadcast %4 : vector<1x960xf32> to vector<16x960xf32>
    %6 = arith.addf %3, %5 : vector<16x960xf32>
    %cst_5 = arith.constant 0.000000e+00 : f32
    %7 = vector.broadcast %cst_5 : f32 to vector<16x960xf32>
    %8 = arith.maximumf %6, %7 : vector<16x960xf32>
    %9 = arith.truncf %8 : vector<16x960xf32> to vector<16x960xbf16>
    %c0_6 = arith.constant 0 : index
    %c0_7 = arith.constant 0 : index
    %10 = vector.load %arg4[%c0_6, %c0_7] : memref<960x480xbf16, #tpu.memory_space<vmem>>, vector<960x480xbf16>
    %cst_8 = arith.constant dense<0.000000e+00> : vector<16x480xf32>
    %11 = tpu.matmul %9, %10, %cst_8 {dimension_numbers = #tpu.dot_dimension_numbers<[1], [0], [0], [1], [0, 0, 1, 1], [], []>} : vector<16x960xbf16>, vector<960x480xbf16>, vector<16x480xf32> -> vector<16x480xf32>
    %c0_9 = arith.constant 0 : index
    %c0_10 = arith.constant 0 : index
    %12 = vector.load %arg5[%c0_9, %c0_10] : memref<1x480xf32, #tpu.memory_space<vmem>>, vector<1x480xf32>
    %13 = vector.broadcast %12 : vector<1x480xf32> to vector<16x480xf32>
    %14 = arith.addf %11, %13 : vector<16x480xf32>
    %15 = arith.addf %14, %0 : vector<16x480xf32>
    %cst_11 = arith.constant dense<0.000000e+00> : vector<16xf32>
    %16 = vector.multi_reduction <add>, %15, %cst_11 [1] : vector<16x480xf32> to vector<16xf32>
    %17 = vector.shape_cast %16 : vector<16xf32> to vector<16x1xf32>
    %cst_12 = arith.constant 4.800000e+02 : f32
    %18 = vector.broadcast %cst_12 : f32 to vector<16x1xf32>
    %19 = arith.divf %17, %18 : vector<16x1xf32>
    %20 = vector.broadcast %19 : vector<16x1xf32> to vector<16x480xf32>
    %21 = arith.subf %15, %20 : vector<16x480xf32>
    %22 = arith.mulf %21, %21 : vector<16x480xf32>
    %cst_13 = arith.constant dense<0.000000e+00> : vector<16xf32>
    %23 = vector.multi_reduction <add>, %22, %cst_13 [1] : vector<16x480xf32> to vector<16xf32>
    %24 = vector.shape_cast %23 : vector<16xf32> to vector<16x1xf32>
    %cst_14 = arith.constant 4.800000e+02 : f32
    %25 = vector.broadcast %cst_14 : f32 to vector<16x1xf32>
    %26 = arith.divf %24, %25 : vector<16x1xf32>
    %27 = vector.broadcast %19 : vector<16x1xf32> to vector<16x480xf32>
    %28 = arith.subf %15, %27 : vector<16x480xf32>
    %cst_15 = arith.constant 9.99999974E-6 : f32
    %29 = vector.broadcast %cst_15 : f32 to vector<16x1xf32>
    %30 = arith.addf %26, %29 : vector<16x1xf32>
    %31 = math.rsqrt %30 : vector<16x1xf32>
    %32 = vector.broadcast %31 : vector<16x1xf32> to vector<16x480xf32>
    %33 = arith.mulf %28, %32 : vector<16x480xf32>
    %c0_16 = arith.constant 0 : index
    %c0_17 = arith.constant 0 : index
    %34 = vector.load %arg6[%c0_16, %c0_17] : memref<1x480xf32, #tpu.memory_space<vmem>>, vector<1x480xf32>
    %35 = vector.broadcast %34 : vector<1x480xf32> to vector<16x480xf32>
    %36 = arith.mulf %33, %35 : vector<16x480xf32>
    %c0_18 = arith.constant 0 : index
    %c0_19 = arith.constant 0 : index
    %37 = vector.load %arg7[%c0_18, %c0_19] : memref<1x480xf32, #tpu.memory_space<vmem>>, vector<1x480xf32>
    %38 = vector.broadcast %37 : vector<1x480xf32> to vector<16x480xf32>
    %39 = arith.addf %36, %38 : vector<16x480xf32>
    %c0_20 = arith.constant 0 : index
    %c0_21 = arith.constant 0 : index
    %40 = vector.load %arg8[%c0_20, %c0_21] : memref<16x480xf32, #tpu.memory_space<vmem>>, vector<16x480xf32>
    tpu.vector_store %arg8[%c0_20, %c0_21], %39 {strides = array<i32>} : memref<16x480xf32, #tpu.memory_space<vmem>>, vector<16x480xf32>,
    return
  }
  func.func @transform_0(%arg0: i32) -> (i32, i32) {
    %c0_i32 = arith.constant 0 : i32
    %c0_i32_0 = arith.constant 0 : i32
    return %arg0, %c0_i32 : i32, i32
  }
  func.func @transform_1(%arg0: i32) -> (i32, i32) {
    %c0_i32 = arith.constant 0 : i32
    %c0_i32_0 = arith.constant 0 : i32
    %c0_i32_1 = arith.constant 0 : i32
    return %c0_i32, %c0_i32_0 : i32, i32
  }
  func.func @transform_2(%arg0: i32) -> (i32, i32) {
    %c0_i32 = arith.constant 0 : i32
    %c0_i32_0 = arith.constant 0 : i32
    %c0_i32_1 = arith.constant 0 : i32
    return %c0_i32, %c0_i32_0 : i32, i32
  }
  func.func @transform_3(%arg0: i32) -> (i32, i32) {
    %c0_i32 = arith.constant 0 : i32
    %c0_i32_0 = arith.constant 0 : i32
    %c0_i32_1 = arith.constant 0 : i32
    return %c0_i32, %c0_i32_0 : i32, i32
  }
  func.func @transform_4(%arg0: i32) -> (i32, i32) {
    %c0_i32 = arith.constant 0 : i32
    %c0_i32_0 = arith.constant 0 : i32
    %c0_i32_1 = arith.constant 0 : i32
    return %c0_i32, %c0_i32_0 : i32, i32
  }
  func.func @transform_5(%arg0: i32) -> (i32, i32) {
    %c0_i32 = arith.constant 0 : i32
    %c0_i32_0 = arith.constant 0 : i32
    %c0_i32_1 = arith.constant 0 : i32
    return %c0_i32, %c0_i32_0 : i32, i32
  }
  func.func @transform_6(%arg0: i32) -> (i32, i32) {
    %c0_i32 = arith.constant 0 : i32
    %c0_i32_0 = arith.constant 0 : i32
    %c0_i32_1 = arith.constant 0 : i32
    return %c0_i32, %c0_i32_0 : i32, i32
  }
  func.func @transform_7(%arg0: i32) -> (i32, i32) {
    %c0_i32 = arith.constant 0 : i32
    %c0_i32_0 = arith.constant 0 : i32
    return %arg0, %c0_i32 : i32, i32
  }
}

module attributes {stable_mosaic.version = 11 : i64} {
  func.func @_outfc_logsoftmax_kernel(%arg0: i32, %arg1: memref<16x480xf32, #tpu.memory_space<vmem>>, %arg2: memref<480x9xbf16, #tpu.memory_space<vmem>>, %arg3: memref<1x9xf32, #tpu.memory_space<vmem>>, %arg4: memref<16x9xf32, #tpu.memory_space<vmem>>) attributes {dimension_semantics = [#tpu.dimension_semantics<parallel>], iteration_bounds = array<i64: 1>, scalar_prefetch = 0 : i64, scratch_operands = 0 : i64, tpu.core_type = #tpu.core_type<tc>, window_params = [{transform_indices = @transform_0, window_bounds = array<i64: 16, 480>}, {pipeline_mode = #tpu.pipeline_mode<synchronous>, transform_indices = @transform_1, window_bounds = array<i64: 480, 9>}, {pipeline_mode = #tpu.pipeline_mode<synchronous>, transform_indices = @transform_2, window_bounds = array<i64: 1, 9>}, {transform_indices = @transform_3, window_bounds = array<i64: 16, 9>}]} {
    %c0 = arith.constant 0 : index
    %c0_0 = arith.constant 0 : index
    %0 = vector.load %arg1[%c0, %c0_0] : memref<16x480xf32, #tpu.memory_space<vmem>>, vector<16x480xf32>
    %1 = arith.truncf %0 : vector<16x480xf32> to vector<16x480xbf16>
    %c0_1 = arith.constant 0 : index
    %c0_2 = arith.constant 0 : index
    %2 = vector.load %arg2[%c0_1, %c0_2] : memref<480x9xbf16, #tpu.memory_space<vmem>>, vector<480x9xbf16>
    %cst = arith.constant dense<0.000000e+00> : vector<16x9xf32>
    %3 = tpu.matmul %1, %2, %cst {dimension_numbers = #tpu.dot_dimension_numbers<[1], [0], [0], [1], [0, 0, 1, 1], [], []>} : vector<16x480xbf16>, vector<480x9xbf16>, vector<16x9xf32> -> vector<16x9xf32>
    %c0_3 = arith.constant 0 : index
    %c0_4 = arith.constant 0 : index
    %4 = vector.load %arg3[%c0_3, %c0_4] : memref<1x9xf32, #tpu.memory_space<vmem>>, vector<1x9xf32>
    %5 = vector.broadcast %4 : vector<1x9xf32> to vector<16x9xf32>
    %6 = arith.addf %3, %5 : vector<16x9xf32>
    %cst_5 = arith.constant dense<0xFF800000> : vector<16xf32>
    %7 = vector.multi_reduction <maximumf>, %6, %cst_5 [1] : vector<16x9xf32> to vector<16xf32>
    %8 = vector.shape_cast %7 : vector<16xf32> to vector<16x1xf32>
    %9 = vector.broadcast %8 : vector<16x1xf32> to vector<16x9xf32>
    %10 = arith.subf %6, %9 : vector<16x9xf32>
    %11 = math.exp %10 : vector<16x9xf32>
    %12 = vector.broadcast %8 : vector<16x1xf32> to vector<16x9xf32>
    %13 = arith.subf %6, %12 : vector<16x9xf32>
    %cst_6 = arith.constant dense<0.000000e+00> : vector<16xf32>
    %14 = vector.multi_reduction <add>, %11, %cst_6 [1] : vector<16x9xf32> to vector<16xf32>
    %15 = vector.shape_cast %14 : vector<16xf32> to vector<16x1xf32>
    %16 = math.log %15 : vector<16x1xf32>
    %17 = vector.broadcast %16 : vector<16x1xf32> to vector<16x9xf32>
    %18 = arith.subf %13, %17 : vector<16x9xf32>
    %c0_7 = arith.constant 0 : index
    %c0_8 = arith.constant 0 : index
    %19 = vector.load %arg4[%c0_7, %c0_8] : memref<16x9xf32, #tpu.memory_space<vmem>>, vector<16x9xf32>
    tpu.vector_store %arg4[%c0_7, %c0_8], %18 {strides = array<i32>} : memref<16x9xf32, #tpu.memory_space<vmem>>, vector<16x9xf32>,
    return
  }
  func.func @transform_0(%arg0: i32) -> (i32, i32) {
    %c0_i32 = arith.constant 0 : i32
    %c0_i32_0 = arith.constant 0 : i32
    return %arg0, %c0_i32 : i32, i32
  }
  func.func @transform_1(%arg0: i32) -> (i32, i32) {
    %c0_i32 = arith.constant 0 : i32
    %c0_i32_0 = arith.constant 0 : i32
    %c0_i32_1 = arith.constant 0 : i32
    return %c0_i32, %c0_i32_0 : i32, i32
  }
  func.func @transform_2(%arg0: i32) -> (i32, i32) {
    %c0_i32 = arith.constant 0 : i32
    %c0_i32_0 = arith.constant 0 : i32
    %c0_i32_1 = arith.constant 0 : i32
    return %c0_i32, %c0_i32_0 : i32, i32
  }
  func.func @transform_3(%arg0: i32) -> (i32, i32) {
    %c0_i32 = arith.constant 0 : i32
    %c0_i32_0 = arith.constant 0 : i32
    return %arg0, %c0_i32 : i32, i32
  }
}

module attributes {stable_mosaic.version = 11 : i64} {
  func.func @_crf_forward_kernel(%arg0: i32, %arg1: memref<8x2x9xf32, #tpu.memory_space<vmem>>, %arg2: memref<8x2x1xf32, #tpu.memory_space<vmem>>, %arg3: memref<9x9xf32, #tpu.memory_space<vmem>>, %arg4: memref<1x9xf32, #tpu.memory_space<vmem>>, %arg5: memref<1x9xf32, #tpu.memory_space<vmem>>, %arg6: memref<2x9xf32, #tpu.memory_space<vmem>>) attributes {dimension_semantics = [#tpu.dimension_semantics<arbitrary>], iteration_bounds = array<i64: 1>, scalar_prefetch = 0 : i64, scratch_operands = 0 : i64, tpu.core_type = #tpu.core_type<tc>, window_params = [{pipeline_mode = #tpu.pipeline_mode<synchronous>, transform_indices = @transform_0, window_bounds = array<i64: 8, 2, 9>}, {pipeline_mode = #tpu.pipeline_mode<synchronous>, transform_indices = @transform_1, window_bounds = array<i64: 8, 2, 1>}, {pipeline_mode = #tpu.pipeline_mode<synchronous>, transform_indices = @transform_2, window_bounds = array<i64: 9, 9>}, {pipeline_mode = #tpu.pipeline_mode<synchronous>, transform_indices = @transform_3, window_bounds = array<i64: 1, 9>}, {pipeline_mode = #tpu.pipeline_mode<synchronous>, transform_indices = @transform_4, window_bounds = array<i64: 1, 9>}, {pipeline_mode = #tpu.pipeline_mode<synchronous>, transform_indices = @transform_5, window_bounds = array<i64: 2, 9>}]} {
    %c0 = arith.constant 0 : index
    %c0_0 = arith.constant 0 : index
    %0 = vector.load %arg3[%c0, %c0_0] : memref<9x9xf32, #tpu.memory_space<vmem>>, vector<9x9xf32>
    %cst = arith.constant dense<0xFF800000> : vector<9xf32>
    %1 = vector.multi_reduction <maximumf>, %0, %cst [0] : vector<9x9xf32> to vector<9xf32>
    %2 = vector.shape_cast %1 : vector<9xf32> to vector<1x9xf32>
    %3 = vector.broadcast %2 : vector<1x9xf32> to vector<9x9xf32>
    %4 = arith.subf %0, %3 : vector<9x9xf32>
    %5 = math.exp %4 : vector<9x9xf32>
    %c0_1 = arith.constant 0 : index
    %c0_2 = arith.constant 0 : index
    %c0_3 = arith.constant 0 : index
    %6 = vector.load %arg1[%c0_1, %c0_2, %c0_3] : memref<8x2x9xf32, #tpu.memory_space<vmem>>, vector<1x2x9xf32>
    %7 = vector.shape_cast %6 : vector<1x2x9xf32> to vector<2x9xf32>
    %c0_4 = arith.constant 0 : index
    %c0_5 = arith.constant 0 : index
    %8 = vector.load %arg4[%c0_4, %c0_5] : memref<1x9xf32, #tpu.memory_space<vmem>>, vector<1x9xf32>
    %9 = vector.broadcast %8 : vector<1x9xf32> to vector<2x9xf32>
    %10 = arith.addf %7, %9 : vector<2x9xf32>
    %c1_i32 = arith.constant 1 : i32
    %11 = arith.index_cast %c1_i32 : i32 to index
    %c0_6 = arith.constant 0 : index
    %c0_7 = arith.constant 0 : index
    %12 = vector.load %arg1[%11, %c0_6, %c0_7] : memref<8x2x9xf32, #tpu.memory_space<vmem>>, vector<1x2x9xf32>
    %13 = vector.shape_cast %12 : vector<1x2x9xf32> to vector<2x9xf32>
    %14 = arith.index_cast %c1_i32 : i32 to index
    %c0_8 = arith.constant 0 : index
    %c0_9 = arith.constant 0 : index
    %15 = vector.load %arg2[%14, %c0_8, %c0_9] : memref<8x2x1xf32, #tpu.memory_space<vmem>>, vector<1x2x1xf32>
    %16 = vector.shape_cast %15 : vector<1x2x1xf32> to vector<2x1xf32>
    %cst_10 = arith.constant dense<0xFF800000> : vector<2xf32>
    %17 = vector.multi_reduction <maximumf>, %10, %cst_10 [1] : vector<2x9xf32> to vector<2xf32>
    %18 = vector.shape_cast %17 : vector<2xf32> to vector<2x1xf32>
    %19 = vector.broadcast %18 : vector<2x1xf32> to vector<2x9xf32>
    %20 = arith.subf %10, %19 : vector<2x9xf32>
    %21 = math.exp %20 : vector<2x9xf32>
    %cst_11 = arith.constant dense<0.000000e+00> : vector<2x9xf32>
    %22 = tpu.matmul %21, %5, %cst_11 {dimension_numbers = #tpu.dot_dimension_numbers<[1], [0], [0], [1], [0, 0, 1, 1], [], []>} : vector<2x9xf32>, vector<9x9xf32>, vector<2x9xf32> -> vector<2x9xf32>
    %23 = math.log %22 : vector<2x9xf32>
    %24 = vector.broadcast %18 : vector<2x1xf32> to vector<2x9xf32>
    %25 = arith.addf %23, %24 : vector<2x9xf32>
    %26 = vector.broadcast %2 : vector<1x9xf32> to vector<2x9xf32>
    %27 = arith.addf %25, %26 : vector<2x9xf32>
    %28 = arith.addf %27, %13 : vector<2x9xf32>
    %cst_12 = arith.constant 5.000000e-01 : f32
    %29 = vector.broadcast %cst_12 : f32 to vector<2x1xf32>
    %30 = arith.cmpf ogt, %16, %29 : vector<2x1xf32>
    %31 = vector.shape_cast %30 : vector<2x1xi1> to vector<2x1xi1>
    %32 = vector.broadcast %31 : vector<2x1xi1> to vector<2x9xi1>
    %33 = arith.select %32, %28, %10 : vector<2x9xi1>, vector<2x9xf32>
    %c2_i32 = arith.constant 2 : i32
    %34 = arith.index_cast %c2_i32 : i32 to index
    %c0_13 = arith.constant 0 : index
    %c0_14 = arith.constant 0 : index
    %35 = vector.load %arg1[%34, %c0_13, %c0_14] : memref<8x2x9xf32, #tpu.memory_space<vmem>>, vector<1x2x9xf32>
    %36 = vector.shape_cast %35 : vector<1x2x9xf32> to vector<2x9xf32>
    %37 = arith.index_cast %c2_i32 : i32 to index
    %c0_15 = arith.constant 0 : index
    %c0_16 = arith.constant 0 : index
    %38 = vector.load %arg2[%37, %c0_15, %c0_16] : memref<8x2x1xf32, #tpu.memory_space<vmem>>, vector<1x2x1xf32>
    %39 = vector.shape_cast %38 : vector<1x2x1xf32> to vector<2x1xf32>
    %cst_17 = arith.constant dense<0xFF800000> : vector<2xf32>
    %40 = vector.multi_reduction <maximumf>, %33, %cst_17 [1] : vector<2x9xf32> to vector<2xf32>
    %41 = vector.shape_cast %40 : vector<2xf32> to vector<2x1xf32>
    %42 = vector.broadcast %41 : vector<2x1xf32> to vector<2x9xf32>
    %43 = arith.subf %33, %42 : vector<2x9xf32>
    %44 = math.exp %43 : vector<2x9xf32>
    %cst_18 = arith.constant dense<0.000000e+00> : vector<2x9xf32>
    %45 = tpu.matmul %44, %5, %cst_18 {dimension_numbers = #tpu.dot_dimension_numbers<[1], [0], [0], [1], [0, 0, 1, 1], [], []>} : vector<2x9xf32>, vector<9x9xf32>, vector<2x9xf32> -> vector<2x9xf32>
    %46 = math.log %45 : vector<2x9xf32>
    %47 = vector.broadcast %41 : vector<2x1xf32> to vector<2x9xf32>
    %48 = arith.addf %46, %47 : vector<2x9xf32>
    %49 = vector.broadcast %2 : vector<1x9xf32> to vector<2x9xf32>
    %50 = arith.addf %48, %49 : vector<2x9xf32>
    %51 = arith.addf %50, %36 : vector<2x9xf32>
    %cst_19 = arith.constant 5.000000e-01 : f32
    %52 = vector.broadcast %cst_19 : f32 to vector<2x1xf32>
    %53 = arith.cmpf ogt, %39, %52 : vector<2x1xf32>
    %54 = vector.shape_cast %53 : vector<2x1xi1> to vector<2x1xi1>
    %55 = vector.broadcast %54 : vector<2x1xi1> to vector<2x9xi1>
    %56 = arith.select %55, %51, %33 : vector<2x9xi1>, vector<2x9xf32>
    %c3_i32 = arith.constant 3 : i32
    %57 = arith.index_cast %c3_i32 : i32 to index
    %c0_20 = arith.constant 0 : index
    %c0_21 = arith.constant 0 : index
    %58 = vector.load %arg1[%57, %c0_20, %c0_21] : memref<8x2x9xf32, #tpu.memory_space<vmem>>, vector<1x2x9xf32>
    %59 = vector.shape_cast %58 : vector<1x2x9xf32> to vector<2x9xf32>
    %60 = arith.index_cast %c3_i32 : i32 to index
    %c0_22 = arith.constant 0 : index
    %c0_23 = arith.constant 0 : index
    %61 = vector.load %arg2[%60, %c0_22, %c0_23] : memref<8x2x1xf32, #tpu.memory_space<vmem>>, vector<1x2x1xf32>
    %62 = vector.shape_cast %61 : vector<1x2x1xf32> to vector<2x1xf32>
    %cst_24 = arith.constant dense<0xFF800000> : vector<2xf32>
    %63 = vector.multi_reduction <maximumf>, %56, %cst_24 [1] : vector<2x9xf32> to vector<2xf32>
    %64 = vector.shape_cast %63 : vector<2xf32> to vector<2x1xf32>
    %65 = vector.broadcast %64 : vector<2x1xf32> to vector<2x9xf32>
    %66 = arith.subf %56, %65 : vector<2x9xf32>
    %67 = math.exp %66 : vector<2x9xf32>
    %cst_25 = arith.constant dense<0.000000e+00> : vector<2x9xf32>
    %68 = tpu.matmul %67, %5, %cst_25 {dimension_numbers = #tpu.dot_dimension_numbers<[1], [0], [0], [1], [0, 0, 1, 1], [], []>} : vector<2x9xf32>, vector<9x9xf32>, vector<2x9xf32> -> vector<2x9xf32>
    %69 = math.log %68 : vector<2x9xf32>
    %70 = vector.broadcast %64 : vector<2x1xf32> to vector<2x9xf32>
    %71 = arith.addf %69, %70 : vector<2x9xf32>
    %72 = vector.broadcast %2 : vector<1x9xf32> to vector<2x9xf32>
    %73 = arith.addf %71, %72 : vector<2x9xf32>
    %74 = arith.addf %73, %59 : vector<2x9xf32>
    %cst_26 = arith.constant 5.000000e-01 : f32
    %75 = vector.broadcast %cst_26 : f32 to vector<2x1xf32>
    %76 = arith.cmpf ogt, %62, %75 : vector<2x1xf32>
    %77 = vector.shape_cast %76 : vector<2x1xi1> to vector<2x1xi1>
    %78 = vector.broadcast %77 : vector<2x1xi1> to vector<2x9xi1>
    %79 = arith.select %78, %74, %56 : vector<2x9xi1>, vector<2x9xf32>
    %c4_i32 = arith.constant 4 : i32
    %80 = arith.index_cast %c4_i32 : i32 to index
    %c0_27 = arith.constant 0 : index
    %c0_28 = arith.constant 0 : index
    %81 = vector.load %arg1[%80, %c0_27, %c0_28] : memref<8x2x9xf32, #tpu.memory_space<vmem>>, vector<1x2x9xf32>
    %82 = vector.shape_cast %81 : vector<1x2x9xf32> to vector<2x9xf32>
    %83 = arith.index_cast %c4_i32 : i32 to index
    %c0_29 = arith.constant 0 : index
    %c0_30 = arith.constant 0 : index
    %84 = vector.load %arg2[%83, %c0_29, %c0_30] : memref<8x2x1xf32, #tpu.memory_space<vmem>>, vector<1x2x1xf32>
    %85 = vector.shape_cast %84 : vector<1x2x1xf32> to vector<2x1xf32>
    %cst_31 = arith.constant dense<0xFF800000> : vector<2xf32>
    %86 = vector.multi_reduction <maximumf>, %79, %cst_31 [1] : vector<2x9xf32> to vector<2xf32>
    %87 = vector.shape_cast %86 : vector<2xf32> to vector<2x1xf32>
    %88 = vector.broadcast %87 : vector<2x1xf32> to vector<2x9xf32>
    %89 = arith.subf %79, %88 : vector<2x9xf32>
    %90 = math.exp %89 : vector<2x9xf32>
    %cst_32 = arith.constant dense<0.000000e+00> : vector<2x9xf32>
    %91 = tpu.matmul %90, %5, %cst_32 {dimension_numbers = #tpu.dot_dimension_numbers<[1], [0], [0], [1], [0, 0, 1, 1], [], []>} : vector<2x9xf32>, vector<9x9xf32>, vector<2x9xf32> -> vector<2x9xf32>
    %92 = math.log %91 : vector<2x9xf32>
    %93 = vector.broadcast %87 : vector<2x1xf32> to vector<2x9xf32>
    %94 = arith.addf %92, %93 : vector<2x9xf32>
    %95 = vector.broadcast %2 : vector<1x9xf32> to vector<2x9xf32>
    %96 = arith.addf %94, %95 : vector<2x9xf32>
    %97 = arith.addf %96, %82 : vector<2x9xf32>
    %cst_33 = arith.constant 5.000000e-01 : f32
    %98 = vector.broadcast %cst_33 : f32 to vector<2x1xf32>
    %99 = arith.cmpf ogt, %85, %98 : vector<2x1xf32>
    %100 = vector.shape_cast %99 : vector<2x1xi1> to vector<2x1xi1>
    %101 = vector.broadcast %100 : vector<2x1xi1> to vector<2x9xi1>
    %102 = arith.select %101, %97, %79 : vector<2x9xi1>, vector<2x9xf32>
    %c5_i32 = arith.constant 5 : i32
    %103 = arith.index_cast %c5_i32 : i32 to index
    %c0_34 = arith.constant 0 : index
    %c0_35 = arith.constant 0 : index
    %104 = vector.load %arg1[%103, %c0_34, %c0_35] : memref<8x2x9xf32, #tpu.memory_space<vmem>>, vector<1x2x9xf32>
    %105 = vector.shape_cast %104 : vector<1x2x9xf32> to vector<2x9xf32>
    %106 = arith.index_cast %c5_i32 : i32 to index
    %c0_36 = arith.constant 0 : index
    %c0_37 = arith.constant 0 : index
    %107 = vector.load %arg2[%106, %c0_36, %c0_37] : memref<8x2x1xf32, #tpu.memory_space<vmem>>, vector<1x2x1xf32>
    %108 = vector.shape_cast %107 : vector<1x2x1xf32> to vector<2x1xf32>
    %cst_38 = arith.constant dense<0xFF800000> : vector<2xf32>
    %109 = vector.multi_reduction <maximumf>, %102, %cst_38 [1] : vector<2x9xf32> to vector<2xf32>
    %110 = vector.shape_cast %109 : vector<2xf32> to vector<2x1xf32>
    %111 = vector.broadcast %110 : vector<2x1xf32> to vector<2x9xf32>
    %112 = arith.subf %102, %111 : vector<2x9xf32>
    %113 = math.exp %112 : vector<2x9xf32>
    %cst_39 = arith.constant dense<0.000000e+00> : vector<2x9xf32>
    %114 = tpu.matmul %113, %5, %cst_39 {dimension_numbers = #tpu.dot_dimension_numbers<[1], [0], [0], [1], [0, 0, 1, 1], [], []>} : vector<2x9xf32>, vector<9x9xf32>, vector<2x9xf32> -> vector<2x9xf32>
    %115 = math.log %114 : vector<2x9xf32>
    %116 = vector.broadcast %110 : vector<2x1xf32> to vector<2x9xf32>
    %117 = arith.addf %115, %116 : vector<2x9xf32>
    %118 = vector.broadcast %2 : vector<1x9xf32> to vector<2x9xf32>
    %119 = arith.addf %117, %118 : vector<2x9xf32>
    %120 = arith.addf %119, %105 : vector<2x9xf32>
    %cst_40 = arith.constant 5.000000e-01 : f32
    %121 = vector.broadcast %cst_40 : f32 to vector<2x1xf32>
    %122 = arith.cmpf ogt, %108, %121 : vector<2x1xf32>
    %123 = vector.shape_cast %122 : vector<2x1xi1> to vector<2x1xi1>
    %124 = vector.broadcast %123 : vector<2x1xi1> to vector<2x9xi1>
    %125 = arith.select %124, %120, %102 : vector<2x9xi1>, vector<2x9xf32>
    %c6_i32 = arith.constant 6 : i32
    %126 = arith.index_cast %c6_i32 : i32 to index
    %c0_41 = arith.constant 0 : index
    %c0_42 = arith.constant 0 : index
    %127 = vector.load %arg1[%126, %c0_41, %c0_42] : memref<8x2x9xf32, #tpu.memory_space<vmem>>, vector<1x2x9xf32>
    %128 = vector.shape_cast %127 : vector<1x2x9xf32> to vector<2x9xf32>
    %129 = arith.index_cast %c6_i32 : i32 to index
    %c0_43 = arith.constant 0 : index
    %c0_44 = arith.constant 0 : index
    %130 = vector.load %arg2[%129, %c0_43, %c0_44] : memref<8x2x1xf32, #tpu.memory_space<vmem>>, vector<1x2x1xf32>
    %131 = vector.shape_cast %130 : vector<1x2x1xf32> to vector<2x1xf32>
    %cst_45 = arith.constant dense<0xFF800000> : vector<2xf32>
    %132 = vector.multi_reduction <maximumf>, %125, %cst_45 [1] : vector<2x9xf32> to vector<2xf32>
    %133 = vector.shape_cast %132 : vector<2xf32> to vector<2x1xf32>
    %134 = vector.broadcast %133 : vector<2x1xf32> to vector<2x9xf32>
    %135 = arith.subf %125, %134 : vector<2x9xf32>
    %136 = math.exp %135 : vector<2x9xf32>
    %cst_46 = arith.constant dense<0.000000e+00> : vector<2x9xf32>
    %137 = tpu.matmul %136, %5, %cst_46 {dimension_numbers = #tpu.dot_dimension_numbers<[1], [0], [0], [1], [0, 0, 1, 1], [], []>} : vector<2x9xf32>, vector<9x9xf32>, vector<2x9xf32> -> vector<2x9xf32>
    %138 = math.log %137 : vector<2x9xf32>
    %139 = vector.broadcast %133 : vector<2x1xf32> to vector<2x9xf32>
    %140 = arith.addf %138, %139 : vector<2x9xf32>
    %141 = vector.broadcast %2 : vector<1x9xf32> to vector<2x9xf32>
    %142 = arith.addf %140, %141 : vector<2x9xf32>
    %143 = arith.addf %142, %128 : vector<2x9xf32>
    %cst_47 = arith.constant 5.000000e-01 : f32
    %144 = vector.broadcast %cst_47 : f32 to vector<2x1xf32>
    %145 = arith.cmpf ogt, %131, %144 : vector<2x1xf32>
    %146 = vector.shape_cast %145 : vector<2x1xi1> to vector<2x1xi1>
    %147 = vector.broadcast %146 : vector<2x1xi1> to vector<2x9xi1>
    %148 = arith.select %147, %143, %125 : vector<2x9xi1>, vector<2x9xf32>
    %c7_i32 = arith.constant 7 : i32
    %149 = arith.index_cast %c7_i32 : i32 to index
    %c0_48 = arith.constant 0 : index
    %c0_49 = arith.constant 0 : index
    %150 = vector.load %arg1[%149, %c0_48, %c0_49] : memref<8x2x9xf32, #tpu.memory_space<vmem>>, vector<1x2x9xf32>
    %151 = vector.shape_cast %150 : vector<1x2x9xf32> to vector<2x9xf32>
    %152 = arith.index_cast %c7_i32 : i32 to index
    %c0_50 = arith.constant 0 : index
    %c0_51 = arith.constant 0 : index
    %153 = vector.load %arg2[%152, %c0_50, %c0_51] : memref<8x2x1xf32, #tpu.memory_space<vmem>>, vector<1x2x1xf32>
    %154 = vector.shape_cast %153 : vector<1x2x1xf32> to vector<2x1xf32>
    %cst_52 = arith.constant dense<0xFF800000> : vector<2xf32>
    %155 = vector.multi_reduction <maximumf>, %148, %cst_52 [1] : vector<2x9xf32> to vector<2xf32>
    %156 = vector.shape_cast %155 : vector<2xf32> to vector<2x1xf32>
    %157 = vector.broadcast %156 : vector<2x1xf32> to vector<2x9xf32>
    %158 = arith.subf %148, %157 : vector<2x9xf32>
    %159 = math.exp %158 : vector<2x9xf32>
    %cst_53 = arith.constant dense<0.000000e+00> : vector<2x9xf32>
    %160 = tpu.matmul %159, %5, %cst_53 {dimension_numbers = #tpu.dot_dimension_numbers<[1], [0], [0], [1], [0, 0, 1, 1], [], []>} : vector<2x9xf32>, vector<9x9xf32>, vector<2x9xf32> -> vector<2x9xf32>
    %161 = math.log %160 : vector<2x9xf32>
    %162 = vector.broadcast %156 : vector<2x1xf32> to vector<2x9xf32>
    %163 = arith.addf %161, %162 : vector<2x9xf32>
    %164 = vector.broadcast %2 : vector<1x9xf32> to vector<2x9xf32>
    %165 = arith.addf %163, %164 : vector<2x9xf32>
    %166 = arith.addf %165, %151 : vector<2x9xf32>
    %cst_54 = arith.constant 5.000000e-01 : f32
    %167 = vector.broadcast %cst_54 : f32 to vector<2x1xf32>
    %168 = arith.cmpf ogt, %154, %167 : vector<2x1xf32>
    %169 = vector.shape_cast %168 : vector<2x1xi1> to vector<2x1xi1>
    %170 = vector.broadcast %169 : vector<2x1xi1> to vector<2x9xi1>
    %171 = arith.select %170, %166, %148 : vector<2x9xi1>, vector<2x9xf32>
    %c7_i32_55 = arith.constant 7 : i32
    %c0_56 = arith.constant 0 : index
    %c0_57 = arith.constant 0 : index
    %172 = vector.load %arg5[%c0_56, %c0_57] : memref<1x9xf32, #tpu.memory_space<vmem>>, vector<1x9xf32>
    %173 = vector.broadcast %172 : vector<1x9xf32> to vector<2x9xf32>
    %174 = arith.addf %171, %173 : vector<2x9xf32>
    %c0_58 = arith.constant 0 : index
    %c0_59 = arith.constant 0 : index
    %175 = vector.load %arg6[%c0_58, %c0_59] : memref<2x9xf32, #tpu.memory_space<vmem>>, vector<2x9xf32>
    tpu.vector_store %arg6[%c0_58, %c0_59], %174 {strides = array<i32>} : memref<2x9xf32, #tpu.memory_space<vmem>>, vector<2x9xf32>,
    return
  }
  func.func @transform_0(%arg0: i32) -> (i32, i32, i32) {
    %c0_i32 = arith.constant 0 : i32
    %c0_i32_0 = arith.constant 0 : i32
    %c0_i32_1 = arith.constant 0 : i32
    %c0_i32_2 = arith.constant 0 : i32
    return %c0_i32, %c0_i32_0, %c0_i32_1 : i32, i32, i32
  }
  func.func @transform_1(%arg0: i32) -> (i32, i32, i32) {
    %c0_i32 = arith.constant 0 : i32
    %c0_i32_0 = arith.constant 0 : i32
    %c0_i32_1 = arith.constant 0 : i32
    %c0_i32_2 = arith.constant 0 : i32
    return %c0_i32, %c0_i32_0, %c0_i32_1 : i32, i32, i32
  }
  func.func @transform_2(%arg0: i32) -> (i32, i32) {
    %c0_i32 = arith.constant 0 : i32
    %c0_i32_0 = arith.constant 0 : i32
    %c0_i32_1 = arith.constant 0 : i32
    return %c0_i32, %c0_i32_0 : i32, i32
  }
  func.func @transform_3(%arg0: i32) -> (i32, i32) {
    %c0_i32 = arith.constant 0 : i32
    %c0_i32_0 = arith.constant 0 : i32
    %c0_i32_1 = arith.constant 0 : i32
    return %c0_i32, %c0_i32_0 : i32, i32
  }
  func.func @transform_4(%arg0: i32) -> (i32, i32) {
    %c0_i32 = arith.constant 0 : i32
    %c0_i32_0 = arith.constant 0 : i32
    %c0_i32_1 = arith.constant 0 : i32
    return %c0_i32, %c0_i32_0 : i32, i32
  }
  func.func @transform_5(%arg0: i32) -> (i32, i32) {
    %c0_i32 = arith.constant 0 : i32
    %c0_i32_0 = arith.constant 0 : i32
    %c0_i32_1 = arith.constant 0 : i32
    return %c0_i32, %c0_i32_0 : i32, i32
  }
}

</mosaic_0001>

<bundles_post_ra>
// kernel: tener_forward.7
= control target key start
LH: loop header
LB: loop body
LE: loop exit
PB: predicated region body
PF: predicated region fallthrough
CT: control target
= control target key end

     0   :  { %vm80_vm0 = vcmask 1043456   ;;  %v215_v2 = vmov 0   ;;  %vm76_vm1 = vcmask 195584   ;;  %v26_v16 = vlaneseq  ;;  %s289_s1 = inlined_call_operand.vmem [shape: bf16[24,480], index: 1, kind: input, shape index: {}]   ;;  %s290_s0 = inlined_call_operand.vmem [shape: f32[16,24], index: 0, kind: input, shape index: {}]   ;;  %s291_s2 = inlined_call_operand.vmem [shape: f32[1,480], index: 2, kind: input, shape index: {}]   ;;  %s292_s3 = inlined_call_operand.vmem [shape: f32[16,480], index: 3, kind: output, shape index: {}]  }
   0x1   :  { %v22_v0 = vld [vmem:[%s289_s1 + $0x20] sm:$0xff]  ;;  %v23_v1 = vld [vmem:[%s289_s1 + $0x28] sm:$0xff]  ;;  %125 = vmatprep.mubr.bf16.mxu0 %v215_v2  ;;  %168 = vmatprep.mubr.bf16.mxu1 %v215_v2  ;;  %vm182_vm2 = vcmask 785408  }
   0x2   :  { %v197_v3 = vcombine.high %v22_v0, %v22_v0  ;;  %v199_v4 = vcombine.high %v23_v1, %v23_v1  ;;  %v196_v5 = vcombine.low %v22_v0, %v22_v0  ;;  %v198_v6 = vcombine.low %v23_v1, %v23_v1  ;;  %v209_v7 = vld [vmem:[%s289_s1 + $0x4] ss:$16 sps:$4 sm:$0xff]   ;;  %v211_v8 = vld [vmem:[%s289_s1 + $0xc] ss:$16 sps:$4 sm:$0xff]   ;;  %v213_v11 = vld [vmem:[%s289_s1] ss:$16 sps:$4 sm:$0xff]  }
   0x3   :  { %v214_v12 = vld [vmem:[%s289_s1 + $0x8] ss:$16 sps:$4 sm:$0xff]   ;;  %v15_v13 = vld [vmem:[%s290_s0] sm:$0xff]  ;;  %v27_v17 = vshrl.u32 %v26_v16, 7 }
   0x4   :  { %200 = vmatprep.subr.msk.bf16.mxu0 %vm80_vm0, %v197_v3  ;;  %202 = vmatprep.subr.msk.bf16.mxu1 %vm80_vm0, %v199_v4  ;;  %v82_v9 = vsel %vm80_vm0, %v196_v5, 0  ;;  %v88_v10 = vsel %vm80_vm0, %v198_v6, 0  ;;  %v16_v14 = vld [vmem:[%s290_s0 + $0x8] sm:$0xff]  ;;  %v24_v20 = vld [vmem:[%s291_s2] sm:$0xf] }
   0x5   :  { %106 = vmatpush1.bf16.msra.mxu0 %v82_v9  ;;  %149 = vmatpush1.bf16.msra.mxu1 %v88_v10  ;;  %v17_v15 = vpack.c.bf16 %v16_v14, %v15_v13  ;;  %v28_v18 = vsub.s32 0, %v27_v17  ;;  %v36_v19 = vsub.s32 2, %v27_v17  ;;  %v32_v21 = vsub.s32 1, %v27_v17 }
   0x6   :  { %107 = vmatprep.subr.bf16.mxu0 %v209_v7  ;;  %150 = vmatprep.subr.bf16.mxu1 %v211_v8  ;;  %v40_v22 = vsub.s32 3, %v27_v17 }
   0x7   :  { %v29_v23 = vrot.slane %v24_v20, %v28_v18  ;;  %v37_v24 = vrot.slane %v24_v20, %v36_v19  ;;  %v33_v25 = vrot.slane %v24_v20, %v32_v21 }
   0x8   :  { %v41_v26 = vrot.slane %v24_v20, %v40_v22 }
   0x9   :  { %108 = vmatpush1.bf16.msra.mxu0 %v213_v11  ;;  %151 = vmatpush1.bf16.msra.mxu1 %v214_v12 }
   0xc   :  { %201 = vmatmul.mubr.msk.bf16.vlgmr.msra.gmra.mxu0 %vm76_vm1, %v17_v15  ;;  %203 = vmatmul.mubr.msk.bf16.vlgmr.msra.gmra.mxu1 %vm76_vm1, %v17_v15 }
  0xcc   :  { %v127_v27 = vpop.f32.mrf.mxu0  ;;  %v170_v28 = vpop.f32.mrf.mxu1 }
  0xcd   :  { %v128_v29 = vadd.f32 %v127_v27, %v29_v23  ;;  %v171_v30 = vadd.f32 %v170_v28, %v37_v24 }
  0xce   :  { %v129_v31 = vpop.f32.mrf.mxu0  ;;  %v172_v32 = vpop.f32.mrf.mxu1 }
  0xcf   :  { %179 = vst [vmem:[%s292_s3] sm:$0xff] %v128_v29  ;;  %181 = vst [vmem:[%s292_s3 + $0x10] sm:$0xff] %v171_v30  ;;  %v130_v33 = vadd.f32 %v129_v31, %v33_v25  ;;  %v173_v34 = vadd.f32 %v172_v32, %v41_v26 }
  0xd0   :  { %v131_v35 = vpop.f32.mrf.mxu0  ;;  %v174_v36 = vpop.f32.mrf.mxu1 }
  0xd1   :  { %180 = vst [vmem:[%s292_s3 + $0x8] sm:$0xff] %v130_v33  ;;  %183 = vst.msk [vmem:[%s292_s3 + $0x18] sm:$0xff] %vm182_vm2, %v173_v34  ;;  %v132_v37 = vadd.f32 %v131_v35, %v29_v23  ;;  %v175_v38 = vadd.f32 %v174_v36, %v37_v24 }
  0xd2   :  { %v133_v39 = vpop.f32.mrf.mxu0  ;;  %v176_v40 = vpop.f32.mrf.mxu1 }
  0xd3   :  { %184 = vst [vmem:[%s292_s3 + $0x20] sm:$0xff] %v132_v37  ;;  %186 = vst [vmem:[%s292_s3 + $0x30] sm:$0xff] %v175_v38  ;;  %v134_v41 = vadd.f32 %v133_v39, %v33_v25  ;;  %v177_v42 = vadd.f32 %v176_v40, %v41_v26 }
  0xd5   :  { %185 = vst [vmem:[%s292_s3 + $0x28] sm:$0xff] %v134_v41  ;;  %187 = vst.msk [vmem:[%s292_s3 + $0x38] sm:$0xff] %vm182_vm2, %v177_v42 }

// kernel: tener_forward.12
= control target key start
LH: loop header
LB: loop body
LE: loop exit
PB: predicated region body
PF: predicated region fallthrough
CT: control target
= control target key end

     0   :  { %v484_v0 = vmov 0   ;;  %vm274_vm0 = vcmask 785408   ;;  %vm360_vm1 = vcmask 72704   ;;  %s648_s1 = inlined_call_operand.vmem [shape: bf16[480,9], index: 1, kind: input, shape index: {}]   ;;  %s649_s0 = inlined_call_operand.vmem [shape: f32[16,480], index: 0, kind: input, shape index: {}]   ;;  %s650_s2 = inlined_call_operand.vmem [shape: f32[1,9], index: 2, kind: input, shape index: {}]   ;;  %s651_s3 = inlined_call_operand.vmem [shape: f32[16,9], index: 3, kind: output, shape index: {}]  }
   0x1   :  { %319 = vmatprep.subr.bf16.mxu1 %v484_v0  ;;  %v446_v1 = vld [vmem:[%s648_s1 + $0xb8] sm:$0xff]   ;;  %v447_v2 = vld [vmem:[%s648_s1 + $0xb0] sm:$0xff]   ;;  %v448_v5 = vld [vmem:[%s648_s1 + $0xa8] sm:$0xff]  }
   0x2   :  { %320 = vmatpush1.bf16.msra.mxu1 %v446_v1  ;;  %v449_v3 = vld [vmem:[%s648_s1 + $0x78] sm:$0xff]   ;;  %v452_v6 = vld [vmem:[%s648_s1 + $0x70] sm:$0xff]   ;;  %v451_v8 = vld [vmem:[%s648_s1 + $0xa0] sm:$0xff]  }
   0x3   :  { %321 = vmatprep.subr.bf16.mxu1 %v484_v0  ;;  %v450_v4 = vld [vmem:[%s648_s1 + $0x38] sm:$0xff]   ;;  %423 = vmatprep.subr.bf16.mxu0 %v449_v3  ;;  %v453_v7 = vld [vmem:[%s648_s1 + $0x30] sm:$0xff]   ;;  %v455_v9 = vld [vmem:[%s648_s1 + $0x68] sm:$0xff]  }
   0x4   :  { %424 = vmatpush3.bf16.msra.mxu0 %v450_v4  ;;  %v456_v10 = vld [vmem:[%s648_s1 + $0x28] sm:$0xff]   ;;  %v458_v11 = vld [vmem:[%s648_s1 + $0x60] sm:$0xff]   ;;  %v454_v12 = vld [vmem:[%s648_s1 + $0x98] sm:$0xff]  }
   0x5   :  { %425 = vmatprep.subr.bf16.mxu0 %v452_v6  ;;  %v459_v13 = vld [vmem:[%s648_s1 + $0x20] sm:$0xff]   ;;  %v461_v14 = vld [vmem:[%s648_s1 + $0x58] sm:$0xff]   ;;  %v457_v15 = vld [vmem:[%s648_s1 + $0x90] sm:$0xff]  }
   0x6   :  { %322 = vmatpush1.bf16.msra.mxu1 %v447_v2  ;;  %v462_v16 = vld [vmem:[%s648_s1 + $0x18] sm:$0xff]   ;;  %v464_v17 = vld [vmem:[%s648_s1 + $0x50] sm:$0xff]   ;;  %v460_v18 = vld [vmem:[%s648_s1 + $0x88] sm:$0xff]  }
   0x7   :  { %323 = vmatprep.subr.bf16.mxu1 %v484_v0  ;;  %v465_v19 = vld [vmem:[%s648_s1 + $0x10] sm:$0xff]   ;;  %v467_v20 = vld [vmem:[%s648_s1 + $0x48] sm:$0xff]   ;;  %v463_v21 = vld [vmem:[%s648_s1 + $0x80] sm:$0xff]  }
   0x8   :  { %426 = vmatpush3.bf16.msra.mxu0 %v453_v7  ;;  %v468_v22 = vld [vmem:[%s648_s1 + $0x8] sm:$0xff]   ;;  %v470_v23 = vld [vmem:[%s648_s1 + $0x40] sm:$0xff]   ;;  %v18_v31 = vld [vmem:[%s649_s0 + $0x18] sm:$0xff] }
   0x9   :  { %427 = vmatprep.subr.bf16.mxu0 %v455_v9  ;;  %v16_v24 = vld [vmem:[%s649_s0 + $0x8] sm:$0xff]  ;;  %v471_v27 = vld [vmem:[%s648_s1] sm:$0xff]   ;;  %v22_v32 = vld [vmem:[%s649_s0 + $0x38] sm:$0xff] }
   0xa   :  { %324 = vmatpush1.bf16.msra.mxu1 %v448_v5  ;;  %v20_v25 = vld [vmem:[%s649_s0 + $0x28] sm:$0xff]  ;;  %v15_v29 = vld [vmem:[%s649_s0] sm:$0xff]  ;;  %v26_v33 = vpack.c.bf16 %v22_v32, %v18_v31  ;;  %v472_v36 = vld [vmem:[%s648_s1 + $0xd8] sm:$0xff]  }
   0xb   :  { %325 = vmatprep.subr.bf16.mxu1 %v484_v0  ;;  %v466_v26 = vld [vmem:[%s648_s1 + $0xe8] sm:$0xff]   ;;  %v24_v28 = vpack.c.bf16 %v20_v25, %v16_v24  ;;  %v19_v30 = vld [vmem:[%s649_s0 + $0x20] sm:$0xff]  ;;  %v473_v37 = vld [vmem:[%s648_s1 + $0xd0] sm:$0xff]  }
   0xc   :  { %428 = vmatpush3.bf16.msra.mxu0 %v456_v10  ;;  %v23_v34 = vpack.c.bf16 %v19_v30, %v15_v29  ;;  %v469_v35 = vld [vmem:[%s648_s1 + $0xe0] sm:$0xff]   ;;  %422 = vmatprep.mubr.msk.bf16.mxu1 %vm274_vm0, %v26_v33  ;;  %v474_v38 = vld [vmem:[%s648_s1 + $0xc8] sm:$0xff]   ;;  %v17_v40 = vld [vmem:[%s649_s0 + $0x10] sm:$0xff] }
   0xd   :  { %429 = vmatprep.subr.bf16.mxu0 %v458_v11  ;;  %310 = vmatprep.mubr.bf16.mxu0 %v24_v28  ;;  %v475_v39 = vld [vmem:[%s648_s1 + $0xc0] sm:$0xff]   ;;  %v21_v41 = vld [vmem:[%s649_s0 + $0x30] sm:$0xff] }
   0xe   :  { %326 = vmatpush1.bf16.msra.mxu1 %v451_v8  ;;  %v25_v42 = vpack.c.bf16 %v21_v41, %v17_v40  ;;  %v391_v48 = vld [vmem:[%s650_s2] ss:$0 sm:$0xff] }
   0xf   :  { %327 = vmatprep.subr.bf16.mxu1 %v484_v0 }
  0x10   :  { %430 = vmatpush3.bf16.msra.mxu0 %v459_v13 }
  0x11   :  { %431 = vmatprep.subr.bf16.mxu0 %v461_v14 }
  0x12   :  { %328 = vmatpush1.bf16.msra.mxu1 %v454_v12 }
  0x13   :  { %329 = vmatprep.subr.bf16.mxu1 %v484_v0 }
  0x14   :  { %432 = vmatpush3.bf16.msra.mxu0 %v462_v16 }
  0x15   :  { %433 = vmatprep.subr.bf16.mxu0 %v464_v17 }
  0x16   :  { %330 = vmatpush1.bf16.msra.mxu1 %v457_v15 }
  0x17   :  { %331 = vmatprep.subr.bf16.mxu1 %v484_v0 }
  0x18   :  { %434 = vmatpush3.bf16.msra.mxu0 %v465_v19 }
  0x19   :  { %435 = vmatprep.subr.bf16.mxu0 %v467_v20 }
  0x1a   :  { %332 = vmatpush1.bf16.msra.mxu1 %v460_v18 }
  0x1b   :  { %333 = vmatprep.subr.bf16.mxu1 %v484_v0 }
  0x1c   :  { %436 = vmatpush3.bf16.msra.mxu0 %v468_v22 }
  0x1d   :  { %437 = vmatprep.subr.bf16.mxu0 %v470_v23 }
  0x1e   :  { %334 = vmatpush1.bf16.msra.mxu1 %v463_v21 }
  0x1f   :  { %339 = vmatprep.subr.bf16.mxu1 %v484_v0 }
  0x20   :  { %438 = vmatpush3.bf16.msra.mxu0 %v471_v27 }
  0x22   :  { %340 = vmatpush2.bf16.msra.mxu1 %v466_v26 }
  0x23   :  { %341 = vmatprep.subr.bf16.mxu1 %v484_v0  ;;  %311 = vmatmul.mubr.bf16.vlgmr.msra.gmra.mxu0 %v23_v34 }
  0x26   :  { %342 = vmatpush2.bf16.msra.mxu1 %v469_v35 }
  0x27   :  { %343 = vmatprep.subr.bf16.mxu1 %v484_v0 }
  0x2a   :  { %344 = vmatpush2.bf16.msra.mxu1 %v472_v36 }
  0x2b   :  { %345 = vmatprep.subr.bf16.mxu1 %v484_v0 }
  0x2e   :  { %346 = vmatpush2.bf16.msra.mxu1 %v473_v37 }
  0x2f   :  { %347 = vmatprep.subr.bf16.mxu1 %v484_v0 }
  0x32   :  { %348 = vmatpush2.bf16.msra.mxu1 %v474_v38 }
  0x33   :  { %349 = vmatprep.subr.bf16.mxu1 %v484_v0 }
  0x36   :  { %350 = vmatpush2.bf16.msra.mxu1 %v475_v39 }
  0x39   :  { %352 = vmatmul.mubr.bf16.vlgmr.msra.gmra.mxu1 %v25_v42 }
  0xe3   :  { %v439_v43 = vpop.f32.mrf.mxu0 }
  0xe5   :  { %v440_v44 = vpop.f32.mrf.mxu0 }
  0xe6   :  { %v441_v46 = vadd.f32 %v440_v44, %v439_v43 }
  0xe7   :  { %v442_v45 = vpop.f32.mrf.mxu0 }
  0xe8   :  { %v313_v50 = vadd.f32 %v441_v46, %v391_v48 }
  0xe9   :  { %v443_v47 = vpop.f32.mrf.mxu0 }
  0xea   :  { %v444_v49 = vadd.f32 %v443_v47, %v442_v45 }
  0xec   :  { %v316_v54 = vadd.f32 %v444_v49, %v391_v48 }
  0xf9   :  { %v353_v51 = vpop.f32.mrf.mxu1 }
  0xfa   :  { %v354_v52 = vadd.f32 %v353_v51, %v313_v50 }
  0xfb   :  { %v355_v53 = vpop.f32.mrf.mxu1 }
  0xfc   :  { %v361_v55 = vsel %vm360_vm1, %v354_v52, -inf }
  0xfd   :  { %v356_v56 = vpop.f32.mrf.mxu1  ;;  %362 = vmax.xlane.f32.xlu0 %v361_v55 }
  0xfe   :  { %v357_v57 = vadd.f32 %v356_v56, %v316_v54 }
  0xff   :  { %v358_v58 = vpop.f32.mrf.mxu1 }
 0x100   :  { %v364_v59 = vsel %vm360_vm1, %v357_v57, -inf }
 0x101   :  { %365 = vmax.xlane.f32.xlu0 %v364_v59 }
 0x186   :  { %v363_v60 = vpop.xlane.xlu0 %362 }
 0x187   :  { %v367_v61 = vsub.f32 %v354_v52, %v363_v60 }
 0x189   :  { %v369_v62 = vmul.f32 1.442695, %v367_v61 }
 0x18a   :  { %v366_v63 = vpop.xlane.xlu0 %365 }
 0x18b   :  { %476 = vpow2.f32 %v369_v62  ;;  %v368_v0 = vsub.f32 %v357_v57, %v366_v63 }
 0x18d   :  { %v371_v1 = vmul.f32 1.442695, %v368_v0 }
 0x18f   :  { %478 = vpow2.f32 %v371_v1 }
 0x198   :  { %v477_v2 = vpop.eup %476 }
 0x199   :  { %v373_v3 = vsel %vm360_vm1, %v477_v2, 0.0 }
 0x19a   :  { %374 = vadd.xlane.f32.xlu1 %v373_v3 }
 0x19c   :  { %v479_v4 = vpop.eup %478 }
 0x19d   :  { %v376_v5 = vsel %vm360_vm1, %v479_v4, 0.0 }
 0x19e   :  { %377 = vadd.xlane.f32.xlu1 %v376_v5 }
 0x223   :  { %v375_v6 = vpop.xlane.xlu1 %374 }
 0x224   :  { %480 = vlog2.f32 %v375_v6 }
 0x227   :  { %v378_v7 = vpop.xlane.xlu1 %377 }
 0x228   :  { %482 = vlog2.f32 %v378_v7 }
 0x231   :  { %v481_v8 = vpop.eup %480 }
 0x232   :  { %v380_v9 = vmul.f32 0.6931472, %v481_v8 }
 0x234   :  { %v383_v10 = vsub.f32 %v367_v61, %v380_v9 }
 0x235   :  { %v483_v11 = vpop.eup %482 }
 0x236   :  { %385 = vst.msk [vmem:[%s651_s3] sm:$0xff] %vm360_vm1, %v383_v10  ;;  %v382_v12 = vmul.f32 0.6931472, %v483_v11 }
 0x238   :  { %v384_v13 = vsub.f32 %v368_v0, %v382_v12 }
 0x23a   :  { %386 = vst.msk [vmem:[%s651_s3 + $0x8] sm:$0xff] %vm360_vm1, %v384_v13 }

// kernel: tener_forward.8
= control target key start
LH: loop header
LB: loop body
LE: loop exit
PB: predicated region body
PF: predicated region fallthrough
CT: control target
= control target key end

     0   :  { %s5343_s30 = smov 0   ;;  %s6820_s0 = inlined_call_operand.vmem [shape: f32[2,8,480], index: 0, kind: input, shape index: {}]   ;;  %s6821_s1 = inlined_call_operand.vmem [shape: bf16[480,960], index: 1, kind: input, shape index: {}]   ;;  %s6822_s2 = inlined_call_operand.vmem [shape: f32[6,80], index: 2, kind: input, shape index: {}]   ;;  %s6823_s3 = inlined_call_operand.vmem [shape: f32[6,80], index: 3, kind: input, shape index: {}]   ;;  %s6824_s4 = inlined_call_operand.vmem [shape: f32[8,40], index: 4, kind: input, shape index: {}]   ;;  %s6825_s5 = inlined_call_operand.vmem [shape: f32[8,40], index: 5, kind: input, shape index: {}]   ;;  %s6826_s6 = inlined_call_operand.vmem [shape: f32[2,1,8], index: 6, kind: input, shape index: {}]   ;;  %s6827_s7 = inlined_call_operand.vmem [shape: f32[1,480], index: 7, kind: input, shape index: {}]   ;;  %s6828_s8 = inlined_call_operand.vmem [shape: f32[1,480], index: 8, kind: input, shape index: {}]   ;;  %s6829_s9 = inlined_call_operand.vmem [shape: f32[2,8,480], index: 9, kind: output, shape index: {}]  }
   0x1 LB: > { %s4611_s10 = sadd.s32 4294967295, %s5273_s30   ;;  %p4615_p0 = scmp.ge.s32.totalorder %s5273_s30, 1  ;;  %s5273_s30 = sphi %s5343_s30, %s19_s30  }
   0x2   : > { %p295_p1 = scmp.lt.s32.totalorder %s5273_s30, 3 }
   0x4   : > { %p296_p2 = pnand %p4615_p0, %p295_p1 }
   0x5   : > { %p334_p3 = scmp.lt.s32.totalorder (!%p296_p2), %s4611_s10, 1  ;;  %s5275_s28 = smov (!%p296_p2), 40  }
   0x6   : > { %299 = sbr.rel (%p296_p2) target bundleno = 4312 (0x10d8), region = 56  ;;  %s5276_s29 = smov (!%p296_p2), 88  }
   0x7   : > { %s5277_s18 = smov (!%p296_p2), 80   ;;  %s5278_s11 = smov (!%p296_p2), 120  }
   0x8   : > { %s5282_s20 = smov (!%p296_p2), 32   ;;  %s5283_s21 = smov (!%p296_p2), 8  }
   0x9   : > { %s5284_s22 = smov (!%p296_p2), 48   ;;  %s5285_s25 = smov (!%p296_p2), 72  }
   0xa   : > { %s5286_s12 = smov (!%p296_p2), 56   ;;  %s5287_s13 = smov (!%p296_p2), 96  }
   0xb   : > { %v412_v0 = vld [vmem:[%s6821_s1 + $0x1c0] sm:$0xff]  ;;  %s6833_s10 = smov (!%p334_p3, %s4611_s10), 1  ;;  %vm1796_vm0 = vcmask 785408   ;;  %vm2173_vm1 = vcmask 326656   ;;  %vm5280_vm2 = vmmov 0   ;;  %vm2371_vm3 = vcmask 654336  }
   0xc   : > { %v416_v1 = vld [vmem:[%s6821_s1 + $0x1e0] sm:$0xff]  ;;  %s4914_s17 = sshll.u32 %s6833_s10, 5  ;;  %s341_s19 = scalar_lea.vmem %s6826_s6, %s6833_s10  ;;  %vm2427_vm6 = vcmask 64512   ;;  %vm2536_vm7 = vcmask 719872   ;;  %vm2448_vm8 = vcmask 261120   ;;  %vm2453_vm9 = vcmask 1043456  }
   0xd   : > { %v540_v2 = vld [vmem:[%s6821_s1 + $0x5c0] sm:$0xff]  ;;  %v4677_v3 = vcombine.high %v412_v0, %v416_v1  ;;  %v4676_v4 = vcombine.low %v412_v0, %v416_v1  ;;  %s5435_s24 = scalar_lea.vmem %s6820_s0, %s4914_s17  ;;  %vm2781_vm10 = vcmask 392192   ;;  %s5288_s16 = smov 112   ;;  %vm3371_vm11 = vcmask 130048  }
   0xe   : > { %v544_v5 = vld [vmem:[%s6821_s1 + $0x5e0] sm:$0xff]  ;;  %v349_v50 = vld [vmem:[%s5435_s24 + $0x8] sm:$0xff]  ;;  %v351_v52 = vld [vmem:[%s5435_s24 + $0x18] sm:$0xff]  ;;  %s5290_s23 = smov 104   ;;  %s5291_s26 = smov 16   ;;  %vm3729_vm12 = vcmask 195584  }
   0xf   : > { %v404_v6 = vld [vmem:[%s6821_s1 + $0x180] sm:$0xff]  ;;  %v4805_v8 = vcombine.high %v540_v2, %v544_v5  ;;  %v4804_v9 = vcombine.low %v540_v2, %v544_v5  ;;  %1800 = vmatprep.subr.bf16.mxu0 %v4677_v3  ;;  %v5451_v53 = vpack.c.bf16 %v349_v50, %v349_v50  ;;  %v5456_v57 = vpack.c.bf16 %v351_v52, %v351_v52  ;;  %s5292_s15 = smov 64  }
  0x10   : > { %v408_v7 = vld [vmem:[%s6821_s1 + $0x1a0] sm:$0xff]  ;;  %1801 = vmatpush1.bf16.msra.mxu0 %v4676_v4  ;;  %vm3946_vm13 = vcmask 523264   ;;  %vm4452_vm14 = vcmask 916480  }
  0x11   : > { %v4669_v10 = vcombine.high %v404_v6, %v408_v7  ;;  %v532_v11 = vld [vmem:[%s6821_s1 + $0x580] sm:$0xff]  ;;  %1841 = vmatprep.subr.bf16.mxu1 %v4805_v8  ;;  %v4668_v18 = vcombine.low %v404_v6, %v408_v7  ;;  %1832 = vmatprep.mubr.bf16.mxu0 %v5451_v53 }
  0x12   : > { %v536_v12 = vld [vmem:[%s6821_s1 + $0x5a0] sm:$0xff]  ;;  %1842 = vmatpush1.bf16.msra.mxu1 %v4804_v9  ;;  %4860 = vmatprep.mubr.msk.bf16.mxu1 %vm1796_vm0, %v5456_v57 }
  0x13   : > { %v396_v13 = vld [vmem:[%s6821_s1 + $0x140] sm:$0xff]  ;;  %v4797_v14 = vcombine.high %v532_v11, %v536_v12  ;;  %1802 = vmatprep.subr.bf16.mxu0 %v4669_v10  ;;  %v4796_v19 = vcombine.low %v532_v11, %v536_v12 }
  0x14   : > { %v400_v15 = vld [vmem:[%s6821_s1 + $0x160] sm:$0xff]  ;;  %1803 = vmatpush1.bf16.msra.mxu0 %v4668_v18 }
  0x15   : > { %v524_v16 = vld [vmem:[%s6821_s1 + $0x540] sm:$0xff]  ;;  %v4661_v20 = vcombine.high %v396_v13, %v400_v15  ;;  %1843 = vmatprep.subr.bf16.mxu1 %v4797_v14  ;;  %v4660_v26 = vcombine.low %v396_v13, %v400_v15 }
  0x16   : > { %v528_v17 = vld [vmem:[%s6821_s1 + $0x560] sm:$0xff]  ;;  %1844 = vmatpush1.bf16.msra.mxu1 %v4796_v19 }
  0x17   : > { %v4789_v21 = vcombine.high %v524_v16, %v528_v17  ;;  %v388_v22 = vld [vmem:[%s6821_s1 + $0x100] sm:$0xff]  ;;  %1804 = vmatprep.subr.bf16.mxu0 %v4661_v20  ;;  %v4788_v27 = vcombine.low %v524_v16, %v528_v17 }
  0x18   : > { %v392_v23 = vld [vmem:[%s6821_s1 + $0x120] sm:$0xff]  ;;  %1805 = vmatpush1.bf16.msra.mxu0 %v4660_v26 }
  0x19   : > { %v516_v24 = vld [vmem:[%s6821_s1 + $0x500] sm:$0xff]  ;;  %v4653_v28 = vcombine.high %v388_v22, %v392_v23  ;;  %1845 = vmatprep.subr.bf16.mxu1 %v4789_v21  ;;  %v4652_v34 = vcombine.low %v388_v22, %v392_v23 }
  0x1a   : > { %v520_v25 = vld [vmem:[%s6821_s1 + $0x520] sm:$0xff]  ;;  %1846 = vmatpush1.bf16.msra.mxu1 %v4788_v27 }
  0x1b   : > { %v4781_v29 = vcombine.high %v516_v24, %v520_v25  ;;  %v380_v30 = vld [vmem:[%s6821_s1 + $0xc0] sm:$0xff]  ;;  %1806 = vmatprep.subr.bf16.mxu0 %v4653_v28  ;;  %v4780_v35 = vcombine.low %v516_v24, %v520_v25 }
  0x1c   : > { %v384_v31 = vld [vmem:[%s6821_s1 + $0xe0] sm:$0xff]  ;;  %1807 = vmatpush1.bf16.msra.mxu0 %v4652_v34 }
  0x1d   : > { %v508_v32 = vld [vmem:[%s6821_s1 + $0x4c0] sm:$0xff]  ;;  %v4645_v36 = vcombine.high %v380_v30, %v384_v31  ;;  %1847 = vmatprep.subr.bf16.mxu1 %v4781_v29  ;;  %v4644_v42 = vcombine.low %v380_v30, %v384_v31 }
  0x1e   : > { %v512_v33 = vld [vmem:[%s6821_s1 + $0x4e0] sm:$0xff]  ;;  %1848 = vmatpush1.bf16.msra.mxu1 %v4780_v35 }
  0x1f   : > { %v4773_v37 = vcombine.high %v508_v32, %v512_v33  ;;  %v372_v38 = vld [vmem:[%s6821_s1 + $0x80] sm:$0xff]  ;;  %1808 = vmatprep.subr.bf16.mxu0 %v4645_v36  ;;  %v4772_v43 = vcombine.low %v508_v32, %v512_v33 }
  0x20   : > { %v376_v39 = vld [vmem:[%s6821_s1 + $0xa0] sm:$0xff]  ;;  %1809 = vmatpush1.bf16.msra.mxu0 %v4644_v42 }
  0x21   : > { %v500_v40 = vld [vmem:[%s6821_s1 + $0x480] sm:$0xff]  ;;  %v4637_v44 = vcombine.high %v372_v38, %v376_v39  ;;  %1849 = vmatprep.subr.bf16.mxu1 %v4773_v37  ;;  %v4636_v51 = vcombine.low %v372_v38, %v376_v39 }
  0x22   : > { %v504_v41 = vld [vmem:[%s6821_s1 + $0x4a0] sm:$0xff]  ;;  %1850 = vmatpush1.bf16.msra.mxu1 %v4772_v43 }
  0x23   : > { %v4765_v45 = vcombine.high %v500_v40, %v504_v41  ;;  %v364_v46 = vld [vmem:[%s6821_s1 + $0x40] sm:$0xff]  ;;  %1810 = vmatprep.subr.bf16.mxu0 %v4637_v44  ;;  %v4764_v54 = vcombine.low %v500_v40, %v504_v41 }
  0x24   : > { %v368_v47 = vld [vmem:[%s6821_s1 + $0x60] sm:$0xff]  ;;  %1811 = vmatpush1.bf16.msra.mxu0 %v4636_v51 }
  0x25   : > { %v492_v48 = vld [vmem:[%s6821_s1 + $0x440] sm:$0xff]  ;;  %v4629_v55 = vcombine.high %v364_v46, %v368_v47  ;;  %1851 = vmatprep.subr.bf16.mxu1 %v4765_v45  ;;  %v4628_v2 = vcombine.low %v364_v46, %v368_v47 }
  0x26   : > { %v496_v49 = vld [vmem:[%s6821_s1 + $0x460] sm:$0xff]  ;;  %1852 = vmatpush1.bf16.msra.mxu1 %v4764_v54 }
  0x27   : > { %v5454_v56 = vld [vmem:[%s5435_s24] sm:$0xff]  ;;  %v4757_v60 = vcombine.high %v492_v48, %v496_v49  ;;  %1812 = vmatprep.subr.bf16.mxu0 %v4629_v55  ;;  %v4756_v3 = vcombine.low %v492_v48, %v496_v49 }
  0x28   : > { %v5461_v58 = vld [vmem:[%s6824_s4] sm:$0xff]  ;;  %1813 = vmatpush1.bf16.msra.mxu0 %v4628_v2 }
  0x29   : > { %v5466_v59 = vld [vmem:[%s6825_s5] sm:$0xff]  ;;  %v2275_v63 = vmul.f32 %v5461_v58, %v5454_v56  ;;  %1853 = vmatprep.subr.bf16.mxu1 %v4757_v60 }
  0x2a   : > { %v356_v61 = vld [vmem:[%s6821_s1] sm:$0xff]  ;;  %2159 = vrot.lane.b32.xlu0 %v5466_v59, %s5275_s28  ;;  %1854 = vmatpush1.bf16.msra.mxu1 %v4756_v3 }
  0x2b   : > { %v360_v62 = vld [vmem:[%s6821_s1 + $0x20] sm:$0xff]  ;;  %2277 = vrot.lane.b32.xlu1 %v2275_v63, %s5275_s28 }
  0x2c   : > { %v484_v0 = vld [vmem:[%s6821_s1 + $0x400] sm:$0xff]  ;;  %v4621_v4 = vcombine.high %v356_v61, %v360_v62  ;;  %v4620_v10 = vcombine.low %v356_v61, %v360_v62 }
  0x2d   : > { %v488_v1 = vld [vmem:[%s6821_s1 + $0x420] sm:$0xff] }
  0x2e   : > { %v4749_v5 = vcombine.high %v484_v0, %v488_v1  ;;  %v476_v6 = vld [vmem:[%s6821_s1 + $0x3c0] sm:$0xff]  ;;  %1814 = vmatprep.subr.bf16.mxu0 %v4621_v4  ;;  %v4748_v11 = vcombine.low %v484_v0, %v488_v1  ;;  %v350_v0 = vld [vmem:[%s5435_s24 + $0x10] sm:$0xff] }
  0x2f   : > { %v480_v7 = vld [vmem:[%s6821_s1 + $0x3e0] sm:$0xff]  ;;  %2148 = vrot.lane.b32.xlu1 %v5461_v58, %s5275_s28  ;;  %1815 = vmatpush1.bf16.msra.mxu0 %v4620_v10  ;;  %v5575_v4 = vpack.c.bf16 %v350_v0, %v350_v0  ;;  %v413_v10 = vld [vmem:[%s6821_s1 + $0x1c8] sm:$0xff] }
  0x30   : > { %v588_v8 = vld [vmem:[%s6821_s1 + $0x740] sm:$0xff]  ;;  %v4741_v12 = vcombine.high %v476_v6, %v480_v7  ;;  %1855 = vmatprep.subr.bf16.mxu1 %v4749_v5  ;;  %v4740_v18 = vcombine.low %v476_v6, %v480_v7  ;;  %v5581_v7 = vpack.c.bf16 %v5454_v56, %v5454_v56  ;;  %v365_v0 = vld [vmem:[%s6821_s1 + $0x48] sm:$0xff] }
  0x31   : > { %v592_v9 = vld [vmem:[%s6821_s1 + $0x760] sm:$0xff]  ;;  %1856 = vmatpush1.bf16.msra.mxu1 %v4748_v11  ;;  %v417_v11 = vld [vmem:[%s6821_s1 + $0x1e8] sm:$0xff] }
  0x32   : > { %v4853_v13 = vcombine.high %v588_v8, %v592_v9  ;;  %v468_v14 = vld [vmem:[%s6821_s1 + $0x380] sm:$0xff]  ;;  %1816 = vmatprep.subr.bf16.mxu0 %v4741_v12  ;;  %v4852_v19 = vcombine.low %v588_v8, %v592_v9  ;;  %v405_v12 = vld [vmem:[%s6821_s1 + $0x188] sm:$0xff] }
  0x33   : > { %v472_v15 = vld [vmem:[%s6821_s1 + $0x3a0] sm:$0xff]  ;;  %1817 = vmatpush2.bf16.msra.mxu0 %v4740_v18 }
  0x34   : > { %v580_v16 = vld [vmem:[%s6821_s1 + $0x700] sm:$0xff]  ;;  %v4733_v20 = vcombine.high %v468_v14, %v472_v15  ;;  %1861 = vmatprep.subr.bf16.mxu1 %v4853_v13  ;;  %v4732_v26 = vcombine.low %v468_v14, %v472_v15  ;;  %v4678_v13 = vcombine.low %v413_v10, %v417_v11  ;;  %v4679_v14 = vcombine.high %v413_v10, %v417_v11  ;;  %v409_v15 = vld [vmem:[%s6821_s1 + $0x1a8] sm:$0xff] }
  0x35   : > { %v584_v17 = vld [vmem:[%s6821_s1 + $0x720] sm:$0xff]  ;;  %1862 = vmatpush2.bf16.msra.mxu1 %v4852_v19  ;;  %v4671_v19 = vcombine.high %v405_v12, %v409_v15  ;;  %v357_v11 = vld [vmem:[%s6821_s1 + $0x8] sm:$0xff] }
  0x36   : > { %v4845_v21 = vcombine.high %v580_v16, %v584_v17  ;;  %v460_v22 = vld [vmem:[%s6821_s1 + $0x340] sm:$0xff]  ;;  %1818 = vmatprep.subr.bf16.mxu0 %v4733_v20  ;;  %v4844_v27 = vcombine.low %v580_v16, %v584_v17  ;;  %v541_v16 = vld [vmem:[%s6821_s1 + $0x5c8] sm:$0xff] }
  0x37   : > { %v464_v23 = vld [vmem:[%s6821_s1 + $0x360] sm:$0xff]  ;;  %1819 = vmatpush2.bf16.msra.mxu0 %v4732_v26  ;;  %v545_v17 = vld [vmem:[%s6821_s1 + $0x5e8] sm:$0xff] }
  0x38   : > { %v572_v24 = vld [vmem:[%s6821_s1 + $0x6c0] sm:$0xff]  ;;  %v4725_v28 = vcombine.high %v460_v22, %v464_v23  ;;  %1863 = vmatprep.subr.bf16.mxu1 %v4845_v21  ;;  %v4724_v34 = vcombine.low %v460_v22, %v464_v23  ;;  %v4806_v20 = vcombine.low %v541_v16, %v545_v17  ;;  %v4807_v21 = vcombine.high %v541_v16, %v545_v17  ;;  %v397_v22 = vld [vmem:[%s6821_s1 + $0x148] sm:$0xff] }
  0x39   : > { %v576_v25 = vld [vmem:[%s6821_s1 + $0x6e0] sm:$0xff]  ;;  %1864 = vmatpush2.bf16.msra.mxu1 %v4844_v27  ;;  %v401_v23 = vld [vmem:[%s6821_s1 + $0x168] sm:$0xff]  ;;  %v4670_v27 = vcombine.low %v405_v12, %v409_v15 }
  0x3a   : > { %v4837_v29 = vcombine.high %v572_v24, %v576_v25  ;;  %v452_v30 = vld [vmem:[%s6821_s1 + $0x300] sm:$0xff]  ;;  %1820 = vmatprep.subr.bf16.mxu0 %v4725_v28  ;;  %v4836_v35 = vcombine.low %v572_v24, %v576_v25  ;;  %v533_v24 = vld [vmem:[%s6821_s1 + $0x588] sm:$0xff] }
  0x3b   : > { %v456_v31 = vld [vmem:[%s6821_s1 + $0x320] sm:$0xff]  ;;  %1821 = vmatpush2.bf16.msra.mxu0 %v4724_v34  ;;  %v537_v25 = vld [vmem:[%s6821_s1 + $0x5a8] sm:$0xff] }
  0x3c   : > { %v564_v32 = vld [vmem:[%s6821_s1 + $0x680] sm:$0xff]  ;;  %v4717_v36 = vcombine.high %v452_v30, %v456_v31  ;;  %1865 = vmatprep.subr.bf16.mxu1 %v4837_v29  ;;  %v4716_v42 = vcombine.low %v452_v30, %v456_v31  ;;  %v4799_v28 = vcombine.high %v533_v24, %v537_v25  ;;  %v525_v29 = vld [vmem:[%s6821_s1 + $0x548] sm:$0xff]  ;;  %v4663_v31 = vcombine.high %v397_v22, %v401_v23 }
  0x3d   : > { %v568_v33 = vld [vmem:[%s6821_s1 + $0x6a0] sm:$0xff]  ;;  %1866 = vmatpush2.bf16.msra.mxu1 %v4836_v35  ;;  %v529_v30 = vld [vmem:[%s6821_s1 + $0x568] sm:$0xff] }
  0x3e   : > { %v4829_v37 = vcombine.high %v564_v32, %v568_v33  ;;  %v444_v38 = vld [vmem:[%s6821_s1 + $0x2c0] sm:$0xff]  ;;  %1822 = vmatprep.subr.bf16.mxu0 %v4717_v36  ;;  %v4828_v43 = vcombine.low %v564_v32, %v568_v33  ;;  %v4798_v32 = vcombine.low %v533_v24, %v537_v25  ;;  %v389_v33 = vld [vmem:[%s6821_s1 + $0x108] sm:$0xff]  ;;  %v4791_v35 = vcombine.high %v525_v29, %v529_v30 }
  0x3f   : > { %v448_v39 = vld [vmem:[%s6821_s1 + $0x2e0] sm:$0xff]  ;;  %1823 = vmatpush2.bf16.msra.mxu0 %v4716_v42  ;;  %v393_v34 = vld [vmem:[%s6821_s1 + $0x128] sm:$0xff] }
  0x40   : > { %v556_v40 = vld [vmem:[%s6821_s1 + $0x640] sm:$0xff]  ;;  %v4709_v44 = vcombine.high %v444_v38, %v448_v39  ;;  %1867 = vmatprep.subr.bf16.mxu1 %v4829_v37  ;;  %v4708_v50 = vcombine.low %v444_v38, %v448_v39  ;;  %v517_v36 = vld [vmem:[%s6821_s1 + $0x508] sm:$0xff]  ;;  %v4662_v39 = vcombine.low %v397_v22, %v401_v23 }
  0x41   : > { %v560_v41 = vld [vmem:[%s6821_s1 + $0x660] sm:$0xff]  ;;  %1868 = vmatpush2.bf16.msra.mxu1 %v4828_v43  ;;  %v521_v37 = vld [vmem:[%s6821_s1 + $0x528] sm:$0xff] }
  0x42   : > { %v4821_v45 = vcombine.high %v556_v40, %v560_v41  ;;  %v436_v46 = vld [vmem:[%s6821_s1 + $0x280] sm:$0xff]  ;;  %1824 = vmatprep.subr.bf16.mxu0 %v4709_v44  ;;  %v4820_v51 = vcombine.low %v556_v40, %v560_v41  ;;  %v4655_v40 = vcombine.high %v389_v33, %v393_v34  ;;  %v4790_v41 = vcombine.low %v525_v29, %v529_v30  ;;  %v381_v43 = vld [vmem:[%s6821_s1 + $0xc8] sm:$0xff] }
  0x43   : > { %v440_v47 = vld [vmem:[%s6821_s1 + $0x2a0] sm:$0xff]  ;;  %1825 = vmatpush2.bf16.msra.mxu0 %v4708_v50  ;;  %v385_v44 = vld [vmem:[%s6821_s1 + $0xe8] sm:$0xff] }
  0x44   : > { %v548_v48 = vld [vmem:[%s6821_s1 + $0x600] sm:$0xff]  ;;  %v4701_v52 = vcombine.high %v436_v46, %v440_v47  ;;  %1869 = vmatprep.subr.bf16.mxu1 %v4821_v45  ;;  %v4700_v61 = vcombine.low %v436_v46, %v440_v47  ;;  %v4783_v45 = vcombine.high %v517_v36, %v521_v37  ;;  %v509_v47 = vld [vmem:[%s6821_s1 + $0x4c8] sm:$0xff]  ;;  %v4647_v50 = vcombine.high %v381_v43, %v385_v44 }
  0x45   : > { %v552_v49 = vld [vmem:[%s6821_s1 + $0x620] sm:$0xff]  ;;  %1870 = vmatpush2.bf16.msra.mxu1 %v4820_v51  ;;  %v4782_v51 = vcombine.low %v517_v36, %v521_v37  ;;  %v361_v12 = vld [vmem:[%s6821_s1 + $0x28] sm:$0xff] }
  0x46   : > { %v4813_v54 = vcombine.high %v548_v48, %v552_v49  ;;  %v428_v55 = vld [vmem:[%s6821_s1 + $0x240] sm:$0xff]  ;;  %1826 = vmatprep.subr.bf16.mxu0 %v4701_v52  ;;  %v4812_v62 = vcombine.low %v548_v48, %v552_v49  ;;  %v513_v48 = vld [vmem:[%s6821_s1 + $0x4e8] sm:$0xff]  ;;  %v4654_v49 = vcombine.low %v389_v33, %v393_v34  ;;  %v4623_v17 = vcombine.high %v357_v11, %v361_v12 }
  0x47   : > { %v432_v60 = vld [vmem:[%s6821_s1 + $0x260] sm:$0xff]  ;;  %1827 = vmatpush2.bf16.msra.mxu0 %v4700_v61  ;;  %v377_v52 = vld [vmem:[%s6821_s1 + $0xa8] sm:$0xff]  ;;  %v4646_v61 = vcombine.low %v381_v43, %v385_v44  ;;  %v4622_v24 = vcombine.low %v357_v11, %v361_v12 }
  0x48   : > { %v4693_v63 = vcombine.high %v428_v55, %v432_v60  ;;  %1871 = vmatprep.subr.bf16.mxu1 %v4813_v54  ;;  %v420_v1 = vld [vmem:[%s6821_s1 + $0x200] sm:$0xff]  ;;  %v4692_v3 = vcombine.low %v428_v55, %v432_v60  ;;  %v4775_v54 = vcombine.high %v509_v47, %v513_v48  ;;  %v501_v55 = vld [vmem:[%s6821_s1 + $0x488] sm:$0xff] }
  0x49   : > { %v424_v2 = vld [vmem:[%s6821_s1 + $0x220] sm:$0xff]  ;;  %1872 = vmatpush2.bf16.msra.mxu1 %v4812_v62  ;;  %v505_v60 = vld [vmem:[%s6821_s1 + $0x4a8] sm:$0xff] }
  0x4a   : > { %1828 = vmatprep.subr.bf16.mxu0 %v4693_v63  ;;  %v4685_v5 = vcombine.high %v420_v1, %v424_v2  ;;  %v4684_v6 = vcombine.low %v420_v1, %v424_v2  ;;  %1882 = vmatprep.subr.bf16.mxu1 %v4679_v14  ;;  %v4774_v63 = vcombine.low %v509_v47, %v513_v48  ;;  %v369_v1 = vld [vmem:[%s6821_s1 + $0x68] sm:$0xff] }
  0x4b   : > { %1829 = vmatpush2.bf16.msra.mxu0 %v4692_v3  ;;  %v4767_v2 = vcombine.high %v501_v55, %v505_v60  ;;  %v493_v3 = vld [vmem:[%s6821_s1 + $0x448] sm:$0xff]  ;;  %v4766_v10 = vcombine.low %v501_v55, %v505_v60  ;;  %v4630_v16 = vcombine.low %v365_v0, %v369_v1 }
  0x4c   : > { %1874 = vmatmul.mubr.bf16.vlgmr.msra.gmra.mxu1 %v5575_v4  ;;  %1830 = vmatprep.subr.bf16.mxu0 %v4685_v5  ;;  %v497_v5 = vld [vmem:[%s6821_s1 + $0x468] sm:$0xff] }
  0x4d   : > { %1914 = vmatprep.mubr.bf16.mxu1 %v5451_v53  ;;  %1883 = vmatpush1.bf16.msra.mxu1 %v4678_v13  ;;  %v4759_v13 = vcombine.high %v493_v3, %v497_v5  ;;  %v485_v14 = vld [vmem:[%s6821_s1 + $0x408] sm:$0xff] }
  0x4e   : > { %1884 = vmatprep.subr.bf16.mxu1 %v4671_v19  ;;  %v489_v15 = vld [vmem:[%s6821_s1 + $0x428] sm:$0xff] }
  0x4f   : > { %1831 = vmatpush2.bf16.msra.mxu0 %v4684_v6  ;;  %v477_v19 = vld [vmem:[%s6821_s1 + $0x3c8] sm:$0xff] }
  0x50   : > { %1923 = vmatprep.subr.bf16.mxu0 %v4807_v21  ;;  %v4751_v21 = vcombine.high %v485_v14, %v489_v15  ;;  %v589_v22 = vld [vmem:[%s6821_s1 + $0x748] sm:$0xff] }
  0x51   : > { %1885 = vmatpush1.bf16.msra.mxu1 %v4670_v27  ;;  %v593_v23 = vld [vmem:[%s6821_s1 + $0x768] sm:$0xff] }
  0x52   : > { %1833 = vmatmul.mubr.bf16.vlgmr.msra.gmra.mxu0 %v5581_v7  ;;  %1886 = vmatprep.subr.bf16.mxu1 %v4663_v31  ;;  %v469_v27 = vld [vmem:[%s6821_s1 + $0x388] sm:$0xff]  ;;  %v4855_v29 = vcombine.high %v589_v22, %v593_v23  ;;  %v4854_v34 = vcombine.low %v589_v22, %v593_v23  ;;  %v406_v22 = vld [vmem:[%s6821_s1 + $0x190] sm:$0xff] }
  0x53   : > { %4861 = vmatprep.mubr.msk.bf16.mxu0 %vm1796_vm0, %v5456_v57  ;;  %1924 = vmatpush1.bf16.msra.mxu0 %v4806_v20  ;;  %v481_v20 = vld [vmem:[%s6821_s1 + $0x3e8] sm:$0xff]  ;;  %v410_v23 = vld [vmem:[%s6821_s1 + $0x1b0] sm:$0xff] }
  0x54   : > { %1925 = vmatprep.subr.bf16.mxu0 %v4799_v28  ;;  %v4743_v25 = vcombine.high %v477_v19, %v481_v20  ;;  %v473_v28 = vld [vmem:[%s6821_s1 + $0x3a8] sm:$0xff] }
  0x55   : > { %1887 = vmatpush1.bf16.msra.mxu1 %v4662_v39  ;;  %v581_v30 = vld [vmem:[%s6821_s1 + $0x708] sm:$0xff]  ;;  %v4735_v33 = vcombine.high %v469_v27, %v473_v28 }
  0x56   : > { %1888 = vmatprep.subr.bf16.mxu1 %v4655_v40  ;;  %v585_v31 = vld [vmem:[%s6821_s1 + $0x728] sm:$0xff]  ;;  %v4734_v40 = vcombine.low %v469_v27, %v473_v28  ;;  %v4673_v27 = vcombine.high %v406_v22, %v410_v23  ;;  %v542_v28 = vld [vmem:[%s6821_s1 + $0x5d0] sm:$0xff] }
  0x57   : > { %1926 = vmatpush1.bf16.msra.mxu0 %v4798_v32  ;;  %v4742_v32 = vcombine.low %v477_v19, %v481_v20  ;;  %v465_v36 = vld [vmem:[%s6821_s1 + $0x368] sm:$0xff]  ;;  %v4847_v37 = vcombine.high %v581_v30, %v585_v31  ;;  %v4846_v43 = vcombine.low %v581_v30, %v585_v31  ;;  %v398_v30 = vld [vmem:[%s6821_s1 + $0x150] sm:$0xff] }
  0x58   : > { %1927 = vmatprep.subr.bf16.mxu0 %v4791_v35  ;;  %v461_v35 = vld [vmem:[%s6821_s1 + $0x348] sm:$0xff]  ;;  %v402_v31 = vld [vmem:[%s6821_s1 + $0x170] sm:$0xff] }
  0x59   : > { %1889 = vmatpush1.bf16.msra.mxu1 %v4654_v49  ;;  %v577_v39 = vld [vmem:[%s6821_s1 + $0x6e8] sm:$0xff]  ;;  %v4726_v49 = vcombine.low %v461_v35, %v465_v36 }
  0x5a   : > { %1890 = vmatprep.subr.bf16.mxu1 %v4647_v50  ;;  %v453_v44 = vld [vmem:[%s6821_s1 + $0x308] sm:$0xff] }
  0x5b   : > { %1928 = vmatpush1.bf16.msra.mxu0 %v4790_v41  ;;  %v4727_v41 = vcombine.high %v461_v35, %v465_v36  ;;  %v565_v47 = vld [vmem:[%s6821_s1 + $0x688] sm:$0xff]  ;;  %v4665_v35 = vcombine.high %v398_v30, %v402_v31  ;;  %v534_v36 = vld [vmem:[%s6821_s1 + $0x590] sm:$0xff] }
  0x5c   : > { %1929 = vmatprep.subr.bf16.mxu0 %v4783_v45  ;;  %v457_v45 = vld [vmem:[%s6821_s1 + $0x328] sm:$0xff] }
  0x5d   : > { %1891 = vmatpush1.bf16.msra.mxu1 %v4646_v61  ;;  %v569_v48 = vld [vmem:[%s6821_s1 + $0x6a8] sm:$0xff]  ;;  %v4719_v50 = vcombine.high %v453_v44, %v457_v45  ;;  %v4718_v61 = vcombine.low %v453_v44, %v457_v45  ;;  %v526_v45 = vld [vmem:[%s6821_s1 + $0x550] sm:$0xff] }
  0x5e   : > { %v557_v55 = vld [vmem:[%s6821_s1 + $0x648] sm:$0xff] }
  0x5f   : > { %1930 = vmatpush1.bf16.msra.mxu0 %v4782_v51  ;;  %v561_v60 = vld [vmem:[%s6821_s1 + $0x668] sm:$0xff] }
  0x60   : > { %1931 = vmatprep.subr.bf16.mxu0 %v4775_v54  ;;  %v4831_v54 = vcombine.high %v565_v47, %v569_v48  ;;  %v429_v11 = vld [vmem:[%s6821_s1 + $0x248] sm:$0xff] }
  0x61   : > { %v433_v12 = vld [vmem:[%s6821_s1 + $0x268] sm:$0xff] }
  0x62   : > { %v421_v19 = vld [vmem:[%s6821_s1 + $0x208] sm:$0xff] }
  0x63   : > { %1932 = vmatpush1.bf16.msra.mxu0 %v4774_v63  ;;  %v4830_v63 = vcombine.low %v565_v47, %v569_v48  ;;  %v425_v20 = vld [vmem:[%s6821_s1 + $0x228] sm:$0xff] }
  0x64   : > { %1933 = vmatprep.subr.bf16.mxu0 %v4767_v2  ;;  %v4823_v2 = vcombine.high %v557_v55, %v561_v60 }
  0x67   : > { %1934 = vmatpush1.bf16.msra.mxu0 %v4766_v10  ;;  %v4822_v10 = vcombine.low %v557_v55, %v561_v60  ;;  %v522_v60 = vld [vmem:[%s6821_s1 + $0x530] sm:$0xff] }
  0x68   : > { %1935 = vmatprep.subr.bf16.mxu0 %v4759_v13 }
  0x9c   : > { %v5586_v8 = vpop.permute.xlu0 %2159 }
  0x9d   : > { %v2274_v9 = vmul.f32 %v5586_v8, %v5454_v56  ;;  %v2278_v18 = vpop.permute.xlu1 %2277 }
  0x9f   : > { %v2280_v26 = vsub.f32 %v2274_v9, %v2278_v18  ;;  %v4631_v9 = vcombine.high %v365_v0, %v369_v1  ;;  %v4758_v18 = vcombine.low %v493_v3, %v497_v5  ;;  %v437_v0 = vld [vmem:[%s6821_s1 + $0x288] sm:$0xff] }
  0xa0   : > { %v441_v1 = vld [vmem:[%s6821_s1 + $0x2a8] sm:$0xff] }
  0xa1   : > { %v2281_v38 = vpack.c.bf16 %v2280_v26, %v2280_v26  ;;  %v5638_v42 = vpop.permute.xlu1 %2148  ;;  %1936 = vmatpush1.bf16.msra.mxu0 %v4758_v18  ;;  %v4750_v26 = vcombine.low %v485_v14, %v489_v15  ;;  %v549_v3 = vld [vmem:[%s6821_s1 + $0x608] sm:$0xff]  ;;  %v414_v14 = vld [vmem:[%s6821_s1 + $0x1d0] sm:$0xff] }
  0xa2   : > { %v2267_v46 = vmul.f32 %v5638_v42, %v5454_v56  ;;  %v373_v56 = vld [vmem:[%s6821_s1 + $0x88] sm:$0xff]  ;;  %1937 = vmatprep.subr.bf16.mxu0 %v4751_v21  ;;  %v418_v15 = vld [vmem:[%s6821_s1 + $0x1f0] sm:$0xff] }
  0xa3   : > { %2283 = vrot.lane.b32.xlu1 %v2281_v38, %s5276_s29  ;;  %v4639_v62 = vcombine.high %v373_v56, %v377_v52  ;;  %v4638_v6 = vcombine.low %v373_v56, %v377_v52  ;;  %v573_v38 = vld [vmem:[%s6821_s1 + $0x6c8] sm:$0xff]  ;;  %v4681_v21 = vcombine.high %v414_v14, %v418_v15 }
  0xa4   : > { %v4838_v51 = vcombine.low %v573_v38, %v577_v39  ;;  %v445_v56 = vld [vmem:[%s6821_s1 + $0x2c8] sm:$0xff] }
  0xa5   : > { %1892 = vmatprep.subr.bf16.mxu1 %v4639_v62  ;;  %1938 = vmatpush1.bf16.msra.mxu0 %v4750_v26  ;;  %v449_v52 = vld [vmem:[%s6821_s1 + $0x2e8] sm:$0xff]  ;;  %v4680_v26 = vcombine.low %v414_v14, %v418_v15  ;;  %v4865_v14 = vld [vmem:[%s6823_s3] ss:$0 sm:$0xff] }
  0xa6   : > { %1893 = vmatpush1.bf16.msra.mxu1 %v4638_v6  ;;  %1943 = vmatprep.subr.bf16.mxu0 %v4855_v29  ;;  %v4711_v62 = vcombine.high %v445_v56, %v449_v52  ;;  %v553_v5 = vld [vmem:[%s6821_s1 + $0x628] sm:$0xff]  ;;  %v4710_v6 = vcombine.low %v445_v56, %v449_v52  ;;  %v546_v29 = vld [vmem:[%s6821_s1 + $0x5f0] sm:$0xff] }
  0xa7   : > { %2269 = vrot.lane.b32.xlu1 %v2267_v46, %s5276_s29  ;;  %1894 = vmatprep.subr.bf16.mxu1 %v4631_v9  ;;  %v4839_v46 = vcombine.high %v573_v38, %v577_v39  ;;  %v4703_v9 = vcombine.high %v437_v0, %v441_v1  ;;  %v4815_v13 = vcombine.high %v549_v3, %v553_v5  ;;  %v390_v38 = vld [vmem:[%s6821_s1 + $0x110] sm:$0xff] }
  0xa8   : > { %v4814_v18 = vcombine.low %v549_v3, %v553_v5  ;;  %v394_v39 = vld [vmem:[%s6821_s1 + $0x130] sm:$0xff] }
  0xa9   : > { %1944 = vmatpush2.bf16.msra.mxu0 %v4854_v34  ;;  %v4809_v34 = vcombine.high %v542_v28, %v546_v29  ;;  %v4657_v44 = vcombine.high %v390_v38, %v394_v39  ;;  %v4656_v48 = vcombine.low %v390_v38, %v394_v39  ;;  %v386_v56 = vld [vmem:[%s6821_s1 + $0xf0] sm:$0xff] }
  0xaa   : > { %1895 = vmatpush1.bf16.msra.mxu1 %v4630_v16  ;;  %1945 = vmatprep.subr.bf16.mxu0 %v4847_v37  ;;  %v4702_v16 = vcombine.low %v437_v0, %v441_v1  ;;  %v538_v37 = vld [vmem:[%s6821_s1 + $0x5b0] sm:$0xff] }
  0xab   : > { %1896 = vmatprep.subr.bf16.mxu1 %v4623_v17  ;;  %v4695_v17 = vcombine.high %v429_v11, %v433_v12  ;;  %v4800_v47 = vcombine.low %v534_v36, %v538_v37  ;;  %v518_v52 = vld [vmem:[%s6821_s1 + $0x510] sm:$0xff]  ;;  %2546 = vrot.lane.b32.xlu1 %v5461_v58, %s5277_s18 }
  0xac   : > { %v374_v1 = vld [vmem:[%s6821_s1 + $0x90] sm:$0xff] }
  0xad   : > { %1946 = vmatpush2.bf16.msra.mxu0 %v4846_v43  ;;  %v4801_v43 = vcombine.high %v534_v36, %v538_v37  ;;  %v510_v3 = vld [vmem:[%s6821_s1 + $0x4d0] sm:$0xff] }
  0xae   : > { %1897 = vmatpush1.bf16.msra.mxu1 %v4622_v24  ;;  %1947 = vmatprep.subr.bf16.mxu0 %v4839_v46  ;;  %v4694_v24 = vcombine.low %v429_v11, %v433_v12  ;;  %v530_v46 = vld [vmem:[%s6821_s1 + $0x570] sm:$0xff] }
  0xaf   : > { %1898 = vmatprep.subr.bf16.mxu1 %v4743_v25  ;;  %v4687_v25 = vcombine.high %v421_v19, %v425_v20  ;;  %2525 = vrot.lane.b32.xlu1 %v5461_v58, %s5278_s11  ;;  %v478_v39 = vld [vmem:[%s6821_s1 + $0x3d0] sm:$0xff] }
  0xb1   : > { %1948 = vmatpush2.bf16.msra.mxu0 %v4838_v51  ;;  %v382_v51 = vld [vmem:[%s6821_s1 + $0xd0] sm:$0xff] }
  0xb2   : > { %1899 = vmatpush2.bf16.msra.mxu1 %v4742_v32  ;;  %1949 = vmatprep.subr.bf16.mxu0 %v4831_v54  ;;  %v4686_v32 = vcombine.low %v421_v19, %v425_v20  ;;  %v4649_v55 = vcombine.high %v382_v51, %v386_v56 }
  0xb3   : > { %1900 = vmatprep.subr.bf16.mxu1 %v4735_v33  ;;  %v4672_v33 = vcombine.low %v406_v22, %v410_v23  ;;  %2541 = vrot.lane.b32.xlu1 %v5466_v59, %s5278_s11  ;;  %v590_v59 = vld [vmem:[%s6821_s1 + $0x750] sm:$0xff] }
  0xb5   : > { %1950 = vmatpush2.bf16.msra.mxu0 %v4830_v63  ;;  %v4785_v63 = vcombine.high %v518_v52, %v522_v60 }
  0xb6   : > { %1901 = vmatpush2.bf16.msra.mxu1 %v4734_v40  ;;  %1951 = vmatprep.subr.bf16.mxu0 %v4823_v2  ;;  %v4808_v40 = vcombine.low %v542_v28, %v546_v29  ;;  %v378_v2 = vld [vmem:[%s6821_s1 + $0xb0] sm:$0xff] }
  0xb7   : > { %1902 = vmatprep.subr.bf16.mxu1 %v4727_v41  ;;  %v4664_v41 = vcombine.low %v398_v30, %v402_v31  ;;  %v358_v29 = vld [vmem:[%s6821_s1 + $0x10] sm:$0xff] }
  0xb8   : > { %v362_v30 = vld [vmem:[%s6821_s1 + $0x30] sm:$0xff] }
  0xb9   : > { %1952 = vmatpush2.bf16.msra.mxu0 %v4822_v10  ;;  %v4640_v10 = vcombine.low %v374_v1, %v378_v2  ;;  %v494_v31 = vld [vmem:[%s6821_s1 + $0x450] sm:$0xff]  ;;  %v4625_v36 = vcombine.high %v358_v29, %v362_v30 }
  0xba   : > { %1903 = vmatpush2.bf16.msra.mxu1 %v4726_v49  ;;  %1953 = vmatprep.subr.bf16.mxu0 %v4815_v13  ;;  %v4793_v49 = vcombine.high %v526_v45, %v530_v46 }
  0xbb   : > { %1904 = vmatprep.subr.bf16.mxu1 %v4719_v50  ;;  %v4792_v50 = vcombine.low %v526_v45, %v530_v46  ;;  %v474_v46 = vld [vmem:[%s6821_s1 + $0x3b0] sm:$0xff] }
  0xbd   : > { %1954 = vmatpush2.bf16.msra.mxu0 %v4814_v18  ;;  %v502_v18 = vld [vmem:[%s6821_s1 + $0x490] sm:$0xff] }
  0xbe   : > { %1905 = vmatpush2.bf16.msra.mxu1 %v4718_v61  ;;  %1964 = vmatprep.subr.bf16.mxu0 %v4681_v21  ;;  %v4648_v61 = vcombine.low %v382_v51, %v386_v56  ;;  %v506_v21 = vld [vmem:[%s6821_s1 + $0x4b0] sm:$0xff] }
  0xbf   : > { %1906 = vmatprep.subr.bf16.mxu1 %v4711_v62  ;;  %v4784_v62 = vcombine.low %v518_v52, %v522_v60  ;;  %v462_v56 = vld [vmem:[%s6821_s1 + $0x350] sm:$0xff] }
  0xc0   : > { %1956 = vmatmul.mubr.bf16.vlgmr.msra.gmra.mxu0 %v5575_v4  ;;  %v466_v52 = vld [vmem:[%s6821_s1 + $0x370] sm:$0xff] }
  0xc1   : > { %1965 = vmatpush1.bf16.msra.mxu0 %v4680_v26  ;;  %1996 = vmatprep.mubr.bf16.mxu0 %v5451_v53 }
  0xc2   : > { %1907 = vmatpush2.bf16.msra.mxu1 %v4710_v6  ;;  %1966 = vmatprep.subr.bf16.mxu0 %v4673_v27  ;;  %v4641_v6 = vcombine.high %v374_v1, %v378_v2  ;;  %v458_v1 = vld [vmem:[%s6821_s1 + $0x330] sm:$0xff] }
  0xc3   : > { %1908 = vmatprep.subr.bf16.mxu1 %v4703_v9  ;;  %v514_v9 = vld [vmem:[%s6821_s1 + $0x4f0] sm:$0xff] }
  0xc4   : > { %v4776_v11 = vcombine.low %v510_v3, %v514_v9  ;;  %v4777_v12 = vcombine.high %v510_v3, %v514_v9  ;;  %v574_v2 = vld [vmem:[%s6821_s1 + $0x6d0] sm:$0xff] }
  0xc5   : > { %1967 = vmatpush1.bf16.msra.mxu0 %v4672_v33  ;;  %v498_v33 = vld [vmem:[%s6821_s1 + $0x470] sm:$0xff] }
  0xc6   : > { %1909 = vmatpush2.bf16.msra.mxu1 %v4702_v16  ;;  %1968 = vmatprep.subr.bf16.mxu0 %v4665_v35  ;;  %v366_v16 = vld [vmem:[%s6821_s1 + $0x50] sm:$0xff]  ;;  %v4624_v35 = vcombine.low %v358_v29, %v362_v30  ;;  %v4760_v37 = vcombine.low %v494_v31, %v498_v33  ;;  %v4761_v38 = vcombine.high %v494_v31, %v498_v33 }
  0xc7   : > { %1910 = vmatprep.subr.bf16.mxu1 %v4695_v17  ;;  %v370_v17 = vld [vmem:[%s6821_s1 + $0x70] sm:$0xff] }
  0xc8   : > { %v4633_v20 = vcombine.high %v366_v16, %v370_v17  ;;  %v4632_v23 = vcombine.low %v366_v16, %v370_v17  ;;  %v578_v3 = vld [vmem:[%s6821_s1 + $0x6f0] sm:$0xff] }
  0xc9   : > { %1969 = vmatpush1.bf16.msra.mxu0 %v4664_v41  ;;  %v4840_v16 = vcombine.low %v574_v2, %v578_v3  ;;  %v430_v30 = vld [vmem:[%s6821_s1 + $0x250] sm:$0xff] }
  0xca   : > { %1911 = vmatpush2.bf16.msra.mxu1 %v4694_v24  ;;  %1970 = vmatprep.subr.bf16.mxu0 %v4657_v44  ;;  %v4768_v24 = vcombine.low %v502_v18, %v506_v21  ;;  %v470_v44 = vld [vmem:[%s6821_s1 + $0x390] sm:$0xff] }
  0xcb   : > { %1912 = vmatprep.subr.bf16.mxu1 %v4687_v25  ;;  %v4769_v25 = vcombine.high %v502_v18, %v506_v21  ;;  %v4736_v60 = vcombine.low %v470_v44, %v474_v46  ;;  %v442_v21 = vld [vmem:[%s6821_s1 + $0x2b0] sm:$0xff] }
  0xcc   : > { %v434_v31 = vld [vmem:[%s6821_s1 + $0x270] sm:$0xff] }
  0xcd   : > { %1971 = vmatpush1.bf16.msra.mxu0 %v4656_v48  ;;  %v554_v33 = vld [vmem:[%s6821_s1 + $0x630] sm:$0xff] }
  0xce   : > { %1913 = vmatpush2.bf16.msra.mxu1 %v4686_v32  ;;  %1972 = vmatprep.subr.bf16.mxu0 %v4649_v55  ;;  %v586_v55 = vld [vmem:[%s6821_s1 + $0x730] sm:$0xff] }
  0xcf   : > { %2005 = vmatprep.subr.bf16.mxu1 %v4809_v34 }
  0xd1   : > { %1915 = vmatmul.mubr.bf16.vlgmr.msra.gmra.mxu1 %v5581_v7  ;;  %1973 = vmatpush1.bf16.msra.mxu0 %v4648_v61 }
  0xd2   : > { %2006 = vmatpush1.bf16.msra.mxu1 %v4808_v40  ;;  %4862 = vmatprep.mubr.msk.bf16.mxu1 %vm1796_vm0, %v5456_v57  ;;  %v482_v40 = vld [vmem:[%s6821_s1 + $0x3f0] sm:$0xff] }
  0xd3   : > { %2007 = vmatprep.subr.bf16.mxu1 %v4801_v43  ;;  %1974 = vmatprep.subr.bf16.mxu0 %v4641_v6  ;;  %v4745_v41 = vcombine.high %v478_v39, %v482_v40  ;;  %v490_v43 = vld [vmem:[%s6821_s1 + $0x430] sm:$0xff]  ;;  %v4744_v48 = vcombine.low %v478_v39, %v482_v40  ;;  %v415_v40 = vld [vmem:[%s6821_s1 + $0x1d8] sm:$0xff] }
  0xd4   : > { %v426_v39 = vld [vmem:[%s6821_s1 + $0x230] sm:$0xff] }
  0xd5   : > { %1975 = vmatpush1.bf16.msra.mxu0 %v4640_v10  ;;  %v4841_v10 = vcombine.high %v574_v2, %v578_v3  ;;  %v395_v2 = vld [vmem:[%s6821_s1 + $0x138] sm:$0xff] }
  0xd6   : > { %2008 = vmatpush1.bf16.msra.mxu1 %v4800_v47  ;;  %1976 = vmatprep.subr.bf16.mxu0 %v4633_v20  ;;  %v594_v47 = vld [vmem:[%s6821_s1 + $0x770] sm:$0xff]  ;;  %v527_v3 = vld [vmem:[%s6821_s1 + $0x558] sm:$0xff] }
  0xd7   : > { %2009 = vmatprep.subr.bf16.mxu1 %v4793_v49  ;;  %v4857_v51 = vcombine.high %v590_v59, %v594_v47  ;;  %v4856_v61 = vcombine.low %v590_v59, %v594_v47  ;;  %v438_v20 = vld [vmem:[%s6821_s1 + $0x290] sm:$0xff]  ;;  %v411_v59 = vld [vmem:[%s6821_s1 + $0x1b8] sm:$0xff] }
  0xd8   : > { %v543_v47 = vld [vmem:[%s6821_s1 + $0x5d8] sm:$0xff] }
  0xd9   : > { %1977 = vmatpush1.bf16.msra.mxu0 %v4632_v23  ;;  %v562_v23 = vld [vmem:[%s6821_s1 + $0x670] sm:$0xff] }
  0xda   : > { %2010 = vmatpush1.bf16.msra.mxu1 %v4792_v50  ;;  %1978 = vmatprep.subr.bf16.mxu0 %v4625_v36  ;;  %v4737_v50 = vcombine.high %v470_v44, %v474_v46  ;;  %v4697_v36 = vcombine.high %v430_v30, %v434_v31  ;;  %v407_v46 = vld [vmem:[%s6821_s1 + $0x198] sm:$0xff] }
  0xdb   : > { %2011 = vmatprep.subr.bf16.mxu1 %v4785_v63 }
  0xdd   : > { %1979 = vmatpush1.bf16.msra.mxu0 %v4624_v35 }
  0xde   : > { %2012 = vmatpush1.bf16.msra.mxu1 %v4784_v62  ;;  %1980 = vmatprep.subr.bf16.mxu0 %v4745_v41  ;;  %v4729_v62 = vcombine.high %v462_v56, %v466_v52  ;;  %v4696_v41 = vcombine.low %v430_v30, %v434_v31  ;;  %v367_v31 = vld [vmem:[%s6821_s1 + $0x58] sm:$0xff] }
  0xdf   : > { %2013 = vmatprep.subr.bf16.mxu1 %v4777_v12  ;;  %v450_v12 = vld [vmem:[%s6821_s1 + $0x2f0] sm:$0xff] }
  0xe1   : > { %1981 = vmatpush2.bf16.msra.mxu0 %v4744_v48  ;;  %v547_v48 = vld [vmem:[%s6821_s1 + $0x5f8] sm:$0xff] }
  0xe2   : > { %2014 = vmatpush1.bf16.msra.mxu1 %v4776_v11  ;;  %1982 = vmatprep.subr.bf16.mxu0 %v4737_v50  ;;  %v446_v11 = vld [vmem:[%s6821_s1 + $0x2d0] sm:$0xff] }
  0xe3   : > { %2015 = vmatprep.subr.bf16.mxu1 %v4769_v25  ;;  %v4713_v17 = vcombine.high %v446_v11, %v450_v12 }
  0xe5   : > { %1983 = vmatpush2.bf16.msra.mxu0 %v4736_v60  ;;  %v539_v60 = vld [vmem:[%s6821_s1 + $0x5b8] sm:$0xff] }
  0xe6   : > { %2016 = vmatpush1.bf16.msra.mxu1 %v4768_v24  ;;  %1984 = vmatprep.subr.bf16.mxu0 %v4729_v62  ;;  %v4712_v24 = vcombine.low %v446_v11, %v450_v12  ;;  %v4810_v62 = vcombine.low %v543_v47, %v547_v48  ;;  %v383_v12 = vld [vmem:[%s6821_s1 + $0xd8] sm:$0xff] }
  0xe7   : > { %2017 = vmatprep.subr.bf16.mxu1 %v4761_v38  ;;  %v422_v38 = vld [vmem:[%s6821_s1 + $0x210] sm:$0xff] }
  0xe8   : > { %v4689_v44 = vcombine.high %v422_v38, %v426_v39 }
  0xea   : > { %2018 = vmatpush1.bf16.msra.mxu1 %v4760_v37 }
 0x10c   : > { %v1875_v54 = vpop.f32.mrf.mxu1 }
 0x10e   : > { %v1877_v0 = vpop.f32.mrf.mxu1 }
 0x110   : > { %v1879_v5 = vpop.f32.mrf.mxu1 }
 0x111   : > { %v4728_v5 = vcombine.low %v462_v56, %v466_v52  ;;  %v4811_v56 = vcombine.high %v543_v47, %v547_v48  ;;  %v399_v52 = vld [vmem:[%s6821_s1 + $0x158] sm:$0xff] }
 0x112   : > { %v1880_v13 = vpop.f32.mrf.mxu1  ;;  %v1834_v15 = vpop.f32.mrf.mxu0  ;;  %v483_v47 = vld [vmem:[%s6821_s1 + $0x3f8] sm:$0xff] }
 0x113   : > { %v5861_v19 = vadd.f32 %v1875_v54, %v1834_v15  ;;  %v582_v54 = vld [vmem:[%s6821_s1 + $0x710] sm:$0xff]  ;;  %1985 = vmatpush2.bf16.msra.mxu0 %v4728_v5  ;;  %v531_v5 = vld [vmem:[%s6821_s1 + $0x578] sm:$0xff] }
 0x114   : > { %v1836_v22 = vpop.f32.mrf.mxu0  ;;  %v4849_v63 = vcombine.high %v582_v54, %v586_v55  ;;  %v4848_v6 = vcombine.low %v582_v54, %v586_v55  ;;  %v566_v13 = vld [vmem:[%s6821_s1 + $0x690] sm:$0xff]  ;;  %v403_v54 = vld [vmem:[%s6821_s1 + $0x178] sm:$0xff]  ;;  %v4795_v11 = vcombine.high %v527_v3, %v531_v5 }
 0x115   : > { %v5867_v26 = vadd.f32 %v4865_v14, %v5861_v19  ;;  %v5869_v27 = vadd.f32 %v1877_v0, %v1836_v22  ;;  %v454_v0 = vld [vmem:[%s6821_s1 + $0x310] sm:$0xff]  ;;  %v535_v55 = vld [vmem:[%s6821_s1 + $0x598] sm:$0xff] }
 0x116   : > { %v1838_v28 = vpop.f32.mrf.mxu0  ;;  %v4721_v9 = vcombine.high %v454_v0, %v458_v1  ;;  %v570_v14 = vld [vmem:[%s6821_s1 + $0x6b0] sm:$0xff]  ;;  %v4720_v15 = vcombine.low %v454_v0, %v458_v1  ;;  %v4803_v0 = vcombine.high %v535_v55, %v539_v60  ;;  %v391_v1 = vld [vmem:[%s6821_s1 + $0x118] sm:$0xff] }
 0x117   : > { %v2163_v32 = vmul.f32 %v5867_v26, %v5461_v58  ;;  %v486_v58 = vld [vmem:[%s6821_s1 + $0x410] sm:$0xff]  ;;  %v4833_v18 = vcombine.high %v566_v13, %v570_v14  ;;  %v4832_v25 = vcombine.low %v566_v13, %v570_v14  ;;  %v4705_v28 = vcombine.high %v438_v20, %v442_v21  ;;  %v387_v13 = vld [vmem:[%s6821_s1 + $0xf8] sm:$0xff] }
 0x118   : > { %v1839_v34 = vpop.f32.mrf.mxu0  ;;  %v4753_v45 = vcombine.high %v486_v58, %v490_v43  ;;  %v4752_v49 = vcombine.low %v486_v58, %v490_v43  ;;  %1986 = vmatprep.subr.bf16.mxu0 %v4721_v9  ;;  %v558_v22 = vld [vmem:[%s6821_s1 + $0x650] sm:$0xff]  ;;  %v419_v58 = vld [vmem:[%s6821_s1 + $0x1f8] sm:$0xff]  ;;  %v4802_v9 = vcombine.low %v535_v55, %v539_v60 }
 0x119   : > { %2165 = vrot.lane.b32.xlu0 %v2163_v32, %s5275_s28  ;;  %1987 = vmatpush2.bf16.msra.mxu0 %v4720_v15  ;;  %v4825_v29 = vcombine.high %v558_v22, %v562_v23  ;;  %v550_v32 = vld [vmem:[%s6821_s1 + $0x610] sm:$0xff]  ;;  %v4704_v34 = vcombine.low %v438_v20, %v442_v21  ;;  %v4824_v35 = vcombine.low %v558_v22, %v562_v23  ;;  %v519_v14 = vld [vmem:[%s6821_s1 + $0x518] sm:$0xff] }
 0x11a   : > { %2019 = vmatprep.subr.bf16.mxu1 %v4753_v45  ;;  %1988 = vmatprep.subr.bf16.mxu0 %v4713_v17  ;;  %v4817_v37 = vcombine.high %v550_v32, %v554_v33  ;;  %v4816_v43 = vcombine.low %v550_v32, %v554_v33  ;;  %v4683_v45 = vcombine.high %v415_v40, %v419_v58  ;;  %v523_v15 = vld [vmem:[%s6821_s1 + $0x538] sm:$0xff] }
 0x11b   : > { %2020 = vmatpush1.bf16.msra.mxu1 %v4752_v49  ;;  %v4688_v49 = vcombine.low %v422_v38, %v426_v39  ;;  %v4682_v50 = vcombine.low %v415_v40, %v419_v58  ;;  %v4794_v17 = vcombine.low %v527_v3, %v531_v5  ;;  %v4787_v20 = vcombine.high %v519_v14, %v523_v15  ;;  %v375_v21 = vld [vmem:[%s6821_s1 + $0x98] sm:$0xff] }
 0x11c   : > { %2025 = vmatprep.subr.bf16.mxu1 %v4857_v51  ;;  %v4675_v51 = vcombine.high %v407_v46, %v411_v59  ;;  %v379_v22 = vld [vmem:[%s6821_s1 + $0xb8] sm:$0xff] }
 0x11d   : > { %1989 = vmatpush2.bf16.msra.mxu0 %v4712_v24  ;;  %v511_v23 = vld [vmem:[%s6821_s1 + $0x4d8] sm:$0xff] }
 0x11e   : > { %1990 = vmatprep.subr.bf16.mxu0 %v4705_v28  ;;  %v515_v24 = vld [vmem:[%s6821_s1 + $0x4f8] sm:$0xff]  ;;  %v4786_v28 = vcombine.low %v519_v14, %v523_v15 }
 0x11f   : > { %2026 = vmatpush2.bf16.msra.mxu1 %v4856_v61  ;;  %v4674_v61 = vcombine.low %v407_v46, %v411_v59  ;;  %v4779_v30 = vcombine.high %v511_v23, %v515_v24  ;;  %v371_v32 = vld [vmem:[%s6821_s1 + $0x78] sm:$0xff] }
 0x120   : > { %2027 = vmatprep.subr.bf16.mxu1 %v4849_v63  ;;  %v4667_v63 = vcombine.high %v399_v52, %v403_v54  ;;  %v503_v33 = vld [vmem:[%s6821_s1 + $0x498] sm:$0xff] }
 0x121   : > { %1991 = vmatpush2.bf16.msra.mxu0 %v4704_v34  ;;  %v507_v34 = vld [vmem:[%s6821_s1 + $0x4b8] sm:$0xff] }
 0x122   : > { %1992 = vmatprep.subr.bf16.mxu0 %v4697_v36  ;;  %v4778_v36 = vcombine.low %v511_v23, %v515_v24  ;;  %v4771_v38 = vcombine.high %v503_v33, %v507_v34  ;;  %v359_v39 = vld [vmem:[%s6821_s1 + $0x18] sm:$0xff] }
 0x123   : > { %2028 = vmatpush2.bf16.msra.mxu1 %v4848_v6  ;;  %v4666_v6 = vcombine.low %v399_v52, %v403_v54  ;;  %v363_v40 = vld [vmem:[%s6821_s1 + $0x38] sm:$0xff] }
 0x124   : > { %2029 = vmatprep.subr.bf16.mxu1 %v4841_v10  ;;  %v4659_v10 = vcombine.high %v391_v1, %v395_v2  ;;  %v495_v58 = vld [vmem:[%s6821_s1 + $0x458] sm:$0xff] }
 0x125   : > { %1993 = vmatpush2.bf16.msra.mxu0 %v4696_v41  ;;  %v499_v41 = vld [vmem:[%s6821_s1 + $0x478] sm:$0xff] }
 0x126   : > { %1994 = vmatprep.subr.bf16.mxu0 %v4689_v44  ;;  %v4770_v44 = vcombine.low %v503_v33, %v507_v34  ;;  %v4763_v46 = vcombine.high %v495_v58, %v499_v41  ;;  %v479_v59 = vld [vmem:[%s6821_s1 + $0x3d8] sm:$0xff] }
 0x127   : > { %2030 = vmatpush2.bf16.msra.mxu1 %v4840_v16  ;;  %v4658_v16 = vcombine.low %v391_v1, %v395_v2  ;;  %v487_v48 = vld [vmem:[%s6821_s1 + $0x418] sm:$0xff] }
 0x128   : > { %2031 = vmatprep.subr.bf16.mxu1 %v4833_v18  ;;  %v4651_v18 = vcombine.high %v383_v12, %v387_v13  ;;  %v471_v54 = vld [vmem:[%s6821_s1 + $0x398] sm:$0xff] }
 0x129   : > { %1995 = vmatpush2.bf16.msra.mxu0 %v4688_v49  ;;  %v491_v49 = vld [vmem:[%s6821_s1 + $0x438] sm:$0xff] }
 0x12a   : > { %2087 = vmatprep.subr.bf16.mxu0 %v4811_v56  ;;  %v4747_v56 = vcombine.high %v479_v59, %v483_v47  ;;  %v4755_v52 = vcombine.high %v487_v48, %v491_v49  ;;  %v475_v55 = vld [vmem:[%s6821_s1 + $0x3b8] sm:$0xff] }
 0x12b   : > { %2032 = vmatpush2.bf16.msra.mxu1 %v4832_v25  ;;  %v4650_v25 = vcombine.low %v383_v12, %v387_v13  ;;  %v591_v60 = vld [vmem:[%s6821_s1 + $0x758] sm:$0xff] }
 0x12c   : > { %2033 = vmatprep.subr.bf16.mxu1 %v4825_v29  ;;  %1997 = vmatmul.mubr.bf16.vlgmr.msra.gmra.mxu0 %v5581_v7  ;;  %v4643_v29 = vcombine.high %v375_v21, %v379_v22  ;;  %v463_v2 = vld [vmem:[%s6821_s1 + $0x358] sm:$0xff] }
 0x12d   : > { %2088 = vmatpush1.bf16.msra.mxu0 %v4810_v62  ;;  %4863 = vmatprep.mubr.msk.bf16.mxu0 %vm1796_vm0, %v5456_v57  ;;  %v4746_v62 = vcombine.low %v479_v59, %v483_v47  ;;  %v467_v3 = vld [vmem:[%s6821_s1 + $0x378] sm:$0xff] }
 0x12e   : > { %2089 = vmatprep.subr.bf16.mxu0 %v4803_v0  ;;  %v4739_v0 = vcombine.high %v471_v54, %v475_v55  ;;  %v583_v5 = vld [vmem:[%s6821_s1 + $0x718] sm:$0xff] }
 0x12f   : > { %2034 = vmatpush2.bf16.msra.mxu1 %v4824_v35  ;;  %v4642_v35 = vcombine.low %v375_v21, %v379_v22  ;;  %v455_v13 = vld [vmem:[%s6821_s1 + $0x318] sm:$0xff] }
 0x130   : > { %2035 = vmatprep.subr.bf16.mxu1 %v4817_v37  ;;  %v4635_v37 = vcombine.high %v367_v31, %v371_v32  ;;  %v459_v14 = vld [vmem:[%s6821_s1 + $0x338] sm:$0xff] }
 0x131   : > { %2090 = vmatpush1.bf16.msra.mxu0 %v4802_v9  ;;  %v4738_v9 = vcombine.low %v471_v54, %v475_v55  ;;  %v575_v15 = vld [vmem:[%s6821_s1 + $0x6d8] sm:$0xff]  ;;  %v5279_v55 = vmov 0.0  }
 0x132   : > { %2091 = vmatprep.subr.bf16.mxu0 %v4795_v11  ;;  %v4731_v11 = vcombine.high %v463_v2, %v467_v3  ;;  %v447_v22 = vld [vmem:[%s6821_s1 + $0x2d8] sm:$0xff] }
 0x133   : > { %2036 = vmatpush2.bf16.msra.mxu1 %v4816_v43  ;;  %v4634_v43 = vcombine.low %v367_v31, %v371_v32  ;;  %v451_v23 = vld [vmem:[%s6821_s1 + $0x2f8] sm:$0xff] }
 0x134   : > { %2046 = vmatprep.subr.bf16.mxu1 %v4683_v45  ;;  %v4627_v45 = vcombine.high %v359_v39, %v363_v40  ;;  %v567_v24 = vld [vmem:[%s6821_s1 + $0x698] sm:$0xff] }
 0x135   : > { %2092 = vmatpush1.bf16.msra.mxu0 %v4794_v17  ;;  %v4730_v17 = vcombine.low %v463_v2, %v467_v3  ;;  %v439_v32 = vld [vmem:[%s6821_s1 + $0x298] sm:$0xff] }
 0x136   : > { %2038 = vmatmul.mubr.bf16.vlgmr.msra.gmra.mxu1 %v5575_v4  ;;  %2093 = vmatprep.subr.bf16.mxu0 %v4787_v20  ;;  %v4723_v20 = vcombine.high %v455_v13, %v459_v14  ;;  %v443_v33 = vld [vmem:[%s6821_s1 + $0x2b8] sm:$0xff] }
 0x137   : > { %2047 = vmatpush1.bf16.msra.mxu1 %v4682_v50  ;;  %2078 = vmatprep.mubr.bf16.mxu1 %v5451_v53  ;;  %v4626_v50 = vcombine.low %v359_v39, %v363_v40  ;;  %v559_v34 = vld [vmem:[%s6821_s1 + $0x658] sm:$0xff] }
 0x138   : > { %2048 = vmatprep.subr.bf16.mxu1 %v4675_v51  ;;  %v4762_v51 = vcombine.low %v495_v58, %v499_v41  ;;  %v431_v40 = vld [vmem:[%s6821_s1 + $0x258] sm:$0xff] }
 0x139   : > { %2094 = vmatpush1.bf16.msra.mxu0 %v4786_v28  ;;  %v4722_v28 = vcombine.low %v455_v13, %v459_v14  ;;  %v435_v58 = vld [vmem:[%s6821_s1 + $0x278] sm:$0xff] }
 0x13a   : > { %2095 = vmatprep.subr.bf16.mxu0 %v4779_v30  ;;  %v4715_v30 = vcombine.high %v447_v22, %v451_v23  ;;  %v551_v41 = vld [vmem:[%s6821_s1 + $0x618] sm:$0xff] }
 0x13b   : > { %2049 = vmatpush1.bf16.msra.mxu1 %v4674_v61  ;;  %v595_v61 = vld [vmem:[%s6821_s1 + $0x778] sm:$0xff] }
 0x13c   : > { %2050 = vmatprep.subr.bf16.mxu1 %v4667_v63  ;;  %v4754_v63 = vcombine.low %v487_v48, %v491_v49  ;;  %v4859_v1 = vcombine.high %v591_v60, %v595_v61  ;;  %v423_v47 = vld [vmem:[%s6821_s1 + $0x218] sm:$0xff]  ;;  %v4698_v49 = vcombine.low %v431_v40, %v435_v58 }
 0x13d   : > { %2096 = vmatpush1.bf16.msra.mxu0 %v4778_v36  ;;  %v4714_v36 = vcombine.low %v447_v22, %v451_v23  ;;  %v427_v48 = vld [vmem:[%s6821_s1 + $0x238] sm:$0xff] }
 0x13e   : > { %2097 = vmatprep.subr.bf16.mxu0 %v4771_v38  ;;  %v4707_v38 = vcombine.high %v439_v32, %v443_v33  ;;  %v4690_v54 = vcombine.low %v423_v47, %v427_v48 }
 0x13f   : > { %2051 = vmatpush1.bf16.msra.mxu1 %v4666_v6  ;;  %v587_v6 = vld [vmem:[%s6821_s1 + $0x738] sm:$0xff] }
 0x140   : > { %2052 = vmatprep.subr.bf16.mxu1 %v4659_v10  ;;  %v4858_v10 = vcombine.low %v591_v60, %v595_v61  ;;  %v4851_v12 = vcombine.high %v583_v5, %v587_v6  ;;  %v6189_v61 = vld [vmem:[%s6824_s4] sm:$0xff] }
 0x141   : > { %2098 = vmatpush1.bf16.msra.mxu0 %v4770_v44  ;;  %v4706_v44 = vcombine.low %v439_v32, %v443_v33 }
 0x142   : > { %2099 = vmatprep.subr.bf16.mxu0 %v4763_v46  ;;  %v4699_v46 = vcombine.high %v431_v40, %v435_v58 }
 0x143   : > { %2053 = vmatpush1.bf16.msra.mxu1 %v4658_v16  ;;  %v579_v16 = vld [vmem:[%s6821_s1 + $0x6f8] sm:$0xff] }
 0x144   : > { %2054 = vmatprep.subr.bf16.mxu1 %v4651_v18  ;;  %v4850_v18 = vcombine.low %v583_v5, %v587_v6  ;;  %v4843_v21 = vcombine.high %v575_v15, %v579_v16  ;;  %v2151_v5 = vmul.f32 %v5638_v42, %v5867_v26  ;;  %v4873_v6 = vld [vmem:[%s6823_s3 + $0x1] ss:$0 sm:$0xff] }
 0x145   : > { %2100 = vmatpush1.bf16.msra.mxu0 %v4762_v51  ;;  %v4691_v51 = vcombine.high %v423_v47, %v427_v48 }
 0x146   : > { %2101 = vmatprep.subr.bf16.mxu0 %v4755_v52 }
 0x147   : > { %2055 = vmatpush1.bf16.msra.mxu1 %v4650_v25  ;;  %v571_v25 = vld [vmem:[%s6821_s1 + $0x6b8] sm:$0xff] }
 0x148   : > { %2056 = vmatprep.subr.bf16.mxu1 %v4643_v29  ;;  %v4842_v29 = vcombine.low %v575_v15, %v579_v16  ;;  %v4835_v31 = vcombine.high %v567_v24, %v571_v25 }
 0x149   : > { %2102 = vmatpush1.bf16.msra.mxu0 %v4754_v63 }
 0x14a   : > { %2107 = vmatprep.subr.bf16.mxu0 %v4859_v1 }
 0x14b   : > { %2057 = vmatpush1.bf16.msra.mxu1 %v4642_v35  ;;  %v563_v35 = vld [vmem:[%s6821_s1 + $0x678] sm:$0xff] }
 0x14c   : > { %2058 = vmatprep.subr.bf16.mxu1 %v4635_v37  ;;  %v4834_v37 = vcombine.low %v567_v24, %v571_v25  ;;  %v4827_v39 = vcombine.high %v559_v34, %v563_v35 }
 0x14d   : > { %2108 = vmatpush2.bf16.msra.mxu0 %v4858_v10 }
 0x14e   : > { %2109 = vmatprep.subr.bf16.mxu0 %v4851_v12 }
 0x14f   : > { %2059 = vmatpush1.bf16.msra.mxu1 %v4634_v43  ;;  %v555_v43 = vld [vmem:[%s6821_s1 + $0x638] sm:$0xff] }
 0x150   : > { %2060 = vmatprep.subr.bf16.mxu1 %v4627_v45  ;;  %v4826_v45 = vcombine.low %v559_v34, %v563_v35  ;;  %v4819_v59 = vcombine.high %v551_v41, %v555_v43 }
 0x151   : > { %2110 = vmatpush2.bf16.msra.mxu0 %v4850_v18 }
 0x152   : > { %2111 = vmatprep.subr.bf16.mxu0 %v4843_v21  ;;  %v6216_v21 = vld [vmem:[%s5435_s24] sm:$0xff] }
 0x153   : > { %2061 = vmatpush1.bf16.msra.mxu1 %v4626_v50  ;;  %v4818_v50 = vcombine.low %v551_v41, %v555_v43  ;;  %v2376_v43 = vsel %vm2371_vm3, %v5581_v7, 0 }
 0x154   : > { %2062 = vmatprep.subr.bf16.mxu1 %v4747_v56  ;;  %v6166_v56 = vld [vmem:[%s6825_s5] sm:$0xff] }
 0x155   : > { %2112 = vmatpush2.bf16.msra.mxu0 %v4842_v29  ;;  %v6170_v52 = vpack.c.bf16 %v6166_v56, %v6166_v56  ;;  %v2266_v22 = vmul.f32 %v6216_v21, %v6166_v56 }
 0x156   : > { %2113 = vmatprep.subr.bf16.mxu0 %v4835_v31 }
 0x157   : > { %2063 = vmatpush2.bf16.msra.mxu1 %v4746_v62  ;;  %v6175_v60 = vsel %vm2173_vm1, %v6170_v52, 0  ;;  %v6193_v62 = vpack.c.bf16 %v6189_v61, %v6189_v61 }
 0x158   : > { %2064 = vmatprep.subr.bf16.mxu1 %v4739_v0  ;;  %v2162_v0 = vmul.f32 %v5586_v8, %v5867_v26 }
 0x159   : > { %2114 = vmatpush2.bf16.msra.mxu0 %v4834_v37  ;;  %v6197_v63 = vsel %vm2173_vm1, %v6193_v62, 0 }
 0x15a   : > { %2115 = vmatprep.subr.bf16.mxu0 %v4827_v39 }
 0x15b   : > { %2065 = vmatpush2.bf16.msra.mxu1 %v4738_v9 }
 0x15c   : > { %2066 = vmatprep.subr.bf16.mxu1 %v4731_v11 }
 0x15d   : > { %2116 = vmatpush2.bf16.msra.mxu0 %v4826_v45  ;;  %v4864_v45 = vld [vmem:[%s6822_s2] ss:$0 sm:$0xff] }
 0x15e   : > { %2117 = vmatprep.subr.bf16.mxu0 %v4819_v59  ;;  %v2139_v47 = vadd.f32 %v4864_v45, %v5861_v19 }
 0x15f   : > { %2067 = vmatpush2.bf16.msra.mxu1 %v4730_v17  ;;  %v2284_v17 = vpop.permute.xlu1 %2283 }
 0x160   : > { %2068 = vmatprep.subr.bf16.mxu1 %v4723_v20  ;;  %v2286_v31 = vsel %vm2173_vm1, %v2284_v17, 0 }
 0x161   : > { %2118 = vmatpush2.bf16.msra.mxu0 %v4818_v50 }
 0x162   : > { %4988 = vmatprep.subr.bf16.mxu0 %v5279_v55 }
 0x163   : > { %2069 = vmatpush2.bf16.msra.mxu1 %v4722_v28  ;;  %v2270_v25 = vpop.permute.xlu1 %2269 }
 0x164   : > { %2070 = vmatprep.subr.bf16.mxu1 %v4715_v30  ;;  %2120 = vmatmul.mubr.bf16.vlgmr.msra.gmra.mxu0 %v5575_v4  ;;  %v2272_v32 = vadd.f32 %v2270_v25, %v2266_v22 }
 0x165   : > { %4989 = vmatpush3.bf16.xpose.msra.mxu0 %v6175_v60  ;;  %4990 = vmatprep.mubr.msk.bf16.mxu0 %vm5280_vm2, %v5279_v55 }
 0x166   : > { %5000 = vmatprep.subr.bf16.mxu0 %v5279_v55  ;;  %v2273_v37 = vpack.c.bf16 %v2272_v32, %v2272_v32 }
 0x167   : > { %2071 = vmatpush2.bf16.msra.mxu1 %v4714_v36 }
 0x168   : > { %2072 = vmatprep.subr.bf16.mxu1 %v4707_v38  ;;  %v2146_v38 = vmul.f32 %v6166_v56, %v5867_v26  ;;  %v2329_v41 = vsel %vm2173_vm1, %v2273_v37, 0  ;;  %v2547_v26 = vpop.permute.xlu1 %2546 }
 0x169   : > { %v2670_v48 = vmul.f32 %v6216_v21, %v2547_v26 }
 0x16b   : > { %2073 = vmatpush2.bf16.msra.mxu1 %v4706_v44 }
 0x16c   : > { %2074 = vmatprep.subr.bf16.mxu1 %v4699_v46  ;;  %v2526_v50 = vpop.permute.xlu1 %2525 }
 0x16f   : > { %2075 = vmatpush2.bf16.msra.mxu1 %v4698_v49  ;;  %v2140_v49 = vpack.c.bf16 %v2139_v47, %v2139_v47 }
 0x170   : > { %2076 = vmatprep.subr.bf16.mxu1 %v4691_v51 }
 0x173   : > { %2077 = vmatpush2.bf16.msra.mxu1 %v4690_v54 }
 0x174   : > { %4994 = vmatprep.subr.bf16.mxu1 %v5279_v55 }
 0x176   : > { %2079 = vmatmul.mubr.bf16.vlgmr.msra.gmra.mxu1 %v5581_v7 }
 0x177   : > { %4996 = vmatprep.mubr.msk.bf16.mxu1 %vm5280_vm2, %v5279_v55  ;;  %4995 = vmatpush3.bf16.xpose.msra.mxu1 %v6197_v63 }
 0x178   : > { %5006 = vmatprep.subr.bf16.mxu1 %v5279_v55 }
 0x180   : > { %v1957_v9 = vpop.f32.mrf.mxu0 }
 0x182   : > { %v1959_v11 = vpop.f32.mrf.mxu0 }
 0x184   : > { %v1961_v14 = vpop.f32.mrf.mxu0 }
 0x186   : > { %v1962_v42 = vpop.f32.mrf.mxu0 }
 0x18b   : > { %v2166_v1 = vpop.permute.xlu0 %2165 }
 0x18c   : > { %v2168_v2 = vsub.f32 %v2162_v0, %v2166_v1  ;;  %v2656_v1 = vmul.f32 %v6216_v21, %v2526_v50 }
 0x18e   : > { %v2169_v3 = vpack.c.bf16 %v2168_v2, %v2168_v2  ;;  %v4872_v2 = vld [vmem:[%s6822_s2 + $0x1] ss:$0 sm:$0xff] }
 0x190   : > { %2171 = vrot.lane.b32.xlu0 %v2169_v3, %s5276_s29 }
 0x191   : > { %v1916_v10 = vpop.f32.mrf.mxu1 }
 0x192   : > { %v6211_v8 = vadd.f32 %v1957_v9, %v1916_v10 }
 0x193   : > { %v1918_v12 = vpop.f32.mrf.mxu1 }
 0x194   : > { %2153 = vrot.lane.b32.xlu0 %v2151_v5, %s5276_s29  ;;  %v6213_v13 = vadd.f32 %v1959_v11, %v1918_v12 }
 0x195   : > { %v1920_v15 = vpop.f32.mrf.mxu1 }
 0x197   : > { %v1921_v16 = vpop.f32.mrf.mxu1 }
 0x198   : > { %2516 = vrot.lane.b32.xlu0 %v4873_v6, %s5277_s18 }
 0x1ec   : > { %v1998_v23 = vpop.f32.mrf.mxu0 }
 0x1ee   : > { %v2000_v29 = vpop.f32.mrf.mxu0 }
 0x1f0   : > { %v2002_v35 = vpop.f32.mrf.mxu0 }
 0x1f2   : > { %v2003_v36 = vpop.f32.mrf.mxu0 }
 0x1f3   : > { %v5281_v36 = vmov 0  }
 0x1f6   : > { %v2039_v18 = vpop.f32.mrf.mxu1 }
 0x1f7   : > { %v6220_v28 = vadd.f32 %v2039_v18, %v1998_v23  ;;  %v2421_v18 = vlaneseq  ;;  %v2132_v23 = vld [vmem:[%s341_s19] sm:$0x1]  ;;  %s5289_s19 = smov 24  }
 0x1f8   : > { %v2041_v20 = vpop.f32.mrf.mxu1  ;;  %vm2419_vm4 = vcmp.gt.f32.partialorder %v2132_v23, 0.5 }
 0x1f9   : > { %v6223_v33 = vadd.f32 %v2041_v20, %v2000_v29  ;;  %v2420_v37 = vsel %vm2419_vm4, 1, %v5281_v36 }
 0x1fa   : > { %v2043_v24 = vpop.f32.mrf.mxu1 }
 0x1fb   : > { %v6286_v24 = vshrl.u32 %v2421_v18, 7 }
 0x1fc   : > { %v2044_v30 = vpop.f32.mrf.mxu1 }
 0x1fd   : > { %v6289_v32 = vsub.s32 0, %v6286_v24 }
 0x202   : > { %v2172_v34 = vpop.permute.xlu0 %2171 }
 0x203   : > { %4991 = vmatmul.mubr.msk.bf16.vlgmr.msra.gmra.mxu0 %vm2173_vm1, %v2172_v34 }
 0x204   : > { %5001 = vmatpush3.bf16.xpose.msra.mxu0 %v2286_v31  ;;  %5002 = vmatprep.mubr.msk.bf16.mxu0 %vm5280_vm2, %v5279_v55 }
 0x205   : > { %5012 = vmatprep.subr.bf16.mxu0 %v5279_v55 }
 0x206   : > { %v2154_v39 = vpop.permute.xlu0 %2153 }
 0x207   : > { %v2156_v40 = vadd.f32 %v2154_v39, %v2146_v38 }
 0x209   : > { %v2157_v58 = vpack.c.bf16 %v2156_v40, %v2156_v40  ;;  %v2424_v40 = vrot.slane %v2420_v37, %v6289_v32 }
 0x20a   : > { %v2517_v44 = vpop.permute.xlu0 %2516 }
 0x20b   : > { %v6238_v46 = vadd.f32 %v2517_v44, %v5861_v19  ;;  %4997 = vmatmul.mubr.msk.bf16.vlgmr.msra.gmra.mxu1 %vm2173_vm1, %v2157_v58  ;;  %5003 = vmatmul.mubr.msk.bf16.vlgmr.msra.gmra.mxu0 %vm2173_vm1, %v6170_v52  ;;  %v6266_v51 = vadd.f32 %v2517_v44, %v5869_v27  ;;  %vm6292_vm5 = vcmp.eq.s32.totalorder %v2424_v40, 1 }
 0x20c   : > { %5007 = vmatpush3.bf16.xpose.msra.mxu1 %v2329_v41  ;;  %5013 = vmatpush3.bf16.xpose.msra.mxu0 %v2376_v43 }
 0x20d   : > { %v2549_v59 = vmul.f32 %v2547_v26, %v6238_v46  ;;  %5008 = vmatprep.mubr.msk.bf16.mxu1 %vm5280_vm2, %v5279_v55  ;;  %5014 = vmatprep.mubr.msk.bf16.mxu0 %vm5280_vm2, %v5279_v55  ;;  %v2528_v54 = vmul.f32 %v2526_v50, %v6238_v46  ;;  %v2529_v0 = vmul.f32 %v2526_v50, %v6266_v51 }
 0x20e   : > { %5018 = vmatprep.subr.bf16.mxu1 %v5279_v55  ;;  %5024 = vmatprep.subr.bf16.mxu0 %v5279_v55 }
 0x20f   : > { %2551 = vrot.lane.b32.xlu1 %v2549_v59, %s5275_s28 }
 0x213   : > { %2672 = vrot.lane.b32.xlu1 %v2670_v48, %s5275_s28  ;;  %5009 = vmatmul.mubr.msk.bf16.vlgmr.msra.gmra.mxu1 %vm2173_vm1, %v6193_v62 }
 0x214   : > { %5015 = vmatmul.mubr.msk.bf16.vlgmr.msra.gmra.mxu0 %vm2371_vm3, %v2140_v49  ;;  %5020 = vmatprep.mubr.msk.bf16.mxu1 %vm5280_vm2, %v5279_v55 }
 0x215   : > { %5025 = vmatpush3.bf16.xpose.msra.mxu0 %v6175_v60  ;;  %5026 = vmatprep.mubr.msk.bf16.mxu0 %vm5280_vm2, %v5279_v55 }
 0x216   : > { %5036 = vmatprep.subr.bf16.mxu0 %v5279_v55 }
 0x217   : > { %2521 = vrot.lane.b32.xlu1 %v6166_v56, %s5277_s18 }
 0x21b   : > { %2532 = vrot.lane.b32.xlu1 %v2528_v54, %s5276_s29 }
 0x21f   : > { %2534 = vrot.lane.b32.xlu1 %v2529_v0, %s5276_s29 }
 0x223   : > { %2660 = vrot.lane.b32.xlu1 %v2656_v1, %s5276_s29 }
 0x224   : > { %v2121_v3 = vpop.f32.mrf.mxu0 }
 0x226   : > { %v2123_v5 = vpop.f32.mrf.mxu0 }
 0x227   : > { %2504 = vrot.lane.b32.xlu1 %v4872_v2, %s5277_s18 }
 0x228   : > { %v2125_v9 = vpop.f32.mrf.mxu0 }
 0x229   : > { %v6302_v9 = vld [vmem:[%s5435_s24 + $0x8] sm:$0xff] }
 0x22a   : > { %v2126_v12 = vpop.f32.mrf.mxu0 }
 0x236   : > { %v2080_v6 = vpop.f32.mrf.mxu1 }
 0x237   : > { %v6278_v10 = vadd.f32 %v2121_v3, %v2080_v6 }
 0x238   : > { %v2082_v11 = vpop.f32.mrf.mxu1 }
 0x239   : > { %v6280_v14 = vadd.f32 %v2123_v5, %v2082_v11  ;;  %v6299_v5 = vpop.permute.xlu1 %2541  ;;  %v2657_v11 = vmul.f32 %v6302_v9, %v2526_v50 }
 0x23a   : > { %v2084_v15 = vpop.f32.mrf.mxu1  ;;  %v2545_v50 = vmul.f32 %v6299_v5, %v6266_v51  ;;  %v2668_v18 = vmul.f32 %v6216_v21, %v6299_v5 }
 0x23b   : > { %v2440_v15 = vpack.c.bf16 %v6213_v13, %v6213_v13 }
 0x23c   : > { %v2085_v42 = vpop.f32.mrf.mxu1 }
 0x23d   : > { %v2544_v42 = vmul.f32 %v6299_v5, %v6238_v46 }
 0x281   : > { %v2552_v6 = vpop.permute.xlu1 %2551 }
 0x285   : > { %v6306_v12 = vpop.permute.xlu1 %2672 }
 0x2c3   : > { %v2214_v16 = vpop.f32.mrf.mxu0 }
 0x2c5   : > { %v4992_v17 = vpop.f32.mrf.mxu0 }
 0x2c6   : > { %v2554_v17 = vsub.f32 %v2544_v42, %v2552_v6 }
 0x2c7   : > { %v2217_v20 = vpop.f32.mrf.mxu0 }
 0x2c8   : > { %v2522_v20 = vpop.permute.xlu1 %2521  ;;  %v2556_v23 = vpack.c.bf16 %v2554_v17, %v2554_v17 }
 0x2c9   : > { %v4993_v22 = vpop.f32.mrf.mxu0  ;;  %v2655_v40 = vmul.f32 %v6216_v21, %v2522_v20 }
 0x2ca   : > { %v2555_v22 = vsub.f32 %v2545_v50, %v2552_v6  ;;  %v2669_v6 = vmul.f32 %v6302_v9, %v6299_v5 }
 0x2cb   : > { %v2260_v25 = vpop.f32.mrf.mxu1  ;;  %v2322_v29 = vpop.f32.mrf.mxu0 }
 0x2cc   : > { %v2261_v58 = vadd.f32 %v2260_v25, %v2214_v16  ;;  %v6315_v16 = vpack.c.bf16 %v6220_v28, %v6220_v28  ;;  %v2675_v25 = vsub.f32 %v2668_v18, %v6306_v12  ;;  %v2533_v28 = vpop.permute.xlu1 %2532 }
 0x2cd   : > { %v4998_v30 = vpop.f32.mrf.mxu1  ;;  %v5004_v31 = vpop.f32.mrf.mxu0 }
 0x2ce   : > { %v2677_v30 = vpack.c.bf16 %v2675_v25, %v2675_v25 }
 0x2cf   : > { %v2263_v34 = vpop.f32.mrf.mxu1  ;;  %v2325_v35 = vpop.f32.mrf.mxu0 }
 0x2d0   : > { %v2535_v51 = vpop.permute.xlu1 %2534  ;;  %v2524_v34 = vmul.f32 %v2522_v20, %v6238_v46 }
 0x2d1   : > { %v4999_v38 = vpop.f32.mrf.mxu1  ;;  %v5005_v39 = vpop.f32.mrf.mxu0  ;;  %v2537_v31 = vsel %vm2536_vm7, %v2533_v28, %v2535_v51 }
 0x2d2   : > { %v2539_v35 = vadd.f32 %v2537_v31, %v2524_v34 }
 0x2d3   : > { %v2365_v41 = vpop.f32.mrf.mxu1 }
 0x2d4   : > { %v2366_v43 = vadd.f32 %v2365_v41, %v2322_v29  ;;  %v2412_v44 = vpop.f32.mrf.mxu0  ;;  %v2557_v29 = vpack.c.bf16 %v2555_v22, %v2555_v22  ;;  %v2540_v36 = vpack.c.bf16 %v2539_v35, %v2539_v35  ;;  %v2661_v37 = vpop.permute.xlu1 %2660 }
 0x2d5   : > { %v2413_v45 = vadd.f32 %v2412_v44, %v2261_v58  ;;  %v5010_v26 = vpop.f32.mrf.mxu1 }
 0x2d6   : > { %v5016_v59 = vpop.f32.mrf.mxu0 }
 0x2d7   : > { %v2418_v48 = vadd.f32 %v2413_v45, %v2366_v43  ;;  %v2368_v49 = vpop.f32.mrf.mxu1 }
 0x2d8   : > { %v2415_v54 = vpop.f32.mrf.mxu0  ;;  %v2505_v43 = vpop.permute.xlu1 %2504 }
 0x2d9   : > { %v5011_v0 = vpop.f32.mrf.mxu1  ;;  %v2426_v1 = vsel %vm6292_vm5, %v2418_v48, -1e+30  ;;  %v4881_v54 = vld [vmem:[%s6823_s3 + $0x2] ss:$0 sm:$0xff]  ;;  %v2508_v42 = vadd.f32 %v2505_v43, %v5869_v27 }
 0x2da   : > { %v5017_v2 = vpop.f32.mrf.mxu0  ;;  %v2428_v3 = vsel %vm2427_vm6, %v2426_v1, -inf }
 0x2db   : > { %2429 = vmax.xlane.f32.xlu0 %v2428_v3  ;;  %v2510_v17 = vpack.c.bf16 %v2508_v42, %v2508_v42 }
 0x2f1   : > { %2662 = vrot.lane.b32.xlu0 %v2657_v11, %s5276_s29  ;;  %v2676_v11 = vsub.f32 %v2669_v6, %v6306_v12 }
 0x2f5   : > { %2444 = vrot.lane.b32.xlu0 %v2440_v15, %s5282_s20  ;;  %v2678_v15 = vpack.c.bf16 %v2676_v11, %v2676_v11 }
 0x2f9   : > { %2446 = vrot.lane.b32.xlu0 %v6315_v16, %s5282_s20 }
 0x2fd   : > { %2560 = vrot.lane.b32.xlu0 %v2556_v23, %s5283_s21 }
 0x301   : > { %2562 = vrot.lane.b32.xlu0 %v2557_v29, %s5283_s21 }
 0x305   : > { %2681 = vrot.lane.b32.xlu0 %v2677_v30, %s5283_s21 }
 0x309   : > { %2785 = vrot.lane.b32.xlu0 %v5581_v7, %s5284_s22  ;;  %v2507_v7 = vadd.f32 %v2505_v43, %v5861_v19 }
 0x30b   : > { %v2509_v48 = vpack.c.bf16 %v2507_v7, %v2507_v7 }
 0x30d   : > { %2787 = vrot.lane.b32.xlu0 %v5451_v53, %s5284_s22 }
 0x311   : > { %2610 = vrot.lane.b32.xlu0 %v2540_v36, %s5284_s22 }
 0x364   : > { %v2430_v38 = vpop.xlane.xlu0 %2429 }
 0x365   : > { %v2431_v39 = vsub.f32 %v2426_v1, %v2430_v38 }
 0x367   : > { %v2432_v58 = vmul.f32 1.442695, %v2431_v39 }
 0x368   : > { %v2663_v41 = vpop.permute.xlu0 %2662 }
 0x369   : > { %5230 = vpow2.f32 %v2432_v58  ;;  %v2664_v46 = vsel %vm2536_vm7, %v2661_v37, %v2663_v41 }
 0x36a   : > { %v2666_v44 = vadd.f32 %v2664_v46, %v2655_v40 }
 0x36c   : > { %v2667_v45 = vpack.c.bf16 %v2666_v44, %v2666_v44  ;;  %v2445_v26 = vpop.permute.xlu0 %2444 }
 0x36e   : > { %2730 = vrot.lane.b32.xlu0 %v2667_v45, %s5284_s22  ;;  %v4880_v45 = vld [vmem:[%s6822_s2 + $0x2] ss:$0 sm:$0xff] }
 0x370   : > { %v2447_v59 = vpop.permute.xlu0 %2446 }
 0x371   : > { %v2449_v49 = vsel %vm2448_vm8, %v2445_v26, %v2447_v59 }
 0x372   : > { %v2455_v21 = vsel %vm2453_vm9, %v2449_v49, 0  ;;  %2777 = vrot.lane.b32.xlu0 %v2509_v48, %s5284_s22 }
 0x373   : > { %5019 = vmatpush3.bf16.msra.mxu1 %v2455_v21 }
 0x374   : > { %v2561_v19 = vpop.permute.xlu0 %2560  ;;  %5030 = vmatprep.subr.bf16.mxu1 %v5279_v55 }
 0x376   : > { %v5231_v0 = vpop.eup %5230  ;;  %2915 = vrot.lane.b32.xlu0 %v4881_v54, %s5282_s20 }
 0x377   : > { %v2434_v1 = vsel %vm2427_vm6, %v5231_v0, 0.0 }
 0x378   : > { %2435 = vadd.xlane.f32.xlu1 %v2434_v1  ;;  %v2563_v2 = vpop.permute.xlu0 %2562 }
 0x379   : > { %v2565_v3 = vsel %vm2427_vm6, %v2561_v19, %v2563_v2 }
 0x37a   : > { %5027 = vmatmul.mubr.msk.bf16.vlgmr.msra.gmra.mxu0 %vm2173_vm1, %v2565_v3 }
 0x37b   : > { %5038 = vmatprep.mubr.msk.bf16.mxu0 %vm5280_vm2, %v5279_v55 }
 0x37c   : > { %v2682_v5 = vpop.permute.xlu0 %2681 }
 0x380   : > { %v2786_v12 = vpop.permute.xlu0 %2785 }
 0x384   : > { %v2788_v50 = vpop.permute.xlu0 %2787 }
 0x385   : > { %v2789_v31 = vsel %vm2781_vm10, %v2786_v12, %v2788_v50 }
 0x386   : > { %v2794_v35 = vsel %vm2371_vm3, %v2789_v31, 0 }
 0x388   : > { %v2611_v18 = vpop.permute.xlu0 %2610 }
 0x389   : > { %2683 = vrot.lane.b32.xlu1 %v2678_v15, %s5283_s21 }
 0x38d   : > { %2779 = vrot.lane.b32.xlu1 %v2510_v17, %s5284_s22 }
 0x391   : > { %2937 = vrot.lane.b32.xlu1 %v6189_v61, %s5282_s20 }
 0x395   : > { %2923 = vrot.lane.b32.xlu1 %v6189_v61, %s5285_s25 }
 0x399   : > { %2933 = vrot.lane.b32.xlu1 %v6166_v56, %s5285_s25 }
 0x3e0   : > { %v2731_v20 = vpop.permute.xlu0 %2730 }
 0x3e1   : > { %v2733_v44 = vsel %vm2173_vm1, %v2731_v20, 0 }
 0x3e4   : > { %v2778_v23 = vpop.permute.xlu0 %2777 }
 0x3e8   : > { %v2916_v30 = vpop.permute.xlu0 %2915 }
 0x3e9   : > { %v6368_v34 = vadd.f32 %v2916_v30, %v5869_v27 }
 0x401   : > { %v2436_v22 = vpop.xlane.xlu1 %2435 }
 0x402   : > { %5232 = vrcp.f32 %v2436_v22 }
 0x405   : > { %v2684_v25 = vpop.permute.xlu1 %2683 }
 0x406   : > { %v2685_v28 = vsel %vm2427_vm6, %v2682_v5, %v2684_v25  ;;  %v4889_v25 = vld [vmem:[%s6823_s3 + $0x3] ss:$0 sm:$0xff] }
 0x407   : > { %v2687_v29 = vsel %vm2173_vm1, %v2685_v28, 0 }
 0x408   : > { %5037 = vmatpush3.bf16.xpose.msra.mxu0 %v2687_v29 }
 0x409   : > { %v2780_v51 = vpop.permute.xlu1 %2779  ;;  %5048 = vmatprep.subr.bf16.mxu0 %v5279_v55 }
 0x40a   : > { %v2782_v41 = vsel %vm2781_vm10, %v2778_v23, %v2780_v51 }
 0x40d   : > { %v2938_v36 = vpop.permute.xlu1 %2937 }
 0x40e   : > { %v2940_v37 = vmul.f32 %v2938_v36, %v6368_v34  ;;  %v3048_v39 = vmul.f32 %v6302_v9, %v2938_v36 }
 0x40f   : > { %v5233_v38 = vpop.eup %5232  ;;  %5039 = vmatmul.mubr.msk.bf16.vlgmr.msra.gmra.mxu0 %vm2173_vm1, %v6170_v52 }
 0x410   : > { %5049 = vmatpush3.bf16.xpose.msra.mxu0 %v2794_v35  ;;  %2942 = vrot.lane.b32.xlu1 %v2940_v37, %s5275_s28  ;;  %v2438_v40 = vmul.f32 %v5233_v38, %v5231_v0 }
 0x411   : > { %5050 = vmatprep.mubr.msk.bf16.mxu0 %vm5280_vm2, %v5279_v55  ;;  %5060 = vmatprep.subr.bf16.mxu0 %v5279_v55  ;;  %v2924_v43 = vpop.permute.xlu1 %2923 }
 0x412   : > { %v2439_v58 = vpack.c.bf16 %v2438_v40, %v2438_v40  ;;  %v2926_v46 = vmul.f32 %v2924_v43, %v6368_v34  ;;  %v3040_v7 = vmul.f32 %v6302_v9, %v2924_v43 }
 0x414   : > { %5021 = vmatmul.mubr.msk.bf16.vlgmr.msra.gmra.mxu1 %vm2427_vm6, %v2439_v58  ;;  %3050 = vrot.lane.b32.xlu1 %v3048_v39, %s5275_s28 }
 0x415   : > { %5031 = vmatpush3.bf16.xpose.msra.mxu1 %v6197_v63  ;;  %5032 = vmatprep.mubr.msk.bf16.mxu1 %vm5280_vm2, %v5279_v55  ;;  %v6412_v21 = vpop.permute.xlu1 %2933 }
 0x416   : > { %5042 = vmatprep.subr.bf16.mxu1 %v5279_v55  ;;  %v3047_v19 = vmul.f32 %v6302_v9, %v6412_v21 }
 0x417   : > { %5051 = vmatmul.mubr.msk.bf16.vlgmr.msra.gmra.mxu0 %vm2371_vm3, %v2782_v41 }
 0x418   : > { %2919 = vrot.lane.b32.xlu1 %v6166_v56, %s5282_s20  ;;  %5061 = vmatpush3.bf16.xpose.msra.mxu0 %v6175_v60 }
 0x419   : > { %5062 = vmatprep.mubr.msk.bf16.mxu0 %vm5280_vm2, %v5279_v55  ;;  %5072 = vmatprep.subr.bf16.mxu0 %v5279_v55 }
 0x41c   : > { %5033 = vmatmul.mubr.msk.bf16.vlgmr.msra.gmra.mxu1 %vm2173_vm1, %v2611_v18  ;;  %2928 = vrot.lane.b32.xlu1 %v2926_v46, %s5276_s29 }
 0x41d   : > { %5043 = vmatpush3.bf16.xpose.msra.mxu1 %v2733_v44  ;;  %5044 = vmatprep.mubr.msk.bf16.mxu1 %vm5280_vm2, %v5279_v55 }
 0x41e   : > { %5054 = vmatprep.subr.bf16.mxu1 %v5279_v55 }
 0x420   : > { %3042 = vrot.lane.b32.xlu1 %v3040_v7, %s5276_s29 }
 0x424   : > { %5045 = vmatmul.mubr.msk.bf16.vlgmr.msra.gmra.mxu1 %vm2173_vm1, %v6193_v62  ;;  %2905 = vrot.lane.b32.xlu1 %v4880_v45, %s5282_s20 }
 0x425   : > { %5056 = vmatprep.mubr.msk.bf16.mxu1 %vm5280_vm2, %v5279_v55 }
 0x428   : > { %2850 = vrot.lane.b32.xlu1 %v6315_v16, %s5277_s18 }
 0x43a   : > { %v2603_v26 = vpop.f32.mrf.mxu0 }
 0x43c   : > { %v5028_v59 = vpop.f32.mrf.mxu0 }
 0x43e   : > { %v2606_v48 = vpop.f32.mrf.mxu0 }
 0x440   : > { %v5029_v49 = vpop.f32.mrf.mxu0 }
 0x482   : > { %v6414_v54 = vpop.permute.xlu1 %2942 }
 0x486   : > { %v3051_v0 = vpop.permute.xlu1 %3050 }
 0x487   : > { %v3053_v1 = vsub.f32 %v3047_v19, %v3051_v0 }
 0x489   : > { %v3054_v2 = vpack.c.bf16 %v3053_v1, %v3053_v1 }
 0x48a   : > { %v2920_v3 = vpop.permute.xlu1 %2919 }
 0x48b   : > { %3056 = vrot.lane.b32.xlu1 %v3054_v2, %s5286_s12  ;;  %v2922_v16 = vmul.f32 %v2920_v3, %v6368_v34  ;;  %v3039_v15 = vmul.f32 %v6302_v9, %v2920_v3 }
 0x48e   : > { %v2929_v6 = vpop.permute.xlu1 %2928 }
 0x48f   : > { %v2931_v11 = vadd.f32 %v2929_v6, %v2922_v16 }
 0x491   : > { %v2932_v42 = vpack.c.bf16 %v2931_v11, %v2931_v11 }
 0x492   : > { %v3043_v17 = vpop.permute.xlu1 %3042 }
 0x493   : > { %v3045_v5 = vadd.f32 %v3043_v17, %v3039_v15  ;;  %2994 = vrot.lane.b32.xlu1 %v2932_v42, %s5287_s13  ;;  %v2936_v42 = vmul.f32 %v6412_v21, %v6368_v34 }
 0x495   : > { %v3046_v12 = vpack.c.bf16 %v3045_v5, %v3045_v5  ;;  %v2945_v17 = vsub.f32 %v2936_v42, %v6414_v54 }
 0x496   : > { %v2906_v50 = vpop.permute.xlu1 %2905 }
 0x497   : > { %3102 = vrot.lane.b32.xlu1 %v3046_v12, %s5287_s13  ;;  %v2908_v18 = vadd.f32 %v2906_v50, %v5869_v27  ;;  %v2946_v5 = vpack.c.bf16 %v2945_v17, %v2945_v17 }
 0x499   : > { %v2909_v23 = vpack.c.bf16 %v2908_v18, %v2908_v18 }
 0x49a   : > { %v2851_v20 = vpop.permute.xlu1 %2850 }
 0x49b   : > { %v2856_v22 = vsel %vm2453_vm9, %v2851_v20, 0  ;;  %3150 = vrot.lane.b32.xlu1 %v5451_v53, %s5287_s13 }
 0x49c   : > { %5055 = vmatpush3.bf16.msra.mxu1 %v2856_v22 }
 0x49d   : > { %5066 = vmatprep.subr.bf16.mxu1 %v5279_v55 }
 0x49f   : > { %3148 = vrot.lane.b32.xlu1 %v2909_v23, %s5287_s13 }
 0x4a3   : > { %3278 = vrot.lane.b32.xlu1 %v4889_v25, %s5288_s16 }
 0x4cf   : > { %v2723_v28 = vpop.f32.mrf.mxu0 }
 0x4d1   : > { %v5040_v29 = vpop.f32.mrf.mxu0 }
 0x4d3   : > { %v2726_v30 = vpop.f32.mrf.mxu0 }
 0x4d4   : > { %v6433_v51 = vpop.f32.mrf.mxu1 }
 0x4d5   : > { %v5041_v31 = vpop.f32.mrf.mxu0 }
 0x4d6   : > { %v5022_v35 = vpop.f32.mrf.mxu1 }
 0x4d7   : > { %v2830_v36 = vpop.f32.mrf.mxu0 }
 0x4d8   : > { %v2494_v37 = vpop.f32.mrf.mxu1 }
 0x4d9   : > { %v5052_v38 = vpop.f32.mrf.mxu0 }
 0x4da   : > { %v5023_v39 = vpop.f32.mrf.mxu1 }
 0x4db   : > { %v2833_v40 = vpop.f32.mrf.mxu0  ;;  %v6474_v39 = vld [vmem:[%s5435_s24 + $0x10] sm:$0xff] }
 0x4dc   : > { %v2649_v58 = vpop.f32.mrf.mxu1 }
 0x4dd   : > { %v5053_v41 = vpop.f32.mrf.mxu0  ;;  %v2650_v44 = vadd.f32 %v2649_v58, %v2603_v26 }
 0x4de   : > { %v5034_v43 = vpop.f32.mrf.mxu1 }
 0x4df   : > { %v2831_v59 = vadd.f32 %v2830_v36, %v2650_v44 }
 0x4e0   : > { %v2652_v46 = vpop.f32.mrf.mxu1 }
 0x4e1   : > { %v6497_v46 = vpack.c.bf16 %v6223_v33, %v6223_v33 }
 0x4e2   : > { %v5035_v7 = vpop.f32.mrf.mxu1 }
 0x4e3   : > { %v3217_v7 = vsel %vm2453_vm9, %v6497_v46, 0 }
 0x4e4   : > { %v2769_v45 = vpop.f32.mrf.mxu1 }
 0x4e5   : > { %v2770_v48 = vadd.f32 %v2769_v45, %v2723_v28 }
 0x4e6   : > { %v5046_v49 = vpop.f32.mrf.mxu1 }
 0x4e7   : > { %v2836_v19 = vadd.f32 %v2831_v59, %v2770_v48 }
 0x4e8   : > { %v2772_v0 = vpop.f32.mrf.mxu1 }
 0x4e9   : > { %v2837_v1 = vsel %vm6292_vm5, %v2836_v19, -1e+30 }
 0x4ea   : > { %v5047_v2 = vpop.f32.mrf.mxu1  ;;  %v2838_v3 = vsel %vm2427_vm6, %v2837_v1, -inf }
 0x4eb   : > { %2839 = vmax.xlane.f32.xlu0 %v2838_v3 }
 0x4fd   : > { %v3057_v12 = vpop.permute.xlu1 %3056 }
 0x4fe   : > { %v3059_v54 = vsel %vm2173_vm1, %v3057_v12, 0 }
 0x505   : > { %v2995_v50 = vpop.permute.xlu1 %2994 }
 0x509   : > { %v3103_v18 = vpop.permute.xlu1 %3102 }
 0x50a   : > { %v3105_v41 = vsel %vm2173_vm1, %v3103_v18, 0 }
 0x50d   : > { %v3151_v20 = vpop.permute.xlu1 %3150 }
 0x50e   : > { %v3156_v29 = vsel %vm2371_vm3, %v3151_v20, 0 }
 0x511   : > { %v3149_v34 = vpop.permute.xlu1 %3148 }
 0x515   : > { %v3279_v22 = vpop.permute.xlu1 %3278 }
 0x516   : > { %v6460_v30 = vadd.f32 %v3279_v22, %v6211_v8 }
 0x574   : > { %v2840_v16 = vpop.xlane.xlu0 %2839 }
 0x575   : > { %v2841_v6 = vsub.f32 %v2837_v1, %v2840_v16 }
 0x577   : > { %v2842_v11 = vmul.f32 1.442695, %v2841_v6 }
 0x579   : > { %5234 = vpow2.f32 %v2842_v11 }
 0x586   : > { %v5235_v15 = vpop.eup %5234 }
 0x587   : > { %v2844_v26 = vsel %vm2427_vm6, %v5235_v15, 0.0 }
 0x588   : > { %2845 = vadd.xlane.f32.xlu0 %v2844_v26 }
 0x59e   : > { %2948 = vrot.lane.b32.xlu0 %v2946_v5, %s5286_s12 }
 0x5a2   : > { %3304 = vrot.lane.b32.xlu0 %v6189_v61, %s5288_s16 }
 0x5a6   : > { %3288 = vrot.lane.b32.xlu0 %v6189_v61, %s5289_s19  ;;  %v6454_v61 = vadd.f32 %v3279_v22, %v5869_v27 }
 0x5aa   : > { %3300 = vrot.lane.b32.xlu0 %v6166_v56, %s5289_s19 }
 0x611   : > { %v2846_v21 = vpop.xlane.xlu0 %2845 }
 0x612   : > { %5236 = vrcp.f32 %v2846_v21 }
 0x615   : > { %v2949_v23 = vpop.permute.xlu0 %2948 }
 0x616   : > { %5063 = vmatmul.mubr.msk.bf16.vlgmr.msra.gmra.mxu0 %vm2173_vm1, %v2949_v23 }
 0x617   : > { %5073 = vmatpush3.bf16.xpose.msra.mxu0 %v3059_v54  ;;  %5074 = vmatprep.mubr.msk.bf16.mxu0 %vm5280_vm2, %v5279_v55 }
 0x618   : > { %5084 = vmatprep.subr.bf16.mxu0 %v5279_v55 }
 0x619   : > { %v3305_v25 = vpop.permute.xlu0 %3304 }
 0x61a   : > { %v3307_v28 = vmul.f32 %v3305_v25, %v6454_v61  ;;  %v3308_v31 = vmul.f32 %v3305_v25, %v6460_v30  ;;  %v3428_v37 = vmul.f32 %v6302_v9, %v3305_v25  ;;  %v3429_v40 = vmul.f32 %v6474_v39, %v3305_v25 }
 0x61c   : > { %3311 = vrot.lane.b32.xlu0 %v3307_v28, %s5275_s28 }
 0x61d   : > { %v3289_v58 = vpop.permute.xlu0 %3288 }
 0x61e   : > { %5075 = vmatmul.mubr.msk.bf16.vlgmr.msra.gmra.mxu0 %vm2173_vm1, %v6170_v52  ;;  %v3291_v43 = vmul.f32 %v3289_v58, %v6460_v30  ;;  %v3418_v44 = vmul.f32 %v6474_v39, %v3289_v58 }
 0x61f   : > { %v5237_v35 = vpop.eup %5236  ;;  %5085 = vmatpush3.bf16.xpose.msra.mxu0 %v3156_v29  ;;  %5086 = vmatprep.mubr.msk.bf16.mxu0 %vm5280_vm2, %v5279_v55 }
 0x620   : > { %3313 = vrot.lane.b32.xlu0 %v3308_v31, %s5275_s28  ;;  %v2848_v36 = vmul.f32 %v5237_v35, %v5235_v15  ;;  %5096 = vmatprep.subr.bf16.mxu0 %v5279_v55 }
 0x621   : > { %v3301_v17 = vpop.permute.xlu0 %3300 }
 0x622   : > { %v2849_v38 = vpack.c.bf16 %v2848_v36, %v2848_v36  ;;  %v3427_v58 = vmul.f32 %v6474_v39, %v3301_v17 }
 0x624   : > { %5057 = vmatmul.mubr.msk.bf16.vlgmr.msra.gmra.mxu1 %vm2427_vm6, %v2849_v38  ;;  %3432 = vrot.lane.b32.xlu0 %v3428_v37, %s5275_s28 }
 0x625   : > { %5067 = vmatpush3.bf16.xpose.msra.mxu1 %v6197_v63  ;;  %5068 = vmatprep.mubr.msk.bf16.mxu1 %vm5280_vm2, %v5279_v55 }
 0x626   : > { %5087 = vmatmul.mubr.msk.bf16.vlgmr.msra.gmra.mxu0 %vm2371_vm3, %v3149_v34  ;;  %5078 = vmatprep.subr.bf16.mxu1 %v5279_v55 }
 0x627   : > { %5097 = vmatpush3.bf16.xpose.msra.mxu0 %v6175_v60  ;;  %5098 = vmatprep.mubr.msk.bf16.mxu0 %vm5280_vm2, %v5279_v55 }
 0x628   : > { %3434 = vrot.lane.b32.xlu0 %v3429_v40, %s5275_s28  ;;  %5108 = vmatprep.subr.bf16.mxu0 %v5279_v55  ;;  %v3303_v40 = vmul.f32 %v3301_v17, %v6460_v30 }
 0x62c   : > { %5069 = vmatmul.mubr.msk.bf16.vlgmr.msra.gmra.mxu1 %vm2173_vm1, %v2995_v50  ;;  %3283 = vrot.lane.b32.xlu0 %v6166_v56, %s5288_s16 }
 0x62d   : > { %5079 = vmatpush3.bf16.xpose.msra.mxu1 %v3105_v41  ;;  %5080 = vmatprep.mubr.msk.bf16.mxu1 %vm5280_vm2, %v5279_v55 }
 0x62e   : > { %5090 = vmatprep.subr.bf16.mxu1 %v5279_v55 }
 0x630   : > { %3293 = vrot.lane.b32.xlu0 %v3291_v43, %s5276_s29 }
 0x634   : > { %5081 = vmatmul.mubr.msk.bf16.vlgmr.msra.gmra.mxu1 %vm2173_vm1, %v6193_v62  ;;  %3420 = vrot.lane.b32.xlu0 %v3418_v44, %s5276_s29  ;;  %v4888_v44 = vld [vmem:[%s6822_s2 + $0x3] ss:$0 sm:$0xff] }
 0x635   : > { %5091 = vmatpush3.bf16.msra.mxu1 %v3217_v7  ;;  %5092 = vmatprep.mubr.msk.bf16.mxu1 %vm5280_vm2, %v5279_v55 }
 0x636   : > { %5102 = vmatprep.subr.bf16.mxu1 %v5279_v55 }
 0x68e   : > { %v3312_v50 = vpop.permute.xlu0 %3311 }
 0x692   : > { %v3314_v23 = vpop.permute.xlu0 %3313 }
 0x693   : > { %v3315_v38 = vsel %vm2173_vm1, %v3312_v50, %v3314_v23 }
 0x694   : > { %v3317_v7 = vsub.f32 %v3303_v40, %v3315_v38  ;;  %v6561_v40 = vld [vmem:[%s6824_s4] sm:$0xff] }
 0x696   : > { %v3433_v36 = vpop.permute.xlu0 %3432 }
 0x69a   : > { %v3435_v37 = vpop.permute.xlu0 %3434 }
 0x69b   : > { %v3436_v41 = vsel %vm2173_vm1, %v3433_v36, %v3435_v37 }
 0x69e   : > { %v3284_v43 = vpop.permute.xlu0 %3283 }
 0x6d6   : > { %v2987_v56 = vpop.f32.mrf.mxu0 }
 0x6d8   : > { %v5064_v33 = vpop.f32.mrf.mxu0 }
 0x6d9   : > { %v3318_v33 = vpack.c.bf16 %v3317_v7, %v3317_v7 }
 0x6da   : > { %v2990_v45 = vpop.f32.mrf.mxu0 }
 0x6db   : > { %v3294_v45 = vpop.permute.xlu0 %3293 }
 0x6dc   : > { %v5065_v59 = vpop.f32.mrf.mxu0 }
 0x6de   : > { %v3095_v48 = vpop.f32.mrf.mxu0 }
 0x6e0   : > { %v5076_v49 = vpop.f32.mrf.mxu0 }
 0x6e2   : > { %v3098_v19 = vpop.f32.mrf.mxu0 }
 0x6e3   : > { %v3287_v19 = vmul.f32 %v3284_v43, %v6460_v30 }
 0x6e4   : > { %v6509_v0 = vpop.f32.mrf.mxu1  ;;  %v5077_v1 = vpop.f32.mrf.mxu0 }
 0x6e5   : > { %v3417_v1 = vmul.f32 %v6474_v39, %v3284_v43 }
 0x6e6   : > { %v5058_v2 = vpop.f32.mrf.mxu1  ;;  %v3192_v3 = vpop.f32.mrf.mxu0 }
 0x6e7   : > { %v3421_v2 = vpop.permute.xlu0 %3420 }
 0x6e8   : > { %v2895_v16 = vpop.f32.mrf.mxu1  ;;  %v5088_v6 = vpop.f32.mrf.mxu0 }
 0x6e9   : > { %v3424_v6 = vadd.f32 %v3421_v2, %v3417_v1 }
 0x6ea   : > { %v5059_v11 = vpop.f32.mrf.mxu1  ;;  %v3195_v15 = vpop.f32.mrf.mxu0 }
 0x6ec   : > { %v3033_v26 = vpop.f32.mrf.mxu1  ;;  %v5089_v42 = vpop.f32.mrf.mxu0 }
 0x6ed   : > { %v3034_v18 = vadd.f32 %v3033_v26, %v2987_v56  ;;  %v3438_v56 = vsub.f32 %v3427_v58, %v3436_v41 }
 0x6ee   : > { %v5070_v5 = vpop.f32.mrf.mxu1 }
 0x6ef   : > { %v3193_v21 = vadd.f32 %v3192_v3, %v3034_v18  ;;  %v3439_v59 = vpack.c.bf16 %v3438_v56, %v3438_v56  ;;  %v3297_v3 = vadd.f32 %v3294_v45, %v3287_v19 }
 0x6f0   : > { %v3036_v12 = vpop.f32.mrf.mxu1 }
 0x6f1   : > { %v3299_v11 = vpack.c.bf16 %v3297_v3, %v3297_v3 }
 0x6f2   : > { %v5071_v20 = vpop.f32.mrf.mxu1 }
 0x6f4   : > { %v3141_v34 = vpop.f32.mrf.mxu1 }
 0x6f5   : > { %v3142_v54 = vadd.f32 %v3141_v34, %v3095_v48  ;;  %v3286_v48 = vmul.f32 %v3284_v43, %v6454_v61  ;;  %v3426_v61 = vpack.c.bf16 %v3424_v6, %v3424_v6 }
 0x6f6   : > { %v5082_v22 = vpop.f32.mrf.mxu1 }
 0x6f7   : > { %v3198_v25 = vadd.f32 %v3193_v21, %v3142_v54  ;;  %v3296_v49 = vadd.f32 %v3294_v45, %v3286_v48 }
 0x6f8   : > { %v3144_v28 = vpop.f32.mrf.mxu1 }
 0x6f9   : > { %v3199_v29 = vsel %vm6292_vm5, %v3198_v25, -1e+30  ;;  %v3298_v16 = vpack.c.bf16 %v3296_v49, %v3296_v49 }
 0x6fa   : > { %v5083_v31 = vpop.f32.mrf.mxu1  ;;  %v3200_v35 = vsel %vm2427_vm6, %v3199_v29, -inf }
 0x6fb   : > { %3201 = vmax.xlane.f32.xlu1 %v3200_v35 }
 0x70c   : > { %3266 = vrot.lane.b32.xlu1 %v4888_v44, %s5288_s16 }
 0x710   : > { %3320 = vrot.lane.b32.xlu1 %v3318_v33, %s5290_s23 }
 0x714   : > { %3441 = vrot.lane.b32.xlu1 %v3439_v59, %s5290_s23 }
 0x718   : > { %3367 = vrot.lane.b32.xlu1 %v3298_v16, %s5291_s26 }
 0x71c   : > { %3369 = vrot.lane.b32.xlu1 %v3299_v11, %s5291_s26 }
 0x720   : > { %3490 = vrot.lane.b32.xlu1 %v3426_v61, %s5291_s26 }
 0x724   : > { %3544 = vrot.lane.b32.xlu1 %v5451_v53, %s5291_s26 }
 0x728   : > { %3546 = vrot.lane.b32.xlu1 %v5575_v4, %s5291_s26 }
 0x784   : > { %v3202_v30 = vpop.xlane.xlu1 %3201 }
 0x785   : > { %v3203_v15 = vsub.f32 %v3199_v29, %v3202_v30  ;;  %v3416_v29 = vmul.f32 %v6302_v9, %v3284_v43  ;;  %v6570_v9 = vld [vmem:[%s6825_s5] sm:$0xff] }
 0x787   : > { %v3204_v26 = vmul.f32 1.442695, %v3203_v15  ;;  %v3423_v36 = vadd.f32 %v3421_v2, %v3416_v29 }
 0x788   : > { %v3267_v42 = vpop.permute.xlu1 %3266 }
 0x789   : > { %5238 = vpow2.f32 %v3204_v26  ;;  %v3269_v17 = vadd.f32 %v3267_v42, %v5869_v27  ;;  %v3270_v5 = vadd.f32 %v3267_v42, %v6211_v8  ;;  %v4897_v27 = vld [vmem:[%s6823_s3 + $0x4] ss:$0 sm:$0xff]  ;;  %v3425_v38 = vpack.c.bf16 %v3423_v36, %v3423_v36 }
 0x78b   : > { %v3271_v12 = vpack.c.bf16 %v3269_v17, %v3269_v17  ;;  %v3272_v53 = vpack.c.bf16 %v3270_v5, %v3270_v5 }
 0x78c   : > { %v3321_v50 = vpop.permute.xlu1 %3320 }
 0x78d   : > { %5099 = vmatmul.mubr.msk.bf16.vlgmr.msra.gmra.mxu0 %vm2173_vm1, %v3321_v50  ;;  %3538 = vrot.lane.b32.xlu1 %v3271_v12, %s5291_s26 }
 0x78e   : > { %5110 = vmatprep.mubr.msk.bf16.mxu0 %vm5280_vm2, %v5279_v55 }
 0x790   : > { %v3442_v18 = vpop.permute.xlu1 %3441 }
 0x791   : > { %v3444_v20 = vsel %vm2173_vm1, %v3442_v18, 0  ;;  %3540 = vrot.lane.b32.xlu1 %v3272_v53, %s5291_s26  ;;  %v6611_v18 = vld [vmem:[%s5435_s24 + $0x18] sm:$0xff] }
 0x792   : > { %5109 = vmatpush3.bf16.xpose.msra.mxu0 %v3444_v20 }
 0x793   : > { %5120 = vmatprep.subr.bf16.mxu0 %v5279_v55 }
 0x794   : > { %v3368_v34 = vpop.permute.xlu1 %3367 }
 0x795   : > { %3682 = vrot.lane.b32.xlu1 %v4897_v27, %s5292_s15 }
 0x796   : > { %v5239_v21 = vpop.eup %5238 }
 0x797   : > { %v3206_v54 = vsel %vm2427_vm6, %v5239_v21, 0.0 }
 0x798   : > { %3207 = vadd.xlane.f32.xlu0 %v3206_v54  ;;  %v3370_v22 = vpop.permute.xlu1 %3369 }
 0x799   : > { %v3372_v23 = vsel %vm3371_vm11, %v3368_v34, %v3370_v22  ;;  %5111 = vmatmul.mubr.msk.bf16.vlgmr.msra.gmra.mxu0 %vm2173_vm1, %v6170_v52 }
 0x79a   : > { %5122 = vmatprep.mubr.msk.bf16.mxu0 %vm5280_vm2, %v5279_v55 }
 0x79c   : > { %v3491_v25 = vpop.permute.xlu1 %3490 }
 0x7a0   : > { %v3545_v28 = vpop.permute.xlu1 %3544 }
 0x7a4   : > { %v3547_v31 = vpop.permute.xlu1 %3546 }
 0x7a5   : > { %v3548_v35 = vsel %vm3371_vm11, %v3545_v28, %v3547_v31 }
 0x7a6   : > { %v3553_v37 = vsel %vm2371_vm3, %v3548_v35, 0 }
 0x7a7   : > { %5121 = vmatpush3.bf16.xpose.msra.mxu0 %v3553_v37 }
 0x7a8   : > { %5132 = vmatprep.subr.bf16.mxu0 %v5279_v55 }
 0x7ae   : > { %3488 = vrot.lane.b32.xlu0 %v3425_v38, %s5291_s26 }
 0x7b2   : > { %3711 = vrot.lane.b32.xlu0 %v6561_v40, %s5292_s15 }
 0x7b6   : > { %3691 = vrot.lane.b32.xlu0 %v6561_v40, %s5290_s23 }
 0x7ba   : > { %3706 = vrot.lane.b32.xlu0 %v6570_v9, %s5290_s23 }
 0x7ff   : > { %v3539_v58 = vpop.permute.xlu1 %3538 }
 0x803   : > { %v3541_v41 = vpop.permute.xlu1 %3540 }
 0x804   : > { %v3542_v43 = vsel %vm3371_vm11, %v3539_v58, %v3541_v41 }
 0x805   : > { %5123 = vmatmul.mubr.msk.bf16.vlgmr.msra.gmra.mxu0 %vm2371_vm3, %v3542_v43 }
 0x806   : > { %5133 = vmatpush3.bf16.xpose.msra.mxu0 %v6175_v60  ;;  %5134 = vmatprep.mubr.msk.bf16.mxu0 %vm5280_vm2, %v5279_v55 }
 0x807   : > { %5144 = vmatprep.subr.bf16.mxu0 %v5279_v55  ;;  %v3683_v7 = vpop.permute.xlu1 %3682 }
 0x808   : > { %v6581_v33 = vadd.f32 %v3683_v7, %v6211_v8  ;;  %v3686_v16 = vadd.f32 %v3683_v7, %v6213_v13 }
 0x821   : > { %v3208_v44 = vpop.xlane.xlu0 %3207 }
 0x822   : > { %5240 = vrcp.f32 %v3208_v44 }
 0x825   : > { %v3489_v56 = vpop.permute.xlu0 %3488 }
 0x826   : > { %v3492_v6 = vsel %vm3371_vm11, %v3489_v56, %v3491_v25 }
 0x827   : > { %v3494_v61 = vsel %vm2173_vm1, %v3492_v6, 0  ;;  %v6629_v6 = vpack.c.bf16 %v6278_v10, %v6278_v10 }
 0x829   : > { %v3712_v45 = vpop.permute.xlu0 %3711 }
 0x82a   : > { %v3714_v59 = vmul.f32 %v3712_v45, %v6581_v33  ;;  %v3835_v48 = vmul.f32 %v6474_v39, %v3712_v45 }
 0x82c   : > { %3716 = vrot.lane.b32.xlu0 %v3714_v59, %s5275_s28 }
 0x82d   : > { %v3692_v2 = vpop.permute.xlu0 %3691 }
 0x82e   : > { %v3694_v3 = vmul.f32 %v3692_v2, %v6581_v33  ;;  %v3695_v11 = vmul.f32 %v3692_v2, %v3686_v16  ;;  %v3821_v53 = vmul.f32 %v6474_v39, %v3692_v2  ;;  %v3822_v20 = vmul.f32 %v6611_v18, %v3692_v2 }
 0x82f   : > { %v5241_v49 = vpop.eup %5240 }
 0x830   : > { %3837 = vrot.lane.b32.xlu0 %v3835_v48, %s5275_s28  ;;  %v3210_v19 = vmul.f32 %v5241_v49, %v5239_v21 }
 0x831   : > { %v3707_v48 = vpop.permute.xlu0 %3706 }
 0x832   : > { %v3211_v1 = vpack.c.bf16 %v3210_v19, %v3210_v19 }
 0x834   : > { %5093 = vmatmul.mubr.msk.bf16.vlgmr.msra.gmra.mxu1 %vm2427_vm6, %v3211_v1  ;;  %3687 = vrot.lane.b32.xlu0 %v6570_v9, %s5292_s15  ;;  %v4896_v1 = vld [vmem:[%s6822_s2 + $0x4] ss:$0 sm:$0xff] }
 0x835   : > { %5103 = vmatpush3.bf16.xpose.msra.mxu1 %v6197_v63  ;;  %5104 = vmatprep.mubr.msk.bf16.mxu1 %vm5280_vm2, %v5279_v55 }
 0x836   : > { %5114 = vmatprep.subr.bf16.mxu1 %v5279_v55 }
 0x838   : > { %3698 = vrot.lane.b32.xlu0 %v3694_v3, %s5276_s29  ;;  %v3709_v3 = vmul.f32 %v3707_v48, %v6581_v33 }
 0x83c   : > { %5105 = vmatmul.mubr.msk.bf16.vlgmr.msra.gmra.mxu1 %vm2173_vm1, %v3372_v23  ;;  %3700 = vrot.lane.b32.xlu0 %v3695_v11, %s5276_s29 }
 0x83d   : > { %5115 = vmatpush3.bf16.xpose.msra.mxu1 %v3494_v61  ;;  %5116 = vmatprep.mubr.msk.bf16.mxu1 %vm5280_vm2, %v5279_v55 }
 0x83e   : > { %5126 = vmatprep.subr.bf16.mxu1 %v5279_v55 }
 0x840   : > { %3825 = vrot.lane.b32.xlu0 %v3821_v53, %s5276_s29 }
 0x844   : > { %5117 = vmatmul.mubr.msk.bf16.vlgmr.msra.gmra.mxu1 %vm2173_vm1, %v6193_v62  ;;  %3827 = vrot.lane.b32.xlu0 %v3822_v20, %s5276_s29 }
 0x845   : > { %5128 = vmatprep.mubr.msk.bf16.mxu1 %vm5280_vm2, %v5279_v55 }
 0x84d   : > { %v3359_v30 = vpop.f32.mrf.mxu0 }
 0x84f   : > { %v5100_v15 = vpop.f32.mrf.mxu0 }
 0x850   : > { %v3834_v15 = vmul.f32 %v6611_v18, %v3707_v48 }
 0x851   : > { %v3362_v26 = vpop.f32.mrf.mxu0 }
 0x853   : > { %v5101_v42 = vpop.f32.mrf.mxu0 }
 0x859   : > { %v3480_v17 = vpop.f32.mrf.mxu0 }
 0x85b   : > { %v5112_v5 = vpop.f32.mrf.mxu0 }
 0x85d   : > { %v3483_v12 = vpop.f32.mrf.mxu0 }
 0x85f   : > { %v5113_v50 = vpop.f32.mrf.mxu0 }
 0x89e   : > { %v3717_v49 = vpop.permute.xlu0 %3716 }
 0x89f   : > { %v3719_v11 = vsub.f32 %v3709_v3, %v3717_v49 }
 0x8a1   : > { %v3721_v42 = vpack.c.bf16 %v3719_v11, %v3719_v11 }
 0x8a2   : > { %v3838_v19 = vpop.permute.xlu0 %3837 }
 0x8a6   : > { %v3688_v2 = vpop.permute.xlu0 %3687 }
 0x8a7   : > { %v3690_v53 = vmul.f32 %v3688_v2, %v6581_v33  ;;  %v3820_v20 = vmul.f32 %v6474_v39, %v3688_v2 }
 0x8aa   : > { %v3699_v61 = vpop.permute.xlu0 %3698 }
 0x8ae   : > { %v3701_v5 = vpop.permute.xlu0 %3700 }
 0x8b2   : > { %v3826_v10 = vpop.permute.xlu0 %3825 }
 0x8b6   : > { %v3828_v50 = vpop.permute.xlu0 %3827 }
 0x8c5   : > { %v3589_v27 = vpop.f32.mrf.mxu0 }
 0x8c7   : > { %v5124_v34 = vpop.f32.mrf.mxu0 }
 0x8c9   : > { %v3592_v21 = vpop.f32.mrf.mxu0 }
 0x8cb   : > { %v5125_v54 = vpop.f32.mrf.mxu0 }
 0x8f4   : > { %v6615_v22 = vpop.f32.mrf.mxu1 }
 0x8f6   : > { %v5094_v23 = vpop.f32.mrf.mxu1 }
 0x8f8   : > { %v3256_v25 = vpop.f32.mrf.mxu1 }
 0x8fa   : > { %v5095_v28 = vpop.f32.mrf.mxu1 }
 0x8fc   : > { %v3410_v29 = vpop.f32.mrf.mxu1 }
 0x8fd   : > { %v3411_v36 = vadd.f32 %v3410_v29, %v3359_v30  ;;  %v3710_v30 = vmul.f32 %v3707_v48, %v3686_v16  ;;  %v3702_v16 = vsel %vm2536_vm7, %v3699_v61, %v3701_v5 }
 0x8fe   : > { %v5106_v31 = vpop.f32.mrf.mxu1  ;;  %v3704_v34 = vadd.f32 %v3702_v16, %v3690_v53 }
 0x8ff   : > { %v3590_v58 = vadd.f32 %v3589_v27, %v3411_v36  ;;  %v3720_v26 = vsub.f32 %v3710_v30, %v3717_v49  ;;  %v3829_v27 = vsel %vm2536_vm7, %v3826_v10, %v3828_v50  ;;  %v4905_v36 = vld [vmem:[%s6823_s3 + $0x5] ss:$0 sm:$0xff] }
 0x900   : > { %v3413_v35 = vpop.f32.mrf.mxu1  ;;  %v3831_v21 = vadd.f32 %v3829_v27, %v3820_v20  ;;  %v3705_v54 = vpack.c.bf16 %v3704_v34, %v3704_v34 }
 0x901   : > { %v3722_v12 = vpack.c.bf16 %v3720_v26, %v3720_v26 }
 0x902   : > { %v5107_v37 = vpop.f32.mrf.mxu1  ;;  %v3832_v23 = vpack.c.bf16 %v3831_v21, %v3831_v21 }
 0x904   : > { %v3530_v38 = vpop.f32.mrf.mxu1 }
 0x905   : > { %v3531_v41 = vadd.f32 %v3530_v38, %v3480_v17  ;;  %v3841_v17 = vsub.f32 %v3834_v15, %v3838_v19 }
 0x906   : > { %v5118_v43 = vpop.f32.mrf.mxu1 }
 0x907   : > { %v3595_v44 = vadd.f32 %v3590_v58, %v3531_v41 }
 0x908   : > { %v3533_v7 = vpop.f32.mrf.mxu1 }
 0x909   : > { %v3596_v56 = vsel %vm6292_vm5, %v3595_v44, -1e+30 }
 0x90a   : > { %v5119_v45 = vpop.f32.mrf.mxu1  ;;  %v3597_v59 = vsel %vm2427_vm6, %v3596_v56, -inf }
 0x90b   : > { %3598 = vmax.xlane.f32.xlu1 %v3597_v59 }
 0x91c   : > { %3670 = vrot.lane.b32.xlu1 %v4896_v1, %s5292_s15 }
 0x920   : > { %3612 = vrot.lane.b32.xlu1 %v6497_v46, %s5284_s22  ;;  %v3843_v46 = vpack.c.bf16 %v3841_v17, %v3841_v17 }
 0x924   : > { %3614 = vrot.lane.b32.xlu1 %v6629_v6, %s5284_s22 }
 0x928   : > { %3725 = vrot.lane.b32.xlu1 %v3721_v42, %s5289_s19 }
 0x92c   : > { %3727 = vrot.lane.b32.xlu1 %v3722_v12, %s5289_s19 }
 0x930   : > { %3848 = vrot.lane.b32.xlu1 %v3843_v46, %s5289_s19 }
 0x934   : > { %3949 = vrot.lane.b32.xlu1 %v5575_v4, %s5292_s15 }
 0x938   : > { %3951 = vrot.lane.b32.xlu1 %v5456_v57, %s5292_s15 }
 0x93c   : > { %3775 = vrot.lane.b32.xlu1 %v3705_v54, %s5292_s15 }
 0x940   : > { %3895 = vrot.lane.b32.xlu1 %v3832_v23, %s5292_s15 }
 0x994   : > { %v3599_v25 = vpop.xlane.xlu1 %3598 }
 0x995   : > { %v3600_v33 = vsub.f32 %v3596_v56, %v3599_v25  ;;  %v3833_v56 = vmul.f32 %v6474_v39, %v3707_v48 }
 0x997   : > { %v3601_v28 = vmul.f32 1.442695, %v3600_v33  ;;  %v3840_v45 = vsub.f32 %v3833_v56, %v3838_v19 }
 0x998   : > { %v3671_v29 = vpop.permute.xlu1 %3670 }
 0x999   : > { %5242 = vpow2.f32 %v3601_v28  ;;  %v3673_v4 = vadd.f32 %v3671_v29, %v6211_v8  ;;  %v3842_v59 = vpack.c.bf16 %v3840_v45, %v3840_v45  ;;  %v3674_v49 = vadd.f32 %v3671_v29, %v6213_v13 }
 0x99b   : > { %v3675_v31 = vpack.c.bf16 %v3673_v4, %v3673_v4  ;;  %v3676_v1 = vpack.c.bf16 %v3674_v49, %v3674_v49 }
 0x99c   : > { %v3613_v35 = vpop.permute.xlu1 %3612 }
 0x99d   : > { %3942 = vrot.lane.b32.xlu1 %v3675_v31, %s5292_s15 }
 0x9a0   : > { %v3615_v37 = vpop.permute.xlu1 %3614 }
 0x9a1   : > { %v3616_v38 = vsel %vm2781_vm10, %v3613_v35, %v3615_v37  ;;  %4079 = vrot.lane.b32.xlu1 %v4905_v36, %s5291_s26 }
 0x9a2   : > { %v3621_v58 = vsel %vm2453_vm9, %v3616_v38, 0 }
 0x9a3   : > { %5127 = vmatpush3.bf16.msra.mxu1 %v3621_v58 }
 0x9a4   : > { %v3726_v41 = vpop.permute.xlu1 %3725  ;;  %5138 = vmatprep.subr.bf16.mxu1 %v5279_v55 }
 0x9a6   : > { %v5243_v8 = vpop.eup %5242 }
 0x9a7   : > { %v3603_v43 = vsel %vm2427_vm6, %v5243_v8, 0.0 }
 0x9a8   : > { %3604 = vadd.xlane.f32.xlu0 %v3603_v43  ;;  %v3728_v44 = vpop.permute.xlu1 %3727 }
 0x9a9   : > { %v3730_v7 = vsel %vm3729_vm12, %v3726_v41, %v3728_v44 }
 0x9aa   : > { %5135 = vmatmul.mubr.msk.bf16.vlgmr.msra.gmra.mxu0 %vm2173_vm1, %v3730_v7 }
 0x9ab   : > { %5146 = vmatprep.mubr.msk.bf16.mxu0 %vm5280_vm2, %v5279_v55 }
 0x9ac   : > { %v3849_v2 = vpop.permute.xlu1 %3848 }
 0x9b0   : > { %v3950_v39 = vpop.permute.xlu1 %3949 }
 0x9b4   : > { %v3952_v48 = vpop.permute.xlu1 %3951 }
 0x9b5   : > { %v3953_v17 = vsel %vm3946_vm13, %v3950_v39, %v3952_v48 }
 0x9b6   : > { %v3958_v12 = vsel %vm2371_vm3, %v3953_v17, 0 }
 0x9b8   : > { %v3776_v19 = vpop.permute.xlu1 %3775 }
 0x9bc   : > { %v3896_v3 = vpop.permute.xlu1 %3895 }
 0x9bd   : > { %v3898_v54 = vsel %vm2173_vm1, %v3896_v3, 0 }
 0x9be   : > { %3846 = vrot.lane.b32.xlu0 %v3842_v59, %s5289_s19 }
 0x9c2   : > { %3944 = vrot.lane.b32.xlu0 %v3676_v1, %s5292_s15 }
 0x9c6   : > { %4101 = vrot.lane.b32.xlu0 %v6561_v40, %s5291_s26 }
 0x9ca   : > { %4087 = vrot.lane.b32.xlu0 %v6561_v40, %s5286_s12 }
 0x9ce   : > { %4097 = vrot.lane.b32.xlu0 %v6570_v9, %s5286_s12 }
 0xa0f   : > { %v3943_v61 = vpop.permute.xlu1 %3942 }
 0xa13   : > { %v4080_v42 = vpop.permute.xlu1 %4079 }
 0xa14   : > { %v6676_v5 = vadd.f32 %v4080_v42, %v6213_v13 }
 0xa31   : > { %v3605_v11 = vpop.xlane.xlu0 %3604 }
 0xa32   : > { %5244 = vrcp.f32 %v3605_v11 }
 0xa35   : > { %v3847_v30 = vpop.permute.xlu0 %3846 }
 0xa36   : > { %v3850_v15 = vsel %vm3729_vm12, %v3847_v30, %v3849_v2 }
 0xa37   : > { %v3852_v26 = vsel %vm2173_vm1, %v3850_v15, 0 }
 0xa38   : > { %5145 = vmatpush3.bf16.xpose.msra.mxu0 %v3852_v26 }
 0xa39   : > { %v3945_v40 = vpop.permute.xlu0 %3944  ;;  %5156 = vmatprep.subr.bf16.mxu0 %v5279_v55 }
 0xa3a   : > { %v3947_v27 = vsel %vm3946_vm13, %v3943_v61, %v3945_v40 }
 0xa3d   : > { %v4102_v46 = vpop.permute.xlu0 %4101 }
 0xa3e   : > { %v4104_v10 = vmul.f32 %v4102_v46, %v6676_v5  ;;  %v4212_v16 = vmul.f32 %v6611_v18, %v4102_v46 }
 0xa3f   : > { %v5245_v50 = vpop.eup %5244  ;;  %5147 = vmatmul.mubr.msk.bf16.vlgmr.msra.gmra.mxu0 %vm2173_vm1, %v6170_v52 }
 0xa40   : > { %5157 = vmatpush3.bf16.xpose.msra.mxu0 %v3958_v12  ;;  %4106 = vrot.lane.b32.xlu0 %v4104_v10, %s5275_s28  ;;  %v3607_v53 = vmul.f32 %v5245_v50, %v5243_v8 }
 0xa41   : > { %5158 = vmatprep.mubr.msk.bf16.mxu0 %vm5280_vm2, %v5279_v55  ;;  %5168 = vmatprep.subr.bf16.mxu0 %v5279_v55  ;;  %v4088_v34 = vpop.permute.xlu0 %4087 }
 0xa42   : > { %v3608_v20 = vpack.c.bf16 %v3607_v53, %v3607_v53  ;;  %v4090_v21 = vmul.f32 %v4088_v34, %v6676_v5  ;;  %v4204_v23 = vmul.f32 %v6611_v18, %v4088_v34 }
 0xa44   : > { %5129 = vmatmul.mubr.msk.bf16.vlgmr.msra.gmra.mxu1 %vm2427_vm6, %v3608_v20  ;;  %4214 = vrot.lane.b32.xlu0 %v4212_v16, %s5275_s28 }
 0xa45   : > { %5139 = vmatpush3.bf16.xpose.msra.mxu1 %v6197_v63  ;;  %5140 = vmatprep.mubr.msk.bf16.mxu1 %vm5280_vm2, %v5279_v55  ;;  %v4098_v29 = vpop.permute.xlu0 %4097 }
 0xa46   : > { %5150 = vmatprep.subr.bf16.mxu1 %v5279_v55  ;;  %v4100_v50 = vmul.f32 %v4098_v29, %v6676_v5  ;;  %v4211_v16 = vmul.f32 %v6611_v18, %v4098_v29 }
 0xa47   : > { %5159 = vmatmul.mubr.msk.bf16.vlgmr.msra.gmra.mxu0 %vm2371_vm3, %v3947_v27 }
 0xa48   : > { %4083 = vrot.lane.b32.xlu0 %v6570_v9, %s5291_s26  ;;  %5169 = vmatpush3.bf16.xpose.msra.mxu0 %v6175_v60  ;;  %v4904_v60 = vld [vmem:[%s6822_s2 + $0x5] ss:$0 sm:$0xff] }
 0xa49   : > { %5170 = vmatprep.mubr.msk.bf16.mxu0 %vm5280_vm2, %v5279_v55  ;;  %5180 = vmatprep.subr.bf16.mxu0 %v5279_v55 }
 0xa4c   : > { %5141 = vmatmul.mubr.msk.bf16.vlgmr.msra.gmra.mxu1 %vm2173_vm1, %v3776_v19  ;;  %4092 = vrot.lane.b32.xlu0 %v4090_v21, %s5276_s29 }
 0xa4d   : > { %5151 = vmatpush3.bf16.xpose.msra.mxu1 %v3898_v54  ;;  %5152 = vmatprep.mubr.msk.bf16.mxu1 %vm5280_vm2, %v5279_v55 }
 0xa4e   : > { %5162 = vmatprep.subr.bf16.mxu1 %v5279_v55 }
 0xa50   : > { %4206 = vrot.lane.b32.xlu0 %v4204_v23, %s5276_s29 }
 0xa54   : > { %5153 = vmatmul.mubr.msk.bf16.vlgmr.msra.gmra.mxu1 %vm2173_vm1, %v6193_v62  ;;  %4069 = vrot.lane.b32.xlu0 %v4904_v60, %s5291_s26 }
 0xa55   : > { %5164 = vmatprep.mubr.msk.bf16.mxu1 %vm5280_vm2, %v5279_v55 }
 0xa6a   : > { %v3768_v9 = vpop.f32.mrf.mxu0 }
 0xa6c   : > { %v5136_v25 = vpop.f32.mrf.mxu0 }
 0xa6e   : > { %v3771_v33 = vpop.f32.mrf.mxu0 }
 0xa70   : > { %v5137_v28 = vpop.f32.mrf.mxu0 }
 0xab2   : > { %v4107_v4 = vpop.permute.xlu0 %4106 }
 0xab3   : > { %v4109_v53 = vsub.f32 %v4100_v50, %v4107_v4 }
 0xab5   : > { %v4110_v27 = vpack.c.bf16 %v4109_v53, %v4109_v53 }
 0xab6   : > { %v4215_v31 = vpop.permute.xlu0 %4214 }
 0xab7   : > { %v4217_v20 = vsub.f32 %v4211_v16, %v4215_v31 }
 0xab9   : > { %v4218_v34 = vpack.c.bf16 %v4217_v20, %v4217_v20 }
 0xaba   : > { %v4084_v35 = vpop.permute.xlu0 %4083 }
 0xabb   : > { %v4203_v37 = vmul.f32 %v6611_v18, %v4084_v35  ;;  %v4086_v21 = vmul.f32 %v4084_v35, %v6676_v5 }
 0xabe   : > { %v4093_v36 = vpop.permute.xlu0 %4092 }
 0xabf   : > { %v4095_v54 = vadd.f32 %v4093_v36, %v4086_v21 }
 0xac1   : > { %v4096_v23 = vpack.c.bf16 %v4095_v54, %v4095_v54 }
 0xac2   : > { %v4207_v38 = vpop.permute.xlu0 %4206 }
 0xac3   : > { %v6719_v58 = vadd.f32 %v4207_v38, %v4203_v37 }
 0xac6   : > { %v4070_v60 = vpop.permute.xlu0 %4069 }
 0xaff   : > { %v3888_v41 = vpop.f32.mrf.mxu0 }
 0xb01   : > { %v5148_v8 = vpop.f32.mrf.mxu0 }
 0xb03   : > { %v3891_v43 = vpop.f32.mrf.mxu0 }
 0xb04   : > { %v6721_v44 = vpop.f32.mrf.mxu1  ;;  %v4210_v43 = vpack.c.bf16 %v6719_v58, %v6719_v58 }
 0xb05   : > { %v5149_v7 = vpop.f32.mrf.mxu0 }
 0xb06   : > { %v5130_v56 = vpop.f32.mrf.mxu1 }
 0xb07   : > { %v3994_v45 = vpop.f32.mrf.mxu0 }
 0xb08   : > { %v3660_v59 = vpop.f32.mrf.mxu1 }
 0xb09   : > { %v5160_v49 = vpop.f32.mrf.mxu0 }
 0xb0a   : > { %v5131_v1 = vpop.f32.mrf.mxu1 }
 0xb0b   : > { %v3997_v2 = vpop.f32.mrf.mxu0 }
 0xb0c   : > { %v3814_v39 = vpop.f32.mrf.mxu1 }
 0xb0d   : > { %v5161_v48 = vpop.f32.mrf.mxu0  ;;  %v3815_v11 = vadd.f32 %v3814_v39, %v3768_v9  ;;  %v4072_v9 = vadd.f32 %v4070_v60, %v6213_v13 }
 0xb0e   : > { %v5142_v19 = vpop.f32.mrf.mxu1 }
 0xb0f   : > { %v3995_v15 = vadd.f32 %v3994_v45, %v3815_v11  ;;  %v4073_v25 = vpack.c.bf16 %v4072_v9, %v4072_v9 }
 0xb10   : > { %v3817_v3 = vpop.f32.mrf.mxu1 }
 0xb12   : > { %v5143_v61 = vpop.f32.mrf.mxu1 }
 0xb14   : > { %v3934_v30 = vpop.f32.mrf.mxu1 }
 0xb15   : > { %v3935_v26 = vadd.f32 %v3934_v30, %v3888_v41 }
 0xb16   : > { %v5154_v42 = vpop.f32.mrf.mxu1 }
 0xb17   : > { %v4000_v40 = vadd.f32 %v3995_v15, %v3935_v26 }
 0xb18   : > { %v3937_v17 = vpop.f32.mrf.mxu1 }
 0xb19   : > { %v4001_v12 = vsel %vm6292_vm5, %v4000_v40, -1e+30 }
 0xb1a   : > { %v5155_v46 = vpop.f32.mrf.mxu1  ;;  %v4002_v10 = vsel %vm2427_vm6, %v4001_v12, -inf }
 0xb1b   : > { %4003 = vmax.xlane.f32.xlu1 %v4002_v10 }
 0xb2c   : > { %4014 = vrot.lane.b32.xlu1 %v6629_v6, %s5287_s13 }
 0xb30   : > { %4112 = vrot.lane.b32.xlu1 %v4110_v27, %s5285_s25 }
 0xb34   : > { %4220 = vrot.lane.b32.xlu1 %v4218_v34, %s5285_s25 }
 0xb38   : > { %4158 = vrot.lane.b32.xlu1 %v4096_v23, %s5288_s16 }
 0xb3c   : > { %4314 = vrot.lane.b32.xlu1 %v5456_v57, %s5288_s16 }
 0xb40   : > { %4312 = vrot.lane.b32.xlu1 %v4073_v25, %s5288_s16 }
 0xba4   : > { %v4004_v33 = vpop.xlane.xlu1 %4003 }
 0xba5   : > { %v4005_v28 = vsub.f32 %v4001_v12, %v4004_v33 }
 0xba7   : > { %v4006_v5 = vmul.f32 1.442695, %v4005_v28 }
 0xba8   : > { %v4015_v29 = vpop.permute.xlu1 %4014 }
 0xba9   : > { %5246 = vpow2.f32 %v4006_v5  ;;  %v4020_v4 = vsel %vm2453_vm9, %v4015_v29, 0 }
 0xbaa   : > { %5163 = vmatpush3.bf16.msra.mxu1 %v4020_v4 }
 0xbab   : > { %5174 = vmatprep.subr.bf16.mxu1 %v5279_v55 }
 0xbac   : > { %v4113_v31 = vpop.permute.xlu1 %4112 }
 0xbad   : > { %5171 = vmatmul.mubr.msk.bf16.vlgmr.msra.gmra.mxu0 %vm2173_vm1, %v4113_v31 }
 0xbae   : > { %5182 = vmatprep.mubr.msk.bf16.mxu0 %vm5280_vm2, %v5279_v55 }
 0xbb0   : > { %v4221_v57 = vpop.permute.xlu1 %4220 }
 0xbb1   : > { %v4223_v13 = vsel %vm2173_vm1, %v4221_v57, 0 }
 0xbb2   : > { %5181 = vmatpush3.bf16.xpose.msra.mxu0 %v4223_v13 }
 0xbb3   : > { %5192 = vmatprep.subr.bf16.mxu0 %v5279_v55 }
 0xbb4   : > { %v4159_v35 = vpop.permute.xlu1 %4158 }
 0xbb6   : > { %v5247_v36 = vpop.eup %5246 }
 0xbb7   : > { %v4008_v37 = vsel %vm2427_vm6, %v5247_v36, 0.0 }
 0xbb8   : > { %4009 = vadd.xlane.f32.xlu0 %v4008_v37  ;;  %v4315_v38 = vpop.permute.xlu1 %4314 }
 0xbb9   : > { %v4320_v41 = vsel %vm2371_vm3, %v4315_v38, 0  ;;  %5183 = vmatmul.mubr.msk.bf16.vlgmr.msra.gmra.mxu0 %vm2173_vm1, %v6170_v52 }
 0xbba   : > { %5193 = vmatpush3.bf16.xpose.msra.mxu0 %v4320_v41  ;;  %5194 = vmatprep.mubr.msk.bf16.mxu0 %vm5280_vm2, %v5279_v55 }
 0xbbc   : > { %v4313_v8 = vpop.permute.xlu1 %4312 }
 0xbc1   : > { %5195 = vmatmul.mubr.msk.bf16.vlgmr.msra.gmra.mxu0 %vm2371_vm3, %v4313_v8 }
 0xbce   : > { %4266 = vrot.lane.b32.xlu0 %v4210_v43, %s5288_s16 }
 0xc41   : > { %v4010_v7 = vpop.xlane.xlu0 %4009 }
 0xc42   : > { %5248 = vrcp.f32 %v4010_v7 }
 0xc45   : > { %v4267_v52 = vpop.permute.xlu0 %4266 }
 0xc46   : > { %v4269_v49 = vsel %vm2173_vm1, %v4267_v52, 0  ;;  %v5265_v52 = vld [vmem:[%s5435_s24] sm:$0xff] }
 0xc4f   : > { %v5249_v56 = vpop.eup %5248 }
 0xc50   : > { %v4012_v45 = vmul.f32 %v5249_v56, %v5247_v36 }
 0xc52   : > { %v4013_v59 = vpack.c.bf16 %v4012_v45, %v4012_v45  ;;  %v5264_v45 = vld [vmem:[%s5435_s24 + $0x8] sm:$0xff] }
 0xc54   : > { %5165 = vmatmul.mubr.msk.bf16.vlgmr.msra.gmra.mxu1 %vm2427_vm6, %v4013_v59 }
 0xc55   : > { %5175 = vmatpush3.bf16.xpose.msra.mxu1 %v6197_v63  ;;  %5176 = vmatprep.mubr.msk.bf16.mxu1 %vm5280_vm2, %v5279_v55 }
 0xc56   : > { %5186 = vmatprep.subr.bf16.mxu1 %v5279_v55 }
 0xc5c   : > { %5177 = vmatmul.mubr.msk.bf16.vlgmr.msra.gmra.mxu1 %vm2173_vm1, %v4159_v35 }
 0xc5d   : > { %5187 = vmatpush3.bf16.xpose.msra.mxu1 %v4269_v49  ;;  %5188 = vmatprep.mubr.msk.bf16.mxu1 %vm5280_vm2, %v5279_v55 }
 0xc5e   : > { %5198 = vmatprep.subr.bf16.mxu1 %v5279_v55 }
 0xc64   : > { %5189 = vmatmul.mubr.msk.bf16.vlgmr.msra.gmra.mxu1 %vm2173_vm1, %v6193_v62 }
 0xc65   : > { %5200 = vmatprep.mubr.msk.bf16.mxu1 %vm5280_vm2, %v5279_v55 }
 0xc6d   : > { %v4151_v63 = vpop.f32.mrf.mxu0 }
 0xc6f   : > { %v5172_v58 = vpop.f32.mrf.mxu0 }
 0xc71   : > { %v4154_v1 = vpop.f32.mrf.mxu0 }
 0xc73   : > { %v5173_v2 = vpop.f32.mrf.mxu0 }
 0xc79   : > { %v4259_v39 = vpop.f32.mrf.mxu0 }
 0xc7b   : > { %v5184_v48 = vpop.f32.mrf.mxu0 }
 0xc7d   : > { %v4262_v19 = vpop.f32.mrf.mxu0 }
 0xc7f   : > { %v5185_v3 = vpop.f32.mrf.mxu0 }
 0xc81   : > { %v4356_v11 = vpop.f32.mrf.mxu0 }
 0xc83   : > { %v5196_v61 = vpop.f32.mrf.mxu0 }
 0xc85   : > { %v4359_v30 = vpop.f32.mrf.mxu0 }
 0xc87   : > { %v5197_v15 = vpop.f32.mrf.mxu0 }
 0xd14   : > { %v4056_v26 = vpop.f32.mrf.mxu1 }
 0xd16   : > { %v5166_v42 = vpop.f32.mrf.mxu1 }
 0xd18   : > { %v4059_v40 = vpop.f32.mrf.mxu1 }
 0xd1a   : > { %v5167_v17 = vpop.f32.mrf.mxu1 }
 0xd1c   : > { %v4197_v62 = vpop.f32.mrf.mxu1 }
 0xd1d   : > { %v4198_v55 = vadd.f32 %v4197_v62, %v4151_v63  ;;  %v5266_v63 = vld [vmem:[%s5435_s24 + $0x10] sm:$0xff] }
 0xd1e   : > { %v5178_v12 = vpop.f32.mrf.mxu1 }
 0xd1f   : > { %v4357_v16 = vadd.f32 %v4356_v11, %v4198_v55 }
 0xd20   : > { %v4200_v46 = vpop.f32.mrf.mxu1 }
 0xd22   : > { %v5179_v10 = vpop.f32.mrf.mxu1 }
 0xd24   : > { %v4305_v50 = vpop.f32.mrf.mxu1 }
 0xd25   : > { %v4306_v53 = vadd.f32 %v4305_v50, %v4259_v39 }
 0xd26   : > { %v5190_v20 = vpop.f32.mrf.mxu1 }
 0xd27   : > { %v4362_v27 = vadd.f32 %v4357_v16, %v4306_v53  ;;  %v4499_v20 = vsub.s32 1, %v6286_v24 }
 0xd28   : > { %v4308_v34 = vpop.f32.mrf.mxu1 }
 0xd29   : > { %v4363_v21 = vsel %vm6292_vm5, %v4362_v27, -1e+30  ;;  %v4503_v27 = vsub.s32 2, %v6286_v24  ;;  %v4507_v34 = vsub.s32 3, %v6286_v24 }
 0xd2a   : > { %v5191_v54 = vpop.f32.mrf.mxu1  ;;  %v4364_v23 = vsel %vm2427_vm6, %v4363_v21, -inf }
 0xd2b   : > { %4365 = vmax.xlane.f32.xlu1 %v4364_v23  ;;  %v4517_v54 = vld [vmem:[%s6828_s8] sm:$0xf] }
 0xd2c   : > { %v4534_v24 = vrot.slane %v4517_v54, %v4507_v34 }
 0xd3c   : > { %4378 = vrot.lane.b32.xlu1 %v6629_v6, %s5291_s26  ;;  %v4376_v6 = vpack.c.bf16 %v6280_v14, %v6280_v14 }
 0xd40   : > { %4430 = vrot.lane.b32.xlu1 %v6509_v0, %s5277_s18 }
 0xd44   : > { %4434 = vrot.lane.b32.xlu1 %v6615_v22, %s5282_s20 }
 0xd48   : > { %4438 = vrot.lane.b32.xlu1 %v6721_v44, %s5288_s16  ;;  %s346_s16 = scalar_lea.vmem %s6829_s9, %s4914_s17 }
 0xd4c   : > { %4442 = vrot.lane.b32.xlu1 %v4056_v26, %s5292_s15 }
 0xdb4   : > { %v4366_v47 = vpop.xlane.xlu1 %4365 }
 0xdb5   : > { %v4367_v60 = vsub.f32 %v4363_v21, %v4366_v47  ;;  %v4491_v21 = vld [vmem:[%s6827_s7] sm:$0xf] }
 0xdb6   : > { %v4496_v23 = vrot.slane %v4491_v21, %v6289_v32  ;;  %v4500_v47 = vrot.slane %v4491_v21, %v4499_v20 }
 0xdb7   : > { %v4368_v9 = vmul.f32 1.442695, %v4367_v60  ;;  %v4504_v60 = vrot.slane %v4491_v21, %v4503_v27 }
 0xdb8   : > { %v4379_v22 = vpop.permute.xlu1 %4378 }
 0xdb9   : > { %5250 = vpow2.f32 %v4368_v9  ;;  %v4508_v9 = vrot.slane %v4491_v21, %v4507_v34 }
 0xdbc   : > { %v4431_v36 = vpop.permute.xlu1 %4430 }
 0xdbd   : > { %v4449_v7 = vsel %vm2371_vm3, %v6433_v51, %v4431_v36 }
 0xdbe   : > { %v4458_v49 = vadd.f32 %v5265_v52, %v4449_v7 }
 0xdc0   : > { %v4435_v37 = vpop.permute.xlu1 %4434 }
 0xdc1   : > { %v4451_v41 = vsel %vm2448_vm8, %v4431_v36, %v4435_v37 }
 0xdc4   : > { %v4439_v38 = vpop.permute.xlu1 %4438 }
 0xdc5   : > { %v4453_v43 = vsel %vm4452_vm14, %v4451_v41, %v4439_v38 }
 0xdc6   : > { %v5251_v25 = vpop.eup %5250  ;;  %v4459_v59 = vadd.f32 %v5264_v45, %v4453_v43 }
 0xdc7   : > { %v4370_v33 = vsel %vm2427_vm6, %v5251_v25, 0.0 }
 0xdc8   : > { %4371 = vadd.xlane.f32.xlu0 %v4370_v33  ;;  %v4443_v8 = vpop.permute.xlu1 %4442  ;;  %v4462_v2 = vadd.f32 %v4459_v59, %v4458_v49  ;;  %v4522_v33 = vrot.slane %v4517_v54, %v6289_v32 }
 0xdc9   : > { %v4455_v56 = vsel %vm3946_vm13, %v4439_v38, %v4443_v8 }
 0xdca   : > { %v4460_v58 = vadd.f32 %v5266_v63, %v4455_v56 }
 0xdcc   : > { %v4463_v19 = vadd.f32 %v4462_v2, %v4460_v58 }
 0xdde   : > { %4380 = vrot.lane.b32.xlu0 %v4376_v6, %s5291_s26  ;;  %v4526_v6 = vrot.slane %v4517_v54, %v4499_v20 }
 0xe51   : > { %v4372_v0 = vpop.xlane.xlu0 %4371 }
 0xe52   : > { %5252 = vrcp.f32 %v4372_v0  ;;  %v4530_v0 = vrot.slane %v4517_v54, %v4503_v27 }
 0xe55   : > { %v4381_v28 = vpop.permute.xlu0 %4380 }
 0xe56   : > { %v4382_v44 = vsel %vm3371_vm11, %v4379_v22, %v4381_v28 }
 0xe57   : > { %v4387_v5 = vsel %vm2453_vm9, %v4382_v44, 0 }
 0xe58   : > { %5199 = vmatpush3.bf16.msra.mxu1 %v4387_v5 }
 0xe5f   : > { %v5253_v29 = vpop.eup %5252 }
 0xe60   : > { %v4374_v4 = vmul.f32 %v5253_v29, %v5251_v25 }
 0xe62   : > { %v4375_v31 = vpack.c.bf16 %v4374_v4, %v4374_v4 }
 0xe64   : > { %5201 = vmatmul.mubr.msk.bf16.vlgmr.msra.gmra.mxu1 %vm2427_vm6, %v4375_v31 }
 0xf24   : > { %v4423_v57 = vpop.f32.mrf.mxu1 }
 0xf25   : > { %4446 = vrot.lane.b32.xlu0 %v4423_v57, %s5291_s26 }
 0xf26   : > { %v5202_v14 = vpop.f32.mrf.mxu1 }
 0xf28   : > { %v4426_v13 = vpop.f32.mrf.mxu1 }
 0xf2a   : > { %v5203_v35 = vpop.f32.mrf.mxu1 }
 0xf97   : > { %v4447_v1 = vpop.permute.xlu0 %4446 }
 0xf98   : > { %v4457_v39 = vsel %vm3371_vm11, %v4443_v8, %v4447_v1 }
 0xf99   : > { %v4461_v48 = vadd.f32 %v6611_v18, %v4457_v39 }
 0xf9b   : > { %v4464_v3 = vsel %vm1796_vm0, %v4461_v48, 0.0 }
 0xf9c   : > { %v4465_v11 = vadd.f32 %v4464_v3, %v4463_v19 }
 0xf9e   : > { %4466 = vadd.xlane.f32.xlu1 %v4465_v11 }
0x1027   : > { %v4467_v51 = vpop.xlane.xlu1 %4466 }
0x1028   : > { %v4469_v61 = vmul.f32 0.0020833334, %v4467_v51 }
0x102a   : > { %v4470_v30 = vsub.f32 %v4458_v49, %v4469_v61  ;;  %v4471_v15 = vsub.f32 %v4459_v59, %v4469_v61  ;;  %v4472_v26 = vsub.f32 %v4460_v58, %v4469_v61  ;;  %v4473_v42 = vsub.f32 %v4461_v48, %v4469_v61 }
0x102c   : > { %v4474_v40 = vmul.f32 %v4470_v30, %v4470_v30  ;;  %v4475_v17 = vmul.f32 %v4471_v15, %v4471_v15  ;;  %v4477_v62 = vmul.f32 %v4473_v42, %v4473_v42  ;;  %v4476_v12 = vmul.f32 %v4472_v26, %v4472_v26 }
0x102e   : > { %v4478_v46 = vadd.f32 %v4475_v17, %v4474_v40  ;;  %v4480_v10 = vsel %vm1796_vm0, %v4477_v62, 0.0 }
0x1030   : > { %v4479_v55 = vadd.f32 %v4478_v46, %v4476_v12 }
0x1032   : > { %v4481_v18 = vadd.f32 %v4480_v10, %v4479_v55 }
0x1034   : > { %4482 = vadd.xlane.f32.xlu0 %v4481_v18 }
0x10bd   : > { %v4483_v50 = vpop.xlane.xlu0 %4482 }
0x10be   : > { %v4484_v16 = vmul.f32 0.0020833334, %v4483_v50 }
0x10c0   : > { %v4485_v53 = vadd.f32 1e-05, %v4484_v16 }
0x10c2   : > { %5254 = vrsqrt.f32 %v4485_v53 }
0x10cf   : > { %v5255_v25 = vpop.eup %5254 }
0x10d0   : > { %v4487_v22 = vmul.f32 %v5255_v25, %v4470_v30  ;;  %v4488_v28 = vmul.f32 %v5255_v25, %v4471_v15  ;;  %v4489_v44 = vmul.f32 %v5255_v25, %v4472_v26  ;;  %v4490_v5 = vmul.f32 %v5255_v25, %v4473_v42 }
0x10d2   : > { %v4513_v29 = vmul.f32 %v4496_v23, %v4487_v22  ;;  %v4514_v4 = vmul.f32 %v4500_v47, %v4488_v28  ;;  %v4515_v31 = vmul.f32 %v4504_v60, %v4489_v44  ;;  %v4516_v57 = vmul.f32 %v4508_v9, %v4490_v5 }
0x10d4   : > { %v4539_v14 = vadd.f32 %v4522_v33, %v4513_v29  ;;  %v4540_v13 = vadd.f32 %v4526_v6, %v4514_v4  ;;  %v4541_v35 = vadd.f32 %v4530_v0, %v4515_v31  ;;  %v4542_v32 = vadd.f32 %v4534_v24, %v4516_v57 }
0x10d6   : > { %4543 = vst [vmem:[%s346_s16] sm:$0xff] %v4539_v14  ;;  %4544 = vst [vmem:[%s346_s16 + $0x8] sm:$0xff] %v4540_v13 }
0x10d7   : > { %4545 = vst [vmem:[%s346_s16 + $0x10] sm:$0xff] %v4541_v35  ;;  %4546 = vst.msk [vmem:[%s346_s16 + $0x18] sm:$0xff] %vm1796_vm0, %v4542_v32 }
0x10d8 PF: > { %s19_s30 = sadd.s32 1, %s5273_s30  }
0x10d9   : > { %p16_p4 = scmp.ge.s32.totalorder %s19_s30, 4  }
0x10db   :  { %18 = sbr.rel (!%p16_p4) target bundleno = 1 (0x1), region = 89 }

// kernel: tener_forward.13
= control target key start
LH: loop header
LB: loop body
LE: loop exit
PB: predicated region body
PF: predicated region fallthrough
CT: control target
= control target key end

     0   :  { %vm22_vm0 = vcmask 72704   ;;  %vm24_vm1 = vcmask 65536   ;;  %vm52_vm2 = vcmask 66560   ;;  %v868_v17 = vmov 0.0   ;;  %s1055_s0 = inlined_call_operand.vmem [shape: f32[8,2,9], index: 0, kind: input, shape index: {}]   ;;  %s1056_s3 = inlined_call_operand.vmem [shape: f32[1,9], index: 3, kind: input, shape index: {}]   ;;  %s1057_s2 = inlined_call_operand.vmem [shape: f32[9,9], index: 2, kind: input, shape index: {}]   ;;  %s1058_s1 = inlined_call_operand.vmem [shape: f32[8,2,1], index: 1, kind: input, shape index: {}]   ;;  %s1059_s4 = inlined_call_operand.vmem [shape: f32[1,9], index: 4, kind: input, shape index: {}]   ;;  %s1060_s5 = inlined_call_operand.vmem [shape: f32[2,9], index: 5, kind: output, shape index: {}]  }
   0x1   :  { %v39_v0 = vld [vmem:[%s1055_s0] sm:$0x3]  ;;  %v21_v4 = vld [vmem:[%s1057_s2 + $0x8] sm:$0x1]  ;;  %782 = vmatprep.subr.mxu0 %v868_v17  ;;  %vm869_vm3 = vmmov 0   ;;  %789 = vmatprep.subr.mxu1 %v868_v17  ;;  %vm62_vm4 = vcmask 1040384  }
   0x2   :  { %v731_v1 = vld [vmem:[%s1056_s3] ss:$0 sm:$0xff]  ;;  %v25_v6 = vsel %vm24_vm1, %v21_v4, -inf  ;;  %786 = vmatprep.mubr.msk.f32.mxu0 %vm869_vm3, %v868_v17  ;;  %793 = vmatprep.mubr.msk.f32.mxu1 %vm869_vm3, %v868_v17  ;;  %v870_v20 = vmov 0   ;;  %v733_v21 = vld [vmem:[%s1058_s1 + $0x2] sm:$0x3] }
   0x3   :  { %v20_v2 = vld [vmem:[%s1057_s2] sm:$0xff]  ;;  %v910_v3 = vadd.f32 %v731_v1, %v39_v0  ;;  %834 = vset.pattern.permute.xlu0 %v870_v20  ;;  %835 = vset.pattern.permute.xlu1 %v870_v20  ;;  %vm141_vm5 = vcmp.gt.f32.partialorder %v733_v21, 0.5  ;;  %v745_v59 = vld [vmem:[%s1058_s1 + $0x8] sm:$0x3] }
   0x4   :  { %v23_v5 = vsel %vm22_vm0, %v20_v2, -inf  ;;  %v741_v22 = vld [vmem:[%s1058_s1 + $0x6] sm:$0x3]  ;;  %v142_v25 = vsel %vm141_vm5, 1, %v870_v20  ;;  %v732_v36 = vld [vmem:[%s1055_s0 + $0x2] sm:$0x3] }
   0x5   :  { %v53_v7 = vsel %vm52_vm2, %v910_v3, -inf  ;;  %v26_v8 = vmax.f32 %v23_v5, %v25_v6  ;;  %vm331_vm6 = vcmp.gt.f32.partialorder %v741_v22, 0.5  ;;  %v737_v42 = vld [vmem:[%s1058_s1 + $0x4] sm:$0x3]  ;;  %vm426_vm10 = vcmp.gt.f32.partialorder %v745_v59, 0.5 }
   0x6   :  { %54 = vmax.xlane.f32.xlu0 %v53_v7  ;;  %v332_v26 = vsel %vm331_vm6, 1, %v870_v20  ;;  %vm236_vm8 = vcmp.gt.f32.partialorder %v737_v42, 0.5  ;;  %v736_v54 = vld [vmem:[%s1055_s0 + $0x4] sm:$0x3]  ;;  %v427_v60 = vsel %vm426_vm10, 1, %v870_v20 }
   0x7   :  { %v27_v9 = vrot.slane %v26_v8, 4  ;;  %v237_v43 = vsel %vm236_vm8, 1, %v870_v20  ;;  %v740_v6 = vld [vmem:[%s1055_s0 + $0x6] sm:$0x3]  ;;  %v752_v59 = vld [vmem:[%s1055_s0 + $0xc] sm:$0x3] }
   0x9   :  { %v28_v10 = vmax.f32 %v26_v8, %v27_v9 }
   0xb   :  { %v29_v11 = vrot.slane %v28_v10, 2 }
   0xd   :  { %v30_v12 = vmax.f32 %v28_v10, %v29_v11 }
   0xf   :  { %v31_v13 = vrot.slane %v30_v12, 1 }
  0x11   :  { %v918_v14 = vmax.f32 %v30_v12, %v31_v13  ;;  %v749_v12 = vld [vmem:[%s1058_s1 + $0xa] sm:$0x3] }
  0x12   :  { %vm521_vm12 = vcmp.gt.f32.partialorder %v749_v12, 0.5 }
  0x13   :  { %v34_v15 = vsub.f32 %v21_v4, %v918_v14  ;;  %v33_v16 = vsub.f32 %v20_v2, %v918_v14  ;;  %v522_v13 = vsel %vm521_vm12, 1, %v870_v20 }
  0x15   :  { %v37_v18 = vmul.f32 1.442695, %v34_v15  ;;  %v35_v19 = vmul.f32 1.442695, %v33_v16 }
  0x17   :  { %836 = vpow2.f32 %v37_v18 }
  0x18   :  { %838 = vpow2.f32 %v35_v19 }
  0x1c   :  { %144 = vperm.xlu0 %834, %v142_v25  }
  0x20   :  { %334 = vperm.xlu0 %834, %v332_v26  }
  0x24   :  { %v936_v23 = vpop.eup %836 }
  0x25   :  { %v938_v24 = vpop.eup %838  ;;  %783 = vmatpush3.msk.msra.mxu0 %vm62_vm4, %v936_v23  ;;  %790 = vmatpush3.msk.msra.mxu1 %vm62_vm4, %v936_v23 }
  0x26   :  { %784 = vmatprep.subr.mxu0 %v868_v17  ;;  %791 = vmatprep.subr.mxu1 %v868_v17 }
  0x27   :  { %785 = vmatpush3.msra.mxu0 %v938_v24  ;;  %792 = vmatpush3.msra.mxu1 %v938_v24 }
  0x28   :  { %796 = vmatprep.subr.mxu0 %v868_v17  ;;  %803 = vmatprep.subr.mxu1 %v868_v17 }
  0x8f   :  { %v55_v27 = vpop.xlane.xlu0 %54 }
  0x90   :  { %v56_v28 = vsub.f32 %v910_v3, %v55_v27 }
  0x92   :  { %v57_v29 = vmul.f32 1.442695, %v56_v28  ;;  %v744_v28 = vld [vmem:[%s1055_s0 + $0x8] sm:$0x3] }
  0x94   :  { %840 = vpow2.f32 %v57_v29 }
  0x97   :  { %v145_v38 = vpop.permute.xlu0 %144 }
  0x98   :  { %vm146_vm7 = vcmp.eq.s32.totalorder %v145_v38, 1 }
  0x9b   :  { %v335_v7 = vpop.permute.xlu0 %334 }
  0x9c   :  { %vm336_vm11 = vcmp.eq.s32.totalorder %v335_v7, 1 }
  0xa1   :  { %v841_v30 = vpop.eup %840 }
  0xa2   :  { %787 = vmatmul.mubr.msk.f32.vlgmr.msra.gmra.mxu0 %vm22_vm0, %v841_v30 }
  0xa3   :  { %797 = vmatpush3.msk.msra.mxu0 %vm62_vm4, %v936_v23  ;;  %800 = vmatprep.mubr.msk.f32.mxu0 %vm869_vm3, %v868_v17 }
  0xa4   :  { %798 = vmatprep.subr.mxu0 %v868_v17 }
  0xa5   :  { %799 = vmatpush3.msra.mxu0 %v938_v24 }
  0xa6   :  { %810 = vmatprep.subr.mxu0 %v868_v17 }
 0x162   :  { %v132_v31 = vpop.f32.mrf.mxu0 }
 0x163   :  { %842 = vlog2.f32 %v132_v31 }
 0x164   :  { %v788_v32 = vpop.f32.mrf.mxu0 }
 0x170   :  { %v843_v33 = vpop.eup %842 }
 0x171   :  { %v137_v34 = vmul.f32 0.6931472, %v843_v33 }
 0x173   :  { %v138_v35 = vadd.f32 %v137_v34, %v55_v27  ;;  %v753_v34 = vld [vmem:[%s1058_s1 + $0xc] sm:$0x3] }
 0x174   :  { %vm616_vm14 = vcmp.gt.f32.partialorder %v753_v34, 0.5 }
 0x175   :  { %v139_v37 = vadd.f32 %v138_v35, %v918_v14  ;;  %v617_v35 = vsel %vm616_vm14, 1, %v870_v20 }
 0x177   :  { %v140_v39 = vadd.f32 %v732_v36, %v139_v37 }
 0x179   :  { %v147_v40 = vsel %vm146_vm7, %v140_v39, %v910_v3 }
 0x17a   :  { %v152_v41 = vsel %vm52_vm2, %v147_v40, -inf }
 0x17b   :  { %153 = vmax.xlane.f32.xlu1 %v152_v41 }
 0x18c   :  { %239 = vperm.xlu1 %835, %v237_v43  }
 0x204   :  { %v154_v44 = vpop.xlane.xlu1 %153 }
 0x205   :  { %v155_v45 = vsub.f32 %v147_v40, %v154_v44 }
 0x207   :  { %v156_v46 = vmul.f32 1.442695, %v155_v45  ;;  %v748_v45 = vld [vmem:[%s1055_s0 + $0xa] sm:$0x3] }
 0x208   :  { %v240_v53 = vpop.permute.xlu1 %239 }
 0x209   :  { %844 = vpow2.f32 %v156_v46  ;;  %vm241_vm9 = vcmp.eq.s32.totalorder %v240_v53, 1 }
 0x216   :  { %v845_v47 = vpop.eup %844 }
 0x217   :  { %794 = vmatmul.mubr.msk.f32.vlgmr.msra.gmra.mxu1 %vm22_vm0, %v845_v47 }
 0x218   :  { %804 = vmatpush3.msk.msra.mxu1 %vm62_vm4, %v936_v23  ;;  %807 = vmatprep.mubr.msk.f32.mxu1 %vm869_vm3, %v868_v17 }
 0x219   :  { %805 = vmatprep.subr.mxu1 %v868_v17 }
 0x21a   :  { %806 = vmatpush3.msra.mxu1 %v938_v24 }
 0x21b   :  { %817 = vmatprep.subr.mxu1 %v868_v17 }
 0x2d7   :  { %v227_v48 = vpop.f32.mrf.mxu1 }
 0x2d8   :  { %846 = vlog2.f32 %v227_v48 }
 0x2d9   :  { %v795_v49 = vpop.f32.mrf.mxu1 }
 0x2e5   :  { %v847_v50 = vpop.eup %846 }
 0x2e6   :  { %v232_v51 = vmul.f32 0.6931472, %v847_v50 }
 0x2e8   :  { %v233_v52 = vadd.f32 %v232_v51, %v154_v44 }
 0x2ea   :  { %v234_v55 = vadd.f32 %v233_v52, %v918_v14 }
 0x2ec   :  { %v235_v56 = vadd.f32 %v736_v54, %v234_v55 }
 0x2ee   :  { %v242_v57 = vsel %vm241_vm9, %v235_v56, %v147_v40 }
 0x2ef   :  { %v247_v58 = vsel %vm52_vm2, %v242_v57, -inf }
 0x2f0   :  { %248 = vmax.xlane.f32.xlu1 %v247_v58 }
 0x301   :  { %429 = vperm.xlu1 %835, %v427_v60  }
 0x379   :  { %v249_v61 = vpop.xlane.xlu1 %248 }
 0x37a   :  { %v250_v62 = vsub.f32 %v242_v57, %v249_v61 }
 0x37c   :  { %v251_v63 = vmul.f32 1.442695, %v250_v62 }
 0x37d   :  { %v430_v29 = vpop.permute.xlu1 %429 }
 0x37e   :  { %848 = vpow2.f32 %v251_v63  ;;  %vm431_vm13 = vcmp.eq.s32.totalorder %v430_v29, 1 }
 0x38b   :  { %v849_v0 = vpop.eup %848 }
 0x38c   :  { %801 = vmatmul.mubr.msk.f32.vlgmr.msra.gmra.mxu0 %vm22_vm0, %v849_v0 }
 0x38d   :  { %811 = vmatpush3.msk.msra.mxu0 %vm62_vm4, %v936_v23  ;;  %814 = vmatprep.mubr.msk.f32.mxu0 %vm869_vm3, %v868_v17 }
 0x38e   :  { %812 = vmatprep.subr.mxu0 %v868_v17 }
 0x38f   :  { %813 = vmatpush3.msra.mxu0 %v938_v24 }
 0x390   :  { %824 = vmatprep.subr.mxu0 %v868_v17 }
 0x44c   :  { %v322_v1 = vpop.f32.mrf.mxu0 }
 0x44d   :  { %850 = vlog2.f32 %v322_v1 }
 0x44e   :  { %v802_v2 = vpop.f32.mrf.mxu0 }
 0x45a   :  { %v851_v3 = vpop.eup %850 }
 0x45b   :  { %v327_v4 = vmul.f32 0.6931472, %v851_v3 }
 0x45d   :  { %v328_v5 = vadd.f32 %v327_v4, %v249_v61 }
 0x45f   :  { %v329_v8 = vadd.f32 %v328_v5, %v918_v14 }
 0x461   :  { %v330_v9 = vadd.f32 %v740_v6, %v329_v8 }
 0x463   :  { %v337_v10 = vsel %vm336_vm11, %v330_v9, %v242_v57  ;;  %v756_v9 = vld [vmem:[%s1055_s0 + $0xe] sm:$0x3] }
 0x464   :  { %v342_v11 = vsel %vm52_vm2, %v337_v10, -inf }
 0x465   :  { %343 = vmax.xlane.f32.xlu0 %v342_v11 }
 0x47b   :  { %524 = vperm.xlu0 %834, %v522_v13   ;;  %v760_v13 = vld [vmem:[%s1059_s4] ss:$0 sm:$0xff] }
 0x4ee   :  { %v344_v15 = vpop.xlane.xlu0 %343 }
 0x4ef   :  { %v345_v16 = vsub.f32 %v337_v10, %v344_v15 }
 0x4f1   :  { %v346_v18 = vmul.f32 1.442695, %v345_v16 }
 0x4f3   :  { %852 = vpow2.f32 %v346_v18 }
 0x4f6   :  { %v525_v46 = vpop.permute.xlu0 %524 }
 0x4f7   :  { %vm526_vm15 = vcmp.eq.s32.totalorder %v525_v46, 1 }
 0x500   :  { %v853_v19 = vpop.eup %852 }
 0x501   :  { %808 = vmatmul.mubr.msk.f32.vlgmr.msra.gmra.mxu1 %vm22_vm0, %v853_v19 }
 0x502   :  { %818 = vmatpush3.msk.msra.mxu1 %vm62_vm4, %v936_v23  ;;  %821 = vmatprep.mubr.msk.f32.mxu1 %vm869_vm3, %v868_v17 }
 0x503   :  { %819 = vmatprep.subr.mxu1 %v868_v17 }
 0x504   :  { %820 = vmatpush3.msra.mxu1 %v938_v24 }
 0x5c1   :  { %v417_v21 = vpop.f32.mrf.mxu1 }
 0x5c2   :  { %854 = vlog2.f32 %v417_v21 }
 0x5c3   :  { %v809_v22 = vpop.f32.mrf.mxu1 }
 0x5cf   :  { %v855_v25 = vpop.eup %854 }
 0x5d0   :  { %v422_v26 = vmul.f32 0.6931472, %v855_v25 }
 0x5d2   :  { %v423_v27 = vadd.f32 %v422_v26, %v344_v15 }
 0x5d4   :  { %v424_v30 = vadd.f32 %v423_v27, %v918_v14 }
 0x5d6   :  { %v425_v31 = vadd.f32 %v744_v28, %v424_v30 }
 0x5d8   :  { %v432_v32 = vsel %vm431_vm13, %v425_v31, %v337_v10 }
 0x5d9   :  { %v437_v33 = vsel %vm52_vm2, %v432_v32, -inf }
 0x5da   :  { %438 = vmax.xlane.f32.xlu1 %v437_v33 }
 0x5eb   :  { %619 = vperm.xlu1 %835, %v617_v35  }
 0x663   :  { %v439_v36 = vpop.xlane.xlu1 %438 }
 0x664   :  { %v440_v37 = vsub.f32 %v432_v32, %v439_v36 }
 0x666   :  { %v441_v38 = vmul.f32 1.442695, %v440_v37 }
 0x667   :  { %v620_v60 = vpop.permute.xlu1 %619 }
 0x668   :  { %856 = vpow2.f32 %v441_v38 }
 0x675   :  { %v857_v39 = vpop.eup %856 }
 0x676   :  { %815 = vmatmul.mubr.msk.f32.vlgmr.msra.gmra.mxu0 %vm22_vm0, %v857_v39 }
 0x677   :  { %825 = vmatpush3.msk.msra.mxu0 %vm62_vm4, %v936_v23  ;;  %828 = vmatprep.mubr.msk.f32.mxu0 %vm869_vm3, %v868_v17  ;;  %vm621_vm3 = vcmp.eq.s32.totalorder %v620_v60, 1 }
 0x678   :  { %826 = vmatprep.subr.mxu0 %v868_v17 }
 0x679   :  { %827 = vmatpush3.msra.mxu0 %v938_v24  ;;  %v757_v24 = vld [vmem:[%s1058_s1 + $0xe] sm:$0x3] }
 0x67a   :  { %vm711_vm1 = vcmp.gt.f32.partialorder %v757_v24, 0.5 }
 0x67b   :  { %v712_v49 = vsel %vm711_vm1, 1, %v870_v20 }
 0x736   :  { %v512_v40 = vpop.f32.mrf.mxu0 }
 0x737   :  { %858 = vlog2.f32 %v512_v40 }
 0x738   :  { %v816_v41 = vpop.f32.mrf.mxu0 }
 0x744   :  { %v859_v42 = vpop.eup %858 }
 0x745   :  { %v517_v43 = vmul.f32 0.6931472, %v859_v42 }
 0x747   :  { %v518_v44 = vadd.f32 %v517_v43, %v439_v36 }
 0x749   :  { %v519_v23 = vadd.f32 %v518_v44, %v918_v14 }
 0x74b   :  { %v520_v47 = vadd.f32 %v748_v45, %v519_v23 }
 0x74d   :  { %v527_v48 = vsel %vm526_vm15, %v520_v47, %v432_v32 }
 0x74e   :  { %v532_v17 = vsel %vm52_vm2, %v527_v48, -inf }
 0x74f   :  { %533 = vmax.xlane.f32.xlu0 %v532_v17 }
 0x765   :  { %714 = vperm.xlu0 %834, %v712_v49  }
 0x7d8   :  { %v534_v50 = vpop.xlane.xlu0 %533 }
 0x7d9   :  { %v535_v51 = vsub.f32 %v527_v48, %v534_v50 }
 0x7db   :  { %v536_v52 = vmul.f32 1.442695, %v535_v51 }
 0x7dd   :  { %860 = vpow2.f32 %v536_v52 }
 0x7e0   :  { %v715_v10 = vpop.permute.xlu0 %714 }
 0x7e1   :  { %vm716_vm4 = vcmp.eq.s32.totalorder %v715_v10, 1 }
 0x7ea   :  { %v861_v53 = vpop.eup %860 }
 0x7eb   :  { %822 = vmatmul.mubr.msk.f32.vlgmr.msra.gmra.mxu1 %vm22_vm0, %v861_v53 }
 0x8ab   :  { %v607_v54 = vpop.f32.mrf.mxu1 }
 0x8ac   :  { %862 = vlog2.f32 %v607_v54 }
 0x8ad   :  { %v823_v55 = vpop.f32.mrf.mxu1 }
 0x8b9   :  { %v863_v56 = vpop.eup %862 }
 0x8ba   :  { %v612_v57 = vmul.f32 0.6931472, %v863_v56 }
 0x8bc   :  { %v613_v58 = vadd.f32 %v612_v57, %v534_v50 }
 0x8be   :  { %v614_v20 = vadd.f32 %v613_v58, %v918_v14 }
 0x8c0   :  { %v615_v61 = vadd.f32 %v752_v59, %v614_v20 }
 0x8c2   :  { %v622_v62 = vsel %vm621_vm3, %v615_v61, %v527_v48 }
 0x8c3   :  { %v627_v63 = vsel %vm52_vm2, %v622_v62, -inf }
 0x8c4   :  { %628 = vmax.xlane.f32.xlu1 %v627_v63 }
 0x94d   :  { %v629_v0 = vpop.xlane.xlu1 %628 }
 0x94e   :  { %v630_v1 = vsub.f32 %v622_v62, %v629_v0 }
 0x950   :  { %v631_v2 = vmul.f32 1.442695, %v630_v1 }
 0x952   :  { %864 = vpow2.f32 %v631_v2 }
 0x95f   :  { %v865_v3 = vpop.eup %864 }
 0x960   :  { %829 = vmatmul.mubr.msk.f32.vlgmr.msra.gmra.mxu0 %vm22_vm0, %v865_v3 }
 0xa20   :  { %v702_v4 = vpop.f32.mrf.mxu0 }
 0xa21   :  { %866 = vlog2.f32 %v702_v4 }
 0xa22   :  { %v830_v5 = vpop.f32.mrf.mxu0 }
 0xa2e   :  { %v867_v6 = vpop.eup %866 }
 0xa2f   :  { %v707_v7 = vmul.f32 0.6931472, %v867_v6 }
 0xa31   :  { %v708_v8 = vadd.f32 %v707_v7, %v629_v0 }
 0xa33   :  { %v709_v11 = vadd.f32 %v708_v8, %v918_v14 }
 0xa35   :  { %v710_v12 = vadd.f32 %v756_v9, %v709_v11 }
 0xa37   :  { %v717_v15 = vsel %vm716_vm4, %v710_v12, %v622_v62 }
 0xa38   :  { %v725_v16 = vadd.f32 %v760_v13, %v717_v15 }
 0xa3a   :  { %726 = vst.msk [vmem:[%s1060_s5] sm:$0x3] %vm52_vm2, %v725_v16 }

// kernel: tener_forward.9
= control target key start
LH: loop header
LB: loop body
LE: loop exit
PB: predicated region body
PF: predicated region fallthrough
CT: control target
= control target key end

     0   :  { %vm1521_vm0 = vcmask 785408   ;;  %vm3355_vm1 = vcmask 523264   ;;  %s6382_s1 = inlined_call_operand.vmem [shape: bf16[480,960], index: 1, kind: input, shape index: {}]   ;;  %s6383_s0 = inlined_call_operand.vmem [shape: f32[16,480], index: 0, kind: input, shape index: {}]   ;;  %s6384_s3 = inlined_call_operand.vmem [shape: bf16[960,480], index: 3, kind: input, shape index: {}]   ;;  %s6385_s2 = inlined_call_operand.vmem [shape: f32[1,960], index: 2, kind: input, shape index: {}]   ;;  %s6386_s4 = inlined_call_operand.vmem [shape: f32[1,480], index: 4, kind: input, shape index: {}]   ;;  %s6387_s5 = inlined_call_operand.vmem [shape: f32[1,480], index: 5, kind: input, shape index: {}]   ;;  %s6388_s6 = inlined_call_operand.vmem [shape: f32[1,480], index: 6, kind: input, shape index: {}]   ;;  %s6389_s7 = inlined_call_operand.vmem [shape: f32[16,480], index: 7, kind: output, shape index: {}]  }
   0x1   :  { %v95_v0 = vld [vmem:[%s6382_s1 + $0x1c0] sm:$0xff]  ;;  %v30_v48 = vld [vmem:[%s6383_s0 + $0x18] sm:$0xff]  ;;  %v28_v59 = vld [vmem:[%s6383_s0 + $0x8] sm:$0xff] }
   0x2   :  { %v99_v1 = vld [vmem:[%s6382_s1 + $0x1e0] sm:$0xff]  ;;  %v34_v51 = vld [vmem:[%s6383_s0 + $0x38] sm:$0xff]  ;;  %v32_v62 = vld [vmem:[%s6383_s0 + $0x28] sm:$0xff] }
   0x3   :  { %v223_v2 = vld [vmem:[%s6382_s1 + $0x5c0] sm:$0xff]  ;;  %v3897_v3 = vcombine.high %v95_v0, %v99_v1  ;;  %v3896_v5 = vcombine.low %v95_v0, %v99_v1  ;;  %v4828_v53 = vpack.c.bf16 %v34_v51, %v30_v48  ;;  %v4850_v0 = vpack.c.bf16 %v32_v62, %v28_v59 }
   0x4   :  { %v227_v4 = vld [vmem:[%s6382_s1 + $0x5e0] sm:$0xff] }
   0x5   :  { %v87_v6 = vld [vmem:[%s6382_s1 + $0x180] sm:$0xff]  ;;  %v4025_v8 = vcombine.high %v223_v2, %v227_v4  ;;  %v4024_v9 = vcombine.low %v223_v2, %v227_v4  ;;  %1525 = vmatprep.subr.bf16.mxu0 %v3897_v3  ;;  %4080 = vmatprep.mubr.msk.bf16.mxu1 %vm1521_vm0, %v4828_v53 }
   0x6   :  { %v91_v7 = vld [vmem:[%s6382_s1 + $0x1a0] sm:$0xff]  ;;  %1526 = vmatpush1.bf16.msra.mxu0 %v3896_v5  ;;  %1557 = vmatprep.mubr.bf16.mxu0 %v4850_v0 }
   0x7   :  { %v3889_v10 = vcombine.high %v87_v6, %v91_v7  ;;  %v215_v11 = vld [vmem:[%s6382_s1 + $0x580] sm:$0xff]  ;;  %1568 = vmatprep.subr.bf16.mxu1 %v4025_v8  ;;  %v3888_v18 = vcombine.low %v87_v6, %v91_v7 }
   0x8   :  { %v219_v12 = vld [vmem:[%s6382_s1 + $0x5a0] sm:$0xff]  ;;  %1569 = vmatpush1.bf16.msra.mxu1 %v4024_v9 }
   0x9   :  { %v79_v13 = vld [vmem:[%s6382_s1 + $0x140] sm:$0xff]  ;;  %v4017_v14 = vcombine.high %v215_v11, %v219_v12  ;;  %1527 = vmatprep.subr.bf16.mxu0 %v3889_v10  ;;  %v4016_v19 = vcombine.low %v215_v11, %v219_v12 }
   0xa   :  { %v83_v15 = vld [vmem:[%s6382_s1 + $0x160] sm:$0xff]  ;;  %1528 = vmatpush1.bf16.msra.mxu0 %v3888_v18 }
   0xb   :  { %v207_v16 = vld [vmem:[%s6382_s1 + $0x540] sm:$0xff]  ;;  %v3881_v20 = vcombine.high %v79_v13, %v83_v15  ;;  %1570 = vmatprep.subr.bf16.mxu1 %v4017_v14  ;;  %v3880_v26 = vcombine.low %v79_v13, %v83_v15 }
   0xc   :  { %v211_v17 = vld [vmem:[%s6382_s1 + $0x560] sm:$0xff]  ;;  %1571 = vmatpush1.bf16.msra.mxu1 %v4016_v19 }
   0xd   :  { %v4009_v21 = vcombine.high %v207_v16, %v211_v17  ;;  %v71_v22 = vld [vmem:[%s6382_s1 + $0x100] sm:$0xff]  ;;  %1529 = vmatprep.subr.bf16.mxu0 %v3881_v20  ;;  %v4008_v27 = vcombine.low %v207_v16, %v211_v17 }
   0xe   :  { %v75_v23 = vld [vmem:[%s6382_s1 + $0x120] sm:$0xff]  ;;  %1530 = vmatpush1.bf16.msra.mxu0 %v3880_v26 }
   0xf   :  { %v199_v24 = vld [vmem:[%s6382_s1 + $0x500] sm:$0xff]  ;;  %v3873_v28 = vcombine.high %v71_v22, %v75_v23  ;;  %1572 = vmatprep.subr.bf16.mxu1 %v4009_v21  ;;  %v3872_v34 = vcombine.low %v71_v22, %v75_v23 }
  0x10   :  { %v203_v25 = vld [vmem:[%s6382_s1 + $0x520] sm:$0xff]  ;;  %1573 = vmatpush1.bf16.msra.mxu1 %v4008_v27 }
  0x11   :  { %v4001_v29 = vcombine.high %v199_v24, %v203_v25  ;;  %v63_v30 = vld [vmem:[%s6382_s1 + $0xc0] sm:$0xff]  ;;  %1531 = vmatprep.subr.bf16.mxu0 %v3873_v28  ;;  %v4000_v35 = vcombine.low %v199_v24, %v203_v25 }
  0x12   :  { %v67_v31 = vld [vmem:[%s6382_s1 + $0xe0] sm:$0xff]  ;;  %1532 = vmatpush1.bf16.msra.mxu0 %v3872_v34 }
  0x13   :  { %v191_v32 = vld [vmem:[%s6382_s1 + $0x4c0] sm:$0xff]  ;;  %v3865_v36 = vcombine.high %v63_v30, %v67_v31  ;;  %1574 = vmatprep.subr.bf16.mxu1 %v4001_v29  ;;  %v3864_v42 = vcombine.low %v63_v30, %v67_v31 }
  0x14   :  { %v195_v33 = vld [vmem:[%s6382_s1 + $0x4e0] sm:$0xff]  ;;  %1575 = vmatpush1.bf16.msra.mxu1 %v4000_v35 }
  0x15   :  { %v3993_v37 = vcombine.high %v191_v32, %v195_v33  ;;  %v55_v38 = vld [vmem:[%s6382_s1 + $0x80] sm:$0xff]  ;;  %1533 = vmatprep.subr.bf16.mxu0 %v3865_v36  ;;  %v3992_v43 = vcombine.low %v191_v32, %v195_v33 }
  0x16   :  { %v59_v39 = vld [vmem:[%s6382_s1 + $0xa0] sm:$0xff]  ;;  %1534 = vmatpush1.bf16.msra.mxu0 %v3864_v42 }
  0x17   :  { %v183_v40 = vld [vmem:[%s6382_s1 + $0x480] sm:$0xff]  ;;  %v3857_v44 = vcombine.high %v55_v38, %v59_v39  ;;  %1576 = vmatprep.subr.bf16.mxu1 %v3993_v37  ;;  %v3856_v52 = vcombine.low %v55_v38, %v59_v39 }
  0x18   :  { %v187_v41 = vld [vmem:[%s6382_s1 + $0x4a0] sm:$0xff]  ;;  %1577 = vmatpush1.bf16.msra.mxu1 %v3992_v43 }
  0x19   :  { %v3985_v45 = vcombine.high %v183_v40, %v187_v41  ;;  %v47_v46 = vld [vmem:[%s6382_s1 + $0x40] sm:$0xff]  ;;  %1535 = vmatprep.subr.bf16.mxu0 %v3857_v44  ;;  %v3984_v54 = vcombine.low %v183_v40, %v187_v41 }
  0x1a   :  { %v51_v47 = vld [vmem:[%s6382_s1 + $0x60] sm:$0xff]  ;;  %1536 = vmatpush1.bf16.msra.mxu0 %v3856_v52 }
  0x1b   :  { %v175_v49 = vld [vmem:[%s6382_s1 + $0x440] sm:$0xff]  ;;  %v3849_v55 = vcombine.high %v47_v46, %v51_v47  ;;  %1578 = vmatprep.subr.bf16.mxu1 %v3985_v45  ;;  %v3848_v63 = vcombine.low %v47_v46, %v51_v47 }
  0x1c   :  { %v179_v50 = vld [vmem:[%s6382_s1 + $0x460] sm:$0xff]  ;;  %1579 = vmatpush1.bf16.msra.mxu1 %v3984_v54 }
  0x1d   :  { %v3977_v56 = vcombine.high %v175_v49, %v179_v50  ;;  %v39_v57 = vld [vmem:[%s6382_s1] sm:$0xff]  ;;  %1537 = vmatprep.subr.bf16.mxu0 %v3849_v55  ;;  %v3976_v1 = vcombine.low %v175_v49, %v179_v50  ;;  %v96_v55 = vld [vmem:[%s6382_s1 + $0x1c8] sm:$0xff] }
  0x1e   :  { %v43_v58 = vld [vmem:[%s6382_s1 + $0x20] sm:$0xff]  ;;  %1538 = vmatpush1.bf16.msra.mxu0 %v3848_v63 }
  0x1f   :  { %v167_v60 = vld [vmem:[%s6382_s1 + $0x400] sm:$0xff]  ;;  %v3841_v2 = vcombine.high %v39_v57, %v43_v58  ;;  %1580 = vmatprep.subr.bf16.mxu1 %v3977_v56  ;;  %v3840_v8 = vcombine.low %v39_v57, %v43_v58  ;;  %v100_v56 = vld [vmem:[%s6382_s1 + $0x1e8] sm:$0xff] }
  0x20   :  { %v171_v61 = vld [vmem:[%s6382_s1 + $0x420] sm:$0xff]  ;;  %1581 = vmatpush1.bf16.msra.mxu1 %v3976_v1  ;;  %v3899_v62 = vcombine.high %v96_v55, %v100_v56 }
  0x21   :  { %v3969_v3 = vcombine.high %v167_v60, %v171_v61  ;;  %v159_v4 = vld [vmem:[%s6382_s1 + $0x3c0] sm:$0xff]  ;;  %1539 = vmatprep.subr.bf16.mxu0 %v3841_v2  ;;  %v3968_v9 = vcombine.low %v167_v60, %v171_v61  ;;  %v29_v60 = vld [vmem:[%s6383_s0 + $0x10] sm:$0xff]  ;;  %v88_v2 = vld [vmem:[%s6382_s1 + $0x188] sm:$0xff] }
  0x22   :  { %v163_v5 = vld [vmem:[%s6382_s1 + $0x3e0] sm:$0xff]  ;;  %1540 = vmatpush1.bf16.msra.mxu0 %v3840_v8  ;;  %v33_v61 = vld [vmem:[%s6383_s0 + $0x30] sm:$0xff] }
  0x23   :  { %v271_v6 = vld [vmem:[%s6382_s1 + $0x740] sm:$0xff]  ;;  %v3961_v10 = vcombine.high %v159_v4, %v163_v5  ;;  %1582 = vmatprep.subr.bf16.mxu1 %v3969_v3  ;;  %v3960_v16 = vcombine.low %v159_v4, %v163_v5  ;;  %v92_v3 = vld [vmem:[%s6382_s1 + $0x1a8] sm:$0xff]  ;;  %v4955_v4 = vpack.c.bf16 %v33_v61, %v29_v60 }
  0x24   :  { %v275_v7 = vld [vmem:[%s6382_s1 + $0x760] sm:$0xff]  ;;  %1583 = vmatpush1.bf16.msra.mxu1 %v3968_v9  ;;  %v3891_v8 = vcombine.high %v88_v2, %v92_v3  ;;  %v224_v9 = vld [vmem:[%s6382_s1 + $0x5c8] sm:$0xff] }
  0x25   :  { %v4073_v11 = vcombine.high %v271_v6, %v275_v7  ;;  %v151_v12 = vld [vmem:[%s6382_s1 + $0x380] sm:$0xff]  ;;  %1541 = vmatprep.subr.bf16.mxu0 %v3961_v10  ;;  %v4072_v17 = vcombine.low %v271_v6, %v275_v7  ;;  %v3898_v6 = vcombine.low %v96_v55, %v100_v56  ;;  %v228_v10 = vld [vmem:[%s6382_s1 + $0x5e8] sm:$0xff] }
  0x26   :  { %v155_v13 = vld [vmem:[%s6382_s1 + $0x3a0] sm:$0xff]  ;;  %1542 = vmatpush2.bf16.msra.mxu0 %v3960_v16  ;;  %v3890_v16 = vcombine.low %v88_v2, %v92_v3  ;;  %v40_v55 = vld [vmem:[%s6382_s1 + $0x8] sm:$0xff] }
  0x27   :  { %v263_v14 = vld [vmem:[%s6382_s1 + $0x700] sm:$0xff]  ;;  %v3953_v18 = vcombine.high %v151_v12, %v155_v13  ;;  %1588 = vmatprep.subr.bf16.mxu1 %v4073_v11  ;;  %v3952_v24 = vcombine.low %v151_v12, %v155_v13  ;;  %v80_v11 = vld [vmem:[%s6382_s1 + $0x148] sm:$0xff] }
  0x28   :  { %v267_v15 = vld [vmem:[%s6382_s1 + $0x720] sm:$0xff]  ;;  %1589 = vmatpush2.bf16.msra.mxu1 %v4072_v17  ;;  %v84_v12 = vld [vmem:[%s6382_s1 + $0x168] sm:$0xff]  ;;  %v4027_v17 = vcombine.high %v224_v9, %v228_v10 }
  0x29   :  { %v4065_v19 = vcombine.high %v263_v14, %v267_v15  ;;  %v143_v20 = vld [vmem:[%s6382_s1 + $0x340] sm:$0xff]  ;;  %1543 = vmatprep.subr.bf16.mxu0 %v3953_v18  ;;  %v4064_v25 = vcombine.low %v263_v14, %v267_v15  ;;  %v3883_v18 = vcombine.high %v80_v11, %v84_v12  ;;  %v44_v56 = vld [vmem:[%s6382_s1 + $0x28] sm:$0xff] }
  0x2a   :  { %v147_v21 = vld [vmem:[%s6382_s1 + $0x360] sm:$0xff]  ;;  %1544 = vmatpush2.bf16.msra.mxu0 %v3952_v24  ;;  %v4026_v24 = vcombine.low %v224_v9, %v228_v10  ;;  %v3843_v60 = vcombine.high %v40_v55, %v44_v56  ;;  %v176_v61 = vld [vmem:[%s6382_s1 + $0x448] sm:$0xff]  ;;  %v3842_v3 = vcombine.low %v40_v55, %v44_v56 }
  0x2b   :  { %v255_v22 = vld [vmem:[%s6382_s1 + $0x6c0] sm:$0xff]  ;;  %v3945_v26 = vcombine.high %v143_v20, %v147_v21  ;;  %1590 = vmatprep.subr.bf16.mxu1 %v4065_v19  ;;  %v3944_v32 = vcombine.low %v143_v20, %v147_v21  ;;  %v216_v19 = vld [vmem:[%s6382_s1 + $0x588] sm:$0xff] }
  0x2c   :  { %v259_v23 = vld [vmem:[%s6382_s1 + $0x6e0] sm:$0xff]  ;;  %1591 = vmatpush2.bf16.msra.mxu1 %v4064_v25  ;;  %v220_v20 = vld [vmem:[%s6382_s1 + $0x5a8] sm:$0xff]  ;;  %v3882_v25 = vcombine.low %v80_v11, %v84_v12 }
  0x2d   :  { %v4057_v27 = vcombine.high %v255_v22, %v259_v23  ;;  %v135_v28 = vld [vmem:[%s6382_s1 + $0x300] sm:$0xff]  ;;  %1545 = vmatprep.subr.bf16.mxu0 %v3945_v26  ;;  %v4056_v33 = vcombine.low %v255_v22, %v259_v23  ;;  %v72_v22 = vld [vmem:[%s6382_s1 + $0x108] sm:$0xff]  ;;  %v4019_v26 = vcombine.high %v216_v19, %v220_v20 }
  0x2e   :  { %v139_v29 = vld [vmem:[%s6382_s1 + $0x320] sm:$0xff]  ;;  %1546 = vmatpush2.bf16.msra.mxu0 %v3944_v32  ;;  %v76_v23 = vld [vmem:[%s6382_s1 + $0x128] sm:$0xff]  ;;  %v4018_v32 = vcombine.low %v216_v19, %v220_v20 }
  0x2f   :  { %v247_v30 = vld [vmem:[%s6382_s1 + $0x680] sm:$0xff]  ;;  %v3937_v34 = vcombine.high %v135_v28, %v139_v29  ;;  %1592 = vmatprep.subr.bf16.mxu1 %v4057_v27  ;;  %v3936_v40 = vcombine.low %v135_v28, %v139_v29  ;;  %v3875_v27 = vcombine.high %v72_v22, %v76_v23  ;;  %v208_v28 = vld [vmem:[%s6382_s1 + $0x548] sm:$0xff] }
  0x30   :  { %v251_v31 = vld [vmem:[%s6382_s1 + $0x6a0] sm:$0xff]  ;;  %1593 = vmatpush2.bf16.msra.mxu1 %v4056_v33  ;;  %v212_v29 = vld [vmem:[%s6382_s1 + $0x568] sm:$0xff]  ;;  %v3874_v33 = vcombine.low %v72_v22, %v76_v23 }
  0x31   :  { %v4049_v35 = vcombine.high %v247_v30, %v251_v31  ;;  %v127_v36 = vld [vmem:[%s6382_s1 + $0x2c0] sm:$0xff]  ;;  %1547 = vmatprep.subr.bf16.mxu0 %v3937_v34  ;;  %v4048_v41 = vcombine.low %v247_v30, %v251_v31  ;;  %v64_v30 = vld [vmem:[%s6382_s1 + $0xc8] sm:$0xff]  ;;  %v4011_v34 = vcombine.high %v208_v28, %v212_v29 }
  0x32   :  { %v131_v37 = vld [vmem:[%s6382_s1 + $0x2e0] sm:$0xff]  ;;  %1548 = vmatpush2.bf16.msra.mxu0 %v3936_v40  ;;  %v68_v31 = vld [vmem:[%s6382_s1 + $0xe8] sm:$0xff]  ;;  %v4010_v40 = vcombine.low %v208_v28, %v212_v29 }
  0x33   :  { %v239_v38 = vld [vmem:[%s6382_s1 + $0x640] sm:$0xff]  ;;  %v3929_v42 = vcombine.high %v127_v36, %v131_v37  ;;  %1594 = vmatprep.subr.bf16.mxu1 %v4049_v35  ;;  %v3928_v48 = vcombine.low %v127_v36, %v131_v37  ;;  %v3867_v35 = vcombine.high %v64_v30, %v68_v31  ;;  %v200_v36 = vld [vmem:[%s6382_s1 + $0x508] sm:$0xff] }
  0x34   :  { %v243_v39 = vld [vmem:[%s6382_s1 + $0x660] sm:$0xff]  ;;  %1595 = vmatpush2.bf16.msra.mxu1 %v4048_v41  ;;  %v204_v37 = vld [vmem:[%s6382_s1 + $0x528] sm:$0xff]  ;;  %v3866_v41 = vcombine.low %v64_v30, %v68_v31 }
  0x35   :  { %v4041_v43 = vcombine.high %v239_v38, %v243_v39  ;;  %v119_v44 = vld [vmem:[%s6382_s1 + $0x280] sm:$0xff]  ;;  %1549 = vmatprep.subr.bf16.mxu0 %v3929_v42  ;;  %v4040_v49 = vcombine.low %v239_v38, %v243_v39  ;;  %v56_v38 = vld [vmem:[%s6382_s1 + $0x88] sm:$0xff]  ;;  %v4003_v42 = vcombine.high %v200_v36, %v204_v37 }
  0x36   :  { %v123_v45 = vld [vmem:[%s6382_s1 + $0x2a0] sm:$0xff]  ;;  %1550 = vmatpush2.bf16.msra.mxu0 %v3928_v48  ;;  %v60_v39 = vld [vmem:[%s6382_s1 + $0xa8] sm:$0xff]  ;;  %v4002_v48 = vcombine.low %v200_v36, %v204_v37 }
  0x37   :  { %v231_v46 = vld [vmem:[%s6382_s1 + $0x600] sm:$0xff]  ;;  %v3921_v50 = vcombine.high %v119_v44, %v123_v45  ;;  %1596 = vmatprep.subr.bf16.mxu1 %v4041_v43  ;;  %v3920_v57 = vcombine.low %v119_v44, %v123_v45  ;;  %v3859_v43 = vcombine.high %v56_v38, %v60_v39  ;;  %v192_v44 = vld [vmem:[%s6382_s1 + $0x4c8] sm:$0xff] }
  0x38   :  { %v235_v47 = vld [vmem:[%s6382_s1 + $0x620] sm:$0xff]  ;;  %1597 = vmatpush2.bf16.msra.mxu1 %v4040_v49  ;;  %v196_v45 = vld [vmem:[%s6382_s1 + $0x4e8] sm:$0xff]  ;;  %v3858_v49 = vcombine.low %v56_v38, %v60_v39 }
  0x39   :  { %v4033_v51 = vcombine.high %v231_v46, %v235_v47  ;;  %v111_v52 = vld [vmem:[%s6382_s1 + $0x240] sm:$0xff]  ;;  %1551 = vmatprep.subr.bf16.mxu0 %v3921_v50  ;;  %v4032_v58 = vcombine.low %v231_v46, %v235_v47  ;;  %v48_v46 = vld [vmem:[%s6382_s1 + $0x48] sm:$0xff]  ;;  %v3995_v50 = vcombine.high %v192_v44, %v196_v45 }
  0x3a   :  { %v115_v54 = vld [vmem:[%s6382_s1 + $0x260] sm:$0xff]  ;;  %1552 = vmatpush2.bf16.msra.mxu0 %v3920_v57  ;;  %v52_v47 = vld [vmem:[%s6382_s1 + $0x68] sm:$0xff]  ;;  %v3994_v57 = vcombine.low %v192_v44, %v196_v45 }
  0x3b   :  { %v3913_v59 = vcombine.high %v111_v52, %v115_v54  ;;  %1598 = vmatprep.subr.bf16.mxu1 %v4033_v51  ;;  %v103_v63 = vld [vmem:[%s6382_s1 + $0x200] sm:$0xff]  ;;  %v3912_v5 = vcombine.low %v111_v52, %v115_v54  ;;  %v3851_v51 = vcombine.high %v48_v46, %v52_v47  ;;  %v184_v52 = vld [vmem:[%s6382_s1 + $0x488] sm:$0xff] }
  0x3c   :  { %v107_v1 = vld [vmem:[%s6382_s1 + $0x220] sm:$0xff]  ;;  %1599 = vmatpush2.bf16.msra.mxu1 %v4032_v58  ;;  %v188_v54 = vld [vmem:[%s6382_s1 + $0x4a8] sm:$0xff]  ;;  %v3850_v58 = vcombine.low %v48_v46, %v52_v47 }
  0x3d   :  { %1553 = vmatprep.subr.bf16.mxu0 %v3913_v59  ;;  %v3905_v7 = vcombine.high %v103_v63, %v107_v1  ;;  %1611 = vmatprep.subr.bf16.mxu1 %v3899_v62  ;;  %v3904_v13 = vcombine.low %v103_v63, %v107_v1  ;;  %v27_v14 = vld [vmem:[%s6383_s0] sm:$0xff]  ;;  %v3987_v59 = vcombine.high %v184_v52, %v188_v54  ;;  %v180_v62 = vld [vmem:[%s6382_s1 + $0x468] sm:$0xff] }
  0x3e   :  { %1554 = vmatpush2.bf16.msra.mxu0 %v3912_v5  ;;  %v31_v15 = vld [vmem:[%s6383_s0 + $0x20] sm:$0xff]  ;;  %v160_v63 = vld [vmem:[%s6382_s1 + $0x3c8] sm:$0xff]  ;;  %v3986_v2 = vcombine.low %v184_v52, %v188_v54  ;;  %v3979_v5 = vcombine.high %v176_v61, %v180_v62  ;;  %v3978_v11 = vcombine.low %v176_v61, %v180_v62 }
  0x3f   :  { %1601 = vmatmul.mubr.bf16.vlgmr.msra.gmra.mxu1 %v4955_v4  ;;  %1555 = vmatprep.subr.bf16.mxu0 %v3905_v7  ;;  %v4983_v21 = vpack.c.bf16 %v31_v15, %v27_v14  ;;  %v164_v1 = vld [vmem:[%s6382_s1 + $0x3e8] sm:$0xff] }
  0x40   :  { %1612 = vmatpush1.bf16.msra.mxu1 %v3898_v6  ;;  %1643 = vmatprep.mubr.bf16.mxu1 %v4850_v0  ;;  %v3963_v6 = vcombine.high %v160_v63, %v164_v1  ;;  %v168_v7 = vld [vmem:[%s6382_s1 + $0x408] sm:$0xff]  ;;  %v3962_v12 = vcombine.low %v160_v63, %v164_v1  ;;  %v97_v1 = vld [vmem:[%s6382_s1 + $0x1d0] sm:$0xff] }
  0x41   :  { %1613 = vmatprep.subr.bf16.mxu1 %v3891_v8  ;;  %v172_v8 = vld [vmem:[%s6382_s1 + $0x428] sm:$0xff] }
  0x42   :  { %1556 = vmatpush2.bf16.msra.mxu0 %v3904_v13  ;;  %v152_v9 = vld [vmem:[%s6382_s1 + $0x388] sm:$0xff]  ;;  %v3971_v13 = vcombine.high %v168_v7, %v172_v8  ;;  %v3970_v19 = vcombine.low %v168_v7, %v172_v8  ;;  %v89_v8 = vld [vmem:[%s6382_s1 + $0x190] sm:$0xff] }
  0x43   :  { %1654 = vmatprep.subr.bf16.mxu0 %v4027_v17  ;;  %v156_v10 = vld [vmem:[%s6382_s1 + $0x3a8] sm:$0xff] }
  0x44   :  { %1614 = vmatpush1.bf16.msra.mxu1 %v3890_v16  ;;  %v3955_v14 = vcombine.high %v152_v9, %v156_v10  ;;  %v272_v15 = vld [vmem:[%s6382_s1 + $0x748] sm:$0xff]  ;;  %v3954_v20 = vcombine.low %v152_v9, %v156_v10  ;;  %v93_v9 = vld [vmem:[%s6382_s1 + $0x1b0] sm:$0xff] }
  0x45   :  { %1615 = vmatprep.subr.bf16.mxu1 %v3883_v18  ;;  %1558 = vmatmul.mubr.bf16.vlgmr.msra.gmra.mxu0 %v4983_v21  ;;  %v276_v16 = vld [vmem:[%s6382_s1 + $0x768] sm:$0xff] }
  0x46   :  { %1655 = vmatpush1.bf16.msra.mxu0 %v4026_v24  ;;  %4081 = vmatprep.mubr.msk.bf16.mxu0 %vm1521_vm0, %v4828_v53  ;;  %v144_v17 = vld [vmem:[%s6382_s1 + $0x348] sm:$0xff]  ;;  %v4075_v22 = vcombine.high %v272_v15, %v276_v16  ;;  %v4074_v28 = vcombine.low %v272_v15, %v276_v16  ;;  %v81_v16 = vld [vmem:[%s6382_s1 + $0x150] sm:$0xff] }
  0x47   :  { %1656 = vmatprep.subr.bf16.mxu0 %v4019_v26  ;;  %v148_v18 = vld [vmem:[%s6382_s1 + $0x368] sm:$0xff] }
  0x48   :  { %1616 = vmatpush1.bf16.msra.mxu1 %v3882_v25  ;;  %v3947_v23 = vcombine.high %v144_v17, %v148_v18  ;;  %v264_v24 = vld [vmem:[%s6382_s1 + $0x708] sm:$0xff]  ;;  %v3946_v29 = vcombine.low %v144_v17, %v148_v18  ;;  %v85_v17 = vld [vmem:[%s6382_s1 + $0x170] sm:$0xff] }
  0x49   :  { %1617 = vmatprep.subr.bf16.mxu1 %v3875_v27  ;;  %v268_v25 = vld [vmem:[%s6382_s1 + $0x728] sm:$0xff] }
  0x4a   :  { %1657 = vmatpush1.bf16.msra.mxu0 %v4018_v32  ;;  %v136_v26 = vld [vmem:[%s6382_s1 + $0x308] sm:$0xff]  ;;  %v4067_v30 = vcombine.high %v264_v24, %v268_v25  ;;  %v4066_v36 = vcombine.low %v264_v24, %v268_v25  ;;  %v3892_v24 = vcombine.low %v89_v8, %v93_v9  ;;  %v73_v25 = vld [vmem:[%s6382_s1 + $0x110] sm:$0xff] }
  0x4b   :  { %1658 = vmatprep.subr.bf16.mxu0 %v4011_v34  ;;  %v140_v27 = vld [vmem:[%s6382_s1 + $0x328] sm:$0xff] }
  0x4c   :  { %1618 = vmatpush1.bf16.msra.mxu1 %v3874_v33  ;;  %v3939_v31 = vcombine.high %v136_v26, %v140_v27  ;;  %v256_v32 = vld [vmem:[%s6382_s1 + $0x6c8] sm:$0xff]  ;;  %v3938_v37 = vcombine.low %v136_v26, %v140_v27  ;;  %v77_v26 = vld [vmem:[%s6382_s1 + $0x130] sm:$0xff] }
  0x4d   :  { %1619 = vmatprep.subr.bf16.mxu1 %v3867_v35  ;;  %v260_v33 = vld [vmem:[%s6382_s1 + $0x6e8] sm:$0xff] }
  0x4e   :  { %1659 = vmatpush1.bf16.msra.mxu0 %v4010_v40  ;;  %v128_v34 = vld [vmem:[%s6382_s1 + $0x2c8] sm:$0xff]  ;;  %v4059_v38 = vcombine.high %v256_v32, %v260_v33  ;;  %v4058_v44 = vcombine.low %v256_v32, %v260_v33  ;;  %v3884_v32 = vcombine.low %v81_v16, %v85_v17  ;;  %v65_v33 = vld [vmem:[%s6382_s1 + $0xd0] sm:$0xff] }
  0x4f   :  { %1660 = vmatprep.subr.bf16.mxu0 %v4003_v42  ;;  %v132_v35 = vld [vmem:[%s6382_s1 + $0x2e8] sm:$0xff] }
  0x50   :  { %1620 = vmatpush1.bf16.msra.mxu1 %v3866_v41  ;;  %v3931_v39 = vcombine.high %v128_v34, %v132_v35  ;;  %v248_v40 = vld [vmem:[%s6382_s1 + $0x688] sm:$0xff]  ;;  %v3930_v45 = vcombine.low %v128_v34, %v132_v35  ;;  %v3877_v35 = vcombine.high %v73_v25, %v77_v26 }
  0x51   :  { %1621 = vmatprep.subr.bf16.mxu1 %v3859_v43  ;;  %v252_v41 = vld [vmem:[%s6382_s1 + $0x6a8] sm:$0xff] }
  0x52   :  { %1661 = vmatpush1.bf16.msra.mxu0 %v4002_v48  ;;  %v120_v42 = vld [vmem:[%s6382_s1 + $0x288] sm:$0xff]  ;;  %v4051_v46 = vcombine.high %v248_v40, %v252_v41  ;;  %v4050_v52 = vcombine.low %v248_v40, %v252_v41  ;;  %v3876_v40 = vcombine.low %v73_v25, %v77_v26  ;;  %v57_v41 = vld [vmem:[%s6382_s1 + $0x90] sm:$0xff] }
  0x53   :  { %1662 = vmatprep.subr.bf16.mxu0 %v3995_v50  ;;  %v124_v43 = vld [vmem:[%s6382_s1 + $0x2a8] sm:$0xff]  ;;  %v257_v25 = vld [vmem:[%s6382_s1 + $0x6d0] sm:$0xff] }
  0x54   :  { %1622 = vmatpush1.bf16.msra.mxu1 %v3858_v49  ;;  %v3923_v47 = vcombine.high %v120_v42, %v124_v43  ;;  %v240_v48 = vld [vmem:[%s6382_s1 + $0x648] sm:$0xff]  ;;  %v3922_v54 = vcombine.low %v120_v42, %v124_v43  ;;  %v61_v42 = vld [vmem:[%s6382_s1 + $0xb0] sm:$0xff] }
  0x55   :  { %1623 = vmatprep.subr.bf16.mxu1 %v3851_v51  ;;  %v244_v49 = vld [vmem:[%s6382_s1 + $0x668] sm:$0xff]  ;;  %v261_v26 = vld [vmem:[%s6382_s1 + $0x6f0] sm:$0xff] }
  0x56   :  { %1663 = vmatpush1.bf16.msra.mxu0 %v3994_v57  ;;  %v112_v50 = vld [vmem:[%s6382_s1 + $0x248] sm:$0xff]  ;;  %v4043_v55 = vcombine.high %v240_v48, %v244_v49  ;;  %v4042_v61 = vcombine.low %v240_v48, %v244_v49 }
  0x57   :  { %1664 = vmatprep.subr.bf16.mxu0 %v3987_v59  ;;  %v116_v51 = vld [vmem:[%s6382_s1 + $0x268] sm:$0xff] }
  0x58   :  { %1624 = vmatpush1.bf16.msra.mxu1 %v3850_v58  ;;  %v3915_v56 = vcombine.high %v112_v50, %v116_v51  ;;  %v232_v57 = vld [vmem:[%s6382_s1 + $0x608] sm:$0xff]  ;;  %v3914_v62 = vcombine.low %v112_v50, %v116_v51  ;;  %v3861_v50 = vcombine.high %v57_v41, %v61_v42 }
  0x59   :  { %1625 = vmatprep.subr.bf16.mxu1 %v3843_v60  ;;  %v236_v58 = vld [vmem:[%s6382_s1 + $0x628] sm:$0xff] }
  0x5a   :  { %1665 = vmatpush1.bf16.msra.mxu0 %v3986_v2  ;;  %v104_v59 = vld [vmem:[%s6382_s1 + $0x208] sm:$0xff]  ;;  %v4035_v63 = vcombine.high %v232_v57, %v236_v58  ;;  %v101_v2 = vld [vmem:[%s6382_s1 + $0x1f0] sm:$0xff]  ;;  %v4034_v7 = vcombine.low %v232_v57, %v236_v58  ;;  %v3860_v57 = vcombine.low %v57_v41, %v61_v42 }
  0x5b   :  { %1666 = vmatprep.subr.bf16.mxu0 %v3979_v5  ;;  %v108_v60 = vld [vmem:[%s6382_s1 + $0x228] sm:$0xff]  ;;  %v225_v5 = vld [vmem:[%s6382_s1 + $0x5d0] sm:$0xff]  ;;  %v3900_v15 = vcombine.low %v97_v1, %v101_v2 }
  0x5c   :  { %1626 = vmatpush1.bf16.msra.mxu1 %v3842_v3  ;;  %v3907_v3 = vcombine.high %v104_v59, %v108_v60  ;;  %v3906_v10 = vcombine.low %v104_v59, %v108_v60  ;;  %v241_v41 = vld [vmem:[%s6382_s1 + $0x650] sm:$0xff] }
  0x5d   :  { %1627 = vmatprep.subr.bf16.mxu1 %v3963_v6  ;;  %v229_v6 = vld [vmem:[%s6382_s1 + $0x5f0] sm:$0xff] }
  0x5e   :  { %1667 = vmatpush1.bf16.msra.mxu0 %v3978_v11  ;;  %v3901_v11 = vcombine.high %v97_v1, %v101_v2  ;;  %v4028_v18 = vcombine.low %v225_v5, %v229_v6  ;;  %v173_v1 = vld [vmem:[%s6382_s1 + $0x430] sm:$0xff] }
  0x5f   :  { %1668 = vmatprep.subr.bf16.mxu0 %v3971_v13  ;;  %v221_v13 = vld [vmem:[%s6382_s1 + $0x5b0] sm:$0xff] }
  0x60   :  { %1628 = vmatpush2.bf16.msra.mxu1 %v3962_v12  ;;  %v217_v12 = vld [vmem:[%s6382_s1 + $0x590] sm:$0xff] }
  0x61   :  { %1629 = vmatprep.subr.bf16.mxu1 %v3955_v14  ;;  %v4029_v14 = vcombine.high %v225_v5, %v229_v6  ;;  %v4020_v27 = vcombine.low %v217_v12, %v221_v13  ;;  %v245_v42 = vld [vmem:[%s6382_s1 + $0x670] sm:$0xff] }
  0x62   :  { %1669 = vmatpush1.bf16.msra.mxu0 %v3970_v19  ;;  %v3893_v19 = vcombine.high %v89_v8, %v93_v9  ;;  %v165_v8 = vld [vmem:[%s6382_s1 + $0x3f0] sm:$0xff] }
  0x63   :  { %1674 = vmatprep.subr.bf16.mxu0 %v4075_v22  ;;  %v209_v22 = vld [vmem:[%s6382_s1 + $0x550] sm:$0xff] }
  0x64   :  { %1630 = vmatpush2.bf16.msra.mxu1 %v3954_v20  ;;  %v4021_v20 = vcombine.high %v217_v12, %v221_v13  ;;  %v273_v9 = vld [vmem:[%s6382_s1 + $0x750] sm:$0xff] }
  0x65   :  { %1631 = vmatprep.subr.bf16.mxu1 %v3947_v23  ;;  %v213_v23 = vld [vmem:[%s6382_s1 + $0x570] sm:$0xff] }
  0x66   :  { %1675 = vmatpush2.bf16.msra.mxu0 %v4074_v28  ;;  %v3885_v28 = vcombine.high %v81_v16, %v85_v17  ;;  %v4012_v34 = vcombine.low %v209_v22, %v213_v23  ;;  %v153_v12 = vld [vmem:[%s6382_s1 + $0x390] sm:$0xff] }
  0x67   :  { %1676 = vmatprep.subr.bf16.mxu0 %v4067_v30  ;;  %v201_v30 = vld [vmem:[%s6382_s1 + $0x510] sm:$0xff] }
  0x68   :  { %1632 = vmatpush2.bf16.msra.mxu1 %v3946_v29  ;;  %v4013_v29 = vcombine.high %v209_v22, %v213_v23  ;;  %v157_v13 = vld [vmem:[%s6382_s1 + $0x3b0] sm:$0xff] }
  0x69   :  { %1633 = vmatprep.subr.bf16.mxu1 %v3939_v31  ;;  %v205_v31 = vld [vmem:[%s6382_s1 + $0x530] sm:$0xff] }
  0x6a   :  { %1677 = vmatpush2.bf16.msra.mxu0 %v4066_v36  ;;  %v4005_v36 = vcombine.high %v201_v30, %v205_v31  ;;  %v4004_v43 = vcombine.low %v201_v30, %v205_v31  ;;  %v265_v16 = vld [vmem:[%s6382_s1 + $0x710] sm:$0xff] }
  0x6b   :  { %1678 = vmatprep.subr.bf16.mxu0 %v4059_v38  ;;  %v193_v38 = vld [vmem:[%s6382_s1 + $0x4d0] sm:$0xff] }
  0x6c   :  { %1634 = vmatpush2.bf16.msra.mxu1 %v3938_v37  ;;  %v69_v37 = vld [vmem:[%s6382_s1 + $0xf0] sm:$0xff] }
  0x6d   :  { %1635 = vmatprep.subr.bf16.mxu1 %v3931_v39  ;;  %v197_v39 = vld [vmem:[%s6382_s1 + $0x4f0] sm:$0xff]  ;;  %v3868_v48 = vcombine.low %v65_v33, %v69_v37 }
  0x6e   :  { %1679 = vmatpush2.bf16.msra.mxu0 %v4058_v44  ;;  %v3869_v44 = vcombine.high %v65_v33, %v69_v37  ;;  %v3996_v49 = vcombine.low %v193_v38, %v197_v39  ;;  %v269_v17 = vld [vmem:[%s6382_s1 + $0x730] sm:$0xff] }
  0x6f   :  { %1680 = vmatprep.subr.bf16.mxu0 %v4051_v46  ;;  %v185_v46 = vld [vmem:[%s6382_s1 + $0x490] sm:$0xff]  ;;  %v4068_v31 = vcombine.low %v265_v16, %v269_v17 }
  0x70   :  { %1636 = vmatpush2.bf16.msra.mxu1 %v3930_v45  ;;  %v3997_v45 = vcombine.high %v193_v38, %v197_v39  ;;  %v149_v22 = vld [vmem:[%s6382_s1 + $0x370] sm:$0xff]  ;;  %v4060_v39 = vcombine.low %v257_v25, %v261_v26 }
  0x71   :  { %1637 = vmatprep.subr.bf16.mxu1 %v3923_v47  ;;  %v189_v47 = vld [vmem:[%s6382_s1 + $0x4b0] sm:$0xff] }
  0x72   :  { %1681 = vmatpush2.bf16.msra.mxu0 %v4050_v52  ;;  %v3989_v51 = vcombine.high %v185_v46, %v189_v47  ;;  %v49_v52 = vld [vmem:[%s6382_s1 + $0x50] sm:$0xff]  ;;  %v3988_v58 = vcombine.low %v185_v46, %v189_v47 }
  0x73   :  { %1682 = vmatprep.subr.bf16.mxu0 %v4043_v55  ;;  %v177_v55 = vld [vmem:[%s6382_s1 + $0x450] sm:$0xff] }
  0x74   :  { %1638 = vmatpush2.bf16.msra.mxu1 %v3922_v54  ;;  %v53_v54 = vld [vmem:[%s6382_s1 + $0x70] sm:$0xff] }
  0x75   :  { %1639 = vmatprep.subr.bf16.mxu1 %v3915_v56  ;;  %v181_v56 = vld [vmem:[%s6382_s1 + $0x470] sm:$0xff]  ;;  %v3853_v59 = vcombine.high %v49_v52, %v53_v54  ;;  %v3852_v2 = vcombine.low %v49_v52, %v53_v54 }
  0x76   :  { %1683 = vmatpush2.bf16.msra.mxu0 %v4042_v61  ;;  %v3981_v60 = vcombine.high %v177_v55, %v181_v56  ;;  %v41_v61 = vld [vmem:[%s6382_s1 + $0x10] sm:$0xff] }
  0x77   :  { %1684 = vmatprep.subr.bf16.mxu0 %v4035_v63  ;;  %v169_v63 = vld [vmem:[%s6382_s1 + $0x410] sm:$0xff] }
  0x78   :  { %1640 = vmatpush2.bf16.msra.mxu1 %v3914_v62  ;;  %v45_v62 = vld [vmem:[%s6382_s1 + $0x30] sm:$0xff]  ;;  %v3973_v6 = vcombine.high %v169_v63, %v173_v1 }
  0x79   :  { %1641 = vmatprep.subr.bf16.mxu1 %v3907_v3  ;;  %v3980_v3 = vcombine.low %v177_v55, %v181_v56  ;;  %v3845_v5 = vcombine.high %v41_v61, %v45_v62  ;;  %v141_v30 = vld [vmem:[%s6382_s1 + $0x330] sm:$0xff]  ;;  %v4044_v56 = vcombine.low %v241_v41, %v245_v42 }
  0x7a   :  { %1685 = vmatpush2.bf16.msra.mxu0 %v4034_v7  ;;  %v161_v7 = vld [vmem:[%s6382_s1 + $0x3d0] sm:$0xff] }
  0x7b   :  { %1697 = vmatprep.subr.bf16.mxu0 %v3901_v11  ;;  %v3844_v11 = vcombine.low %v41_v61, %v45_v62  ;;  %v249_v33 = vld [vmem:[%s6382_s1 + $0x690] sm:$0xff] }
  0x7c   :  { %1642 = vmatpush2.bf16.msra.mxu1 %v3906_v10  ;;  %v277_v10 = vld [vmem:[%s6382_s1 + $0x770] sm:$0xff] }
  0x7d   :  { %1740 = vmatprep.subr.bf16.mxu1 %v4029_v14  ;;  %1687 = vmatmul.mubr.bf16.vlgmr.msra.gmra.mxu0 %v4955_v4  ;;  %v3972_v14 = vcombine.low %v169_v63, %v173_v1  ;;  %v4076_v23 = vcombine.low %v273_v9, %v277_v10  ;;  %v129_v37 = vld [vmem:[%s6382_s1 + $0x2d0] sm:$0xff] }
  0x7e   :  { %1698 = vmatpush1.bf16.msra.mxu0 %v3900_v15  ;;  %1729 = vmatprep.mubr.bf16.mxu0 %v4850_v0  ;;  %v3965_v15 = vcombine.high %v161_v7, %v165_v8  ;;  %v133_v38 = vld [vmem:[%s6382_s1 + $0x2f0] sm:$0xff] }
  0x7f   :  { %1644 = vmatmul.mubr.bf16.vlgmr.msra.gmra.mxu1 %v4983_v21  ;;  %1699 = vmatprep.subr.bf16.mxu0 %v3893_v19  ;;  %v3964_v19 = vcombine.low %v161_v7, %v165_v8  ;;  %v125_v46 = vld [vmem:[%s6382_s1 + $0x2b0] sm:$0xff]  ;;  %v3932_v52 = vcombine.low %v129_v37, %v133_v38  ;;  %v226_v8 = vld [vmem:[%s6382_s1 + $0x5d8] sm:$0xff] }
  0x80   :  { %1741 = vmatpush1.bf16.msra.mxu1 %v4028_v18  ;;  %4082 = vmatprep.mubr.msk.bf16.mxu1 %vm1521_vm0, %v4828_v53  ;;  %v4077_v18 = vcombine.high %v273_v9, %v277_v10  ;;  %v113_v54 = vld [vmem:[%s6382_s1 + $0x250] sm:$0xff] }
  0x81   :  { %1742 = vmatprep.subr.bf16.mxu1 %v4021_v20  ;;  %v145_v20 = vld [vmem:[%s6382_s1 + $0x350] sm:$0xff] }
  0x82   :  { %1700 = vmatpush1.bf16.msra.mxu0 %v3892_v24  ;;  %v3957_v24 = vcombine.high %v153_v12, %v157_v13  ;;  %v117_v55 = vld [vmem:[%s6382_s1 + $0x270] sm:$0xff] }
  0x83   :  { %1701 = vmatprep.subr.bf16.mxu0 %v3885_v28  ;;  %v3956_v28 = vcombine.low %v153_v12, %v157_v13  ;;  %v105_v62 = vld [vmem:[%s6382_s1 + $0x210] sm:$0xff]  ;;  %v3916_v7 = vcombine.low %v113_v54, %v117_v55  ;;  %v230_v12 = vld [vmem:[%s6382_s1 + $0x5f8] sm:$0xff] }
  0x84   :  { %1743 = vmatpush1.bf16.msra.mxu1 %v4020_v27  ;;  %v4069_v27 = vcombine.high %v265_v16, %v269_v17  ;;  %v109_v63 = vld [vmem:[%s6382_s1 + $0x230] sm:$0xff]  ;;  %v82_v13 = vld [vmem:[%s6382_s1 + $0x158] sm:$0xff] }
  0x85   :  { %1744 = vmatprep.subr.bf16.mxu1 %v4013_v29  ;;  %v137_v29 = vld [vmem:[%s6382_s1 + $0x310] sm:$0xff]  ;;  %v3909_v10 = vcombine.high %v105_v62, %v109_v63  ;;  %v218_v16 = vld [vmem:[%s6382_s1 + $0x598] sm:$0xff] }
  0x86   :  { %1702 = vmatpush1.bf16.msra.mxu0 %v3884_v32  ;;  %v3949_v32 = vcombine.high %v145_v20, %v149_v22  ;;  %v222_v17 = vld [vmem:[%s6382_s1 + $0x5b8] sm:$0xff] }
  0x87   :  { %1703 = vmatprep.subr.bf16.mxu0 %v3877_v35  ;;  %v4061_v35 = vcombine.high %v257_v25, %v261_v26  ;;  %v210_v25 = vld [vmem:[%s6382_s1 + $0x558] sm:$0xff] }
  0x88   :  { %1745 = vmatpush1.bf16.msra.mxu1 %v4012_v34  ;;  %v253_v34 = vld [vmem:[%s6382_s1 + $0x6b0] sm:$0xff] }
  0x89   :  { %1746 = vmatprep.subr.bf16.mxu1 %v4005_v36  ;;  %v3948_v36 = vcombine.low %v145_v20, %v149_v22  ;;  %v4052_v47 = vcombine.low %v249_v33, %v253_v34  ;;  %v74_v20 = vld [vmem:[%s6382_s1 + $0x118] sm:$0xff] }
  0x8a   :  { %1704 = vmatpush1.bf16.msra.mxu0 %v3876_v40  ;;  %v3941_v40 = vcombine.high %v137_v29, %v141_v30  ;;  %v78_v22 = vld [vmem:[%s6382_s1 + $0x138] sm:$0xff] }
  0x8b   :  { %1705 = vmatprep.subr.bf16.mxu0 %v3869_v44  ;;  %v3940_v44 = vcombine.low %v137_v29, %v141_v30  ;;  %v3879_v29 = vcombine.high %v74_v20, %v78_v22  ;;  %v70_v30 = vld [vmem:[%s6382_s1 + $0xf8] sm:$0xff] }
  0x8c   :  { %1747 = vmatpush1.bf16.msra.mxu1 %v4004_v43  ;;  %v4053_v43 = vcombine.high %v249_v33, %v253_v34  ;;  %v3878_v33 = vcombine.low %v74_v20, %v78_v22 }
  0x8d   :  { %1748 = vmatprep.subr.bf16.mxu1 %v3997_v45  ;;  %v121_v45 = vld [vmem:[%s6382_s1 + $0x290] sm:$0xff] }
  0x8e   :  { %1706 = vmatpush1.bf16.msra.mxu0 %v3868_v48  ;;  %v3933_v48 = vcombine.high %v129_v37, %v133_v38  ;;  %v3924_v61 = vcombine.low %v121_v45, %v125_v46  ;;  %v206_v37 = vld [vmem:[%s6382_s1 + $0x538] sm:$0xff] }
  0x8f   :  { %1707 = vmatprep.subr.bf16.mxu0 %v3861_v50  ;;  %v237_v50 = vld [vmem:[%s6382_s1 + $0x630] sm:$0xff]  ;;  %v62_v38 = vld [vmem:[%s6382_s1 + $0xb8] sm:$0xff] }
  0x90   :  { %1749 = vmatpush1.bf16.msra.mxu1 %v3996_v49  ;;  %v233_v49 = vld [vmem:[%s6382_s1 + $0x610] sm:$0xff] }
  0x91   :  { %1750 = vmatprep.subr.bf16.mxu1 %v3989_v51  ;;  %v4045_v51 = vcombine.high %v241_v41, %v245_v42  ;;  %v4036_v1 = vcombine.low %v233_v49, %v237_v50  ;;  %v50_v42 = vld [vmem:[%s6382_s1 + $0x58] sm:$0xff] }
  0x92   :  { %1708 = vmatpush1.bf16.msra.mxu0 %v3860_v57  ;;  %v3925_v57 = vcombine.high %v121_v45, %v125_v46  ;;  %v54_v45 = vld [vmem:[%s6382_s1 + $0x78] sm:$0xff] }
  0x93   :  { %1709 = vmatprep.subr.bf16.mxu0 %v3853_v59  ;;  %v102_v59 = vld [vmem:[%s6382_s1 + $0x1f8] sm:$0xff] }
  0x94   :  { %1751 = vmatpush1.bf16.msra.mxu1 %v3988_v58  ;;  %v98_v58 = vld [vmem:[%s6382_s1 + $0x1d8] sm:$0xff] }
  0x95   :  { %1752 = vmatprep.subr.bf16.mxu1 %v3981_v60  ;;  %v4037_v60 = vcombine.high %v233_v49, %v237_v50  ;;  %v3902_v9 = vcombine.low %v98_v58, %v102_v59  ;;  %v42_v50 = vld [vmem:[%s6382_s1 + $0x18] sm:$0xff] }
  0x96   :  { %1710 = vmatpush1.bf16.msra.mxu0 %v3852_v2  ;;  %v3917_v2 = vcombine.high %v113_v54, %v117_v55  ;;  %v46_v54 = vld [vmem:[%s6382_s1 + $0x38] sm:$0xff] }
  0x97   :  { %1711 = vmatprep.subr.bf16.mxu0 %v3845_v5  ;;  %v94_v5 = vld [vmem:[%s6382_s1 + $0x1b8] sm:$0xff] }
  0x98   :  { %1753 = vmatpush1.bf16.msra.mxu1 %v3980_v3  ;;  %v90_v3 = vld [vmem:[%s6382_s1 + $0x198] sm:$0xff] }
  0x99   :  { %1754 = vmatprep.subr.bf16.mxu1 %v3973_v6  ;;  %v3903_v6 = vcombine.high %v98_v58, %v102_v59  ;;  %v162_v58 = vld [vmem:[%s6382_s1 + $0x3d8] sm:$0xff] }
  0x9a   :  { %1712 = vmatpush1.bf16.msra.mxu0 %v3844_v11  ;;  %v3895_v11 = vcombine.high %v90_v3, %v94_v5  ;;  %v166_v59 = vld [vmem:[%s6382_s1 + $0x3f8] sm:$0xff] }
  0x9b   :  { %1713 = vmatprep.subr.bf16.mxu0 %v3965_v15  ;;  %v3908_v15 = vcombine.low %v105_v62, %v109_v63  ;;  %v182_v62 = vld [vmem:[%s6382_s1 + $0x478] sm:$0xff] }
  0x9c   :  { %1755 = vmatpush1.bf16.msra.mxu1 %v3972_v14  ;;  %v86_v14 = vld [vmem:[%s6382_s1 + $0x178] sm:$0xff] }
  0x9d   :  { %1760 = vmatprep.subr.bf16.mxu1 %v4077_v18  ;;  %v3894_v18 = vcombine.low %v90_v3, %v94_v5  ;;  %v3886_v26 = vcombine.low %v82_v13, %v86_v14  ;;  %v3967_v3 = vcombine.high %v162_v58, %v166_v59  ;;  %v170_v5 = vld [vmem:[%s6382_s1 + $0x418] sm:$0xff] }
  0x9e   :  { %1714 = vmatpush2.bf16.msra.mxu0 %v3964_v19  ;;  %v4031_v19 = vcombine.high %v226_v8, %v230_v12 }
  0x9f   :  { %1715 = vmatprep.subr.bf16.mxu0 %v3957_v24  ;;  %v4030_v24 = vcombine.low %v226_v8, %v230_v12  ;;  %v158_v8 = vld [vmem:[%s6382_s1 + $0x3b8] sm:$0xff] }
  0xa0   :  { %1761 = vmatpush2.bf16.msra.mxu1 %v4076_v23  ;;  %v3887_v23 = vcombine.high %v82_v13, %v86_v14  ;;  %v146_v13 = vld [vmem:[%s6382_s1 + $0x358] sm:$0xff] }
  0xa1   :  { %1762 = vmatprep.subr.bf16.mxu1 %v4069_v27  ;;  %v4023_v27 = vcombine.high %v218_v16, %v222_v17  ;;  %v150_v14 = vld [vmem:[%s6382_s1 + $0x378] sm:$0xff] }
  0xa2   :  { %1716 = vmatpush2.bf16.msra.mxu0 %v3956_v28  ;;  %v66_v28 = vld [vmem:[%s6382_s1 + $0xd8] sm:$0xff] }
  0xa3   :  { %1717 = vmatprep.subr.bf16.mxu0 %v3949_v32  ;;  %v202_v32 = vld [vmem:[%s6382_s1 + $0x518] sm:$0xff] }
  0xa4   :  { %1763 = vmatpush2.bf16.msra.mxu1 %v4068_v31  ;;  %v4022_v31 = vcombine.low %v218_v16, %v222_v17  ;;  %v4007_v41 = vcombine.high %v202_v32, %v206_v37  ;;  %v4006_v46 = vcombine.low %v202_v32, %v206_v37 }
  0xa5   :  { %1764 = vmatprep.subr.bf16.mxu1 %v4061_v35  ;;  %v58_v35 = vld [vmem:[%s6382_s1 + $0x98] sm:$0xff] }
  0xa6   :  { %1718 = vmatpush2.bf16.msra.mxu0 %v3948_v36  ;;  %v3871_v36 = vcombine.high %v66_v28, %v70_v30 }
  0xa7   :  { %1719 = vmatprep.subr.bf16.mxu0 %v3941_v40  ;;  %v3870_v40 = vcombine.low %v66_v28, %v70_v30  ;;  %v262_v28 = vld [vmem:[%s6382_s1 + $0x6f8] sm:$0xff] }
  0xa8   :  { %1765 = vmatpush2.bf16.msra.mxu1 %v4060_v39  ;;  %v194_v39 = vld [vmem:[%s6382_s1 + $0x4d8] sm:$0xff] }
  0xa9   :  { %1766 = vmatprep.subr.bf16.mxu1 %v4053_v43  ;;  %v3863_v43 = vcombine.high %v58_v35, %v62_v38  ;;  %v130_v30 = vld [vmem:[%s6382_s1 + $0x2d8] sm:$0xff] }
  0xaa   :  { %1720 = vmatpush2.bf16.msra.mxu0 %v3940_v44  ;;  %v198_v44 = vld [vmem:[%s6382_s1 + $0x4f8] sm:$0xff] }
  0xab   :  { %1721 = vmatprep.subr.bf16.mxu0 %v3933_v48  ;;  %v3862_v48 = vcombine.low %v58_v35, %v62_v38  ;;  %v3999_v49 = vcombine.high %v194_v39, %v198_v44  ;;  %v3998_v55 = vcombine.low %v194_v39, %v198_v44  ;;  %v254_v35 = vld [vmem:[%s6382_s1 + $0x6b8] sm:$0xff] }
  0xac   :  { %1767 = vmatpush2.bf16.msra.mxu1 %v4052_v47  ;;  %v186_v47 = vld [vmem:[%s6382_s1 + $0x498] sm:$0xff] }
  0xad   :  { %1768 = vmatprep.subr.bf16.mxu1 %v4045_v51  ;;  %v3855_v51 = vcombine.high %v50_v42, %v54_v45  ;;  %v122_v38 = vld [vmem:[%s6382_s1 + $0x298] sm:$0xff] }
  0xae   :  { %1722 = vmatpush2.bf16.msra.mxu0 %v3932_v52  ;;  %v190_v52 = vld [vmem:[%s6382_s1 + $0x4b8] sm:$0xff] }
  0xaf   :  { %1723 = vmatprep.subr.bf16.mxu0 %v3925_v57  ;;  %v3991_v57 = vcombine.high %v186_v47, %v190_v52  ;;  %v3990_v63 = vcombine.low %v186_v47, %v190_v52  ;;  %v126_v39 = vld [vmem:[%s6382_s1 + $0x2b8] sm:$0xff] }
  0xb0   :  { %1769 = vmatpush2.bf16.msra.mxu1 %v4044_v56  ;;  %v3854_v56 = vcombine.low %v50_v42, %v54_v45  ;;  %v242_v44 = vld [vmem:[%s6382_s1 + $0x658] sm:$0xff] }
  0xb1   :  { %1770 = vmatprep.subr.bf16.mxu1 %v4037_v60  ;;  %v178_v60 = vld [vmem:[%s6382_s1 + $0x458] sm:$0xff] }
  0xb2   :  { %1724 = vmatpush2.bf16.msra.mxu0 %v3924_v61  ;;  %v3847_v61 = vcombine.high %v42_v50, %v46_v54  ;;  %v246_v45 = vld [vmem:[%s6382_s1 + $0x678] sm:$0xff] }
  0xb3   :  { %1725 = vmatprep.subr.bf16.mxu0 %v3917_v2  ;;  %v3983_v2 = vcombine.high %v178_v60, %v182_v62  ;;  %v118_v47 = vld [vmem:[%s6382_s1 + $0x278] sm:$0xff] }
  0xb4   :  { %1771 = vmatpush2.bf16.msra.mxu1 %v4036_v1  ;;  %v3846_v1 = vcombine.low %v42_v50, %v46_v54  ;;  %v4047_v50 = vcombine.high %v242_v44, %v246_v45  ;;  %v234_v52 = vld [vmem:[%s6382_s1 + $0x618] sm:$0xff] }
  0xb5   :  { %1783 = vmatprep.subr.bf16.mxu1 %v3903_v6  ;;  %v174_v6 = vld [vmem:[%s6382_s1 + $0x438] sm:$0xff] }
  0xb6   :  { %1726 = vmatpush2.bf16.msra.mxu0 %v3916_v7  ;;  %v154_v7 = vld [vmem:[%s6382_s1 + $0x398] sm:$0xff]  ;;  %v3975_v12 = vcombine.high %v170_v5, %v174_v6  ;;  %v3974_v17 = vcombine.low %v170_v5, %v174_v6  ;;  %v4347_v5 = vld [vmem:[%s6384_s3 + $0x2e0] ss:$16 sps:$4 sm:$0xff]   ;;  %v4355_v6 = vld [vmem:[%s6384_s3 + $0x2c4] ss:$16 sps:$4 sm:$0xff]  }
  0xb7   :  { %1773 = vmatmul.mubr.bf16.vlgmr.msra.gmra.mxu1 %v4955_v4  ;;  %1727 = vmatprep.subr.bf16.mxu0 %v3909_v10  ;;  %v274_v10 = vld [vmem:[%s6382_s1 + $0x758] sm:$0xff]  ;;  %v3959_v16 = vcombine.high %v154_v7, %v158_v8  ;;  %v3958_v20 = vcombine.low %v154_v7, %v158_v8  ;;  %v4329_v7 = vld [vmem:[%s6384_s3 + $0xc0] ss:$16 sps:$4 sm:$0xff]   ;;  %v4334_v8 = vld [vmem:[%s6384_s3 + $0xa4] ss:$16 sps:$4 sm:$0xff]  }
  0xb8   :  { %1784 = vmatpush1.bf16.msra.mxu1 %v3902_v9  ;;  %1815 = vmatprep.mubr.bf16.mxu1 %v4850_v0  ;;  %v214_v0 = vld [vmem:[%s6382_s1 + $0x578] sm:$0xff]  ;;  %v3982_v9 = vcombine.low %v178_v60, %v182_v62 }
  0xb9   :  { %1785 = vmatprep.subr.bf16.mxu1 %v3895_v11  ;;  %v4015_v34 = vcombine.high %v210_v25, %v214_v0  ;;  %v3966_v11 = vcombine.low %v162_v58, %v166_v59  ;;  %v238_v54 = vld [vmem:[%s6382_s1 + $0x638] sm:$0xff] }
  0xba   :  { %1728 = vmatpush2.bf16.msra.mxu0 %v3908_v15  ;;  %v278_v15 = vld [vmem:[%s6382_s1 + $0x778] sm:$0xff]  ;;  %v4039_v59 = vcombine.high %v234_v52, %v238_v54 }
  0xbb   :  { %1826 = vmatprep.subr.bf16.mxu0 %v4031_v19  ;;  %v270_v19 = vld [vmem:[%s6382_s1 + $0x738] sm:$0xff]  ;;  %v4079_v22 = vcombine.high %v274_v10, %v278_v15 }
  0xbc   :  { %1786 = vmatpush1.bf16.msra.mxu1 %v3894_v18  ;;  %v266_v18 = vld [vmem:[%s6382_s1 + $0x718] sm:$0xff] }
  0xbd   :  { %1787 = vmatprep.subr.bf16.mxu1 %v3887_v23  ;;  %1730 = vmatmul.mubr.bf16.vlgmr.msra.gmra.mxu0 %v4983_v21  ;;  %v138_v23 = vld [vmem:[%s6382_s1 + $0x318] sm:$0xff] }
  0xbe   :  { %1827 = vmatpush1.bf16.msra.mxu0 %v4030_v24  ;;  %4083 = vmatprep.mubr.msk.bf16.mxu0 %vm1521_vm0, %v4828_v53  ;;  %v4014_v53 = vcombine.low %v210_v25, %v214_v0  ;;  %v142_v24 = vld [vmem:[%s6382_s1 + $0x338] sm:$0xff]  ;;  %v3951_v25 = vcombine.high %v146_v13, %v150_v14  ;;  %v4071_v0 = vcombine.high %v266_v18, %v270_v19 }
  0xbf   :  { %1828 = vmatprep.subr.bf16.mxu0 %v4023_v27  ;;  %v258_v27 = vld [vmem:[%s6382_s1 + $0x6d8] sm:$0xff]  ;;  %v3943_v32 = vcombine.high %v138_v23, %v142_v24 }
  0xc0   :  { %1788 = vmatpush1.bf16.msra.mxu1 %v3886_v26  ;;  %v4078_v26 = vcombine.low %v274_v10, %v278_v15  ;;  %v4063_v37 = vcombine.high %v258_v27, %v262_v28  ;;  %v281_v10 = vlaneseq }
  0xc1   :  { %1789 = vmatprep.subr.bf16.mxu1 %v3879_v29  ;;  %v3950_v29 = vcombine.low %v146_v13, %v150_v14  ;;  %v4367_v13 = vld [vmem:[%s6384_s3 + $0x284] ss:$16 sps:$4 sm:$0xff]   ;;  %v4335_v14 = vld [vmem:[%s6384_s3 + $0x80] ss:$16 sps:$4 sm:$0xff]  }
  0xc2   :  { %1829 = vmatpush1.bf16.msra.mxu0 %v4022_v31  ;;  %v134_v31 = vld [vmem:[%s6382_s1 + $0x2f8] sm:$0xff]  ;;  %v5555_v15 = vshrl.u32 %v281_v10, 7 }
  0xc3   :  { %1830 = vmatprep.subr.bf16.mxu0 %v4015_v34  ;;  %v250_v34 = vld [vmem:[%s6382_s1 + $0x698] sm:$0xff] }
  0xc4   :  { %1790 = vmatpush1.bf16.msra.mxu1 %v3878_v33  ;;  %v4070_v33 = vcombine.low %v266_v18, %v270_v19  ;;  %v4055_v42 = vcombine.high %v250_v34, %v254_v35  ;;  %v5564_v18 = vsub.s32 1, %v5555_v15  ;;  %v4373_v19 = vld [vmem:[%s6384_s3 + $0x264] ss:$16 sps:$4 sm:$0xff]  }
  0xc5   :  { %1791 = vmatprep.subr.bf16.mxu1 %v3871_v36  ;;  %v3942_v36 = vcombine.low %v138_v23, %v142_v24  ;;  %v5577_v23 = vld [vmem:[%s6385_s2] sm:$0xff] }
  0xc6   :  { %1831 = vmatpush1.bf16.msra.mxu0 %v4014_v53  ;;  %v3935_v53 = vcombine.high %v130_v30, %v134_v31  ;;  %v4343_v24 = vld [vmem:[%s6384_s3 + $0x44] ss:$16 sps:$4 sm:$0xff]  }
  0xc7   :  { %1832 = vmatprep.subr.bf16.mxu0 %v4007_v41  ;;  %v3934_v41 = vcombine.low %v130_v30, %v134_v31  ;;  %v4346_v31 = vld [vmem:[%s6384_s3 + $0x24] ss:$16 sps:$4 sm:$0xff]  }
  0xc8   :  { %1792 = vmatpush1.bf16.msra.mxu1 %v3870_v40  ;;  %v4062_v40 = vcombine.low %v258_v27, %v262_v28  ;;  %v4379_v27 = vld [vmem:[%s6384_s3 + $0x244] ss:$16 sps:$4 sm:$0xff]  }
  0xc9   :  { %1793 = vmatprep.subr.bf16.mxu1 %v3863_v43  ;;  %v3927_v43 = vcombine.high %v122_v38, %v126_v39 }
  0xca   :  { %1833 = vmatpush1.bf16.msra.mxu0 %v4006_v46  ;;  %v114_v46 = vld [vmem:[%s6382_s1 + $0x258] sm:$0xff] }
  0xcb   :  { %1834 = vmatprep.subr.bf16.mxu0 %v3999_v49  ;;  %v3926_v49 = vcombine.low %v122_v38, %v126_v39  ;;  %v3918_v58 = vcombine.low %v114_v46, %v118_v47  ;;  %v4383_v39 = vld [vmem:[%s6384_s3 + $0x220] ss:$16 sps:$4 sm:$0xff]  }
  0xcc   :  { %1794 = vmatpush1.bf16.msra.mxu1 %v3862_v48  ;;  %v4054_v48 = vcombine.low %v250_v34, %v254_v35  ;;  %v4385_v34 = vld [vmem:[%s6384_s3 + $0x224] ss:$16 sps:$4 sm:$0xff]  }
  0xcd   :  { %1795 = vmatprep.subr.bf16.mxu1 %v3855_v51  ;;  %v3919_v51 = vcombine.high %v114_v46, %v118_v47  ;;  %v4358_v46 = vld [vmem:[%s6384_s3 + $0x1e4] ss:$16 sps:$4 sm:$0xff]   ;;  %v4389_v47 = vld [vmem:[%s6384_s3 + $0x200] ss:$16 sps:$4 sm:$0xff]  }
  0xce   :  { %1835 = vmatpush1.bf16.msra.mxu0 %v3998_v55  ;;  %v106_v55 = vld [vmem:[%s6382_s1 + $0x218] sm:$0xff] }
  0xcf   :  { %1836 = vmatprep.subr.bf16.mxu0 %v3991_v57  ;;  %v4046_v57 = vcombine.low %v242_v44, %v246_v45  ;;  %v4350_v45 = vld [vmem:[%s6384_s3] ss:$16 sps:$4 sm:$0xff]  }
  0xd0   :  { %1796 = vmatpush1.bf16.msra.mxu1 %v3854_v56  ;;  %v110_v56 = vld [vmem:[%s6382_s1 + $0x238] sm:$0xff] }
  0xd1   :  { %1797 = vmatprep.subr.bf16.mxu1 %v3847_v61  ;;  %v3911_v60 = vcombine.high %v106_v55, %v110_v56  ;;  %v4038_v61 = vcombine.low %v234_v52, %v238_v54  ;;  %v3910_v62 = vcombine.low %v106_v55, %v110_v56  ;;  %v4356_v52 = vld [vmem:[%s6384_s3 + $0x1e0] ss:$16 sps:$4 sm:$0xff]   ;;  %v4364_v54 = vld [vmem:[%s6384_s3 + $0x1c4] ss:$16 sps:$4 sm:$0xff]  }
  0xd2   :  { %1837 = vmatpush1.bf16.msra.mxu0 %v3990_v63  ;;  %v4328_v63 = vld [vmem:[%s6384_s3 + $0xe4] ss:$16 sps:$4 sm:$0xff]   ;;  %v4395_v55 = vld [vmem:[%s6384_s3 + $0x3e0] ss:$16 sps:$4 sm:$0xff]  }
  0xd3   :  { %1838 = vmatprep.subr.bf16.mxu0 %v3983_v2  ;;  %v4326_v2 = vld [vmem:[%s6384_s3 + $0xe0] ss:$16 sps:$4 sm:$0xff]   ;;  %v4403_v56 = vld [vmem:[%s6384_s3 + $0x3c4] ss:$16 sps:$4 sm:$0xff]  }
  0xd4   :  { %1798 = vmatpush1.bf16.msra.mxu1 %v3846_v1  ;;  %v4349_v1 = vld [vmem:[%s6384_s3 + $0x2e4] ss:$16 sps:$4 sm:$0xff]  }
  0xd5   :  { %1799 = vmatprep.subr.bf16.mxu1 %v3967_v3  ;;  %v4331_v3 = vld [vmem:[%s6384_s3 + $0xc4] ss:$16 sps:$4 sm:$0xff]  }
  0xd6   :  { %1839 = vmatpush1.bf16.msra.mxu0 %v3982_v9  ;;  %v4353_v9 = vld [vmem:[%s6384_s3 + $0x2c0] ss:$16 sps:$4 sm:$0xff]  }
  0xd7   :  { %1840 = vmatprep.subr.bf16.mxu0 %v3975_v12  ;;  %v4359_v12 = vld [vmem:[%s6384_s3 + $0x2a0] ss:$16 sps:$4 sm:$0xff]  }
  0xd8   :  { %1800 = vmatpush2.bf16.msra.mxu1 %v3966_v11  ;;  %v4337_v11 = vld [vmem:[%s6384_s3 + $0x84] ss:$16 sps:$4 sm:$0xff]  }
  0xd9   :  { %1801 = vmatprep.subr.bf16.mxu1 %v3959_v16  ;;  %v4340_v16 = vld [vmem:[%s6384_s3 + $0x64] ss:$16 sps:$4 sm:$0xff]  }
  0xda   :  { %1841 = vmatpush1.bf16.msra.mxu0 %v3974_v17  ;;  %v4365_v17 = vld [vmem:[%s6384_s3 + $0x280] ss:$16 sps:$4 sm:$0xff]  }
  0xdb   :  { %1846 = vmatprep.subr.bf16.mxu0 %v4079_v22  ;;  %v4338_v22 = vld [vmem:[%s6384_s3 + $0x60] ss:$16 sps:$4 sm:$0xff]  }
  0xdc   :  { %1802 = vmatpush2.bf16.msra.mxu1 %v3958_v20 }
  0xdd   :  { %1803 = vmatprep.subr.bf16.mxu1 %v3951_v25  ;;  %v4371_v25 = vld [vmem:[%s6384_s3 + $0x260] ss:$16 sps:$4 sm:$0xff]  }
  0xde   :  { %1847 = vmatpush2.bf16.msra.mxu0 %v4078_v26  ;;  %v288_v26 = vrot.slane %v5577_v23, %v5564_v18 }
  0xdf   :  { %1848 = vmatprep.subr.bf16.mxu0 %v4071_v0  ;;  %v4341_v0 = vld [vmem:[%s6384_s3 + $0x40] ss:$16 sps:$4 sm:$0xff]  }
  0xe0   :  { %1804 = vmatpush2.bf16.msra.mxu1 %v3950_v29 }
  0xe1   :  { %1805 = vmatprep.subr.bf16.mxu1 %v3943_v32  ;;  %v4377_v32 = vld [vmem:[%s6384_s3 + $0x240] ss:$16 sps:$4 sm:$0xff]  }
  0xe2   :  { %1849 = vmatpush2.bf16.msra.mxu0 %v4070_v33 }
  0xe3   :  { %1850 = vmatprep.subr.bf16.mxu0 %v4063_v37  ;;  %v4344_v37 = vld [vmem:[%s6384_s3 + $0x20] ss:$16 sps:$4 sm:$0xff]  }
  0xe4   :  { %1806 = vmatpush2.bf16.msra.mxu1 %v3942_v36 }
  0xe5   :  { %1807 = vmatprep.subr.bf16.mxu1 %v3935_v53  ;;  %v4352_v53 = vld [vmem:[%s6384_s3 + $0x4] ss:$16 sps:$4 sm:$0xff]  }
  0xe6   :  { %1851 = vmatpush2.bf16.msra.mxu0 %v4062_v40 }
  0xe7   :  { %1852 = vmatprep.subr.bf16.mxu0 %v4055_v42  ;;  %v4391_v42 = vld [vmem:[%s6384_s3 + $0x204] ss:$16 sps:$4 sm:$0xff]  }
  0xe8   :  { %1808 = vmatpush2.bf16.msra.mxu1 %v3934_v41 }
  0xe9   :  { %1809 = vmatprep.subr.bf16.mxu1 %v3927_v43 }
  0xea   :  { %1853 = vmatpush2.bf16.msra.mxu0 %v4054_v48 }
  0xeb   :  { %1854 = vmatprep.subr.bf16.mxu0 %v4047_v50  ;;  %v4397_v50 = vld [vmem:[%s6384_s3 + $0x3e4] ss:$16 sps:$4 sm:$0xff]  }
  0xec   :  { %1810 = vmatpush2.bf16.msra.mxu1 %v3926_v49 }
  0xed   :  { %1811 = vmatprep.subr.bf16.mxu1 %v3919_v51 }
  0xee   :  { %1855 = vmatpush2.bf16.msra.mxu0 %v4046_v57  ;;  %v4362_v57 = vld [vmem:[%s6384_s3 + $0x1c0] ss:$16 sps:$4 sm:$0xff]  }
  0xef   :  { %1856 = vmatprep.subr.bf16.mxu0 %v4039_v59  ;;  %v4401_v59 = vld [vmem:[%s6384_s3 + $0x3c0] ss:$16 sps:$4 sm:$0xff]  }
  0xf0   :  { %1812 = vmatpush2.bf16.msra.mxu1 %v3918_v58  ;;  %v4370_v58 = vld [vmem:[%s6384_s3 + $0x1a4] ss:$16 sps:$4 sm:$0xff]  }
  0xf1   :  { %1813 = vmatprep.subr.bf16.mxu1 %v3911_v60  ;;  %v4406_v60 = vld [vmem:[%s6384_s3 + $0x3a4] ss:$16 sps:$4 sm:$0xff]  }
  0xf2   :  { %1857 = vmatpush2.bf16.msra.mxu0 %v4038_v61  ;;  %v4368_v61 = vld [vmem:[%s6384_s3 + $0x1a0] ss:$16 sps:$4 sm:$0xff]  }
  0xf3   :  { %3359 = vmatprep.subr.bf16.mxu0 %v4328_v63  ;;  %v4404_v63 = vld [vmem:[%s6384_s3 + $0x3a0] ss:$16 sps:$4 sm:$0xff]  }
  0xf4   :  { %1814 = vmatpush2.bf16.msra.mxu1 %v3910_v62  ;;  %v4376_v62 = vld [vmem:[%s6384_s3 + $0x184] ss:$16 sps:$4 sm:$0xff]  }
  0xf5   :  { %3402 = vmatprep.subr.bf16.mxu1 %v4349_v1  ;;  %1859 = vmatmul.mubr.bf16.vlgmr.msra.gmra.mxu0 %v4955_v4  ;;  %v4361_v4 = vld [vmem:[%s6384_s3 + $0x2a4] ss:$16 sps:$4 sm:$0xff]  }
  0xf6   :  { %3360 = vmatpush1.bf16.msra.mxu0 %v4326_v2  ;;  %v4409_v1 = vld [vmem:[%s6384_s3 + $0x384] ss:$16 sps:$4 sm:$0xff]   ;;  %v4374_v2 = vld [vmem:[%s6384_s3 + $0x180] ss:$16 sps:$4 sm:$0xff]  }
  0xf7   :  { %1816 = vmatmul.mubr.bf16.vlgmr.msra.gmra.mxu1 %v4983_v21  ;;  %3361 = vmatprep.subr.bf16.mxu0 %v4331_v3  ;;  %v4332_v21 = vld [vmem:[%s6384_s3 + $0xa0] ss:$16 sps:$4 sm:$0xff]   ;;  %v4382_v3 = vld [vmem:[%s6384_s3 + $0x164] ss:$16 sps:$4 sm:$0xff]  }
  0xf8   :  { %3403 = vmatpush1.bf16.msra.mxu1 %v4347_v5  ;;  %v4407_v5 = vld [vmem:[%s6384_s3 + $0x380] ss:$16 sps:$4 sm:$0xff]  }
  0xf9   :  { %3404 = vmatprep.subr.bf16.mxu1 %v4355_v6  ;;  %v4412_v6 = vld [vmem:[%s6384_s3 + $0x364] ss:$16 sps:$4 sm:$0xff]  }
  0xfa   :  { %3362 = vmatpush1.bf16.msra.mxu0 %v4329_v7  ;;  %v5684_v7 = vsub.s32 0, %v5555_v15 }
  0xfb   :  { %3363 = vmatprep.subr.bf16.mxu0 %v4334_v8  ;;  %v4380_v8 = vld [vmem:[%s6384_s3 + $0x160] ss:$16 sps:$4 sm:$0xff]  }
  0xfc   :  { %3405 = vmatpush1.bf16.msra.mxu1 %v4353_v9  ;;  %v4388_v9 = vld [vmem:[%s6384_s3 + $0x144] ss:$16 sps:$4 sm:$0xff]   ;;  %v284_v10 = vrot.slane %v5577_v23, %v5684_v7 }
  0xfd   :  { %3406 = vmatprep.subr.bf16.mxu1 %v4361_v4  ;;  %v4410_v4 = vld [vmem:[%s6384_s3 + $0x360] ss:$16 sps:$4 sm:$0xff]  }
  0xfe   :  { %3364 = vmatpush1.bf16.msra.mxu0 %v4332_v21  ;;  %v4415_v21 = vld [vmem:[%s6384_s3 + $0x344] ss:$16 sps:$4 sm:$0xff]  }
  0xff   :  { %3365 = vmatprep.subr.bf16.mxu0 %v4337_v11  ;;  %v5569_v20 = vpop.f32.mrf.mxu1  ;;  %v4386_v11 = vld [vmem:[%s6384_s3 + $0x140] ss:$16 sps:$4 sm:$0xff]  }
 0x100   :  { %3407 = vmatpush1.bf16.msra.mxu1 %v4359_v12 }
 0x101   :  { %3408 = vmatprep.subr.bf16.mxu1 %v4367_v13  ;;  %v1604_v28 = vpop.f32.mrf.mxu1  ;;  %v4394_v13 = vld [vmem:[%s6384_s3 + $0x124] ss:$16 sps:$4 sm:$0xff]  }
 0x102   :  { %3366 = vmatpush1.bf16.msra.mxu0 %v4335_v14  ;;  %v4413_v14 = vld [vmem:[%s6384_s3 + $0x340] ss:$16 sps:$4 sm:$0xff]  }
 0x103   :  { %3367 = vmatprep.subr.bf16.mxu0 %v4340_v16  ;;  %v5604_v35 = vpop.f32.mrf.mxu1  ;;  %v4418_v16 = vld [vmem:[%s6384_s3 + $0x324] ss:$16 sps:$4 sm:$0xff]  }
 0x104   :  { %3409 = vmatpush1.bf16.msra.mxu1 %v4365_v17 }
 0x105   :  { %3410 = vmatprep.subr.bf16.mxu1 %v4373_v19  ;;  %v5590_v29 = vpop.f32.mrf.mxu0  ;;  %v1608_v43 = vpop.f32.mrf.mxu1  ;;  %v4392_v19 = vld [vmem:[%s6384_s3 + $0x120] ss:$16 sps:$4 sm:$0xff]  }
 0x106   :  { %3368 = vmatpush1.bf16.msra.mxu0 %v4338_v22  ;;  %v1560_v17 = vadd.f32 %v5590_v29, %v284_v10 }
 0x107   :  { %v1561_v30 = vpop.f32.mrf.mxu0  ;;  %3369 = vmatprep.subr.bf16.mxu0 %v4343_v24  ;;  %v4400_v24 = vld [vmem:[%s6384_s3 + $0x104] ss:$16 sps:$4 sm:$0xff]  }
 0x108   :  { %3411 = vmatpush1.bf16.msra.mxu1 %v4371_v25  ;;  %v1562_v33 = vadd.f32 %v1561_v30, %v288_v26  ;;  %v4416_v25 = vld [vmem:[%s6384_s3 + $0x320] ss:$16 sps:$4 sm:$0xff]   ;;  %v4424_v30 = vld [vmem:[%s6384_s3 + $0x4e4] ss:$16 sps:$4 sm:$0xff]  }
 0x109   :  { %3412 = vmatprep.subr.bf16.mxu1 %v4379_v27  ;;  %v5606_v36 = vpop.f32.mrf.mxu0  ;;  %v1603_v27 = vadd.f32 %v5569_v20, %v1560_v17  ;;  %v4478_v20 = vld [vmem:[%s6384_s3 + $0x6e4] ss:$16 sps:$4 sm:$0xff]  }
 0x10a   :  { %3370 = vmatpush1.bf16.msra.mxu0 %v4341_v0  ;;  %v1605_v40 = vadd.f32 %v1604_v28, %v1562_v33  ;;  %v1564_v12 = vadd.f32 %v5606_v36, %v284_v10  ;;  %v4398_v28 = vld [vmem:[%s6384_s3 + $0x100] ss:$16 sps:$4 sm:$0xff]   ;;  %v4430_v36 = vld [vmem:[%s6384_s3 + $0x4a4] ss:$16 sps:$4 sm:$0xff]  }
 0x10b   :  { %v1565_v38 = vpop.f32.mrf.mxu0  ;;  %3371 = vmatprep.subr.bf16.mxu0 %v4346_v31  ;;  %v4419_v0 = vld [vmem:[%s6384_s3 + $0x300] ss:$16 sps:$4 sm:$0xff]   ;;  %v1869_v31 = vmax.f32 %v1603_v27, 0.0  ;;  %v4490_v17 = vld [vmem:[%s6384_s3 + $0x6a4] ss:$16 sps:$4 sm:$0xff]  }
 0x10c   :  { %3413 = vmatpush1.bf16.msra.mxu1 %v4377_v32  ;;  %v1566_v41 = vadd.f32 %v1565_v38, %v288_v26  ;;  %v1870_v48 = vmax.f32 %v1605_v40, 0.0  ;;  %v1607_v22 = vadd.f32 %v5604_v35, %v1564_v12  ;;  %v4421_v26 = vld [vmem:[%s6384_s3 + $0x304] ss:$16 sps:$4 sm:$0xff]   ;;  %v4422_v32 = vld [vmem:[%s6384_s3 + $0x4e0] ss:$16 sps:$4 sm:$0xff]   ;;  %v5759_v38 = vsub.s32 2, %v5555_v15 }
 0x10d   :  { %3414 = vmatprep.subr.bf16.mxu1 %v4385_v34  ;;  %v4427_v34 = vld [vmem:[%s6384_s3 + $0x4c4] ss:$16 sps:$4 sm:$0xff]   ;;  %v4425_v35 = vld [vmem:[%s6384_s3 + $0x4c0] ss:$16 sps:$4 sm:$0xff]  }
 0x10e   :  { %v1609_v44 = vadd.f32 %v1608_v43, %v1566_v41  ;;  %3372 = vmatpush1.bf16.msra.mxu0 %v4344_v37  ;;  %v1877_v29 = vmax.f32 %v1607_v22, 0.0  ;;  %v5756_v37 = vsub.s32 3, %v5555_v15  ;;  %v4476_v10 = vld [vmem:[%s6384_s3 + $0x6e0] ss:$16 sps:$4 sm:$0xff]   ;;  %v4484_v12 = vld [vmem:[%s6384_s3 + $0x6c4] ss:$16 sps:$4 sm:$0xff]  }
 0x10f   :  { %3373 = vmatprep.subr.bf16.mxu0 %v4352_v53  ;;  %v4428_v53 = vld [vmem:[%s6384_s3 + $0x4a0] ss:$16 sps:$4 sm:$0xff]   ;;  %v4451_v22 = vld [vmem:[%s6384_s3 + $0x5c4] ss:$16 sps:$4 sm:$0xff]  }
 0x110   :  { %3415 = vmatpush1.bf16.msra.mxu1 %v4383_v39  ;;  %v1878_v49 = vmax.f32 %v1609_v44, 0.0  ;;  %v5743_v33 = vpack.c.bf16 %v1877_v29, %v1869_v31  ;;  %v4433_v39 = vld [vmem:[%s6384_s3 + $0x484] ss:$16 sps:$4 sm:$0xff]   ;;  %v296_v41 = vrot.slane %v5577_v23, %v5756_v37  ;;  %v4431_v44 = vld [vmem:[%s6384_s3 + $0x480] ss:$16 sps:$4 sm:$0xff]  }
 0x111   :  { %3416 = vmatprep.subr.bf16.mxu1 %v4391_v42  ;;  %v292_v42 = vrot.slane %v5577_v23, %v5759_v38  ;;  %v4454_v27 = vld [vmem:[%s6384_s3 + $0x5a4] ss:$16 sps:$4 sm:$0xff]  }
 0x112   :  { %3374 = vmatpush1.bf16.msra.mxu0 %v4350_v45  ;;  %v5632_v51 = vpack.c.bf16 %v1878_v49, %v1870_v48  ;;  %v4502_v29 = vld [vmem:[%s6384_s3 + $0x664] ss:$16 sps:$4 sm:$0xff]  }
 0x113   :  { %3375 = vmatprep.subr.bf16.mxu0 %v4358_v46  ;;  %v4436_v46 = vld [vmem:[%s6384_s3 + $0x464] ss:$16 sps:$4 sm:$0xff]  }
 0x114   :  { %3417 = vmatpush1.bf16.msra.mxu1 %v4389_v47  ;;  %3391 = vmatprep.mubr.bf16.mxu0 %v5632_v51  ;;  %v4508_v31 = vld [vmem:[%s6384_s3 + $0x644] ss:$16 sps:$4 sm:$0xff]  }
 0x115   :  { %3418 = vmatprep.subr.bf16.mxu1 %v4397_v50 }
 0x116   :  { %3376 = vmatpush2.bf16.msra.mxu0 %v4356_v52 }
 0x117   :  { %3377 = vmatprep.subr.bf16.mxu0 %v4364_v54  ;;  %v4434_v54 = vld [vmem:[%s6384_s3 + $0x460] ss:$16 sps:$4 sm:$0xff]  }
 0x118   :  { %3419 = vmatpush2.bf16.msra.mxu1 %v4395_v55 }
 0x119   :  { %3420 = vmatprep.subr.bf16.mxu1 %v4403_v56  ;;  %v4439_v56 = vld [vmem:[%s6384_s3 + $0x444] ss:$16 sps:$4 sm:$0xff]  }
 0x11a   :  { %3378 = vmatpush2.bf16.msra.mxu0 %v4362_v57 }
 0x11b   :  { %3379 = vmatprep.subr.bf16.mxu0 %v4370_v58 }
 0x11c   :  { %3421 = vmatpush2.bf16.msra.mxu1 %v4401_v59 }
 0x11d   :  { %3422 = vmatprep.subr.bf16.mxu1 %v4406_v60 }
 0x11e   :  { %3380 = vmatpush2.bf16.msra.mxu0 %v4368_v61 }
 0x11f   :  { %3381 = vmatprep.subr.bf16.mxu0 %v4376_v62 }
 0x120   :  { %3423 = vmatpush2.bf16.msra.mxu1 %v4404_v63  ;;  %v4437_v63 = vld [vmem:[%s6384_s3 + $0x440] ss:$16 sps:$4 sm:$0xff]  }
 0x121   :  { %3424 = vmatprep.subr.bf16.mxu1 %v4409_v1 }
 0x122   :  { %3382 = vmatpush2.bf16.msra.mxu0 %v4374_v2  ;;  %v4442_v2 = vld [vmem:[%s6384_s3 + $0x424] ss:$16 sps:$4 sm:$0xff]  }
 0x123   :  { %3383 = vmatprep.subr.bf16.mxu0 %v4382_v3 }
 0x124   :  { %3425 = vmatpush2.bf16.msra.mxu1 %v4407_v5 }
 0x125   :  { %3426 = vmatprep.subr.bf16.mxu1 %v4412_v6 }
 0x126   :  { %3384 = vmatpush2.bf16.msra.mxu0 %v4380_v8 }
 0x127   :  { %3385 = vmatprep.subr.bf16.mxu0 %v4388_v9  ;;  %v4440_v9 = vld [vmem:[%s6384_s3 + $0x420] ss:$16 sps:$4 sm:$0xff]  }
 0x128   :  { %3427 = vmatpush2.bf16.msra.mxu1 %v4410_v4 }
 0x129   :  { %3428 = vmatprep.subr.bf16.mxu1 %v4415_v21  ;;  %v4445_v21 = vld [vmem:[%s6384_s3 + $0x404] ss:$16 sps:$4 sm:$0xff]  }
 0x12a   :  { %3386 = vmatpush2.bf16.msra.mxu0 %v4386_v11 }
 0x12b   :  { %3387 = vmatprep.subr.bf16.mxu0 %v4394_v13  ;;  %v4443_v13 = vld [vmem:[%s6384_s3 + $0x400] ss:$16 sps:$4 sm:$0xff]  }
 0x12c   :  { %3429 = vmatpush2.bf16.msra.mxu1 %v4413_v14  ;;  %v4448_v14 = vld [vmem:[%s6384_s3 + $0x5e4] ss:$16 sps:$4 sm:$0xff]  }
 0x12d   :  { %3430 = vmatprep.subr.bf16.mxu1 %v4418_v16  ;;  %v4482_v16 = vld [vmem:[%s6384_s3 + $0x6c0] ss:$16 sps:$4 sm:$0xff]  }
 0x12e   :  { %3388 = vmatpush2.bf16.msra.mxu0 %v4392_v19  ;;  %v4446_v19 = vld [vmem:[%s6384_s3 + $0x5e0] ss:$16 sps:$4 sm:$0xff]  }
 0x12f   :  { %3389 = vmatprep.subr.bf16.mxu0 %v4400_v24  ;;  %v4488_v24 = vld [vmem:[%s6384_s3 + $0x6a0] ss:$16 sps:$4 sm:$0xff]  }
 0x130   :  { %3431 = vmatpush2.bf16.msra.mxu1 %v4416_v25  ;;  %v4496_v25 = vld [vmem:[%s6384_s3 + $0x684] ss:$16 sps:$4 sm:$0xff]  }
 0x131   :  { %3432 = vmatprep.subr.bf16.mxu1 %v4421_v26  ;;  %v4449_v26 = vld [vmem:[%s6384_s3 + $0x5c0] ss:$16 sps:$4 sm:$0xff]  }
 0x132   :  { %3390 = vmatpush2.bf16.msra.mxu0 %v4398_v28  ;;  %v4494_v28 = vld [vmem:[%s6384_s3 + $0x680] ss:$16 sps:$4 sm:$0xff]  }
 0x133   :  { %3445 = vmatprep.subr.bf16.mxu0 %v4424_v30  ;;  %v4457_v30 = vld [vmem:[%s6384_s3 + $0x584] ss:$16 sps:$4 sm:$0xff]  }
 0x134   :  { %3433 = vmatpush2.bf16.msra.mxu1 %v4419_v0  ;;  %v4452_v0 = vld [vmem:[%s6384_s3 + $0x5a0] ss:$16 sps:$4 sm:$0xff]  }
 0x135   :  { %3488 = vmatprep.subr.bf16.mxu1 %v4478_v20  ;;  %3392 = vmatmul.mubr.bf16.vlgmr.msra.gmra.mxu0 %v5743_v33  ;;  %v4500_v20 = vld [vmem:[%s6384_s3 + $0x660] ss:$16 sps:$4 sm:$0xff]  }
 0x136   :  { %3446 = vmatpush1.bf16.msra.mxu0 %v4422_v32  ;;  %v4455_v32 = vld [vmem:[%s6384_s3 + $0x580] ss:$16 sps:$4 sm:$0xff]  }
 0x137   :  { %3447 = vmatprep.subr.bf16.mxu0 %v4427_v34  ;;  %v4460_v34 = vld [vmem:[%s6384_s3 + $0x564] ss:$16 sps:$4 sm:$0xff]  }
 0x13a   :  { %3448 = vmatpush1.bf16.msra.mxu0 %v4425_v35  ;;  %v4506_v35 = vld [vmem:[%s6384_s3 + $0x640] ss:$16 sps:$4 sm:$0xff]  }
 0x13b   :  { %3449 = vmatprep.subr.bf16.mxu0 %v4430_v36  ;;  %v4514_v36 = vld [vmem:[%s6384_s3 + $0x624] ss:$16 sps:$4 sm:$0xff]  }
 0x13d   :  { %v1688_v40 = vpop.f32.mrf.mxu0 }
 0x13e   :  { %3450 = vmatpush1.bf16.msra.mxu0 %v4428_v53  ;;  %v4458_v53 = vld [vmem:[%s6384_s3 + $0x560] ss:$16 sps:$4 sm:$0xff]  }
 0x13f   :  { %v1645_v43 = vpop.f32.mrf.mxu1  ;;  %v1690_v45 = vpop.f32.mrf.mxu0  ;;  %3451 = vmatprep.subr.bf16.mxu0 %v4433_v39  ;;  %v4463_v39 = vld [vmem:[%s6384_s3 + $0x544] ss:$16 sps:$4 sm:$0xff]  }
 0x140   :  { %v1646_v49 = vadd.f32 %v1645_v43, %v292_v42  ;;  %v4466_v43 = vld [vmem:[%s6384_s3 + $0x524] ss:$16 sps:$4 sm:$0xff]  }
 0x141   :  { %v1647_v47 = vpop.f32.mrf.mxu1  ;;  %v1692_v52 = vpop.f32.mrf.mxu0 }
 0x142   :  { %v1648_v48 = vadd.f32 %v1647_v47, %v296_v41  ;;  %3452 = vmatpush1.bf16.msra.mxu0 %v4431_v44  ;;  %v1689_v61 = vadd.f32 %v1688_v40, %v1646_v49  ;;  %v4512_v40 = vld [vmem:[%s6384_s3 + $0x620] ss:$16 sps:$4 sm:$0xff]   ;;  %v4469_v47 = vld [vmem:[%s6384_s3 + $0x504] ss:$16 sps:$4 sm:$0xff]  }
 0x143   :  { %v1649_v50 = vpop.f32.mrf.mxu1  ;;  %3453 = vmatprep.subr.bf16.mxu0 %v4436_v46  ;;  %v1694_v62 = vpop.f32.mrf.mxu0  ;;  %v4518_v44 = vld [vmem:[%s6384_s3 + $0x600] ss:$16 sps:$4 sm:$0xff]   ;;  %v4532_v49 = vld [vmem:[%s6384_s3 + $0x744] ss:$16 sps:$4 sm:$0xff]  }
 0x144   :  { %v1650_v55 = vadd.f32 %v1649_v50, %v292_v42  ;;  %v1691_v58 = vadd.f32 %v1690_v45, %v1648_v48  ;;  %v1871_v8 = vmax.f32 %v1689_v61, 0.0  ;;  %v4461_v42 = vld [vmem:[%s6384_s3 + $0x540] ss:$16 sps:$4 sm:$0xff]   ;;  %v4526_v45 = vld [vmem:[%s6384_s3 + $0x764] ss:$16 sps:$4 sm:$0xff]  }
 0x145   :  { %v1651_v57 = vpop.f32.mrf.mxu1  ;;  %v4464_v46 = vld [vmem:[%s6384_s3 + $0x520] ss:$16 sps:$4 sm:$0xff]  }
 0x146   :  { %v1693_v59 = vadd.f32 %v1692_v52, %v1650_v55  ;;  %v1652_v60 = vadd.f32 %v1651_v57, %v296_v41  ;;  %3454 = vmatpush1.bf16.msra.mxu0 %v4434_v54  ;;  %v1872_v5 = vmax.f32 %v1691_v58, 0.0  ;;  %v4520_v41 = vld [vmem:[%s6384_s3 + $0x604] ss:$16 sps:$4 sm:$0xff]   ;;  %v4524_v48 = vld [vmem:[%s6384_s3 + $0x760] ss:$16 sps:$4 sm:$0xff]  }
 0x147   :  { %3455 = vmatprep.subr.bf16.mxu0 %v4439_v56  ;;  %v4467_v50 = vld [vmem:[%s6384_s3 + $0x500] ss:$16 sps:$4 sm:$0xff]   ;;  %v4472_v52 = vld [vmem:[%s6384_s3 + $0x2ec] ss:$16 sps:$4 sm:$0xff]   ;;  %v4538_v55 = vld [vmem:[%s6384_s3 + $0x724] ss:$16 sps:$4 sm:$0xff]  }
 0x148   :  { %v1695_v1 = vadd.f32 %v1694_v62, %v1652_v60  ;;  %v1879_v3 = vmax.f32 %v1693_v59, 0.0  ;;  %v4530_v54 = vld [vmem:[%s6384_s3 + $0x740] ss:$16 sps:$4 sm:$0xff]   ;;  %v4544_v57 = vld [vmem:[%s6384_s3 + $0x704] ss:$16 sps:$4 sm:$0xff]   ;;  %v303_v59 = vsub.s32 5, %v5555_v15 }
 0x149   :  { %v4536_v56 = vld [vmem:[%s6384_s3 + $0x720] ss:$16 sps:$4 sm:$0xff]   ;;  %v4550_v60 = vld [vmem:[%s6384_s3 + $0xec] ss:$16 sps:$4 sm:$0xff]   ;;  %v299_v62 = vsub.s32 4, %v5555_v15 }
 0x14a   :  { %v1880_v6 = vmax.f32 %v1695_v1, 0.0  ;;  %3456 = vmatpush1.bf16.msra.mxu0 %v4437_v63  ;;  %v5800_v11 = vpack.c.bf16 %v1879_v3, %v1871_v8  ;;  %v4542_v58 = vld [vmem:[%s6384_s3 + $0x700] ss:$16 sps:$4 sm:$0xff]   ;;  %v304_v63 = vrot.slane %v5577_v23, %v303_v59  ;;  %v4533_v59 = vld [vmem:[%s6384_s3 + $0x388] ss:$16 sps:$4 sm:$0xff]  }
 0x14b   :  { %3457 = vmatprep.subr.bf16.mxu0 %v4442_v2  ;;  %v300_v2 = vrot.slane %v5577_v23, %v299_v62 }
 0x14c   :  { %v5792_v4 = vpack.c.bf16 %v1880_v6, %v1872_v5 }
 0x14e   :  { %3434 = vmatprep.mubr.bf16.mxu1 %v5792_v4  ;;  %3458 = vmatpush1.bf16.msra.mxu0 %v4440_v9 }
 0x14f   :  { %3435 = vmatmul.mubr.bf16.vlgmr.msra.gmra.mxu1 %v5800_v11  ;;  %3459 = vmatprep.subr.bf16.mxu0 %v4445_v21 }
 0x150   :  { %3489 = vmatpush1.bf16.msra.mxu1 %v4476_v10 }
 0x151   :  { %3490 = vmatprep.subr.bf16.mxu1 %v4484_v12 }
 0x152   :  { %3460 = vmatpush1.bf16.msra.mxu0 %v4443_v13 }
 0x153   :  { %3461 = vmatprep.subr.bf16.mxu0 %v4448_v14 }
 0x154   :  { %3491 = vmatpush1.bf16.msra.mxu1 %v4482_v16 }
 0x155   :  { %3492 = vmatprep.subr.bf16.mxu1 %v4490_v17 }
 0x156   :  { %3462 = vmatpush2.bf16.msra.mxu0 %v4446_v19 }
 0x157   :  { %3463 = vmatprep.subr.bf16.mxu0 %v4451_v22 }
 0x158   :  { %3493 = vmatpush1.bf16.msra.mxu1 %v4488_v24 }
 0x159   :  { %3494 = vmatprep.subr.bf16.mxu1 %v4496_v25 }
 0x15a   :  { %3464 = vmatpush2.bf16.msra.mxu0 %v4449_v26 }
 0x15b   :  { %3465 = vmatprep.subr.bf16.mxu0 %v4454_v27 }
 0x15c   :  { %3495 = vmatpush1.bf16.msra.mxu1 %v4494_v28 }
 0x15d   :  { %3496 = vmatprep.subr.bf16.mxu1 %v4502_v29  ;;  %v4470_v29 = vld [vmem:[%s6384_s3 + $0x2e8] ss:$16 sps:$4 sm:$0xff]  }
 0x15e   :  { %3466 = vmatpush2.bf16.msra.mxu0 %v4452_v0 }
 0x15f   :  { %3467 = vmatprep.subr.bf16.mxu0 %v4457_v30  ;;  %v4475_v30 = vld [vmem:[%s6384_s3 + $0x2cc] ss:$16 sps:$4 sm:$0xff]  }
 0x160   :  { %3497 = vmatpush1.bf16.msra.mxu1 %v4500_v20  ;;  %v4473_v20 = vld [vmem:[%s6384_s3 + $0x2c8] ss:$16 sps:$4 sm:$0xff]  }
 0x161   :  { %3498 = vmatprep.subr.bf16.mxu1 %v4508_v31  ;;  %v4481_v31 = vld [vmem:[%s6384_s3 + $0x2ac] ss:$16 sps:$4 sm:$0xff]  }
 0x162   :  { %3468 = vmatpush2.bf16.msra.mxu0 %v4455_v32  ;;  %v4479_v32 = vld [vmem:[%s6384_s3 + $0x2a8] ss:$16 sps:$4 sm:$0xff]  }
 0x163   :  { %3469 = vmatprep.subr.bf16.mxu0 %v4460_v34  ;;  %v4487_v34 = vld [vmem:[%s6384_s3 + $0x28c] ss:$16 sps:$4 sm:$0xff]  }
 0x164   :  { %3499 = vmatpush1.bf16.msra.mxu1 %v4506_v35  ;;  %v4493_v35 = vld [vmem:[%s6384_s3 + $0x26c] ss:$16 sps:$4 sm:$0xff]  }
 0x165   :  { %3500 = vmatprep.subr.bf16.mxu1 %v4514_v36  ;;  %v4491_v36 = vld [vmem:[%s6384_s3 + $0x268] ss:$16 sps:$4 sm:$0xff]  }
 0x166   :  { %3470 = vmatpush2.bf16.msra.mxu0 %v4458_v53  ;;  %v4499_v53 = vld [vmem:[%s6384_s3 + $0x24c] ss:$16 sps:$4 sm:$0xff]  }
 0x167   :  { %3471 = vmatprep.subr.bf16.mxu0 %v4463_v39  ;;  %v4497_v39 = vld [vmem:[%s6384_s3 + $0x248] ss:$16 sps:$4 sm:$0xff]  }
 0x168   :  { %3501 = vmatpush1.bf16.msra.mxu1 %v4512_v40  ;;  %v4505_v40 = vld [vmem:[%s6384_s3 + $0x22c] ss:$16 sps:$4 sm:$0xff]  }
 0x169   :  { %3502 = vmatprep.subr.bf16.mxu1 %v4520_v41  ;;  %v4503_v41 = vld [vmem:[%s6384_s3 + $0x228] ss:$16 sps:$4 sm:$0xff]  }
 0x16a   :  { %3472 = vmatpush2.bf16.msra.mxu0 %v4461_v42  ;;  %v4511_v42 = vld [vmem:[%s6384_s3 + $0x20c] ss:$16 sps:$4 sm:$0xff]  }
 0x16b   :  { %3473 = vmatprep.subr.bf16.mxu0 %v4466_v43  ;;  %v4509_v43 = vld [vmem:[%s6384_s3 + $0x208] ss:$16 sps:$4 sm:$0xff]  }
 0x16c   :  { %3503 = vmatpush1.bf16.msra.mxu1 %v4518_v44  ;;  %v4517_v44 = vld [vmem:[%s6384_s3 + $0x3ec] ss:$16 sps:$4 sm:$0xff]  }
 0x16d   :  { %3512 = vmatprep.subr.bf16.mxu1 %v4526_v45  ;;  %v4515_v45 = vld [vmem:[%s6384_s3 + $0x3e8] ss:$16 sps:$4 sm:$0xff]  }
 0x16e   :  { %3474 = vmatpush2.bf16.msra.mxu0 %v4464_v46  ;;  %v4523_v46 = vld [vmem:[%s6384_s3 + $0x3cc] ss:$16 sps:$4 sm:$0xff]  }
 0x16f   :  { %3475 = vmatprep.subr.bf16.mxu0 %v4469_v47  ;;  %v4521_v47 = vld [vmem:[%s6384_s3 + $0x3c8] ss:$16 sps:$4 sm:$0xff]  }
 0x170   :  { %3513 = vmatpush2.bf16.msra.mxu1 %v4524_v48  ;;  %v4529_v48 = vld [vmem:[%s6384_s3 + $0x3ac] ss:$16 sps:$4 sm:$0xff]  }
 0x171   :  { %3514 = vmatprep.subr.bf16.mxu1 %v4532_v49  ;;  %v311_v49 = vsub.s32 7, %v5555_v15 }
 0x172   :  { %3476 = vmatpush2.bf16.msra.mxu0 %v4467_v50  ;;  %v4527_v50 = vld [vmem:[%s6384_s3 + $0x3a8] ss:$16 sps:$4 sm:$0xff]  }
 0x173   :  { %3574 = vmatprep.subr.bf16.mxu0 %v4472_v52  ;;  %v307_v52 = vsub.s32 6, %v5555_v15  ;;  %v4541_v15 = vld [vmem:[%s6384_s3 + $0x36c] ss:$16 sps:$4 sm:$0xff]  }
 0x174   :  { %3515 = vmatpush2.bf16.msra.mxu1 %v4530_v54  ;;  %v4535_v54 = vld [vmem:[%s6384_s3 + $0x38c] ss:$16 sps:$4 sm:$0xff]  }
 0x175   :  { %3516 = vmatprep.subr.bf16.mxu1 %v4538_v55 }
 0x177   :  { %v1774_v61 = vpop.f32.mrf.mxu1 }
 0x178   :  { %3517 = vmatpush2.bf16.msra.mxu1 %v4536_v56  ;;  %v312_v56 = vrot.slane %v5577_v23, %v311_v49  ;;  %v4586_v49 = vld [vmem:[%s6384_s3 + $0x2c] ss:$16 sps:$4 sm:$0xff]  }
 0x179   :  { %3518 = vmatprep.subr.bf16.mxu1 %v4544_v57  ;;  %v1776_v1 = vpop.f32.mrf.mxu1  ;;  %v308_v57 = vrot.slane %v5577_v23, %v307_v52  ;;  %v4539_v23 = vld [vmem:[%s6384_s3 + $0x368] ss:$16 sps:$4 sm:$0xff]  }
 0x17a   :  { %v4584_v52 = vld [vmem:[%s6384_s3 + $0x28] ss:$16 sps:$4 sm:$0xff]  }
 0x17b   :  { %v1778_v8 = vpop.f32.mrf.mxu1 }
 0x17c   :  { %3519 = vmatpush2.bf16.msra.mxu1 %v4542_v58 }
 0x17d   :  { %3531 = vmatprep.subr.bf16.mxu1 %v4550_v60  ;;  %v1731_v3 = vpop.f32.mrf.mxu0  ;;  %v1780_v17 = vpop.f32.mrf.mxu1 }
 0x17e   :  { %v1732_v9 = vadd.f32 %v1731_v3, %v300_v2 }
 0x17f   :  { %v1733_v5 = vpop.f32.mrf.mxu0 }
 0x180   :  { %v1734_v6 = vadd.f32 %v1733_v5, %v304_v63  ;;  %v1775_v19 = vadd.f32 %v1774_v61, %v1732_v9  ;;  %v4547_v5 = vld [vmem:[%s6384_s3 + $0x34c] ss:$16 sps:$4 sm:$0xff]  }
 0x181   :  { %v1735_v21 = vpop.f32.mrf.mxu0 }
 0x182   :  { %v1736_v10 = vadd.f32 %v1735_v21, %v300_v2  ;;  %v1777_v13 = vadd.f32 %v1776_v1, %v1734_v6  ;;  %v1873_v27 = vmax.f32 %v1775_v19, 0.0 }
 0x183   :  { %v1737_v12 = vpop.f32.mrf.mxu0 }
 0x184   :  { %v1779_v14 = vadd.f32 %v1778_v8, %v1736_v10  ;;  %v1738_v16 = vadd.f32 %v1737_v12, %v304_v63  ;;  %v1874_v25 = vmax.f32 %v1777_v13, 0.0  ;;  %v4545_v13 = vld [vmem:[%s6384_s3 + $0x348] ss:$16 sps:$4 sm:$0xff]  }
 0x186   :  { %v1781_v22 = vadd.f32 %v1780_v17, %v1738_v16  ;;  %v1881_v24 = vmax.f32 %v1779_v14, 0.0  ;;  %v4553_v16 = vld [vmem:[%s6384_s3 + $0x32c] ss:$16 sps:$4 sm:$0xff]  }
 0x188   :  { %v1882_v26 = vmax.f32 %v1781_v22, 0.0  ;;  %v5936_v0 = vpack.c.bf16 %v1881_v24, %v1873_v27  ;;  %v4548_v27 = vld [vmem:[%s6384_s3 + $0xe8] ss:$16 sps:$4 sm:$0xff]  }
 0x18a   :  { %v5931_v28 = vpack.c.bf16 %v1882_v26, %v1874_v25  ;;  %v4551_v25 = vld [vmem:[%s6384_s3 + $0x328] ss:$16 sps:$4 sm:$0xff]  }
 0x18c   :  { %3477 = vmatprep.mubr.bf16.mxu0 %v5931_v28 }
 0x18d   :  { %3478 = vmatmul.mubr.bf16.vlgmr.msra.gmra.mxu0 %v5936_v0 }
 0x18e   :  { %3575 = vmatpush1.bf16.msra.mxu0 %v4470_v29  ;;  %3606 = vmatprep.mubr.bf16.mxu0 %v5792_v4  ;;  %v4485_v4 = vld [vmem:[%s6384_s3 + $0x288] ss:$16 sps:$4 sm:$0xff]  }
 0x18f   :  { %3576 = vmatprep.subr.bf16.mxu0 %v4475_v30  ;;  %v4556_v30 = vld [vmem:[%s6384_s3 + $0xcc] ss:$16 sps:$4 sm:$0xff]  }
 0x192   :  { %3577 = vmatpush1.bf16.msra.mxu0 %v4473_v20  ;;  %v4559_v20 = vld [vmem:[%s6384_s3 + $0x30c] ss:$16 sps:$4 sm:$0xff]  }
 0x193   :  { %3578 = vmatprep.subr.bf16.mxu0 %v4481_v31  ;;  %v4557_v31 = vld [vmem:[%s6384_s3 + $0x308] ss:$16 sps:$4 sm:$0xff]  }
 0x196   :  { %3579 = vmatpush1.bf16.msra.mxu0 %v4479_v32  ;;  %v4554_v32 = vld [vmem:[%s6384_s3 + $0xc8] ss:$16 sps:$4 sm:$0xff]  }
 0x197   :  { %3580 = vmatprep.subr.bf16.mxu0 %v4487_v34  ;;  %v4565_v34 = vld [vmem:[%s6384_s3 + $0x6ec] ss:$16 sps:$4 sm:$0xff]  }
 0x19a   :  { %3581 = vmatpush1.bf16.msra.mxu0 %v4485_v4  ;;  %v4562_v4 = vld [vmem:[%s6384_s3 + $0xac] ss:$16 sps:$4 sm:$0xff]  }
 0x19b   :  { %3582 = vmatprep.subr.bf16.mxu0 %v4493_v35  ;;  %v4563_v35 = vld [vmem:[%s6384_s3 + $0x6e8] ss:$16 sps:$4 sm:$0xff]  }
 0x19e   :  { %3583 = vmatpush1.bf16.msra.mxu0 %v4491_v36  ;;  %v4571_v36 = vld [vmem:[%s6384_s3 + $0x6cc] ss:$16 sps:$4 sm:$0xff]  }
 0x19f   :  { %3584 = vmatprep.subr.bf16.mxu0 %v4499_v53  ;;  %v4568_v53 = vld [vmem:[%s6384_s3 + $0x8c] ss:$16 sps:$4 sm:$0xff]  }
 0x1a2   :  { %3585 = vmatpush1.bf16.msra.mxu0 %v4497_v39  ;;  %v4569_v39 = vld [vmem:[%s6384_s3 + $0x6c8] ss:$16 sps:$4 sm:$0xff]  }
 0x1a3   :  { %3586 = vmatprep.subr.bf16.mxu0 %v4505_v40  ;;  %v4566_v40 = vld [vmem:[%s6384_s3 + $0x88] ss:$16 sps:$4 sm:$0xff]  }
 0x1a6   :  { %3587 = vmatpush1.bf16.msra.mxu0 %v4503_v41  ;;  %v4577_v41 = vld [vmem:[%s6384_s3 + $0x6ac] ss:$16 sps:$4 sm:$0xff]  }
 0x1a7   :  { %3588 = vmatprep.subr.bf16.mxu0 %v4511_v42  ;;  %v4575_v42 = vld [vmem:[%s6384_s3 + $0x6a8] ss:$16 sps:$4 sm:$0xff]  }
 0x1aa   :  { %3589 = vmatpush1.bf16.msra.mxu0 %v4509_v43  ;;  %v4572_v43 = vld [vmem:[%s6384_s3 + $0x68] ss:$16 sps:$4 sm:$0xff]  }
 0x1ab   :  { %3590 = vmatprep.subr.bf16.mxu0 %v4517_v44  ;;  %v4583_v44 = vld [vmem:[%s6384_s3 + $0x68c] ss:$16 sps:$4 sm:$0xff]  }
 0x1ae   :  { %3591 = vmatpush2.bf16.msra.mxu0 %v4515_v45  ;;  %v4580_v45 = vld [vmem:[%s6384_s3 + $0x4c] ss:$16 sps:$4 sm:$0xff]  }
 0x1af   :  { %3592 = vmatprep.subr.bf16.mxu0 %v4523_v46  ;;  %v4581_v46 = vld [vmem:[%s6384_s3 + $0x688] ss:$16 sps:$4 sm:$0xff]  }
 0x1b2   :  { %3593 = vmatpush2.bf16.msra.mxu0 %v4521_v47  ;;  %v4578_v47 = vld [vmem:[%s6384_s3 + $0x48] ss:$16 sps:$4 sm:$0xff]  }
 0x1b3   :  { %3594 = vmatprep.subr.bf16.mxu0 %v4529_v48  ;;  %v4589_v48 = vld [vmem:[%s6384_s3 + $0x66c] ss:$16 sps:$4 sm:$0xff]  }
 0x1b5   :  { %v1860_v55 = vpop.f32.mrf.mxu0 }
 0x1b6   :  { %3595 = vmatpush2.bf16.msra.mxu0 %v4527_v50  ;;  %v4587_v50 = vld [vmem:[%s6384_s3 + $0x668] ss:$16 sps:$4 sm:$0xff]  }
 0x1b7   :  { %v1817_v58 = vpop.f32.mrf.mxu1  ;;  %v1862_v60 = vpop.f32.mrf.mxu0  ;;  %3596 = vmatprep.subr.bf16.mxu0 %v4535_v54  ;;  %v4595_v54 = vld [vmem:[%s6384_s3 + $0x64c] ss:$16 sps:$4 sm:$0xff]  }
 0x1b8   :  { %v1818_v63 = vadd.f32 %v1817_v58, %v308_v57  ;;  %v4601_v58 = vld [vmem:[%s6384_s3 + $0x62c] ss:$16 sps:$4 sm:$0xff]  }
 0x1b9   :  { %v1819_v61 = vpop.f32.mrf.mxu1  ;;  %v1864_v2 = vpop.f32.mrf.mxu0 }
 0x1ba   :  { %v1820_v62 = vadd.f32 %v1819_v61, %v312_v56  ;;  %3597 = vmatpush2.bf16.msra.mxu0 %v4533_v59  ;;  %v1861_v10 = vadd.f32 %v1860_v55, %v1818_v63  ;;  %v4592_v55 = vld [vmem:[%s6384_s3 + $0xc] ss:$16 sps:$4 sm:$0xff]   ;;  %v4605_v63 = vld [vmem:[%s6384_s3 + $0x608] ss:$16 sps:$4 sm:$0xff]  }
 0x1bb   :  { %v1821_v1 = vpop.f32.mrf.mxu1  ;;  %3598 = vmatprep.subr.bf16.mxu0 %v4541_v15  ;;  %v1866_v12 = vpop.f32.mrf.mxu0  ;;  %v4598_v59 = vld [vmem:[%s6384_s3 + $0x1ec] ss:$16 sps:$4 sm:$0xff]   ;;  %v4596_v15 = vld [vmem:[%s6384_s3 + $0x1e8] ss:$16 sps:$4 sm:$0xff]  }
 0x1bc   :  { %v1822_v3 = vadd.f32 %v1821_v1, %v308_v57  ;;  %v1863_v8 = vadd.f32 %v1862_v60, %v1820_v62  ;;  %v1875_v24 = vmax.f32 %v1861_v10, 0.0  ;;  %v4590_v57 = vld [vmem:[%s6384_s3 + $0x8] ss:$16 sps:$4 sm:$0xff]   ;;  %v4607_v61 = vld [vmem:[%s6384_s3 + $0x60c] ss:$16 sps:$4 sm:$0xff]  }
 0x1bd   :  { %v1823_v6 = vpop.f32.mrf.mxu1  ;;  %v4599_v60 = vld [vmem:[%s6384_s3 + $0x628] ss:$16 sps:$4 sm:$0xff]   ;;  %v4604_v62 = vld [vmem:[%s6384_s3 + $0x1cc] ss:$16 sps:$4 sm:$0xff]  }
 0x1be   :  { %v1865_v9 = vadd.f32 %v1864_v2, %v1822_v3  ;;  %v1824_v21 = vadd.f32 %v1823_v6, %v312_v56  ;;  %3599 = vmatpush2.bf16.msra.mxu0 %v4539_v23  ;;  %v1876_v19 = vmax.f32 %v1863_v8, 0.0  ;;  %v4593_v56 = vld [vmem:[%s6384_s3 + $0x648] ss:$16 sps:$4 sm:$0xff]   ;;  %v4613_v2 = vld [vmem:[%s6384_s3 + $0x76c] ss:$16 sps:$4 sm:$0xff]  }
 0x1bf   :  { %3600 = vmatprep.subr.bf16.mxu0 %v4547_v5  ;;  %v4602_v1 = vld [vmem:[%s6384_s3 + $0x1c8] ss:$16 sps:$4 sm:$0xff]   ;;  %v4610_v23 = vld [vmem:[%s6384_s3 + $0x1ac] ss:$16 sps:$4 sm:$0xff]  }
 0x1c0   :  { %v1867_v14 = vadd.f32 %v1866_v12, %v1824_v21  ;;  %v1883_v17 = vmax.f32 %v1865_v9, 0.0  ;;  %v4611_v3 = vld [vmem:[%s6384_s3 + $0x768] ss:$16 sps:$4 sm:$0xff]   ;;  %v4619_v6 = vld [vmem:[%s6384_s3 + $0x74c] ss:$16 sps:$4 sm:$0xff]  }
 0x1c1   :  { %v4608_v5 = vld [vmem:[%s6384_s3 + $0x1a8] ss:$16 sps:$4 sm:$0xff]   ;;  %v4616_v8 = vld [vmem:[%s6384_s3 + $0x18c] ss:$16 sps:$4 sm:$0xff]  }
 0x1c2   :  { %v1884_v22 = vmax.f32 %v1867_v14, 0.0  ;;  %3601 = vmatpush2.bf16.msra.mxu0 %v4545_v13  ;;  %v6032_v29 = vpack.c.bf16 %v1883_v17, %v1875_v24  ;;  %v4617_v9 = vld [vmem:[%s6384_s3 + $0x748] ss:$16 sps:$4 sm:$0xff]   ;;  %v4625_v10 = vld [vmem:[%s6384_s3 + $0x72c] ss:$16 sps:$4 sm:$0xff]  }
 0x1c3   :  { %3602 = vmatprep.subr.bf16.mxu0 %v4553_v16  ;;  %v4614_v21 = vld [vmem:[%s6384_s3 + $0x188] ss:$16 sps:$4 sm:$0xff]   ;;  %v4622_v12 = vld [vmem:[%s6384_s3 + $0x16c] ss:$16 sps:$4 sm:$0xff]  }
 0x1c4   :  { %v1892_v26 = vpack.c.bf16 %v1884_v22, %v1876_v19  ;;  %v4623_v13 = vld [vmem:[%s6384_s3 + $0x728] ss:$16 sps:$4 sm:$0xff]   ;;  %v4631_v16 = vld [vmem:[%s6384_s3 + $0x70c] ss:$16 sps:$4 sm:$0xff]  }
 0x1c5   :  { %v4620_v14 = vld [vmem:[%s6384_s3 + $0x168] ss:$16 sps:$4 sm:$0xff]   ;;  %v4628_v17 = vld [vmem:[%s6384_s3 + $0x14c] ss:$16 sps:$4 sm:$0xff]  }
 0x1c6   :  { %4324 = vmatprep.mubr.msk.bf16.mxu1 %vm3355_vm1, %v1892_v26  ;;  %3603 = vmatpush2.bf16.msra.mxu0 %v4551_v25  ;;  %v4629_v19 = vld [vmem:[%s6384_s3 + $0x708] ss:$16 sps:$4 sm:$0xff]   ;;  %v4634_v24 = vld [vmem:[%s6384_s3 + $0x12c] ss:$16 sps:$4 sm:$0xff]  }
 0x1c7   :  { %3521 = vmatmul.mubr.bf16.vlgmr.msra.gmra.mxu1 %v6032_v29  ;;  %3604 = vmatprep.subr.bf16.mxu0 %v4559_v20  ;;  %v4626_v22 = vld [vmem:[%s6384_s3 + $0x148] ss:$16 sps:$4 sm:$0xff]  }
 0x1c8   :  { %3532 = vmatpush1.bf16.msra.mxu1 %v4548_v27  ;;  %3563 = vmatprep.mubr.bf16.mxu1 %v5632_v51  ;;  %v4560_v51 = vld [vmem:[%s6384_s3 + $0xa8] ss:$16 sps:$4 sm:$0xff]  }
 0x1c9   :  { %3533 = vmatprep.subr.bf16.mxu1 %v4556_v30  ;;  %v4632_v25 = vld [vmem:[%s6384_s3 + $0x128] ss:$16 sps:$4 sm:$0xff]   ;;  %v4640_v30 = vld [vmem:[%s6384_s3 + $0x4ec] ss:$16 sps:$4 sm:$0xff]  }
 0x1ca   :  { %3605 = vmatpush2.bf16.msra.mxu0 %v4557_v31  ;;  %v4635_v27 = vld [vmem:[%s6384_s3 + $0x108] ss:$16 sps:$4 sm:$0xff]  }
 0x1cb   :  { %3660 = vmatprep.subr.bf16.mxu0 %v4565_v34  ;;  %v4638_v20 = vld [vmem:[%s6384_s3 + $0x4e8] ss:$16 sps:$4 sm:$0xff]  }
 0x1cc   :  { %3534 = vmatpush1.bf16.msra.mxu1 %v4554_v32  ;;  %v4641_v31 = vld [vmem:[%s6384_s3 + $0x4c8] ss:$16 sps:$4 sm:$0xff]   ;;  %v4646_v32 = vld [vmem:[%s6384_s3 + $0x4ac] ss:$16 sps:$4 sm:$0xff]  }
 0x1cd   :  { %3535 = vmatprep.subr.bf16.mxu1 %v4562_v4  ;;  %3607 = vmatmul.mubr.bf16.vlgmr.msra.gmra.mxu0 %v5800_v11  ;;  %v4574_v11 = vld [vmem:[%s6384_s3 + $0x6c] ss:$16 sps:$4 sm:$0xff]   ;;  %v4644_v34 = vld [vmem:[%s6384_s3 + $0x4a8] ss:$16 sps:$4 sm:$0xff]  }
 0x1ce   :  { %3661 = vmatpush1.bf16.msra.mxu0 %v4563_v35  ;;  %4325 = vmatprep.mubr.msk.bf16.mxu0 %vm3355_vm1, %v1892_v26  ;;  %v4637_v26 = vld [vmem:[%s6384_s3 + $0x10c] ss:$16 sps:$4 sm:$0xff]   ;;  %v4650_v35 = vld [vmem:[%s6384_s3 + $0x468] ss:$16 sps:$4 sm:$0xff]  }
 0x1cf   :  { %3662 = vmatprep.subr.bf16.mxu0 %v4571_v36  ;;  %v4652_v4 = vld [vmem:[%s6384_s3 + $0x46c] ss:$16 sps:$4 sm:$0xff]   ;;  %v4653_v36 = vld [vmem:[%s6384_s3 + $0x448] ss:$16 sps:$4 sm:$0xff]  }
 0x1d0   :  { %3536 = vmatpush1.bf16.msra.mxu1 %v4560_v51  ;;  %v4655_v51 = vld [vmem:[%s6384_s3 + $0x44c] ss:$16 sps:$4 sm:$0xff]  }
 0x1d1   :  { %3537 = vmatprep.subr.bf16.mxu1 %v4568_v53  ;;  %v4658_v53 = vld [vmem:[%s6384_s3 + $0x42c] ss:$16 sps:$4 sm:$0xff]  }
 0x1d2   :  { %3663 = vmatpush1.bf16.msra.mxu0 %v4569_v39  ;;  %v4656_v39 = vld [vmem:[%s6384_s3 + $0x428] ss:$16 sps:$4 sm:$0xff]  }
 0x1d3   :  { %3664 = vmatprep.subr.bf16.mxu0 %v4577_v41  ;;  %v4659_v41 = vld [vmem:[%s6384_s3 + $0x408] ss:$16 sps:$4 sm:$0xff]  }
 0x1d4   :  { %3538 = vmatpush1.bf16.msra.mxu1 %v4566_v40  ;;  %v4661_v40 = vld [vmem:[%s6384_s3 + $0x40c] ss:$16 sps:$4 sm:$0xff]  }
 0x1d5   :  { %3539 = vmatprep.subr.bf16.mxu1 %v4574_v11  ;;  %v4664_v11 = vld [vmem:[%s6384_s3 + $0x5ec] ss:$16 sps:$4 sm:$0xff]  }
 0x1d6   :  { %3665 = vmatpush1.bf16.msra.mxu0 %v4575_v42  ;;  %v4662_v42 = vld [vmem:[%s6384_s3 + $0x5e8] ss:$16 sps:$4 sm:$0xff]  }
 0x1d7   :  { %3666 = vmatprep.subr.bf16.mxu0 %v4583_v44  ;;  %v4665_v44 = vld [vmem:[%s6384_s3 + $0x5c8] ss:$16 sps:$4 sm:$0xff]  }
 0x1d8   :  { %3540 = vmatpush1.bf16.msra.mxu1 %v4572_v43  ;;  %v4667_v43 = vld [vmem:[%s6384_s3 + $0x5cc] ss:$16 sps:$4 sm:$0xff]  }
 0x1d9   :  { %3541 = vmatprep.subr.bf16.mxu1 %v4580_v45  ;;  %v4670_v45 = vld [vmem:[%s6384_s3 + $0x5ac] ss:$16 sps:$4 sm:$0xff]  }
 0x1da   :  { %3667 = vmatpush1.bf16.msra.mxu0 %v4581_v46  ;;  %v4668_v46 = vld [vmem:[%s6384_s3 + $0x5a8] ss:$16 sps:$4 sm:$0xff]  }
 0x1db   :  { %3668 = vmatprep.subr.bf16.mxu0 %v4589_v48  ;;  %v4671_v48 = vld [vmem:[%s6384_s3 + $0x588] ss:$16 sps:$4 sm:$0xff]  }
 0x1dc   :  { %3542 = vmatpush1.bf16.msra.mxu1 %v4578_v47  ;;  %v4673_v47 = vld [vmem:[%s6384_s3 + $0x58c] ss:$16 sps:$4 sm:$0xff]  }
 0x1dd   :  { %3543 = vmatprep.subr.bf16.mxu1 %v4586_v49  ;;  %v4676_v49 = vld [vmem:[%s6384_s3 + $0x56c] ss:$16 sps:$4 sm:$0xff]  }
 0x1de   :  { %3669 = vmatpush1.bf16.msra.mxu0 %v4587_v50  ;;  %v4674_v50 = vld [vmem:[%s6384_s3 + $0x568] ss:$16 sps:$4 sm:$0xff]  }
 0x1df   :  { %3670 = vmatprep.subr.bf16.mxu0 %v4595_v54  ;;  %v4677_v54 = vld [vmem:[%s6384_s3 + $0x548] ss:$16 sps:$4 sm:$0xff]  }
 0x1e0   :  { %3544 = vmatpush1.bf16.msra.mxu1 %v4584_v52  ;;  %v4679_v52 = vld [vmem:[%s6384_s3 + $0x54c] ss:$16 sps:$4 sm:$0xff]  }
 0x1e1   :  { %3545 = vmatprep.subr.bf16.mxu1 %v4592_v55  ;;  %v4682_v55 = vld [vmem:[%s6384_s3 + $0x52c] ss:$16 sps:$4 sm:$0xff]  }
 0x1e2   :  { %3671 = vmatpush1.bf16.msra.mxu0 %v4593_v56  ;;  %v4680_v56 = vld [vmem:[%s6384_s3 + $0x528] ss:$16 sps:$4 sm:$0xff]  }
 0x1e3   :  { %3672 = vmatprep.subr.bf16.mxu0 %v4601_v58  ;;  %v4683_v58 = vld [vmem:[%s6384_s3 + $0x508] ss:$16 sps:$4 sm:$0xff]  }
 0x1e4   :  { %3546 = vmatpush1.bf16.msra.mxu1 %v4590_v57  ;;  %v4685_v57 = vld [vmem:[%s6384_s3 + $0x50c] ss:$16 sps:$4 sm:$0xff]  }
 0x1e5   :  { %3547 = vmatprep.subr.bf16.mxu1 %v4598_v59 }
 0x1e6   :  { %3673 = vmatpush1.bf16.msra.mxu0 %v4599_v60 }
 0x1e7   :  { %3674 = vmatprep.subr.bf16.mxu0 %v4607_v61 }
 0x1e8   :  { %3548 = vmatpush2.bf16.msra.mxu1 %v4596_v15 }
 0x1e9   :  { %3549 = vmatprep.subr.bf16.mxu1 %v4604_v62 }
 0x1ea   :  { %3675 = vmatpush1.bf16.msra.mxu0 %v4605_v63 }
 0x1eb   :  { %3684 = vmatprep.subr.bf16.mxu0 %v4613_v2 }
 0x1ec   :  { %3550 = vmatpush2.bf16.msra.mxu1 %v4602_v1 }
 0x1ed   :  { %3551 = vmatprep.subr.bf16.mxu1 %v4610_v23 }
 0x1ee   :  { %3685 = vmatpush2.bf16.msra.mxu0 %v4611_v3 }
 0x1ef   :  { %3686 = vmatprep.subr.bf16.mxu0 %v4619_v6 }
 0x1f0   :  { %3552 = vmatpush2.bf16.msra.mxu1 %v4608_v5 }
 0x1f1   :  { %3553 = vmatprep.subr.bf16.mxu1 %v4616_v8 }
 0x1f2   :  { %3687 = vmatpush2.bf16.msra.mxu0 %v4617_v9 }
 0x1f3   :  { %3688 = vmatprep.subr.bf16.mxu0 %v4625_v10 }
 0x1f4   :  { %3554 = vmatpush2.bf16.msra.mxu1 %v4614_v21 }
 0x1f5   :  { %3555 = vmatprep.subr.bf16.mxu1 %v4622_v12  ;;  %v3393_v59 = vpop.f32.mrf.mxu0 }
 0x1f6   :  { %3689 = vmatpush2.bf16.msra.mxu0 %v4623_v13 }
 0x1f7   :  { %3690 = vmatprep.subr.bf16.mxu0 %v4631_v16  ;;  %v3395_v60 = vpop.f32.mrf.mxu0 }
 0x1f8   :  { %3556 = vmatpush2.bf16.msra.mxu1 %v4620_v14 }
 0x1f9   :  { %3557 = vmatprep.subr.bf16.mxu1 %v4628_v17  ;;  %v3397_v61 = vpop.f32.mrf.mxu0 }
 0x1fa   :  { %3691 = vmatpush2.bf16.msra.mxu0 %v4629_v19 }
 0x1fb   :  { %v3399_v63 = vpop.f32.mrf.mxu0 }
 0x1fc   :  { %3558 = vmatpush2.bf16.msra.mxu1 %v4626_v22 }
 0x1fd   :  { %3559 = vmatprep.subr.bf16.mxu1 %v4634_v24  ;;  %3693 = vmatmul.mubr.bf16.vlgmr.msra.gmra.mxu0 %v6032_v29  ;;  %v4643_v29 = vld [vmem:[%s6384_s3 + $0x4cc] ss:$16 sps:$4 sm:$0xff]  }
 0x200   :  { %3560 = vmatpush2.bf16.msra.mxu1 %v4632_v25 }
 0x201   :  { %3561 = vmatprep.subr.bf16.mxu1 %v4637_v26 }
 0x204   :  { %3562 = vmatpush2.bf16.msra.mxu1 %v4635_v27 }
 0x205   :  { %3617 = vmatprep.subr.bf16.mxu1 %v4640_v30 }
 0x207   :  { %3564 = vmatmul.mubr.bf16.vlgmr.msra.gmra.mxu1 %v5743_v33  ;;  %v4649_v33 = vld [vmem:[%s6384_s3 + $0x48c] ss:$16 sps:$4 sm:$0xff]  }
 0x208   :  { %3618 = vmatpush1.bf16.msra.mxu1 %v4638_v20  ;;  %3649 = vmatprep.mubr.bf16.mxu1 %v5931_v28  ;;  %v4647_v28 = vld [vmem:[%s6384_s3 + $0x488] ss:$16 sps:$4 sm:$0xff]  }
 0x209   :  { %3619 = vmatprep.subr.bf16.mxu1 %v4643_v29 }
 0x20c   :  { %3620 = vmatpush1.bf16.msra.mxu1 %v4641_v31 }
 0x20d   :  { %3621 = vmatprep.subr.bf16.mxu1 %v4646_v32 }
 0x20f   :  { %v3436_v15 = vpop.f32.mrf.mxu1 }
 0x210   :  { %3622 = vmatpush1.bf16.msra.mxu1 %v4644_v34 }
 0x211   :  { %3623 = vmatprep.subr.bf16.mxu1 %v4649_v33  ;;  %v3438_v62 = vpop.f32.mrf.mxu1 }
 0x213   :  { %v3440_v1 = vpop.f32.mrf.mxu1 }
 0x214   :  { %3624 = vmatpush1.bf16.msra.mxu1 %v4647_v28 }
 0x215   :  { %3625 = vmatprep.subr.bf16.mxu1 %v4652_v4  ;;  %v3442_v23 = vpop.f32.mrf.mxu1 }
 0x218   :  { %3626 = vmatpush1.bf16.msra.mxu1 %v4650_v35 }
 0x219   :  { %3627 = vmatprep.subr.bf16.mxu1 %v4655_v51 }
 0x21c   :  { %3628 = vmatpush1.bf16.msra.mxu1 %v4653_v36 }
 0x21d   :  { %3629 = vmatprep.subr.bf16.mxu1 %v4658_v53 }
 0x220   :  { %3630 = vmatpush1.bf16.msra.mxu1 %v4656_v39 }
 0x221   :  { %3631 = vmatprep.subr.bf16.mxu1 %v4661_v40 }
 0x224   :  { %3632 = vmatpush1.bf16.msra.mxu1 %v4659_v41 }
 0x225   :  { %3633 = vmatprep.subr.bf16.mxu1 %v4664_v11 }
 0x228   :  { %3634 = vmatpush2.bf16.msra.mxu1 %v4662_v42 }
 0x229   :  { %3635 = vmatprep.subr.bf16.mxu1 %v4667_v43 }
 0x22c   :  { %3636 = vmatpush2.bf16.msra.mxu1 %v4665_v44 }
 0x22d   :  { %3637 = vmatprep.subr.bf16.mxu1 %v4670_v45  ;;  %v4690_v45 = vld [vmem:[%s6383_s0 + $0x8] sm:$0xff] }
 0x230   :  { %3638 = vmatpush2.bf16.msra.mxu1 %v4668_v46 }
 0x231   :  { %3639 = vmatprep.subr.bf16.mxu1 %v4673_v47 }
 0x234   :  { %3640 = vmatpush2.bf16.msra.mxu1 %v4671_v48 }
 0x235   :  { %3641 = vmatprep.subr.bf16.mxu1 %v4676_v49 }
 0x238   :  { %3642 = vmatpush2.bf16.msra.mxu1 %v4674_v50 }
 0x239   :  { %3643 = vmatprep.subr.bf16.mxu1 %v4679_v52 }
 0x23c   :  { %3644 = vmatpush2.bf16.msra.mxu1 %v4677_v54 }
 0x23d   :  { %3645 = vmatprep.subr.bf16.mxu1 %v4682_v55  ;;  %v4691_v55 = vld [vmem:[%s6383_s0] sm:$0xff] }
 0x240   :  { %3646 = vmatpush2.bf16.msra.mxu1 %v4680_v56 }
 0x241   :  { %3647 = vmatprep.subr.bf16.mxu1 %v4685_v57 }
 0x244   :  { %3648 = vmatpush2.bf16.msra.mxu1 %v4683_v58 }
 0x247   :  { %3650 = vmatmul.mubr.bf16.vlgmr.msra.gmra.mxu1 %v5936_v0  ;;  %v2133_v0 = vld [vmem:[%s6386_s4] sm:$0xf] }
 0x248   :  { %v2142_v13 = vrot.slane %v2133_v0, %v5564_v18  ;;  %v2138_v17 = vrot.slane %v2133_v0, %v5684_v7  ;;  %v2146_v25 = vrot.slane %v2133_v0, %v5759_v38  ;;  %v2150_v30 = vrot.slane %v2133_v0, %v5756_v37 }
 0x24a   :  { %v3396_v19 = vadd.f32 %v3395_v60, %v2142_v13  ;;  %v3394_v26 = vadd.f32 %v3393_v59, %v2138_v17  ;;  %v3400_v20 = vadd.f32 %v3399_v63, %v2142_v13  ;;  %v3398_v28 = vadd.f32 %v3397_v61, %v2138_v17  ;;  %v4692_v61 = vld [vmem:[%s6383_s0 + $0x28] sm:$0xff]  ;;  %v4695_v13 = vld [vmem:[%s6383_s0 + $0x18] sm:$0xff] }
 0x24c   :  { %v3439_v27 = vadd.f32 %v3438_v62, %v3396_v19  ;;  %v3437_v29 = vadd.f32 %v3436_v15, %v3394_v26  ;;  %v3443_v4 = vadd.f32 %v3442_v23, %v3400_v20  ;;  %v3441_v39 = vadd.f32 %v3440_v1, %v3398_v28 }
 0x24d   :  { %v3479_v2 = vpop.f32.mrf.mxu0 }
 0x24e   :  { %v3480_v35 = vadd.f32 %v3479_v2, %v3437_v29 }
 0x24f   :  { %v3481_v3 = vpop.f32.mrf.mxu0 }
 0x250   :  { %v3482_v31 = vadd.f32 %v3481_v3, %v3439_v27 }
 0x251   :  { %v3483_v6 = vpop.f32.mrf.mxu0 }
 0x252   :  { %v3484_v44 = vadd.f32 %v3483_v6, %v3441_v39  ;;  %v4693_v6 = vld [vmem:[%s6383_s0 + $0x10] sm:$0xff] }
 0x253   :  { %v3485_v9 = vpop.f32.mrf.mxu0 }
 0x254   :  { %v3486_v40 = vadd.f32 %v3485_v9, %v3443_v4  ;;  %v4694_v9 = vld [vmem:[%s6383_s0 + $0x20] sm:$0xff] }
 0x287   :  { %v3522_v5 = vpop.f32.mrf.mxu1 }
 0x288   :  { %v3523_v41 = vadd.f32 %v3522_v5, %v3480_v35 }
 0x289   :  { %v3524_v8 = vpop.f32.mrf.mxu1 }
 0x28a   :  { %v3525_v51 = vadd.f32 %v3524_v8, %v3482_v31  ;;  %v3703_v56 = vadd.f32 %v4691_v55, %v3523_v41 }
 0x28b   :  { %v3526_v21 = vpop.f32.mrf.mxu1 }
 0x28c   :  { %v3704_v46 = vadd.f32 %v4690_v45, %v3525_v51  ;;  %v3527_v57 = vadd.f32 %v3526_v21, %v3484_v44 }
 0x28d   :  { %v3608_v10 = vpop.f32.mrf.mxu0  ;;  %v3528_v12 = vpop.f32.mrf.mxu1 }
 0x28e   :  { %v3529_v47 = vadd.f32 %v3528_v12, %v3486_v40  ;;  %v3711_v2 = vadd.f32 %v3704_v46, %v3703_v56  ;;  %v3707_v21 = vadd.f32 %v4694_v9, %v3527_v57 }
 0x28f   :  { %v3610_v14 = vpop.f32.mrf.mxu0 }
 0x290   :  { %v3708_v62 = vadd.f32 %v4692_v61, %v3529_v47 }
 0x291   :  { %v3612_v22 = vpop.f32.mrf.mxu0 }
 0x292   :  { %v3717_v19 = vadd.f32 %v3708_v62, %v3707_v21 }
 0x293   :  { %v3614_v32 = vpop.f32.mrf.mxu0 }
 0x2bd   :  { %v3694_v36 = vpop.f32.mrf.mxu0 }
 0x2bf   :  { %v3696_v48 = vpop.f32.mrf.mxu0 }
 0x2c1   :  { %v3698_v63 = vpop.f32.mrf.mxu0 }
 0x2c3   :  { %v3700_v17 = vpop.f32.mrf.mxu0 }
 0x2c7   :  { %v3565_v16 = vpop.f32.mrf.mxu1 }
 0x2c8   :  { %v3566_v33 = vadd.f32 %v3565_v16, %v2146_v25 }
 0x2c9   :  { %v3567_v24 = vpop.f32.mrf.mxu1 }
 0x2ca   :  { %v3568_v53 = vadd.f32 %v3567_v24, %v2150_v30  ;;  %v3609_v43 = vadd.f32 %v3608_v10, %v3566_v33 }
 0x2cb   :  { %v3569_v34 = vpop.f32.mrf.mxu1 }
 0x2cc   :  { %v3570_v42 = vadd.f32 %v3569_v34, %v2146_v25  ;;  %v3611_v54 = vadd.f32 %v3610_v14, %v3568_v53 }
 0x2cd   :  { %v3571_v11 = vpop.f32.mrf.mxu1 }
 0x2ce   :  { %v3572_v50 = vadd.f32 %v3571_v11, %v2150_v30  ;;  %v3613_v15 = vadd.f32 %v3612_v22, %v3570_v42  ;;  %v4696_v22 = vld [vmem:[%s6383_s0 + $0x30] sm:$0xff]  ;;  %v4697_v30 = vld [vmem:[%s6383_s0 + $0x38] sm:$0xff] }
 0x2d0   :  { %v3615_v5 = vadd.f32 %v3614_v32, %v3572_v50 }
 0x307   :  { %v3651_v49 = vpop.f32.mrf.mxu1 }
 0x308   :  { %v3652_v52 = vadd.f32 %v3651_v49, %v3609_v43 }
 0x309   :  { %v3653_v58 = vpop.f32.mrf.mxu1 }
 0x30a   :  { %v3695_v59 = vadd.f32 %v3694_v36, %v3652_v52  ;;  %v3654_v60 = vadd.f32 %v3653_v58, %v3611_v54 }
 0x30b   :  { %v3655_v1 = vpop.f32.mrf.mxu1 }
 0x30c   :  { %v3697_v23 = vadd.f32 %v3696_v48, %v3654_v60  ;;  %v3656_v3 = vadd.f32 %v3655_v1, %v3613_v15  ;;  %v3705_v8 = vadd.f32 %v4693_v6, %v3695_v59 }
 0x30d   :  { %v3657_v10 = vpop.f32.mrf.mxu1 }
 0x30e   :  { %v3699_v12 = vadd.f32 %v3698_v63, %v3656_v3  ;;  %v3658_v0 = vadd.f32 %v3657_v10, %v3615_v5  ;;  %v3706_v14 = vadd.f32 %v4695_v13, %v3697_v23  ;;  %v3712_v16 = vadd.f32 %v3711_v2, %v3705_v8  ;;  %v3768_v2 = vld [vmem:[%s6387_s5] sm:$0xf] }
 0x30f   :  { %v3798_v23 = vld [vmem:[%s6388_s6] sm:$0xf]  ;;  %v3773_v3 = vrot.slane %v3768_v2, %v5684_v7  ;;  %v3777_v5 = vrot.slane %v3768_v2, %v5564_v18  ;;  %v3781_v6 = vrot.slane %v3768_v2, %v5759_v38 }
 0x310   :  { %v3709_v24 = vadd.f32 %v4696_v22, %v3699_v12  ;;  %v3701_v25 = vadd.f32 %v3700_v17, %v3658_v0  ;;  %v3713_v26 = vsel %vm1521_vm0, %v3706_v14, 0.0  ;;  %v3807_v10 = vrot.slane %v3798_v23, %v5564_v18 }
 0x311   :  { %v3714_v27 = vadd.f32 %v3713_v26, %v3712_v16  ;;  %v3811_v12 = vrot.slane %v3798_v23, %v5759_v38  ;;  %v3815_v0 = vrot.slane %v3798_v23, %v5756_v37 }
 0x312   :  { %v3710_v20 = vadd.f32 %v4697_v30, %v3701_v25  ;;  %v3718_v29 = vadd.f32 %v3717_v19, %v3709_v24 }
 0x313   :  { %3715 = vadd.xlane.f32.xlu0 %v3714_v27 }
 0x314   :  { %v3719_v31 = vsel %vm1521_vm0, %v3710_v20, 0.0 }
 0x315   :  { %v3720_v32 = vadd.f32 %v3719_v31, %v3718_v29 }
 0x317   :  { %3721 = vadd.xlane.f32.xlu0 %v3720_v32 }
 0x39c   :  { %v3716_v34 = vpop.xlane.xlu0 %3715 }
 0x39d   :  { %v3724_v33 = vmul.f32 0.0020833334, %v3716_v34 }
 0x39f   :  { %v3726_v28 = vsub.f32 %v3703_v56, %v3724_v33  ;;  %v3727_v4 = vsub.f32 %v3704_v46, %v3724_v33  ;;  %v3728_v35 = vsub.f32 %v3705_v8, %v3724_v33  ;;  %v3729_v51 = vsub.f32 %v3706_v14, %v3724_v33 }
 0x3a0   :  { %v3722_v36 = vpop.xlane.xlu0 %3721  ;;  %v3785_v8 = vrot.slane %v3768_v2, %v5756_v37 }
 0x3a1   :  { %v3725_v53 = vmul.f32 0.0020833334, %v3722_v36  ;;  %v3734_v39 = vmul.f32 %v3726_v28, %v3726_v28  ;;  %v3735_v40 = vmul.f32 %v3727_v4, %v3727_v4  ;;  %v3736_v41 = vmul.f32 %v3728_v35, %v3728_v35 }
 0x3a2   :  { %v3737_v11 = vmul.f32 %v3729_v51, %v3729_v51 }
 0x3a3   :  { %v3730_v42 = vsub.f32 %v3707_v21, %v3725_v53  ;;  %v3731_v43 = vsub.f32 %v3708_v62, %v3725_v53  ;;  %v3742_v44 = vadd.f32 %v3735_v40, %v3734_v39  ;;  %v3732_v45 = vsub.f32 %v3709_v24, %v3725_v53 }
 0x3a4   :  { %v3733_v47 = vsub.f32 %v3710_v20, %v3725_v53  ;;  %v3744_v52 = vsel %vm1521_vm0, %v3737_v11, 0.0  ;;  %v3803_v21 = vrot.slane %v3798_v23, %v5684_v7 }
 0x3a5   :  { %v3743_v48 = vadd.f32 %v3742_v44, %v3736_v41  ;;  %v3738_v49 = vmul.f32 %v3730_v42, %v3730_v42  ;;  %v3739_v50 = vmul.f32 %v3731_v43, %v3731_v43  ;;  %v3740_v55 = vmul.f32 %v3732_v45, %v3732_v45 }
 0x3a6   :  { %v3741_v54 = vmul.f32 %v3733_v47, %v3733_v47 }
 0x3a7   :  { %v3745_v46 = vadd.f32 %v3744_v52, %v3743_v48  ;;  %v3748_v56 = vadd.f32 %v3739_v50, %v3738_v49 }
 0x3a8   :  { %v3750_v58 = vsel %vm1521_vm0, %v3741_v54, 0.0 }
 0x3a9   :  { %3746 = vadd.xlane.f32.xlu1 %v3745_v46  ;;  %v3749_v57 = vadd.f32 %v3748_v56, %v3740_v55 }
 0x3ab   :  { %v3751_v59 = vadd.f32 %v3750_v58, %v3749_v57 }
 0x3ad   :  { %3752 = vadd.xlane.f32.xlu1 %v3751_v59 }
 0x432   :  { %v3747_v60 = vpop.xlane.xlu1 %3746 }
 0x433   :  { %v3754_v15 = vmul.f32 0.0020833334, %v3747_v60 }
 0x435   :  { %v3756_v61 = vadd.f32 1e-05, %v3754_v15 }
 0x436   :  { %v3753_v62 = vpop.xlane.xlu1 %3752 }
 0x437   :  { %4686 = vrsqrt.f32 %v3756_v61  ;;  %v3755_v63 = vmul.f32 0.0020833334, %v3753_v62 }
 0x439   :  { %v3757_v1 = vadd.f32 1e-05, %v3755_v63 }
 0x43b   :  { %4688 = vrsqrt.f32 %v3757_v1 }
 0x444   :  { %v4687_v9 = vpop.eup %4686 }
 0x445   :  { %v3760_v13 = vmul.f32 %v4687_v9, %v3726_v28  ;;  %v3761_v14 = vmul.f32 %v4687_v9, %v3727_v4  ;;  %v3762_v16 = vmul.f32 %v4687_v9, %v3728_v35  ;;  %v3763_v17 = vmul.f32 %v4687_v9, %v3729_v51 }
 0x447   :  { %v3790_v19 = vmul.f32 %v3773_v3, %v3760_v13  ;;  %v3791_v22 = vmul.f32 %v3777_v5, %v3761_v14  ;;  %v3792_v24 = vmul.f32 %v3781_v6, %v3762_v16  ;;  %v3793_v25 = vmul.f32 %v3785_v8, %v3763_v17 }
 0x448   :  { %v4689_v26 = vpop.eup %4688 }
 0x449   :  { %v3820_v27 = vadd.f32 %v3803_v21, %v3790_v19  ;;  %v3821_v30 = vadd.f32 %v3807_v10, %v3791_v22  ;;  %v3822_v20 = vadd.f32 %v3811_v12, %v3792_v24  ;;  %v3823_v29 = vadd.f32 %v3815_v0, %v3793_v25 }
 0x44a   :  { %v3764_v7 = vmul.f32 %v4689_v26, %v3730_v42  ;;  %v3765_v31 = vmul.f32 %v4689_v26, %v3731_v43  ;;  %v3766_v18 = vmul.f32 %v4689_v26, %v3732_v45  ;;  %v3767_v32 = vmul.f32 %v4689_v26, %v3733_v47 }
 0x44b   :  { %3828 = vst [vmem:[%s6389_s7] sm:$0xff] %v3820_v27  ;;  %3829 = vst [vmem:[%s6389_s7 + $0x8] sm:$0xff] %v3821_v30 }
 0x44c   :  { %3830 = vst [vmem:[%s6389_s7 + $0x10] sm:$0xff] %v3822_v20  ;;  %3831 = vst.msk [vmem:[%s6389_s7 + $0x18] sm:$0xff] %vm1521_vm0, %v3823_v29  ;;  %v3794_v37 = vmul.f32 %v3773_v3, %v3764_v7  ;;  %v3795_v38 = vmul.f32 %v3777_v5, %v3765_v31  ;;  %v3796_v34 = vmul.f32 %v3781_v6, %v3766_v18 }
 0x44d   :  { %v3797_v33 = vmul.f32 %v3785_v8, %v3767_v32 }
 0x44e   :  { %v3824_v28 = vadd.f32 %v3803_v21, %v3794_v37  ;;  %v3825_v4 = vadd.f32 %v3807_v10, %v3795_v38  ;;  %v3826_v35 = vadd.f32 %v3811_v12, %v3796_v34 }
 0x44f   :  { %v3827_v51 = vadd.f32 %v3815_v0, %v3797_v33 }
 0x450   :  { %3832 = vst [vmem:[%s6389_s7 + $0x20] sm:$0xff] %v3824_v28  ;;  %3833 = vst [vmem:[%s6389_s7 + $0x28] sm:$0xff] %v3825_v4 }
 0x451   :  { %3834 = vst [vmem:[%s6389_s7 + $0x30] sm:$0xff] %v3826_v35  ;;  %3835 = vst.msk [vmem:[%s6389_s7 + $0x38] sm:$0xff] %vm1521_vm0, %v3827_v51 }

</bundles_post_ra>
